<compile_context>
chip_gen: v7x
topology: tpu7x:2x2x1
jax: 0.10.0
libtpu: 0.0.40
codegen_flags: <defaults>
</compile_context>

<pallas_src>
import jax
import jax.numpy as jnp
from jax.experimental import pallas as pl
from jax.experimental.pallas import tpu as pltpu

LEAKY_SLOPE = 0.01          # PyTorch default negative_slope for LeakyReLU
MXU_DTYPE = jnp.bfloat16    # matmul operand dtype (accumulation stays f32)

# order in which (w, b) pairs are passed to the kernel
_PARAM_ORDER = ('cp', 'pm1', 'pm2', 'pr', 'po', 'vw',
                'c1a', 'c1b', 'c2a', 'c2b', 'c3a', 'c3b')


def _leaky(x):
    return jnp.where(x >= 0, x, LEAKY_SLOPE * x)


def _sigmoid(x):
    return 1.0 / (1.0 + jnp.exp(-x))


# ---------------------------------------------------------------------------
# In-kernel helpers (operate on traced (L, C) values living in vregs/VMEM)
# ---------------------------------------------------------------------------
def _pad_same(x, K):
    """Zero-pad rows for a 'same' conv with odd kernel size K."""
    p = (K - 1) // 2
    z = jnp.zeros((p, x.shape[1]), x.dtype)
    return jnp.concatenate([z, x, z], axis=0)


def _im2col(x, K):
    """(L, Cin) -> (L, K*Cin); column k*Cin+ci holds x[l + k - pad, ci]."""
    L = x.shape[0]
    xp = _pad_same(x, K)
    return jnp.concatenate([xp[k:k + L, :] for k in range(K)], axis=-1)


def _conv_mxu(x, K, w_ref, b_ref):
    """'same' Conv1d as a single MXU matmul; w_ref is (K*Cin, Cout) bf16."""
    cols = _im2col(x, K).astype(MXU_DTYPE)
    y = jnp.dot(cols, w_ref[...], preferred_element_type=jnp.float32)
    return y + b_ref[...]


def _conv_cin1(x, K, w_ref, b_ref):
    """'same' Conv1d with Cin==1 as VPU broadcast MACs; w_ref is (K, Cout)."""
    L = x.shape[0]
    xp = _pad_same(x, K)                                   # (L+2p, 1)
    acc = jnp.zeros((L, w_ref.shape[1]), jnp.float32)
    for k in range(K):
        acc = acc + xp[k:k + L, :] * w_ref[k:k + 1, :]     # (L,1)*(1,Cout)
    return acc + b_ref[...]


def _conv_cout1(x, K, w_ref, b_ref):
    """'same' Conv1d with Cout==1 on VPU + lane reduction; w_ref is (K, Cin)."""
    L = x.shape[0]
    xp = _pad_same(x, K)                                   # (L+2p, Cin)
    acc = jnp.zeros(x.shape, jnp.float32)
    for k in range(K):
        acc = acc + xp[k:k + L, :] * w_ref[k:k + 1, :]     # (L,Cin)*(1,Cin)
    return jnp.sum(acc, axis=-1, keepdims=True) + b_ref[...]


def _maxpool5_from_ref(ref, lo):
    """MaxPool1d(5,5) via sublane-strided reads of a (L, C) VMEM ref."""
    m = ref[pl.ds(0, lo, stride=5), :]
    for j in range(1, 5):
        m = jnp.maximum(m, ref[pl.ds(j, lo, stride=5), :])
    return m


# ---------------------------------------------------------------------------
# Single fused kernel for the whole BVPFeatrueExtraction forward (one batch el.)
# ---------------------------------------------------------------------------
def _bvp_kernel(x_ref, peak_ref, *refs):
    (wcp, bcp, wpm1, bpm1, wpm2, bpm2, wpr, bpr, wpo, bpo, wvw, bvw,
     wc1a, bc1a, wc1b, bc1b, wc2a, bc2a, wc2b, bc2b, wc3a, bc3a, wc3b, bc3b,
     x16_ref, xpeak_ref, x32_ref, x64_ref, x128_ref) = refs

    # conv_peak: Conv1d(1,16,3) + BN + LeakyReLU  (VPU path, Cin==1)
    x16 = _leaky(_conv_cin1(x_ref[...], 3, wcp, bcp))                 # (L, 16)

    # peak_main / peak_residual / peak_out
    pm = _leaky(_conv_mxu(x16, 3, wpm1, bpm1))                        # (L, 8)
    pm = _leaky(_conv_mxu(pm, 3, wpm2, bpm2))                         # (L, 4)
    pr = _leaky(_conv_mxu(x16, 3, wpr, bpr))                          # (L, 4)
    x_peak_out = _sigmoid(_conv_cout1(pm + pr, 3, wpo, bpo))          # (L, 1)

    # MixA_Module: softmax(sigmoid(v) + attn + peak) over L, gate + residual
    v = _conv_cout1(x16, 3, wvw, bvw)                                 # (L, 1)
    logits = _sigmoid(v) + x_peak_out + peak_ref[...]                 # (L, 1)
    m = jnp.max(logits, axis=0, keepdims=True)
    e = jnp.exp(logits - m)
    attn = e * pl.reciprocal(jnp.sum(e, axis=0, keepdims=True), approx=False)
    x16_sa = x16 * attn + x16                                         # (L, 16)

    # conv_1
    h = _leaky(_conv_mxu(x16_sa, 9, wc1a, bc1a))                      # (L, 32)
    x32 = _leaky(_conv_mxu(h, 9, wc1b, bc1b))                         # (L, 32)

    x16_ref[...] = x16
    xpeak_ref[...] = x_peak_out
    x32_ref[...] = x32

    # max_pool1d(5,5) + conv_2   (pool reads the freshly written VMEM block)
    lo1 = x64_ref.shape[0]
    p1 = _maxpool5_from_ref(x32_ref, lo1)                             # (L//5, 32)
    h = _leaky(_conv_mxu(p1, 7, wc2a, bc2a))                          # (L//5, 64)
    x64 = _leaky(_conv_mxu(h, 7, wc2b, bc2b))                         # (L//5, 64)
    x64_ref[...] = x64

    # max_pool1d(5,5) + conv_3
    lo2 = x128_ref.shape[0]
    p2 = _maxpool5_from_ref(x64_ref, lo2)                             # (L//25, 64)
    h = _leaky(_conv_mxu(p2, 3, wc3a, bc3a))                          # (L//25, 128)
    x128_ref[...] = _leaky(_conv_mxu(h, 3, wc3b, bc3b))               # (L//25, 128)


# ---------------------------------------------------------------------------
# Wrapper: PyTorch NCL boundary <-> NLC kernel layout
# ---------------------------------------------------------------------------
def bvp_feature_extraction(params, x_ncl, peak):
    """x_ncl: (B, 1, L) f32 (PyTorch NCL), peak: (B, L).
    Returns (x_16, x_32, x_64, x_128, x_peak) in the PyTorch layout."""
    B, _, L = x_ncl.shape
    lo1, lo2 = L // 5, (L // 5) // 5

    x_nlc = jnp.transpose(x_ncl, (0, 2, 1))                # (B, L, 1)
    peak_nlc = peak[:, :, None]                            # (B, L, 1)

    flat = []
    for name in _PARAM_ORDER:
        flat += [params[name]['w'], params[name]['b']]

    def act_spec(l, c):
        return pl.BlockSpec((None, l, c), lambda b: (b, 0, 0))

    def w_spec(a):
        return pl.BlockSpec(a.shape, lambda b: (0, 0))

    in_specs = [act_spec(L, 1), act_spec(L, 1)] + [w_spec(a) for a in flat]
    out_specs = [act_spec(L, 16), act_spec(L, 1), act_spec(L, 32),
                 act_spec(lo1, 64), act_spec(lo2, 128)]
    out_shape = (jax.ShapeDtypeStruct((B, L, 16), jnp.float32),
                 jax.ShapeDtypeStruct((B, L, 1), jnp.float32),
                 jax.ShapeDtypeStruct((B, L, 32), jnp.float32),
                 jax.ShapeDtypeStruct((B, lo1, 64), jnp.float32),
                 jax.ShapeDtypeStruct((B, lo2, 128), jnp.float32))

    x16, xpo, x32, x64, x128 = pl.pallas_call(
        _bvp_kernel,
        grid=(B,),
        in_specs=in_specs,
        out_specs=out_specs,
        out_shape=out_shape,
        compiler_params=pltpu.CompilerParams(
            dimension_semantics=("parallel",)),
    )(x_nlc, peak_nlc, *flat)

    # back to the PyTorch NCL convention at the module boundary
    return (jnp.transpose(x16, (0, 2, 1)),
            jnp.transpose(x32, (0, 2, 1)),
            jnp.transpose(x64, (0, 2, 1)),
            jnp.transpose(x128, (0, 2, 1)),
            xpo[:, :, 0])


# ---------------------------------------------------------------------------
# Synthetic, deterministic parameters (BN folded in eval mode)
# ---------------------------------------------------------------------------
def init_params(key):
    keys = jax.random.split(key, 48)
    idx = [0]

    def rnd(shape, scale=0.1):
        k = keys[idx[0]]
        idx[0] += 1
        return jax.random.normal(k, shape, jnp.float32) * scale

    eps = 1e-5

    # Eval-mode BatchNorm1d fold: gamma=1, beta=0, running_mean=0, running_var=1.
    # TODO(synk): training-mode batch statistics of nn.BatchNorm1d are not reproduced.
    def bn_fold(w, b, gamma=1.0, beta=0.0, mean=0.0, var=1.0):
        s = gamma / jnp.sqrt(var + eps)
        return w * s, (b - mean) * s + beta

    def conv_mxu_p(K, cin, cout, bn=True):
        w, b = rnd((K, cin, cout)), rnd((1, cout))
        if bn:
            w, b = bn_fold(w, b)
        return {'w': w.reshape(K * cin, cout).astype(MXU_DTYPE), 'b': b}

    def conv_cin1_p(K, cout, bn=True):
        w, b = rnd((K, 1, cout)), rnd((1, cout))
        if bn:
            w, b = bn_fold(w, b)
        return {'w': w.reshape(K, cout), 'b': b}       # f32 (VPU path)

    def conv_cout1_p(K, cin, bn=False):
        w, b = rnd((K, cin, 1)), rnd((1, 1))
        if bn:
            w, b = bn_fold(w, b)
        return {'w': w.reshape(K, cin), 'b': b}        # f32 (VPU path)

    return {
        'cp':  conv_cin1_p(3, 16),            # conv_peak: Conv1d(1,16,3)+BN+LReLU
        'pm1': conv_mxu_p(3, 16, 8),          # peak_main[0]
        'pm2': conv_mxu_p(3, 8, 4),           # peak_main[1]
        'pr':  conv_mxu_p(3, 16, 4),          # peak_residual
        'po':  conv_cout1_p(3, 4, bn=False),  # peak_out: Conv1d(4,1,3)+Sigmoid
        'vw':  conv_cout1_p(3, 16, bn=False), # MixA v_w: Conv1d(16,1,3)
        'c1a': conv_mxu_p(9, 16, 32),
        'c1b': conv_mxu_p(9, 32, 32),
        'c2a': conv_mxu_p(7, 32, 64),
        'c2b': conv_mxu_p(7, 64, 64),
        'c3a': conv_mxu_p(3, 64, 128),
        'c3b': conv_mxu_p(3, 128, 128),
    }


if __name__ == "__main__":
    key = jax.random.PRNGKey(0)
    kp, kx, kpk = jax.random.split(key, 3)
    B, L = 2, 100                                          # L divisible by 25
    params = init_params(kp)
    x = jax.random.normal(kx, (B, 1, L), jnp.float32)      # PyTorch NCL input
    peak_x = jax.random.uniform(kpk, (B, L), jnp.float32)

    fwd = jax.jit(bvp_feature_extraction)
    x16, x32, x64, x128, x_peak = fwd(params, x, peak_x)
    jax.block_until_ready((x16, x32, x64, x128, x_peak))

    assert x16.shape == (B, 16, L), x16.shape
    assert x32.shape == (B, 32, L), x32.shape
    assert x64.shape == (B, 64, L // 5), x64.shape
    assert x128.shape == (B, 128, L // 25), x128.shape
    assert x_peak.shape == (B, L), x_peak.shape
    for t in (x16, x32, x64, x128, x_peak):
        assert bool(jnp.all(jnp.isfinite(t)))
    print("KERNEL_OK")
</pallas_src>

<mosaic_0001>
module attributes {stable_mosaic.version = 11 : i64} {
  func.func @_bvp_kernel(%arg0: i32, %arg1: memref<1x100x1xf32, #tpu.memory_space<vmem>>, %arg2: memref<1x100x1xf32, #tpu.memory_space<vmem>>, %arg3: memref<3x16xf32, #tpu.memory_space<vmem>>, %arg4: memref<1x16xf32, #tpu.memory_space<vmem>>, %arg5: memref<48x8xbf16, #tpu.memory_space<vmem>>, %arg6: memref<1x8xf32, #tpu.memory_space<vmem>>, %arg7: memref<24x4xbf16, #tpu.memory_space<vmem>>, %arg8: memref<1x4xf32, #tpu.memory_space<vmem>>, %arg9: memref<48x4xbf16, #tpu.memory_space<vmem>>, %arg10: memref<1x4xf32, #tpu.memory_space<vmem>>, %arg11: memref<3x4xf32, #tpu.memory_space<vmem>>, %arg12: memref<1x1xf32, #tpu.memory_space<vmem>>, %arg13: memref<3x16xf32, #tpu.memory_space<vmem>>, %arg14: memref<1x1xf32, #tpu.memory_space<vmem>>, %arg15: memref<144x32xbf16, #tpu.memory_space<vmem>>, %arg16: memref<1x32xf32, #tpu.memory_space<vmem>>, %arg17: memref<288x32xbf16, #tpu.memory_space<vmem>>, %arg18: memref<1x32xf32, #tpu.memory_space<vmem>>, %arg19: memref<224x64xbf16, #tpu.memory_space<vmem>>, %arg20: memref<1x64xf32, #tpu.memory_space<vmem>>, %arg21: memref<448x64xbf16, #tpu.memory_space<vmem>>, %arg22: memref<1x64xf32, #tpu.memory_space<vmem>>, %arg23: memref<192x128xbf16, #tpu.memory_space<vmem>>, %arg24: memref<1x128xf32, #tpu.memory_space<vmem>>, %arg25: memref<384x128xbf16, #tpu.memory_space<vmem>>, %arg26: memref<1x128xf32, #tpu.memory_space<vmem>>, %arg27: memref<1x100x16xf32, #tpu.memory_space<vmem>>, %arg28: memref<1x100x1xf32, #tpu.memory_space<vmem>>, %arg29: memref<1x100x32xf32, #tpu.memory_space<vmem>>, %arg30: memref<1x20x64xf32, #tpu.memory_space<vmem>>, %arg31: memref<1x4x128xf32, #tpu.memory_space<vmem>>) attributes {dimension_semantics = [#tpu.dimension_semantics<parallel>], iteration_bounds = array<i64: 2>, scalar_prefetch = 0 : i64, scratch_operands = 0 : i64, tpu.core_type = #tpu.core_type<tc>, window_params = [{transform_indices = @transform_0, window_bounds = array<i64: 1, 100, 1>}, {transform_indices = @transform_1, window_bounds = array<i64: 1, 100, 1>}, {pipeline_mode = #tpu.pipeline_mode<synchronous>, transform_indices = @transform_2, window_bounds = array<i64: 3, 16>}, {pipeline_mode = #tpu.pipeline_mode<synchronous>, transform_indices = @transform_3, window_bounds = array<i64: 1, 16>}, {pipeline_mode = #tpu.pipeline_mode<synchronous>, transform_indices = @transform_4, window_bounds = array<i64: 48, 8>}, {pipeline_mode = #tpu.pipeline_mode<synchronous>, transform_indices = @transform_5, window_bounds = array<i64: 1, 8>}, {pipeline_mode = #tpu.pipeline_mode<synchronous>, transform_indices = @transform_6, window_bounds = array<i64: 24, 4>}, {pipeline_mode = #tpu.pipeline_mode<synchronous>, transform_indices = @transform_7, window_bounds = array<i64: 1, 4>}, {pipeline_mode = #tpu.pipeline_mode<synchronous>, transform_indices = @transform_8, window_bounds = array<i64: 48, 4>}, {pipeline_mode = #tpu.pipeline_mode<synchronous>, transform_indices = @transform_9, window_bounds = array<i64: 1, 4>}, {pipeline_mode = #tpu.pipeline_mode<synchronous>, transform_indices = @transform_10, window_bounds = array<i64: 3, 4>}, {pipeline_mode = #tpu.pipeline_mode<synchronous>, transform_indices = @transform_11, window_bounds = array<i64: 1, 1>}, {pipeline_mode = #tpu.pipeline_mode<synchronous>, transform_indices = @transform_12, window_bounds = array<i64: 3, 16>}, {pipeline_mode = #tpu.pipeline_mode<synchronous>, transform_indices = @transform_13, window_bounds = array<i64: 1, 1>}, {pipeline_mode = #tpu.pipeline_mode<synchronous>, transform_indices = @transform_14, window_bounds = array<i64: 144, 32>}, {pipeline_mode = #tpu.pipeline_mode<synchronous>, transform_indices = @transform_15, window_bounds = array<i64: 1, 32>}, {pipeline_mode = #tpu.pipeline_mode<synchronous>, transform_indices = @transform_16, window_bounds = array<i64: 288, 32>}, {pipeline_mode = #tpu.pipeline_mode<synchronous>, transform_indices = @transform_17, window_bounds = array<i64: 1, 32>}, {pipeline_mode = #tpu.pipeline_mode<synchronous>, transform_indices = @transform_18, window_bounds = array<i64: 224, 64>}, {pipeline_mode = #tpu.pipeline_mode<synchronous>, transform_indices = @transform_19, window_bounds = array<i64: 1, 64>}, {pipeline_mode = #tpu.pipeline_mode<synchronous>, transform_indices = @transform_20, window_bounds = array<i64: 448, 64>}, {pipeline_mode = #tpu.pipeline_mode<synchronous>, transform_indices = @transform_21, window_bounds = array<i64: 1, 64>}, {pipeline_mode = #tpu.pipeline_mode<synchronous>, transform_indices = @transform_22, window_bounds = array<i64: 192, 128>}, {pipeline_mode = #tpu.pipeline_mode<synchronous>, transform_indices = @transform_23, window_bounds = array<i64: 1, 128>}, {pipeline_mode = #tpu.pipeline_mode<synchronous>, transform_indices = @transform_24, window_bounds = array<i64: 384, 128>}, {pipeline_mode = #tpu.pipeline_mode<synchronous>, transform_indices = @transform_25, window_bounds = array<i64: 1, 128>}, {transform_indices = @transform_26, window_bounds = array<i64: 1, 100, 16>}, {transform_indices = @transform_27, window_bounds = array<i64: 1, 100, 1>}, {transform_indices = @transform_28, window_bounds = array<i64: 1, 100, 32>}, {transform_indices = @transform_29, window_bounds = array<i64: 1, 20, 64>}, {transform_indices = @transform_30, window_bounds = array<i64: 1, 4, 128>}]} {
    %c0 = arith.constant 0 : index
    %c0_0 = arith.constant 0 : index
    %c0_1 = arith.constant 0 : index
    %0 = vector.load %arg1[%c0, %c0_0, %c0_1] : memref<1x100x1xf32, #tpu.memory_space<vmem>>, vector<1x100x1xf32>
    %1 = vector.shape_cast %0 : vector<1x100x1xf32> to vector<100x1xf32>
    %cst = arith.constant 0.000000e+00 : f32
    %2 = vector.broadcast %cst : f32 to vector<1x1xf32>
    %3 = tpu.concatenate %2, %1, %2 in 0 : vector<1x1xf32>, vector<100x1xf32>, vector<1x1xf32> -> vector<102x1xf32>
    %cst_2 = arith.constant 0.000000e+00 : f32
    %4 = vector.broadcast %cst_2 : f32 to vector<100x16xf32>
    %5 = vector.extract_strided_slice %3 {offsets = [0, 0], sizes = [100, 1], strides = [1, 1]} : vector<102x1xf32> to vector<100x1xf32>
    %c0_3 = arith.constant 0 : index
    %c0_4 = arith.constant 0 : index
    %6 = vector.load %arg3[%c0_3, %c0_4] : memref<3x16xf32, #tpu.memory_space<vmem>>, vector<1x16xf32>
    %7 = vector.broadcast %5 : vector<100x1xf32> to vector<100x16xf32>
    %8 = vector.broadcast %6 : vector<1x16xf32> to vector<100x16xf32>
    %9 = arith.mulf %7, %8 : vector<100x16xf32>
    %10 = arith.addf %4, %9 : vector<100x16xf32>
    %11 = vector.extract_strided_slice %3 {offsets = [1, 0], sizes = [100, 1], strides = [1, 1]} : vector<102x1xf32> to vector<100x1xf32>
    %c1 = arith.constant 1 : index
    %c0_5 = arith.constant 0 : index
    %12 = vector.load %arg3[%c1, %c0_5] : memref<3x16xf32, #tpu.memory_space<vmem>>, vector<1x16xf32>
    %13 = vector.broadcast %11 : vector<100x1xf32> to vector<100x16xf32>
    %14 = vector.broadcast %12 : vector<1x16xf32> to vector<100x16xf32>
    %15 = arith.mulf %13, %14 : vector<100x16xf32>
    %16 = arith.addf %10, %15 : vector<100x16xf32>
    %17 = vector.extract_strided_slice %3 {offsets = [2, 0], sizes = [100, 1], strides = [1, 1]} : vector<102x1xf32> to vector<100x1xf32>
    %c2 = arith.constant 2 : index
    %c0_6 = arith.constant 0 : index
    %18 = vector.load %arg3[%c2, %c0_6] : memref<3x16xf32, #tpu.memory_space<vmem>>, vector<1x16xf32>
    %19 = vector.broadcast %17 : vector<100x1xf32> to vector<100x16xf32>
    %20 = vector.broadcast %18 : vector<1x16xf32> to vector<100x16xf32>
    %21 = arith.mulf %19, %20 : vector<100x16xf32>
    %22 = arith.addf %16, %21 : vector<100x16xf32>
    %c0_7 = arith.constant 0 : index
    %c0_8 = arith.constant 0 : index
    %23 = vector.load %arg4[%c0_7, %c0_8] : memref<1x16xf32, #tpu.memory_space<vmem>>, vector<1x16xf32>
    %24 = vector.broadcast %23 : vector<1x16xf32> to vector<100x16xf32>
    %25 = arith.addf %22, %24 : vector<100x16xf32>
    %cst_9 = arith.constant 0.000000e+00 : f32
    %26 = vector.broadcast %cst_9 : f32 to vector<100x16xf32>
    %27 = arith.cmpf oge, %25, %26 : vector<100x16xf32>
    %cst_10 = arith.constant 0.00999999977 : f32
    %28 = vector.broadcast %cst_10 : f32 to vector<100x16xf32>
    %29 = arith.mulf %28, %25 : vector<100x16xf32>
    %30 = arith.select %27, %25, %29 : vector<100x16xi1>, vector<100x16xf32>
    %cst_11 = arith.constant 0.000000e+00 : f32
    %31 = vector.broadcast %cst_11 : f32 to vector<1x16xf32>
    %32 = tpu.concatenate %31, %30, %31 in 0 : vector<1x16xf32>, vector<100x16xf32>, vector<1x16xf32> -> vector<102x16xf32>
    %33 = vector.extract_strided_slice %32 {offsets = [0, 0], sizes = [100, 16], strides = [1, 1]} : vector<102x16xf32> to vector<100x16xf32>
    %34 = vector.extract_strided_slice %32 {offsets = [1, 0], sizes = [100, 16], strides = [1, 1]} : vector<102x16xf32> to vector<100x16xf32>
    %35 = vector.extract_strided_slice %32 {offsets = [2, 0], sizes = [100, 16], strides = [1, 1]} : vector<102x16xf32> to vector<100x16xf32>
    %36 = tpu.concatenate %33, %34, %35 in 1 : vector<100x16xf32>, vector<100x16xf32>, vector<100x16xf32> -> vector<100x48xf32>
    %37 = arith.truncf %36 : vector<100x48xf32> to vector<100x48xbf16>
    %c0_12 = arith.constant 0 : index
    %c0_13 = arith.constant 0 : index
    %38 = vector.load %arg5[%c0_12, %c0_13] : memref<48x8xbf16, #tpu.memory_space<vmem>>, vector<48x8xbf16>
    %cst_14 = arith.constant dense<0.000000e+00> : vector<100x8xf32>
    %39 = tpu.matmul %37, %38, %cst_14 {dimension_numbers = #tpu.dot_dimension_numbers<[1], [0], [0], [1], [0, 0, 1, 1], [], []>} : vector<100x48xbf16>, vector<48x8xbf16>, vector<100x8xf32> -> vector<100x8xf32>
    %c0_15 = arith.constant 0 : index
    %c0_16 = arith.constant 0 : index
    %40 = vector.load %arg6[%c0_15, %c0_16] : memref<1x8xf32, #tpu.memory_space<vmem>>, vector<1x8xf32>
    %41 = vector.broadcast %40 : vector<1x8xf32> to vector<100x8xf32>
    %42 = arith.addf %39, %41 : vector<100x8xf32>
    %cst_17 = arith.constant 0.000000e+00 : f32
    %43 = vector.broadcast %cst_17 : f32 to vector<100x8xf32>
    %44 = arith.cmpf oge, %42, %43 : vector<100x8xf32>
    %cst_18 = arith.constant 0.00999999977 : f32
    %45 = vector.broadcast %cst_18 : f32 to vector<100x8xf32>
    %46 = arith.mulf %45, %42 : vector<100x8xf32>
    %47 = arith.select %44, %42, %46 : vector<100x8xi1>, vector<100x8xf32>
    %cst_19 = arith.constant 0.000000e+00 : f32
    %48 = vector.broadcast %cst_19 : f32 to vector<1x8xf32>
    %49 = tpu.concatenate %48, %47, %48 in 0 : vector<1x8xf32>, vector<100x8xf32>, vector<1x8xf32> -> vector<102x8xf32>
    %50 = vector.extract_strided_slice %49 {offsets = [0, 0], sizes = [100, 8], strides = [1, 1]} : vector<102x8xf32> to vector<100x8xf32>
    %51 = vector.extract_strided_slice %49 {offsets = [1, 0], sizes = [100, 8], strides = [1, 1]} : vector<102x8xf32> to vector<100x8xf32>
    %52 = vector.extract_strided_slice %49 {offsets = [2, 0], sizes = [100, 8], strides = [1, 1]} : vector<102x8xf32> to vector<100x8xf32>
    %53 = tpu.concatenate %50, %51, %52 in 1 : vector<100x8xf32>, vector<100x8xf32>, vector<100x8xf32> -> vector<100x24xf32>
    %54 = arith.truncf %53 : vector<100x24xf32> to vector<100x24xbf16>
    %c0_20 = arith.constant 0 : index
    %c0_21 = arith.constant 0 : index
    %55 = vector.load %arg7[%c0_20, %c0_21] : memref<24x4xbf16, #tpu.memory_space<vmem>>, vector<24x4xbf16>
    %cst_22 = arith.constant dense<0.000000e+00> : vector<100x4xf32>
    %56 = tpu.matmul %54, %55, %cst_22 {dimension_numbers = #tpu.dot_dimension_numbers<[1], [0], [0], [1], [0, 0, 1, 1], [], []>} : vector<100x24xbf16>, vector<24x4xbf16>, vector<100x4xf32> -> vector<100x4xf32>
    %c0_23 = arith.constant 0 : index
    %c0_24 = arith.constant 0 : index
    %57 = vector.load %arg8[%c0_23, %c0_24] : memref<1x4xf32, #tpu.memory_space<vmem>>, vector<1x4xf32>
    %58 = vector.broadcast %57 : vector<1x4xf32> to vector<100x4xf32>
    %59 = arith.addf %56, %58 : vector<100x4xf32>
    %cst_25 = arith.constant 0.000000e+00 : f32
    %60 = vector.broadcast %cst_25 : f32 to vector<100x4xf32>
    %61 = arith.cmpf oge, %59, %60 : vector<100x4xf32>
    %cst_26 = arith.constant 0.00999999977 : f32
    %62 = vector.broadcast %cst_26 : f32 to vector<100x4xf32>
    %63 = arith.mulf %62, %59 : vector<100x4xf32>
    %64 = arith.select %61, %59, %63 : vector<100x4xi1>, vector<100x4xf32>
    %cst_27 = arith.constant 0.000000e+00 : f32
    %65 = vector.broadcast %cst_27 : f32 to vector<1x16xf32>
    %66 = tpu.concatenate %65, %30, %65 in 0 : vector<1x16xf32>, vector<100x16xf32>, vector<1x16xf32> -> vector<102x16xf32>
    %67 = vector.extract_strided_slice %66 {offsets = [0, 0], sizes = [100, 16], strides = [1, 1]} : vector<102x16xf32> to vector<100x16xf32>
    %68 = vector.extract_strided_slice %66 {offsets = [1, 0], sizes = [100, 16], strides = [1, 1]} : vector<102x16xf32> to vector<100x16xf32>
    %69 = vector.extract_strided_slice %66 {offsets = [2, 0], sizes = [100, 16], strides = [1, 1]} : vector<102x16xf32> to vector<100x16xf32>
    %70 = tpu.concatenate %67, %68, %69 in 1 : vector<100x16xf32>, vector<100x16xf32>, vector<100x16xf32> -> vector<100x48xf32>
    %71 = arith.truncf %70 : vector<100x48xf32> to vector<100x48xbf16>
    %c0_28 = arith.constant 0 : index
    %c0_29 = arith.constant 0 : index
    %72 = vector.load %arg9[%c0_28, %c0_29] : memref<48x4xbf16, #tpu.memory_space<vmem>>, vector<48x4xbf16>
    %cst_30 = arith.constant dense<0.000000e+00> : vector<100x4xf32>
    %73 = tpu.matmul %71, %72, %cst_30 {dimension_numbers = #tpu.dot_dimension_numbers<[1], [0], [0], [1], [0, 0, 1, 1], [], []>} : vector<100x48xbf16>, vector<48x4xbf16>, vector<100x4xf32> -> vector<100x4xf32>
    %c0_31 = arith.constant 0 : index
    %c0_32 = arith.constant 0 : index
    %74 = vector.load %arg10[%c0_31, %c0_32] : memref<1x4xf32, #tpu.memory_space<vmem>>, vector<1x4xf32>
    %75 = vector.broadcast %74 : vector<1x4xf32> to vector<100x4xf32>
    %76 = arith.addf %73, %75 : vector<100x4xf32>
    %cst_33 = arith.constant 0.000000e+00 : f32
    %77 = vector.broadcast %cst_33 : f32 to vector<100x4xf32>
    %78 = arith.cmpf oge, %76, %77 : vector<100x4xf32>
    %cst_34 = arith.constant 0.00999999977 : f32
    %79 = vector.broadcast %cst_34 : f32 to vector<100x4xf32>
    %80 = arith.mulf %79, %76 : vector<100x4xf32>
    %81 = arith.select %78, %76, %80 : vector<100x4xi1>, vector<100x4xf32>
    %82 = arith.addf %64, %81 : vector<100x4xf32>
    %cst_35 = arith.constant 0.000000e+00 : f32
    %83 = vector.broadcast %cst_35 : f32 to vector<1x4xf32>
    %84 = tpu.concatenate %83, %82, %83 in 0 : vector<1x4xf32>, vector<100x4xf32>, vector<1x4xf32> -> vector<102x4xf32>
    %cst_36 = arith.constant 0.000000e+00 : f32
    %85 = vector.broadcast %cst_36 : f32 to vector<100x4xf32>
    %86 = vector.extract_strided_slice %84 {offsets = [0, 0], sizes = [100, 4], strides = [1, 1]} : vector<102x4xf32> to vector<100x4xf32>
    %c0_37 = arith.constant 0 : index
    %c0_38 = arith.constant 0 : index
    %87 = vector.load %arg11[%c0_37, %c0_38] : memref<3x4xf32, #tpu.memory_space<vmem>>, vector<1x4xf32>
    %88 = vector.broadcast %87 : vector<1x4xf32> to vector<100x4xf32>
    %89 = arith.mulf %86, %88 : vector<100x4xf32>
    %90 = arith.addf %85, %89 : vector<100x4xf32>
    %91 = vector.extract_strided_slice %84 {offsets = [1, 0], sizes = [100, 4], strides = [1, 1]} : vector<102x4xf32> to vector<100x4xf32>
    %c1_39 = arith.constant 1 : index
    %c0_40 = arith.constant 0 : index
    %92 = vector.load %arg11[%c1_39, %c0_40] : memref<3x4xf32, #tpu.memory_space<vmem>>, vector<1x4xf32>
    %93 = vector.broadcast %92 : vector<1x4xf32> to vector<100x4xf32>
    %94 = arith.mulf %91, %93 : vector<100x4xf32>
    %95 = arith.addf %90, %94 : vector<100x4xf32>
    %96 = vector.extract_strided_slice %84 {offsets = [2, 0], sizes = [100, 4], strides = [1, 1]} : vector<102x4xf32> to vector<100x4xf32>
    %c2_41 = arith.constant 2 : index
    %c0_42 = arith.constant 0 : index
    %97 = vector.load %arg11[%c2_41, %c0_42] : memref<3x4xf32, #tpu.memory_space<vmem>>, vector<1x4xf32>
    %98 = vector.broadcast %97 : vector<1x4xf32> to vector<100x4xf32>
    %99 = arith.mulf %96, %98 : vector<100x4xf32>
    %100 = arith.addf %95, %99 : vector<100x4xf32>
    %cst_43 = arith.constant dense<0.000000e+00> : vector<100xf32>
    %101 = vector.multi_reduction <add>, %100, %cst_43 [1] : vector<100x4xf32> to vector<100xf32>
    %102 = vector.shape_cast %101 : vector<100xf32> to vector<100x1xf32>
    %c0_44 = arith.constant 0 : index
    %c0_45 = arith.constant 0 : index
    %103 = vector.load %arg12[%c0_44, %c0_45] : memref<1x1xf32, #tpu.memory_space<vmem>>, vector<1x1xf32>
    %104 = vector.broadcast %103 : vector<1x1xf32> to vector<100x1xf32>
    %105 = arith.addf %102, %104 : vector<100x1xf32>
    %cst_46 = arith.constant 0.000000e+00 : f32
    %106 = vector.broadcast %cst_46 : f32 to vector<100x1xf32>
    %107 = arith.subf %106, %105 : vector<100x1xf32>
    %108 = math.exp %107 : vector<100x1xf32>
    %cst_47 = arith.constant 1.000000e+00 : f32
    %109 = vector.broadcast %cst_47 : f32 to vector<100x1xf32>
    %110 = arith.addf %109, %108 : vector<100x1xf32>
    %cst_48 = arith.constant 1.000000e+00 : f32
    %111 = vector.broadcast %cst_48 : f32 to vector<100x1xf32>
    %112 = arith.divf %111, %110 : vector<100x1xf32>
    %cst_49 = arith.constant 0.000000e+00 : f32
    %113 = vector.broadcast %cst_49 : f32 to vector<1x16xf32>
    %114 = tpu.concatenate %113, %30, %113 in 0 : vector<1x16xf32>, vector<100x16xf32>, vector<1x16xf32> -> vector<102x16xf32>
    %cst_50 = arith.constant 0.000000e+00 : f32
    %115 = vector.broadcast %cst_50 : f32 to vector<100x16xf32>
    %116 = vector.extract_strided_slice %114 {offsets = [0, 0], sizes = [100, 16], strides = [1, 1]} : vector<102x16xf32> to vector<100x16xf32>
    %c0_51 = arith.constant 0 : index
    %c0_52 = arith.constant 0 : index
    %117 = vector.load %arg13[%c0_51, %c0_52] : memref<3x16xf32, #tpu.memory_space<vmem>>, vector<1x16xf32>
    %118 = vector.broadcast %117 : vector<1x16xf32> to vector<100x16xf32>
    %119 = arith.mulf %116, %118 : vector<100x16xf32>
    %120 = arith.addf %115, %119 : vector<100x16xf32>
    %121 = vector.extract_strided_slice %114 {offsets = [1, 0], sizes = [100, 16], strides = [1, 1]} : vector<102x16xf32> to vector<100x16xf32>
    %c1_53 = arith.constant 1 : index
    %c0_54 = arith.constant 0 : index
    %122 = vector.load %arg13[%c1_53, %c0_54] : memref<3x16xf32, #tpu.memory_space<vmem>>, vector<1x16xf32>
    %123 = vector.broadcast %122 : vector<1x16xf32> to vector<100x16xf32>
    %124 = arith.mulf %121, %123 : vector<100x16xf32>
    %125 = arith.addf %120, %124 : vector<100x16xf32>
    %126 = vector.extract_strided_slice %114 {offsets = [2, 0], sizes = [100, 16], strides = [1, 1]} : vector<102x16xf32> to vector<100x16xf32>
    %c2_55 = arith.constant 2 : index
    %c0_56 = arith.constant 0 : index
    %127 = vector.load %arg13[%c2_55, %c0_56] : memref<3x16xf32, #tpu.memory_space<vmem>>, vector<1x16xf32>
    %128 = vector.broadcast %127 : vector<1x16xf32> to vector<100x16xf32>
    %129 = arith.mulf %126, %128 : vector<100x16xf32>
    %130 = arith.addf %125, %129 : vector<100x16xf32>
    %cst_57 = arith.constant dense<0.000000e+00> : vector<100xf32>
    %131 = vector.multi_reduction <add>, %130, %cst_57 [1] : vector<100x16xf32> to vector<100xf32>
    %132 = vector.shape_cast %131 : vector<100xf32> to vector<100x1xf32>
    %c0_58 = arith.constant 0 : index
    %c0_59 = arith.constant 0 : index
    %133 = vector.load %arg14[%c0_58, %c0_59] : memref<1x1xf32, #tpu.memory_space<vmem>>, vector<1x1xf32>
    %134 = vector.broadcast %133 : vector<1x1xf32> to vector<100x1xf32>
    %135 = arith.addf %132, %134 : vector<100x1xf32>
    %cst_60 = arith.constant 0.000000e+00 : f32
    %136 = vector.broadcast %cst_60 : f32 to vector<100x1xf32>
    %137 = arith.subf %136, %135 : vector<100x1xf32>
    %138 = math.exp %137 : vector<100x1xf32>
    %cst_61 = arith.constant 1.000000e+00 : f32
    %139 = vector.broadcast %cst_61 : f32 to vector<100x1xf32>
    %140 = arith.addf %139, %138 : vector<100x1xf32>
    %cst_62 = arith.constant 1.000000e+00 : f32
    %141 = vector.broadcast %cst_62 : f32 to vector<100x1xf32>
    %142 = arith.divf %141, %140 : vector<100x1xf32>
    %143 = arith.addf %142, %112 : vector<100x1xf32>
    %c0_63 = arith.constant 0 : index
    %c0_64 = arith.constant 0 : index
    %c0_65 = arith.constant 0 : index
    %144 = vector.load %arg2[%c0_63, %c0_64, %c0_65] : memref<1x100x1xf32, #tpu.memory_space<vmem>>, vector<1x100x1xf32>
    %145 = vector.shape_cast %144 : vector<1x100x1xf32> to vector<100x1xf32>
    %146 = arith.addf %143, %145 : vector<100x1xf32>
    %cst_66 = arith.constant dense<0xFF800000> : vector<1xf32>
    %147 = vector.multi_reduction <maximumf>, %146, %cst_66 [0] : vector<100x1xf32> to vector<1xf32>
    %148 = vector.shape_cast %147 : vector<1xf32> to vector<1x1xf32>
    %149 = vector.broadcast %148 : vector<1x1xf32> to vector<100x1xf32>
    %150 = arith.subf %146, %149 : vector<100x1xf32>
    %151 = math.exp %150 : vector<100x1xf32>
    %cst_67 = arith.constant dense<0.000000e+00> : vector<1xf32>
    %152 = vector.multi_reduction <add>, %151, %cst_67 [0] : vector<100x1xf32> to vector<1xf32>
    %153 = vector.shape_cast %152 : vector<1xf32> to vector<1x1xf32>
    %154 = tpu.reciprocal %153 : vector<1x1xf32> -> vector<1x1xf32>
    %155 = vector.broadcast %154 : vector<1x1xf32> to vector<100x1xf32>
    %156 = arith.mulf %151, %155 : vector<100x1xf32>
    %157 = vector.broadcast %156 : vector<100x1xf32> to vector<100x16xf32>
    %158 = arith.mulf %30, %157 : vector<100x16xf32>
    %159 = arith.addf %158, %30 : vector<100x16xf32>
    %cst_68 = arith.constant 0.000000e+00 : f32
    %160 = vector.broadcast %cst_68 : f32 to vector<4x16xf32>
    %161 = tpu.concatenate %160, %159, %160 in 0 : vector<4x16xf32>, vector<100x16xf32>, vector<4x16xf32> -> vector<108x16xf32>
    %162 = vector.extract_strided_slice %161 {offsets = [0, 0], sizes = [100, 16], strides = [1, 1]} : vector<108x16xf32> to vector<100x16xf32>
    %163 = vector.extract_strided_slice %161 {offsets = [1, 0], sizes = [100, 16], strides = [1, 1]} : vector<108x16xf32> to vector<100x16xf32>
    %164 = vector.extract_strided_slice %161 {offsets = [2, 0], sizes = [100, 16], strides = [1, 1]} : vector<108x16xf32> to vector<100x16xf32>
    %165 = vector.extract_strided_slice %161 {offsets = [3, 0], sizes = [100, 16], strides = [1, 1]} : vector<108x16xf32> to vector<100x16xf32>
    %166 = vector.extract_strided_slice %161 {offsets = [4, 0], sizes = [100, 16], strides = [1, 1]} : vector<108x16xf32> to vector<100x16xf32>
    %167 = vector.extract_strided_slice %161 {offsets = [5, 0], sizes = [100, 16], strides = [1, 1]} : vector<108x16xf32> to vector<100x16xf32>
    %168 = vector.extract_strided_slice %161 {offsets = [6, 0], sizes = [100, 16], strides = [1, 1]} : vector<108x16xf32> to vector<100x16xf32>
    %169 = vector.extract_strided_slice %161 {offsets = [7, 0], sizes = [100, 16], strides = [1, 1]} : vector<108x16xf32> to vector<100x16xf32>
    %170 = vector.extract_strided_slice %161 {offsets = [8, 0], sizes = [100, 16], strides = [1, 1]} : vector<108x16xf32> to vector<100x16xf32>
    %171 = tpu.concatenate %162, %163, %164, %165, %166, %167, %168, %169, %170 in 1 : vector<100x16xf32>, vector<100x16xf32>, vector<100x16xf32>, vector<100x16xf32>, vector<100x16xf32>, vector<100x16xf32>, vector<100x16xf32>, vector<100x16xf32>, vector<100x16xf32> -> vector<100x144xf32>
    %172 = arith.truncf %171 : vector<100x144xf32> to vector<100x144xbf16>
    %c0_69 = arith.constant 0 : index
    %c0_70 = arith.constant 0 : index
    %173 = vector.load %arg15[%c0_69, %c0_70] : memref<144x32xbf16, #tpu.memory_space<vmem>>, vector<144x32xbf16>
    %cst_71 = arith.constant dense<0.000000e+00> : vector<100x32xf32>
    %174 = tpu.matmul %172, %173, %cst_71 {dimension_numbers = #tpu.dot_dimension_numbers<[1], [0], [0], [1], [0, 0, 1, 1], [], []>} : vector<100x144xbf16>, vector<144x32xbf16>, vector<100x32xf32> -> vector<100x32xf32>
    %c0_72 = arith.constant 0 : index
    %c0_73 = arith.constant 0 : index
    %175 = vector.load %arg16[%c0_72, %c0_73] : memref<1x32xf32, #tpu.memory_space<vmem>>, vector<1x32xf32>
    %176 = vector.broadcast %175 : vector<1x32xf32> to vector<100x32xf32>
    %177 = arith.addf %174, %176 : vector<100x32xf32>
    %cst_74 = arith.constant 0.000000e+00 : f32
    %178 = vector.broadcast %cst_74 : f32 to vector<100x32xf32>
    %179 = arith.cmpf oge, %177, %178 : vector<100x32xf32>
    %cst_75 = arith.constant 0.00999999977 : f32
    %180 = vector.broadcast %cst_75 : f32 to vector<100x32xf32>
    %181 = arith.mulf %180, %177 : vector<100x32xf32>
    %182 = arith.select %179, %177, %181 : vector<100x32xi1>, vector<100x32xf32>
    %cst_76 = arith.constant 0.000000e+00 : f32
    %183 = vector.broadcast %cst_76 : f32 to vector<4x32xf32>
    %184 = tpu.concatenate %183, %182, %183 in 0 : vector<4x32xf32>, vector<100x32xf32>, vector<4x32xf32> -> vector<108x32xf32>
    %185 = vector.extract_strided_slice %184 {offsets = [0, 0], sizes = [100, 32], strides = [1, 1]} : vector<108x32xf32> to vector<100x32xf32>
    %186 = vector.extract_strided_slice %184 {offsets = [1, 0], sizes = [100, 32], strides = [1, 1]} : vector<108x32xf32> to vector<100x32xf32>
    %187 = vector.extract_strided_slice %184 {offsets = [2, 0], sizes = [100, 32], strides = [1, 1]} : vector<108x32xf32> to vector<100x32xf32>
    %188 = vector.extract_strided_slice %184 {offsets = [3, 0], sizes = [100, 32], strides = [1, 1]} : vector<108x32xf32> to vector<100x32xf32>
    %189 = vector.extract_strided_slice %184 {offsets = [4, 0], sizes = [100, 32], strides = [1, 1]} : vector<108x32xf32> to vector<100x32xf32>
    %190 = vector.extract_strided_slice %184 {offsets = [5, 0], sizes = [100, 32], strides = [1, 1]} : vector<108x32xf32> to vector<100x32xf32>
    %191 = vector.extract_strided_slice %184 {offsets = [6, 0], sizes = [100, 32], strides = [1, 1]} : vector<108x32xf32> to vector<100x32xf32>
    %192 = vector.extract_strided_slice %184 {offsets = [7, 0], sizes = [100, 32], strides = [1, 1]} : vector<108x32xf32> to vector<100x32xf32>
    %193 = vector.extract_strided_slice %184 {offsets = [8, 0], sizes = [100, 32], strides = [1, 1]} : vector<108x32xf32> to vector<100x32xf32>
    %194 = tpu.concatenate %185, %186, %187, %188, %189, %190, %191, %192, %193 in 1 : vector<100x32xf32>, vector<100x32xf32>, vector<100x32xf32>, vector<100x32xf32>, vector<100x32xf32>, vector<100x32xf32>, vector<100x32xf32>, vector<100x32xf32>, vector<100x32xf32> -> vector<100x288xf32>
    %195 = arith.truncf %194 : vector<100x288xf32> to vector<100x288xbf16>
    %c0_77 = arith.constant 0 : index
    %c0_78 = arith.constant 0 : index
    %196 = vector.load %arg17[%c0_77, %c0_78] : memref<288x32xbf16, #tpu.memory_space<vmem>>, vector<288x32xbf16>
    %cst_79 = arith.constant dense<0.000000e+00> : vector<100x32xf32>
    %197 = tpu.matmul %195, %196, %cst_79 {dimension_numbers = #tpu.dot_dimension_numbers<[1], [0], [0], [1], [0, 0, 1, 1], [], []>} : vector<100x288xbf16>, vector<288x32xbf16>, vector<100x32xf32> -> vector<100x32xf32>
    %c0_80 = arith.constant 0 : index
    %c0_81 = arith.constant 0 : index
    %198 = vector.load %arg18[%c0_80, %c0_81] : memref<1x32xf32, #tpu.memory_space<vmem>>, vector<1x32xf32>
    %199 = vector.broadcast %198 : vector<1x32xf32> to vector<100x32xf32>
    %200 = arith.addf %197, %199 : vector<100x32xf32>
    %cst_82 = arith.constant 0.000000e+00 : f32
    %201 = vector.broadcast %cst_82 : f32 to vector<100x32xf32>
    %202 = arith.cmpf oge, %200, %201 : vector<100x32xf32>
    %cst_83 = arith.constant 0.00999999977 : f32
    %203 = vector.broadcast %cst_83 : f32 to vector<100x32xf32>
    %204 = arith.mulf %203, %200 : vector<100x32xf32>
    %205 = arith.select %202, %200, %204 : vector<100x32xi1>, vector<100x32xf32>
    %c0_84 = arith.constant 0 : index
    %c0_85 = arith.constant 0 : index
    %c0_86 = arith.constant 0 : index
    %206 = vector.load %arg27[%c0_84, %c0_85, %c0_86] : memref<1x100x16xf32, #tpu.memory_space<vmem>>, vector<1x100x16xf32>
    %207 = vector.shape_cast %206 : vector<1x100x16xf32> to vector<100x16xf32>
    %208 = vector.shape_cast %30 : vector<100x16xf32> to vector<1x100x16xf32>
    tpu.vector_store %arg27[%c0_84, %c0_85, %c0_86], %208 {strides = array<i32>} : memref<1x100x16xf32, #tpu.memory_space<vmem>>, vector<1x100x16xf32>,
    %c0_87 = arith.constant 0 : index
    %c0_88 = arith.constant 0 : index
    %c0_89 = arith.constant 0 : index
    %209 = vector.load %arg28[%c0_87, %c0_88, %c0_89] : memref<1x100x1xf32, #tpu.memory_space<vmem>>, vector<1x100x1xf32>
    %210 = vector.shape_cast %209 : vector<1x100x1xf32> to vector<100x1xf32>
    %211 = vector.shape_cast %112 : vector<100x1xf32> to vector<1x100x1xf32>
    tpu.vector_store %arg28[%c0_87, %c0_88, %c0_89], %211 {strides = array<i32>} : memref<1x100x1xf32, #tpu.memory_space<vmem>>, vector<1x100x1xf32>,
    %c0_90 = arith.constant 0 : index
    %c0_91 = arith.constant 0 : index
    %c0_92 = arith.constant 0 : index
    %212 = vector.load %arg29[%c0_90, %c0_91, %c0_92] : memref<1x100x32xf32, #tpu.memory_space<vmem>>, vector<1x100x32xf32>
    %213 = vector.shape_cast %212 : vector<1x100x32xf32> to vector<100x32xf32>
    %214 = vector.shape_cast %205 : vector<100x32xf32> to vector<1x100x32xf32>
    tpu.vector_store %arg29[%c0_90, %c0_91, %c0_92], %214 {strides = array<i32>} : memref<1x100x32xf32, #tpu.memory_space<vmem>>, vector<1x100x32xf32>,
    %c0_93 = arith.constant 0 : index
    %c0_94 = arith.constant 0 : index
    %c0_95 = arith.constant 0 : index
    %215 = tpu.strided_load %arg29[%c0_93, %c0_94, %c0_95] {strides = array<i32: 1, 5, 1>} : memref<1x100x32xf32, #tpu.memory_space<vmem>>, vector<1x20x32xf32>
    %216 = vector.shape_cast %215 : vector<1x20x32xf32> to vector<20x32xf32>
    %c0_96 = arith.constant 0 : index
    %c1_97 = arith.constant 1 : index
    %c0_98 = arith.constant 0 : index
    %217 = tpu.strided_load %arg29[%c0_96, %c1_97, %c0_98] {strides = array<i32: 1, 5, 1>} : memref<1x100x32xf32, #tpu.memory_space<vmem>>, vector<1x20x32xf32>
    %218 = vector.shape_cast %217 : vector<1x20x32xf32> to vector<20x32xf32>
    %219 = arith.maximumf %216, %218 : vector<20x32xf32>
    %c0_99 = arith.constant 0 : index
    %c2_100 = arith.constant 2 : index
    %c0_101 = arith.constant 0 : index
    %220 = tpu.strided_load %arg29[%c0_99, %c2_100, %c0_101] {strides = array<i32: 1, 5, 1>} : memref<1x100x32xf32, #tpu.memory_space<vmem>>, vector<1x20x32xf32>
    %221 = vector.shape_cast %220 : vector<1x20x32xf32> to vector<20x32xf32>
    %222 = arith.maximumf %219, %221 : vector<20x32xf32>
    %c0_102 = arith.constant 0 : index
    %c3 = arith.constant 3 : index
    %c0_103 = arith.constant 0 : index
    %223 = tpu.strided_load %arg29[%c0_102, %c3, %c0_103] {strides = array<i32: 1, 5, 1>} : memref<1x100x32xf32, #tpu.memory_space<vmem>>, vector<1x20x32xf32>
    %224 = vector.shape_cast %223 : vector<1x20x32xf32> to vector<20x32xf32>
    %225 = arith.maximumf %222, %224 : vector<20x32xf32>
    %c0_104 = arith.constant 0 : index
    %c4 = arith.constant 4 : index
    %c0_105 = arith.constant 0 : index
    %226 = tpu.strided_load %arg29[%c0_104, %c4, %c0_105] {strides = array<i32: 1, 5, 1>} : memref<1x100x32xf32, #tpu.memory_space<vmem>>, vector<1x20x32xf32>
    %227 = vector.shape_cast %226 : vector<1x20x32xf32> to vector<20x32xf32>
    %228 = arith.maximumf %225, %227 : vector<20x32xf32>
    %cst_106 = arith.constant 0.000000e+00 : f32
    %229 = vector.broadcast %cst_106 : f32 to vector<3x32xf32>
    %230 = tpu.concatenate %229, %228, %229 in 0 : vector<3x32xf32>, vector<20x32xf32>, vector<3x32xf32> -> vector<26x32xf32>
    %231 = vector.extract_strided_slice %230 {offsets = [0, 0], sizes = [20, 32], strides = [1, 1]} : vector<26x32xf32> to vector<20x32xf32>
    %232 = vector.extract_strided_slice %230 {offsets = [1, 0], sizes = [20, 32], strides = [1, 1]} : vector<26x32xf32> to vector<20x32xf32>
    %233 = vector.extract_strided_slice %230 {offsets = [2, 0], sizes = [20, 32], strides = [1, 1]} : vector<26x32xf32> to vector<20x32xf32>
    %234 = vector.extract_strided_slice %230 {offsets = [3, 0], sizes = [20, 32], strides = [1, 1]} : vector<26x32xf32> to vector<20x32xf32>
    %235 = vector.extract_strided_slice %230 {offsets = [4, 0], sizes = [20, 32], strides = [1, 1]} : vector<26x32xf32> to vector<20x32xf32>
    %236 = vector.extract_strided_slice %230 {offsets = [5, 0], sizes = [20, 32], strides = [1, 1]} : vector<26x32xf32> to vector<20x32xf32>
    %237 = vector.extract_strided_slice %230 {offsets = [6, 0], sizes = [20, 32], strides = [1, 1]} : vector<26x32xf32> to vector<20x32xf32>
    %238 = tpu.concatenate %231, %232, %233, %234, %235, %236, %237 in 1 : vector<20x32xf32>, vector<20x32xf32>, vector<20x32xf32>, vector<20x32xf32>, vector<20x32xf32>, vector<20x32xf32>, vector<20x32xf32> -> vector<20x224xf32>
    %239 = arith.truncf %238 : vector<20x224xf32> to vector<20x224xbf16>
    %c0_107 = arith.constant 0 : index
    %c0_108 = arith.constant 0 : index
    %240 = vector.load %arg19[%c0_107, %c0_108] : memref<224x64xbf16, #tpu.memory_space<vmem>>, vector<224x64xbf16>
    %cst_109 = arith.constant dense<0.000000e+00> : vector<20x64xf32>
    %241 = tpu.matmul %239, %240, %cst_109 {dimension_numbers = #tpu.dot_dimension_numbers<[1], [0], [0], [1], [0, 0, 1, 1], [], []>} : vector<20x224xbf16>, vector<224x64xbf16>, vector<20x64xf32> -> vector<20x64xf32>
    %c0_110 = arith.constant 0 : index
    %c0_111 = arith.constant 0 : index
    %242 = vector.load %arg20[%c0_110, %c0_111] : memref<1x64xf32, #tpu.memory_space<vmem>>, vector<1x64xf32>
    %243 = vector.broadcast %242 : vector<1x64xf32> to vector<20x64xf32>
    %244 = arith.addf %241, %243 : vector<20x64xf32>
    %cst_112 = arith.constant 0.000000e+00 : f32
    %245 = vector.broadcast %cst_112 : f32 to vector<20x64xf32>
    %246 = arith.cmpf oge, %244, %245 : vector<20x64xf32>
    %cst_113 = arith.constant 0.00999999977 : f32
    %247 = vector.broadcast %cst_113 : f32 to vector<20x64xf32>
    %248 = arith.mulf %247, %244 : vector<20x64xf32>
    %249 = arith.select %246, %244, %248 : vector<20x64xi1>, vector<20x64xf32>
    %cst_114 = arith.constant 0.000000e+00 : f32
    %250 = vector.broadcast %cst_114 : f32 to vector<3x64xf32>
    %251 = tpu.concatenate %250, %249, %250 in 0 : vector<3x64xf32>, vector<20x64xf32>, vector<3x64xf32> -> vector<26x64xf32>
    %252 = vector.extract_strided_slice %251 {offsets = [0, 0], sizes = [20, 64], strides = [1, 1]} : vector<26x64xf32> to vector<20x64xf32>
    %253 = vector.extract_strided_slice %251 {offsets = [1, 0], sizes = [20, 64], strides = [1, 1]} : vector<26x64xf32> to vector<20x64xf32>
    %254 = vector.extract_strided_slice %251 {offsets = [2, 0], sizes = [20, 64], strides = [1, 1]} : vector<26x64xf32> to vector<20x64xf32>
    %255 = vector.extract_strided_slice %251 {offsets = [3, 0], sizes = [20, 64], strides = [1, 1]} : vector<26x64xf32> to vector<20x64xf32>
    %256 = vector.extract_strided_slice %251 {offsets = [4, 0], sizes = [20, 64], strides = [1, 1]} : vector<26x64xf32> to vector<20x64xf32>
    %257 = vector.extract_strided_slice %251 {offsets = [5, 0], sizes = [20, 64], strides = [1, 1]} : vector<26x64xf32> to vector<20x64xf32>
    %258 = vector.extract_strided_slice %251 {offsets = [6, 0], sizes = [20, 64], strides = [1, 1]} : vector<26x64xf32> to vector<20x64xf32>
    %259 = tpu.concatenate %252, %253, %254, %255, %256, %257, %258 in 1 : vector<20x64xf32>, vector<20x64xf32>, vector<20x64xf32>, vector<20x64xf32>, vector<20x64xf32>, vector<20x64xf32>, vector<20x64xf32> -> vector<20x448xf32>
    %260 = arith.truncf %259 : vector<20x448xf32> to vector<20x448xbf16>
    %c0_115 = arith.constant 0 : index
    %c0_116 = arith.constant 0 : index
    %261 = vector.load %arg21[%c0_115, %c0_116] : memref<448x64xbf16, #tpu.memory_space<vmem>>, vector<448x64xbf16>
    %cst_117 = arith.constant dense<0.000000e+00> : vector<20x64xf32>
    %262 = tpu.matmul %260, %261, %cst_117 {dimension_numbers = #tpu.dot_dimension_numbers<[1], [0], [0], [1], [0, 0, 1, 1], [], []>} : vector<20x448xbf16>, vector<448x64xbf16>, vector<20x64xf32> -> vector<20x64xf32>
    %c0_118 = arith.constant 0 : index
    %c0_119 = arith.constant 0 : index
    %263 = vector.load %arg22[%c0_118, %c0_119] : memref<1x64xf32, #tpu.memory_space<vmem>>, vector<1x64xf32>
    %264 = vector.broadcast %263 : vector<1x64xf32> to vector<20x64xf32>
    %265 = arith.addf %262, %264 : vector<20x64xf32>
    %cst_120 = arith.constant 0.000000e+00 : f32
    %266 = vector.broadcast %cst_120 : f32 to vector<20x64xf32>
    %267 = arith.cmpf oge, %265, %266 : vector<20x64xf32>
    %cst_121 = arith.constant 0.00999999977 : f32
    %268 = vector.broadcast %cst_121 : f32 to vector<20x64xf32>
    %269 = arith.mulf %268, %265 : vector<20x64xf32>
    %270 = arith.select %267, %265, %269 : vector<20x64xi1>, vector<20x64xf32>
    %c0_122 = arith.constant 0 : index
    %c0_123 = arith.constant 0 : index
    %c0_124 = arith.constant 0 : index
    %271 = vector.load %arg30[%c0_122, %c0_123, %c0_124] : memref<1x20x64xf32, #tpu.memory_space<vmem>>, vector<1x20x64xf32>
    %272 = vector.shape_cast %271 : vector<1x20x64xf32> to vector<20x64xf32>
    %273 = vector.shape_cast %270 : vector<20x64xf32> to vector<1x20x64xf32>
    tpu.vector_store %arg30[%c0_122, %c0_123, %c0_124], %273 {strides = array<i32>} : memref<1x20x64xf32, #tpu.memory_space<vmem>>, vector<1x20x64xf32>,
    %c0_125 = arith.constant 0 : index
    %c0_126 = arith.constant 0 : index
    %c0_127 = arith.constant 0 : index
    %274 = tpu.strided_load %arg30[%c0_125, %c0_126, %c0_127] {strides = array<i32: 1, 5, 1>} : memref<1x20x64xf32, #tpu.memory_space<vmem>>, vector<1x4x64xf32>
    %275 = vector.shape_cast %274 : vector<1x4x64xf32> to vector<4x64xf32>
    %c0_128 = arith.constant 0 : index
    %c1_129 = arith.constant 1 : index
    %c0_130 = arith.constant 0 : index
    %276 = tpu.strided_load %arg30[%c0_128, %c1_129, %c0_130] {strides = array<i32: 1, 5, 1>} : memref<1x20x64xf32, #tpu.memory_space<vmem>>, vector<1x4x64xf32>
    %277 = vector.shape_cast %276 : vector<1x4x64xf32> to vector<4x64xf32>
    %278 = arith.maximumf %275, %277 : vector<4x64xf32>
    %c0_131 = arith.constant 0 : index
    %c2_132 = arith.constant 2 : index
    %c0_133 = arith.constant 0 : index
    %279 = tpu.strided_load %arg30[%c0_131, %c2_132, %c0_133] {strides = array<i32: 1, 5, 1>} : memref<1x20x64xf32, #tpu.memory_space<vmem>>, vector<1x4x64xf32>
    %280 = vector.shape_cast %279 : vector<1x4x64xf32> to vector<4x64xf32>
    %281 = arith.maximumf %278, %280 : vector<4x64xf32>
    %c0_134 = arith.constant 0 : index
    %c3_135 = arith.constant 3 : index
    %c0_136 = arith.constant 0 : index
    %282 = tpu.strided_load %arg30[%c0_134, %c3_135, %c0_136] {strides = array<i32: 1, 5, 1>} : memref<1x20x64xf32, #tpu.memory_space<vmem>>, vector<1x4x64xf32>
    %283 = vector.shape_cast %282 : vector<1x4x64xf32> to vector<4x64xf32>
    %284 = arith.maximumf %281, %283 : vector<4x64xf32>
    %c0_137 = arith.constant 0 : index
    %c4_138 = arith.constant 4 : index
    %c0_139 = arith.constant 0 : index
    %285 = tpu.strided_load %arg30[%c0_137, %c4_138, %c0_139] {strides = array<i32: 1, 5, 1>} : memref<1x20x64xf32, #tpu.memory_space<vmem>>, vector<1x4x64xf32>
    %286 = vector.shape_cast %285 : vector<1x4x64xf32> to vector<4x64xf32>
    %287 = arith.maximumf %284, %286 : vector<4x64xf32>
    %cst_140 = arith.constant 0.000000e+00 : f32
    %288 = vector.broadcast %cst_140 : f32 to vector<1x64xf32>
    %289 = tpu.concatenate %288, %287, %288 in 0 : vector<1x64xf32>, vector<4x64xf32>, vector<1x64xf32> -> vector<6x64xf32>
    %290 = vector.extract_strided_slice %289 {offsets = [0, 0], sizes = [4, 64], strides = [1, 1]} : vector<6x64xf32> to vector<4x64xf32>
    %291 = vector.extract_strided_slice %289 {offsets = [1, 0], sizes = [4, 64], strides = [1, 1]} : vector<6x64xf32> to vector<4x64xf32>
    %292 = vector.extract_strided_slice %289 {offsets = [2, 0], sizes = [4, 64], strides = [1, 1]} : vector<6x64xf32> to vector<4x64xf32>
    %293 = tpu.concatenate %290, %291, %292 in 1 : vector<4x64xf32>, vector<4x64xf32>, vector<4x64xf32> -> vector<4x192xf32>
    %294 = arith.truncf %293 : vector<4x192xf32> to vector<4x192xbf16>
    %c0_141 = arith.constant 0 : index
    %c0_142 = arith.constant 0 : index
    %295 = vector.load %arg23[%c0_141, %c0_142] : memref<192x128xbf16, #tpu.memory_space<vmem>>, vector<192x128xbf16>
    %cst_143 = arith.constant dense<0.000000e+00> : vector<4x128xf32>
    %296 = tpu.matmul %294, %295, %cst_143 {dimension_numbers = #tpu.dot_dimension_numbers<[1], [0], [0], [1], [0, 0, 1, 1], [], []>} : vector<4x192xbf16>, vector<192x128xbf16>, vector<4x128xf32> -> vector<4x128xf32>
    %c0_144 = arith.constant 0 : index
    %c0_145 = arith.constant 0 : index
    %297 = vector.load %arg24[%c0_144, %c0_145] : memref<1x128xf32, #tpu.memory_space<vmem>>, vector<1x128xf32>
    %298 = vector.broadcast %297 : vector<1x128xf32> to vector<4x128xf32>
    %299 = arith.addf %296, %298 : vector<4x128xf32>
    %cst_146 = arith.constant 0.000000e+00 : f32
    %300 = vector.broadcast %cst_146 : f32 to vector<4x128xf32>
    %301 = arith.cmpf oge, %299, %300 : vector<4x128xf32>
    %cst_147 = arith.constant 0.00999999977 : f32
    %302 = vector.broadcast %cst_147 : f32 to vector<4x128xf32>
    %303 = arith.mulf %302, %299 : vector<4x128xf32>
    %304 = arith.select %301, %299, %303 : vector<4x128xi1>, vector<4x128xf32>
    %cst_148 = arith.constant 0.000000e+00 : f32
    %305 = vector.broadcast %cst_148 : f32 to vector<1x128xf32>
    %306 = tpu.concatenate %305, %304, %305 in 0 : vector<1x128xf32>, vector<4x128xf32>, vector<1x128xf32> -> vector<6x128xf32>
    %307 = vector.extract_strided_slice %306 {offsets = [0, 0], sizes = [4, 128], strides = [1, 1]} : vector<6x128xf32> to vector<4x128xf32>
    %308 = vector.extract_strided_slice %306 {offsets = [1, 0], sizes = [4, 128], strides = [1, 1]} : vector<6x128xf32> to vector<4x128xf32>
    %309 = vector.extract_strided_slice %306 {offsets = [2, 0], sizes = [4, 128], strides = [1, 1]} : vector<6x128xf32> to vector<4x128xf32>
    %310 = tpu.concatenate %307, %308, %309 in 1 : vector<4x128xf32>, vector<4x128xf32>, vector<4x128xf32> -> vector<4x384xf32>
    %311 = arith.truncf %310 : vector<4x384xf32> to vector<4x384xbf16>
    %c0_149 = arith.constant 0 : index
    %c0_150 = arith.constant 0 : index
    %312 = vector.load %arg25[%c0_149, %c0_150] : memref<384x128xbf16, #tpu.memory_space<vmem>>, vector<384x128xbf16>
    %cst_151 = arith.constant dense<0.000000e+00> : vector<4x128xf32>
    %313 = tpu.matmul %311, %312, %cst_151 {dimension_numbers = #tpu.dot_dimension_numbers<[1], [0], [0], [1], [0, 0, 1, 1], [], []>} : vector<4x384xbf16>, vector<384x128xbf16>, vector<4x128xf32> -> vector<4x128xf32>
    %c0_152 = arith.constant 0 : index
    %c0_153 = arith.constant 0 : index
    %314 = vector.load %arg26[%c0_152, %c0_153] : memref<1x128xf32, #tpu.memory_space<vmem>>, vector<1x128xf32>
    %315 = vector.broadcast %314 : vector<1x128xf32> to vector<4x128xf32>
    %316 = arith.addf %313, %315 : vector<4x128xf32>
    %cst_154 = arith.constant 0.000000e+00 : f32
    %317 = vector.broadcast %cst_154 : f32 to vector<4x128xf32>
    %318 = arith.cmpf oge, %316, %317 : vector<4x128xf32>
    %cst_155 = arith.constant 0.00999999977 : f32
    %319 = vector.broadcast %cst_155 : f32 to vector<4x128xf32>
    %320 = arith.mulf %319, %316 : vector<4x128xf32>
    %321 = arith.select %318, %316, %320 : vector<4x128xi1>, vector<4x128xf32>
    %c0_156 = arith.constant 0 : index
    %c0_157 = arith.constant 0 : index
    %c0_158 = arith.constant 0 : index
    %322 = vector.load %arg31[%c0_156, %c0_157, %c0_158] : memref<1x4x128xf32, #tpu.memory_space<vmem>>, vector<1x4x128xf32>
    %323 = vector.shape_cast %322 : vector<1x4x128xf32> to vector<4x128xf32>
    %324 = vector.shape_cast %321 : vector<4x128xf32> to vector<1x4x128xf32>
    tpu.vector_store %arg31[%c0_156, %c0_157, %c0_158], %324 {strides = array<i32>} : memref<1x4x128xf32, #tpu.memory_space<vmem>>, vector<1x4x128xf32>,
    return
  }
  func.func @transform_0(%arg0: i32) -> (i32, i32, i32) {
    %c0_i32 = arith.constant 0 : i32
    %c0_i32_0 = arith.constant 0 : i32
    %c0_i32_1 = arith.constant 0 : i32
    return %arg0, %c0_i32, %c0_i32_0 : i32, i32, i32
  }
  func.func @transform_1(%arg0: i32) -> (i32, i32, i32) {
    %c0_i32 = arith.constant 0 : i32
    %c0_i32_0 = arith.constant 0 : i32
    %c0_i32_1 = arith.constant 0 : i32
    return %arg0, %c0_i32, %c0_i32_0 : i32, i32, i32
  }
  func.func @transform_2(%arg0: i32) -> (i32, i32) {
    %c0_i32 = arith.constant 0 : i32
    %c0_i32_0 = arith.constant 0 : i32
    %c0_i32_1 = arith.constant 0 : i32
    return %c0_i32, %c0_i32_0 : i32, i32
  }
  func.func @transform_3(%arg0: i32) -> (i32, i32) {
    %c0_i32 = arith.constant 0 : i32
    %c0_i32_0 = arith.constant 0 : i32
    %c0_i32_1 = arith.constant 0 : i32
    return %c0_i32, %c0_i32_0 : i32, i32
  }
  func.func @transform_4(%arg0: i32) -> (i32, i32) {
    %c0_i32 = arith.constant 0 : i32
    %c0_i32_0 = arith.constant 0 : i32
    %c0_i32_1 = arith.constant 0 : i32
    return %c0_i32, %c0_i32_0 : i32, i32
  }
  func.func @transform_5(%arg0: i32) -> (i32, i32) {
    %c0_i32 = arith.constant 0 : i32
    %c0_i32_0 = arith.constant 0 : i32
    %c0_i32_1 = arith.constant 0 : i32
    return %c0_i32, %c0_i32_0 : i32, i32
  }
  func.func @transform_6(%arg0: i32) -> (i32, i32) {
    %c0_i32 = arith.constant 0 : i32
    %c0_i32_0 = arith.constant 0 : i32
    %c0_i32_1 = arith.constant 0 : i32
    return %c0_i32, %c0_i32_0 : i32, i32
  }
  func.func @transform_7(%arg0: i32) -> (i32, i32) {
    %c0_i32 = arith.constant 0 : i32
    %c0_i32_0 = arith.constant 0 : i32
    %c0_i32_1 = arith.constant 0 : i32
    return %c0_i32, %c0_i32_0 : i32, i32
  }
  func.func @transform_8(%arg0: i32) -> (i32, i32) {
    %c0_i32 = arith.constant 0 : i32
    %c0_i32_0 = arith.constant 0 : i32
    %c0_i32_1 = arith.constant 0 : i32
    return %c0_i32, %c0_i32_0 : i32, i32
  }
  func.func @transform_9(%arg0: i32) -> (i32, i32) {
    %c0_i32 = arith.constant 0 : i32
    %c0_i32_0 = arith.constant 0 : i32
    %c0_i32_1 = arith.constant 0 : i32
    return %c0_i32, %c0_i32_0 : i32, i32
  }
  func.func @transform_10(%arg0: i32) -> (i32, i32) {
    %c0_i32 = arith.constant 0 : i32
    %c0_i32_0 = arith.constant 0 : i32
    %c0_i32_1 = arith.constant 0 : i32
    return %c0_i32, %c0_i32_0 : i32, i32
  }
  func.func @transform_11(%arg0: i32) -> (i32, i32) {
    %c0_i32 = arith.constant 0 : i32
    %c0_i32_0 = arith.constant 0 : i32
    %c0_i32_1 = arith.constant 0 : i32
    return %c0_i32, %c0_i32_0 : i32, i32
  }
  func.func @transform_12(%arg0: i32) -> (i32, i32) {
    %c0_i32 = arith.constant 0 : i32
    %c0_i32_0 = arith.constant 0 : i32
    %c0_i32_1 = arith.constant 0 : i32
    return %c0_i32, %c0_i32_0 : i32, i32
  }
  func.func @transform_13(%arg0: i32) -> (i32, i32) {
    %c0_i32 = arith.constant 0 : i32
    %c0_i32_0 = arith.constant 0 : i32
    %c0_i32_1 = arith.constant 0 : i32
    return %c0_i32, %c0_i32_0 : i32, i32
  }
  func.func @transform_14(%arg0: i32) -> (i32, i32) {
    %c0_i32 = arith.constant 0 : i32
    %c0_i32_0 = arith.constant 0 : i32
    %c0_i32_1 = arith.constant 0 : i32
    return %c0_i32, %c0_i32_0 : i32, i32
  }
  func.func @transform_15(%arg0: i32) -> (i32, i32) {
    %c0_i32 = arith.constant 0 : i32
    %c0_i32_0 = arith.constant 0 : i32
    %c0_i32_1 = arith.constant 0 : i32
    return %c0_i32, %c0_i32_0 : i32, i32
  }
  func.func @transform_16(%arg0: i32) -> (i32, i32) {
    %c0_i32 = arith.constant 0 : i32
    %c0_i32_0 = arith.constant 0 : i32
    %c0_i32_1 = arith.constant 0 : i32
    return %c0_i32, %c0_i32_0 : i32, i32
  }
  func.func @transform_17(%arg0: i32) -> (i32, i32) {
    %c0_i32 = arith.constant 0 : i32
    %c0_i32_0 = arith.constant 0 : i32
    %c0_i32_1 = arith.constant 0 : i32
    return %c0_i32, %c0_i32_0 : i32, i32
  }
  func.func @transform_18(%arg0: i32) -> (i32, i32) {
    %c0_i32 = arith.constant 0 : i32
    %c0_i32_0 = arith.constant 0 : i32
    %c0_i32_1 = arith.constant 0 : i32
    return %c0_i32, %c0_i32_0 : i32, i32
  }
  func.func @transform_19(%arg0: i32) -> (i32, i32) {
    %c0_i32 = arith.constant 0 : i32
    %c0_i32_0 = arith.constant 0 : i32
    %c0_i32_1 = arith.constant 0 : i32
    return %c0_i32, %c0_i32_0 : i32, i32
  }
  func.func @transform_20(%arg0: i32) -> (i32, i32) {
    %c0_i32 = arith.constant 0 : i32
    %c0_i32_0 = arith.constant 0 : i32
    %c0_i32_1 = arith.constant 0 : i32
    return %c0_i32, %c0_i32_0 : i32, i32
  }
  func.func @transform_21(%arg0: i32) -> (i32, i32) {
    %c0_i32 = arith.constant 0 : i32
    %c0_i32_0 = arith.constant 0 : i32
    %c0_i32_1 = arith.constant 0 : i32
    return %c0_i32, %c0_i32_0 : i32, i32
  }
  func.func @transform_22(%arg0: i32) -> (i32, i32) {
    %c0_i32 = arith.constant 0 : i32
    %c0_i32_0 = arith.constant 0 : i32
    %c0_i32_1 = arith.constant 0 : i32
    return %c0_i32, %c0_i32_0 : i32, i32
  }
  func.func @transform_23(%arg0: i32) -> (i32, i32) {
    %c0_i32 = arith.constant 0 : i32
    %c0_i32_0 = arith.constant 0 : i32
    %c0_i32_1 = arith.constant 0 : i32
    return %c0_i32, %c0_i32_0 : i32, i32
  }
  func.func @transform_24(%arg0: i32) -> (i32, i32) {
    %c0_i32 = arith.constant 0 : i32
    %c0_i32_0 = arith.constant 0 : i32
    %c0_i32_1 = arith.constant 0 : i32
    return %c0_i32, %c0_i32_0 : i32, i32
  }
  func.func @transform_25(%arg0: i32) -> (i32, i32) {
    %c0_i32 = arith.constant 0 : i32
    %c0_i32_0 = arith.constant 0 : i32
    %c0_i32_1 = arith.constant 0 : i32
    return %c0_i32, %c0_i32_0 : i32, i32
  }
  func.func @transform_26(%arg0: i32) -> (i32, i32, i32) {
    %c0_i32 = arith.constant 0 : i32
    %c0_i32_0 = arith.constant 0 : i32
    %c0_i32_1 = arith.constant 0 : i32
    return %arg0, %c0_i32, %c0_i32_0 : i32, i32, i32
  }
  func.func @transform_27(%arg0: i32) -> (i32, i32, i32) {
    %c0_i32 = arith.constant 0 : i32
    %c0_i32_0 = arith.constant 0 : i32
    %c0_i32_1 = arith.constant 0 : i32
    return %arg0, %c0_i32, %c0_i32_0 : i32, i32, i32
  }
  func.func @transform_28(%arg0: i32) -> (i32, i32, i32) {
    %c0_i32 = arith.constant 0 : i32
    %c0_i32_0 = arith.constant 0 : i32
    %c0_i32_1 = arith.constant 0 : i32
    return %arg0, %c0_i32, %c0_i32_0 : i32, i32, i32
  }
  func.func @transform_29(%arg0: i32) -> (i32, i32, i32) {
    %c0_i32 = arith.constant 0 : i32
    %c0_i32_0 = arith.constant 0 : i32
    %c0_i32_1 = arith.constant 0 : i32
    return %arg0, %c0_i32, %c0_i32_0 : i32, i32, i32
  }
  func.func @transform_30(%arg0: i32) -> (i32, i32, i32) {
    %c0_i32 = arith.constant 0 : i32
    %c0_i32_0 = arith.constant 0 : i32
    %c0_i32_1 = arith.constant 0 : i32
    return %arg0, %c0_i32, %c0_i32_0 : i32, i32, i32
  }
}

</mosaic_0001>

<bundles_post_ra>
// kernel: bvp_feature_extraction.1
= control target key start
LH: loop header
LB: loop body
LE: loop exit
PB: predicated region body
PF: predicated region fallthrough
CT: control target
= control target key end

     0   :  { %s8135_s6 = smov 1   ;;  %s8136_s10 = smov 2   ;;  %s11116_s0 = inlined_call_operand.smem [shape: u32[31], index: -1, kind: input, shape index: {}] }
   0x1   :  { %s8186_s5 = sld [smem:[%s11116_s0]]   ;;  %s8137_s14 = smov 3  }
   0x2   :  { %s8191_s9 = sld [smem:[%s11116_s0 + %s8135_s6]]   ;;  %s8138_s18 = smov 4  }
   0x3   :  { %s8196_s13 = sld [smem:[%s11116_s0 + %s8136_s10]]   ;;  %s8139_s22 = smov 5  }
   0x4   :  { %s8201_s17 = sld [smem:[%s11116_s0 + %s8137_s14]]   ;;  %s8140_s26 = smov 6  }
   0x5   :  { %s8206_s21 = sld [smem:[%s11116_s0 + %s8138_s18]]   ;;  %s8141_s30 = smov 7  }
   0x6   :  { %s8211_s25 = sld [smem:[%s11116_s0 + %s8139_s22]]   ;;  %s8142_s4 = smov 8  }
   0x7   :  { %11181 = sst [smem:[#allocation7_spill]] %s8186_s5  ;;  %s8143_s10 = smov 9  }
   0x8   :  { %11182 = sst [smem:[#allocation8_spill]] %s8191_s9  ;;  %s8144_s15 = smov 10  }
   0x9   :  { %s8216_s29 = sld [smem:[%s11116_s0 + %s8140_s26]]   ;;  %s8145_s20 = smov 11  }
   0xa   :  { %s8221_s3 = sld [smem:[%s11116_s0 + %s8141_s30]]   ;;  %s8146_s26 = smov 12  }
   0xb   :  { %s8226_s8 = sld [smem:[%s11116_s0 + %s8142_s4]]   ;;  %s8147_s1 = smov 14  }
   0xc   :  { %s8231_s14 = sld [smem:[%s11116_s0 + %s8143_s10]]   ;;  %s8148_s7 = smov 15  }
   0xd   :  { %s8236_s19 = sld [smem:[%s11116_s0 + %s8144_s15]]   ;;  %s8149_s15 = smov 16  }
   0xe   :  { %s6625_s24 = sld [smem:[%s11116_s0 + %s8145_s20]]   ;;  %s8150_s22 = smov 17  }
   0xf   :  { %s8244_s30 = sld [smem:[%s11116_s0 + %s8146_s26]]   ;;  %s8151_s28 = smov 18  }
  0x10   :  { %11183 = sst [smem:[#allocation9_spill]] %s8221_s3  ;;  %s8154_s23 = smov 21  }
  0x11   :  { %11184 = sst [smem:[#allocation10_spill]] %s8226_s8 }
  0x12   :  { %s8249_s6 = sld [smem:[%s11116_s0 + %s8147_s1]]  }
  0x13   :  { %s8254_s12 = sld [smem:[%s11116_s0 + %s8148_s7]]   ;;  %s8152_s7 = smov 19  }
  0x14   :  { %s8259_s20 = sld [smem:[%s11116_s0 + %s8149_s15]]   ;;  %v67_v0 = vstv %s6625_s24  ;;  %s8153_s15 = smov 20  }
  0x15   :  { %s8264_s27 = sld [smem:[%s11116_s0 + %s8150_s22]]   ;;  %68 = vst [vmem:[#allocation2] sm:$0x1] %v67_v0  ;;  %s8155_s24 = smov 22  }
  0x16   :  { %s8269_s4 = sld [smem:[%s11116_s0 + %s8151_s28]]  }
  0x17   :  { %s8274_s16 = sld [smem:[%s11116_s0 + %s8152_s7]]   ;;  %s8156_s7 = smov 23  }
  0x18   :  { %11185 = sst [smem:[#allocation11_spill]] %s8249_s6 }
  0x19   :  { %11186 = sst [smem:[#allocation12_spill]] %s8254_s12  ;;  %s8157_s12 = smov 24  }
  0x1a   :  { %11187 = sst [smem:[#allocation13_spill]] %s8259_s20 }
  0x1b   :  { %11188 = sst [smem:[#allocation14_spill]] %s8264_s27  ;;  %s8158_s27 = smov 25  }
  0x1c   :  { %11189 = sst [smem:[#allocation15_spill]] %s8269_s4 }
  0x1d   :  { %11190 = sst [smem:[#allocation16_spill]] %s8274_s16  ;;  %s8160_s16 = smov 27  }
  0x1e   :  { %s8279_s22 = sld [smem:[%s11116_s0 + %s8153_s15]]  }
  0x1f   :  { %s8284_s28 = sld [smem:[%s11116_s0 + %s8154_s23]]  }
  0x20   :  { %s8289_s10 = sld [smem:[%s11116_s0 + %s8155_s24]]   ;;  %s8159_s24 = smov 26  }
  0x21   :  { %s8294_s4 = sld [smem:[%s11116_s0 + %s8156_s7]]  }
  0x24   :  { %11191 = sst [smem:[#allocation17_spill]] %s8279_s22 }
  0x25   :  { %11192 = sst [smem:[#allocation18_spill]] %s8284_s28 }
  0x26   :  { %11193 = sst [smem:[#allocation19_spill]] %s8289_s10 }
  0x27   :  { %11194 = sst [smem:[#allocation20_spill]] %s8294_s4 }
  0x28   :  { %s8299_s22 = sld [smem:[%s11116_s0 + %s8157_s12]]   ;;  %s8161_s12 = smov 28  }
  0x29   :  { %s8304_s28 = sld [smem:[%s11116_s0 + %s8158_s27]]   ;;  %s8162_s27 = smov 29  }
  0x2a   :  { %s8309_s10 = sld [smem:[%s11116_s0 + %s8159_s24]]   ;;  %s8163_s24 = smov 30  }
  0x2b   :  { %s8314_s4 = sld [smem:[%s11116_s0 + %s8160_s16]]   ;;  %s8164_s16 = smov 13  }
  0x2c   :  { %s8329_s20 = sld [smem:[%s11116_s0 + %s8163_s24]]  }
  0x2d   :  { %s6627_s6 = sld [smem:[%s11116_s0 + %s8164_s16]]  }
  0x2e   :  { %11195 = sst [smem:[#allocation21_spill]] %s8299_s22 }
  0x2f   :  { %11196 = sst [smem:[#allocation22_spill]] %s8304_s28 }
  0x30   :  { %s8319_s22 = sld [smem:[%s11116_s0 + %s8161_s12]]  }
  0x31   :  { %11197 = sst [smem:[#allocation23_spill]] %s8314_s4 }
  0x32   :  { %s8324_s28 = sld [smem:[%s11116_s0 + %s8162_s27]]  }
  0x33   :  { %v69_v1 = vstv %s6627_s6 }
  0x34   :  { %70 = vst [vmem:[#allocation3] sm:$0x1] %v69_v1 }
  0x35   :  { %71 = vsyncpa [#allocation5], 0 }
  0x36   :  { %73 = vsyncpa [#allocation5 + $0x1], 0  ;;  %s8334_s12 = smov 0   ;;  %s8336_s15 = smov 0  }
  0x37   :  { %s8338_s18 = smov 0   ;;  %s8340_s27 = smov 0  }
  0x38 LB: > { %s11198_s8 = sld [smem:[#allocation10_spill]]  ;;  %s8355_s0 = sadd.s32 4294967295, %s8133_s27   ;;  %s8121_s12 = sphi %s8334_s12, %s11275_s12   ;;  %s8133_s27 = sphi %s8340_s27, %s11278_s27   ;;  %s8129_s18 = sphi %s8338_s18, %s11277_s18   ;;  %s8125_s15 = sphi %s8336_s15, %s11276_s15  }
  0x39   : > { %s6646_s6 = sadd.s32 4294967294, %s8133_s27   ;;  %s8359_s23 = sadd.s32 1, %s8133_s27  }
  0x3a   : > { %s746_s26 = sadd.s32 1, %s8129_s18  ;;  %s743_s24 = ssub.s32 %s8133_s27, %s8359_s23 }
  0x3b   : > { %p756_p0 = scmp.ne.s32.totalorder %s8129_s18, %s8125_s15  ;;  %p744_p1 = scmp.eq.s32.totalorder %s743_s24, 0 }
  0x3c   : > { %p757_p2 = scmp.eq.s32.totalorder %s8355_s0, 1  ;;  %p762_p3 = scmp.ne.s32.totalorder %s8125_s15, %s8121_s12 }
  0x3d   : > { %p763_p4 = scmp.eq.s32.totalorder %s6646_s6, 1  ;;  %p6649_p7 = scmp.ge.s32.totalorder %s8133_s27, 1 }
  0x3e   : > { %s8370_s1 = scalar_select %p744_p1, %s8129_s18, %s746_s26  }
  0x3f   : > { %p8372_p5 = por %p757_p2, %p756_p0  ;;  %p8376_p6 = por %p763_p4, %p762_p3 }
  0x40   : > { %p869_p8 = scmp.lt.s32.totalorder %s8133_s27, 3 }
  0x42   : > { %p870_p9 = pnand %p6649_p7, %p869_p8 }
  0x44   : > { %873 = sbr.rel (%p870_p9) target bundleno = 3651 (0xe43), region = 124 }
  0x4b   : > { %s11201_s5 = sld [smem:[#allocation7_spill]]  ;;  %p972_p10 = scmp.lt.s32.totalorder %s8355_s0, 1  ;;  %v11123_v2 = vmov 0   ;;  %vm1029_vm0 = vcmask 1040384   ;;  %vm1058_vm1 = vcmask 1044480   ;;  %v7826_v43 = vld [vmem:[%s8206_s21] sm:$0xff]  }
  0x4c   : > { %7245 = vset.pattern.permute.xlu1 %v11123_v2  ;;  %7244 = vset.pattern.permute.xlu0 %v11123_v2  ;;  %v11125_v44 = vmov 0.0   ;;  %v7827_v45 = vld [vmem:[%s8206_s21 + $0x8] sm:$0xff]   ;;  %v8414_v46 = vld [vmem:[%s8196_s13 + $0x1] ss:$0 sm:$0xff]  ;;  %v8417_v47 = vld [vmem:[%s8196_s13 + $0x2] ss:$0 sm:$0xff] }
  0x4d   : > { %s8386_s7 = scalar_select %p972_p10, %s8355_s0, 1  ;;  %7009 = vmatprep.subr.bf16.mxu0 %v11125_v44  ;;  %7043 = vmatprep.subr.bf16.mxu1 %v11125_v44  ;;  %v8420_v50 = vld [vmem:[%s8196_s13] ss:$0 sm:$0xff]  ;;  %vm1176_vm2 = vcmask 1046528   ;;  %vm1259_vm3 = vcmask 1045504   ;;  %vm1553_vm4 = vcmask 130048  }
  0x4e   : > { %7010 = vmatpush3.bf16.msra.mxu0 %v7826_v43  ;;  %vm2946_vm14 = vcmask 125952   ;;  %s11163_s24 = smov 32   ;;  %s11226_s3 = sld [smem:[#allocation9_spill]] }
  0x4f   : > { %s8389_s11 = smul.u32 104, %s8386_s7  ;;  %7011 = vmatprep.subr.bf16.mxu0 %v11125_v44  ;;  %s11229_s4 = sld [smem:[#allocation23_spill]] }
  0x50   : > { %s11230_s9 = sld [smem:[#allocation8_spill]] }
  0x51   : > { %s976_s6 = scalar_lea.vmem %s11201_s5, %s8389_s11  ;;  %s8471_s26 = scalar_lea.vmem %s8309_s10, %s8389_s11 }
  0x52   : > { %v1004_v3 = vld [vmem:[%s976_s6 + $0x8] sm:$0xff]  ;;  %v1005_v4 = vld [vmem:[%s976_s6 + $0x10] sm:$0xff]  ;;  %v1003_v5 = vld [vmem:[%s976_s6] sm:$0xff]  ;;  %7012 = vmatpush3.bf16.msra.mxu0 %v7827_v45  ;;  %s11248_s5 = smov 64  }
  0x53   : > { %v1031_v6 = vrot.slane %v1004_v3, 7  ;;  %v1033_v7 = vrot.slane %v1005_v4, 7  ;;  %v1030_v8 = vrot.slane %v1003_v5, 7  ;;  %v1006_v9 = vld [vmem:[%s976_s6 + $0x18] sm:$0xff]  ;;  %v1007_v11 = vld [vmem:[%s976_s6 + $0x20] sm:$0xff]  ;;  %v1008_v12 = vld [vmem:[%s976_s6 + $0x28] sm:$0xff]  ;;  %7013 = vmatprep.subr.bf16.mxu0 %v11125_v44 }
  0x54   : > { %v1035_v10 = vrot.slane %v1006_v9, 7  ;;  %v1009_v15 = vld [vmem:[%s976_s6 + $0x30] sm:$0xff]  ;;  %v1010_v16 = vld [vmem:[%s976_s6 + $0x38] sm:$0xff]  ;;  %v1011_v18 = vld [vmem:[%s976_s6 + $0x40] sm:$0xff]  ;;  %v1037_v22 = vrot.slane %v1007_v11, 7  ;;  %v1039_v23 = vrot.slane %v1008_v12, 7 }
  0x55   : > { %v1034_v13 = vsel %vm1029_vm0, %v1031_v6, %v1033_v7  ;;  %v1057_v14 = vsel %vm1029_vm0, 0.0, %v1030_v8  ;;  %v1014_v17 = vld [vmem:[%s976_s6 + $0x58] sm:$0xff]  ;;  %v1015_v19 = vld [vmem:[%s976_s6 + $0x60] sm:$0xf]  ;;  %v1032_v21 = vsel %vm1029_vm0, %v1030_v8, %v1031_v6  ;;  %v1012_v24 = vld [vmem:[%s976_s6 + $0x48] sm:$0xff]  ;;  %v1041_v28 = vrot.slane %v1009_v15, 7 }
  0x56   : > { %1071 = vperm.xlu1 %7245, %v1034_v13   ;;  %1063 = vperm.xlu0 %7244, %v1057_v14   ;;  %v1036_v20 = vsel %vm1029_vm0, %v1033_v7, %v1035_v10  ;;  %v1013_v25 = vld [vmem:[%s976_s6 + $0x50] sm:$0xff]  ;;  %v1051_v26 = vrot.slane %v1014_v17, 7  ;;  %v1053_v27 = vrot.slane %v1015_v19, 7  ;;  %v1043_v29 = vrot.slane %v1010_v16, 7  ;;  %s11161_s6 = smov 16  }
  0x57   : > { %v1045_v30 = vrot.slane %v1011_v18, 7  ;;  %v1047_v31 = vrot.slane %v1012_v24, 7  ;;  %v1040_v33 = vsel %vm1029_vm0, %v1037_v22, %v1039_v23  ;;  %v1038_v34 = vsel %vm1029_vm0, %v1035_v10, %v1037_v22 }
  0x58   : > { %v1054_v32 = vsel %vm1029_vm0, %v1051_v26, %v1053_v27  ;;  %v1049_v35 = vrot.slane %v1013_v25, 7  ;;  %v1044_v37 = vsel %vm1029_vm0, %v1041_v28, %v1043_v29  ;;  %v1042_v38 = vsel %vm1029_vm0, %v1039_v23, %v1041_v28 }
  0x59   : > { %v1059_v36 = vsel %vm1058_vm1, %v1054_v32, 0.0  ;;  %v1048_v39 = vsel %vm1029_vm0, %v1045_v30, %v1047_v31  ;;  %v1046_v40 = vsel %vm1029_vm0, %v1043_v29, %v1045_v30 }
  0x5a   : > { %1075 = vperm.xlu1 %7245, %v1036_v20   ;;  %1067 = vperm.xlu0 %7244, %v1032_v21   ;;  %v1052_v41 = vsel %vm1029_vm0, %v1049_v35, %v1051_v26  ;;  %v1050_v42 = vsel %vm1029_vm0, %v1047_v31, %v1049_v35  ;;  %v8446_v20 = vld [vmem:[%s8201_s17] ss:$0 sm:$0xff] }
  0x5e   : > { %1083 = vperm.xlu1 %7245, %v1040_v33   ;;  %1079 = vperm.xlu0 %7244, %v1038_v34  }
  0x62   : > { %1091 = vperm.xlu1 %7245, %v1044_v37   ;;  %1087 = vperm.xlu0 %7244, %v1042_v38  }
  0x66   : > { %1099 = vperm.xlu1 %7245, %v1048_v39   ;;  %1095 = vperm.xlu0 %7244, %v1046_v40  }
  0x6a   : > { %1107 = vperm.xlu1 %7245, %v1052_v41   ;;  %1103 = vperm.xlu0 %7244, %v1050_v42  }
  0x6e   : > { %1112 = vperm.xlu0 %7244, %v1059_v36  }
  0xd5   : > { %v1072_v48 = vpop.permute.xlu1 %1071  ;;  %v1064_v49 = vpop.permute.xlu0 %1063 }
  0xd6   : > { %v1152_v51 = vmul.f32 %v8414_v46, %v1072_v48  ;;  %v1235_v52 = vmul.f32 %v8417_v47, %v1072_v48  ;;  %v1150_v53 = vmul.f32 %v8414_v46, %v1064_v49  ;;  %v1233_v54 = vmul.f32 %v8417_v47, %v1064_v49 }
  0xd7   : > { %v1121_v57 = vmul.f32 %v8420_v50, %v1072_v48  ;;  %v1119_v58 = vmul.f32 %v8420_v50, %v1064_v49 }
  0xd8   : > { %v1180_v61 = vrot.slane %v1152_v51, 1  ;;  %v1263_v62 = vrot.slane %v1235_v52, 2  ;;  %v1177_v1 = vrot.slane %v1150_v53, 1  ;;  %v1260_v3 = vrot.slane %v1233_v54, 2 }
  0xd9   : > { %v1076_v55 = vpop.permute.xlu1 %1075  ;;  %v1068_v56 = vpop.permute.xlu0 %1067 }
  0xda   : > { %v1153_v59 = vmul.f32 %v8414_v46, %v1076_v55  ;;  %v1236_v60 = vmul.f32 %v8417_v47, %v1076_v55  ;;  %v1151_v63 = vmul.f32 %v8414_v46, %v1068_v56  ;;  %v1234_v0 = vmul.f32 %v8417_v47, %v1068_v56 }
  0xdb   : > { %v1122_v6 = vmul.f32 %v8420_v50, %v1076_v55  ;;  %v1120_v7 = vmul.f32 %v8420_v50, %v1068_v56 }
  0xdc   : > { %v1182_v4 = vrot.slane %v1153_v59, 1  ;;  %v1265_v5 = vrot.slane %v1236_v60, 2  ;;  %v1178_v8 = vrot.slane %v1151_v63, 1  ;;  %v1261_v9 = vrot.slane %v1234_v0, 2 }
  0xdd   : > { %v1084_v10 = vpop.permute.xlu1 %1083  ;;  %v1080_v11 = vpop.permute.xlu0 %1079 }
  0xde   : > { %v1183_v12 = vsel %vm1176_vm2, %v1180_v61, %v1182_v4  ;;  %v1266_v13 = vsel %vm1259_vm3, %v1263_v62, %v1265_v5  ;;  %v8437_v14 = vmul.f32 %v8420_v50, %v1084_v10  ;;  %v8440_v15 = vmul.f32 %v8414_v46, %v1084_v10 }
  0xdf   : > { %v1217_v16 = vadd.f32 %v1183_v12, %v1121_v57  ;;  %v1179_v17 = vsel %vm1176_vm2, %v1177_v1, %v1178_v8  ;;  %v1181_v18 = vsel %vm1176_vm2, %v1178_v8, %v1180_v61  ;;  %v1262_v19 = vsel %vm1259_vm3, %v1260_v3, %v1261_v9 }
  0xe0   : > { %v1215_v21 = vadd.f32 %v1179_v17, %v1119_v58  ;;  %v1216_v22 = vadd.f32 %v1181_v18, %v1120_v7  ;;  %v1264_v23 = vsel %vm1259_vm3, %v1261_v9, %v1263_v62  ;;  %v1186_v24 = vrot.slane %v8440_v15, 1 }
  0xe1   : > { %v1300_v25 = vadd.f32 %v1266_v13, %v1217_v16  ;;  %v8451_v26 = vmul.f32 %v8417_v47, %v1084_v10  ;;  %v1123_v27 = vmul.f32 %v8420_v50, %v1080_v11  ;;  %v1154_v28 = vmul.f32 %v8414_v46, %v1080_v11  ;;  %v1092_v29 = vpop.permute.xlu1 %1091  ;;  %v1088_v38 = vpop.permute.xlu0 %1087 }
  0xe2   : > { %v1298_v30 = vadd.f32 %v1262_v19, %v1215_v21  ;;  %v1299_v31 = vadd.f32 %v1264_v23, %v1216_v22  ;;  %v1237_v32 = vmul.f32 %v8417_v47, %v1080_v11  ;;  %v8457_v33 = vmul.f32 %v8420_v50, %v1092_v29 }
  0xe3   : > { %v1320_v34 = vadd.f32 %v8446_v20, %v1300_v25  ;;  %v1269_v35 = vrot.slane %v8451_v26, 2  ;;  %v1184_v36 = vrot.slane %v1154_v28, 1  ;;  %v8462_v37 = vmul.f32 %v8414_v46, %v1092_v29 }
  0xe4   : > { %v1318_v39 = vadd.f32 %v8446_v20, %v1298_v30  ;;  %v1319_v40 = vadd.f32 %v8446_v20, %v1299_v31  ;;  %v1267_v41 = vrot.slane %v1237_v32, 2  ;;  %v8467_v42 = vmul.f32 %v8417_v47, %v1092_v29 }
  0xe5   : > { %vm1333_vm5 = vcmp.ge.f32.partialorder %v1320_v34, 0.0  ;;  %v1346_v43 = vmul.f32 0.01, %v1320_v34  ;;  %v1185_v45 = vsel %vm1176_vm2, %v1182_v4, %v1184_v36  ;;  %v1187_v48 = vsel %vm1176_vm2, %v1184_v36, %v1186_v24  ;;  %v1100_v60 = vpop.permute.xlu1 %1099  ;;  %v1096_v1 = vpop.permute.xlu0 %1095 }
  0xe6   : > { %vm1331_vm6 = vcmp.ge.f32.partialorder %v1318_v39, 0.0  ;;  %vm1332_vm7 = vcmp.ge.f32.partialorder %v1319_v40, 0.0  ;;  %v1344_v49 = vmul.f32 0.01, %v1318_v39  ;;  %v1345_v51 = vmul.f32 0.01, %v1319_v40 }
  0xe7   : > { %v8475_v52 = vsel %vm1333_vm5, %v1320_v34, %v1346_v43  ;;  %v1218_v53 = vadd.f32 %v1185_v45, %v1122_v6  ;;  %v1219_v54 = vadd.f32 %v1187_v48, %v1123_v27  ;;  %v1268_v55 = vsel %vm1259_vm3, %v1265_v5, %v1267_v41 }
  0xe8   : > { %11202 = vst [vmem:[#allocation24_spill] sm:$0xff] %v8475_v52  ;;  %v1386_v56 = vrot.slane %v8475_v52, 7  ;;  %5105 = vst.msk [vmem:[%s8471_s26 + $0x10] sm:$0xff] %vm1553_vm4, %v8475_v52  ;;  %v8482_v57 = vsel %vm1331_vm6, %v1318_v39, %v1344_v49  ;;  %v8484_v58 = vsel %vm1332_vm7, %v1319_v40, %v1345_v51  ;;  %v1270_v59 = vsel %vm1259_vm3, %v1267_v41, %v1269_v35 }
  0xe9   : > { %11203 = vst [vmem:[#allocation25_spill] sm:$0xff] %v8482_v57  ;;  %11204 = vst [vmem:[#allocation26_spill] sm:$0xff] %v8484_v58  ;;  %v1384_v61 = vrot.slane %v8484_v58, 7  ;;  %v1301_v62 = vadd.f32 %v1268_v55, %v1218_v53  ;;  %v1302_v63 = vadd.f32 %v1270_v59, %v1219_v54  ;;  %v1190_v0 = vrot.slane %v8462_v37, 1  ;;  %v1108_v28 = vpop.permute.xlu1 %1107  ;;  %v1104_v29 = vpop.permute.xlu0 %1103 }
  0xea   : > { %5103 = vst.msk [vmem:[%s8471_s26] sm:$0xff] %vm1553_vm4, %v8482_v57  ;;  %5104 = vst.msk [vmem:[%s8471_s26 + $0x8] sm:$0xff] %vm1553_vm4, %v8484_v58  ;;  %v1273_v3 = vrot.slane %v8467_v42, 2  ;;  %v1125_v4 = vmul.f32 %v8420_v50, %v1088_v38  ;;  %v1156_v5 = vmul.f32 %v8414_v46, %v1088_v38  ;;  %v1239_v6 = vmul.f32 %v8417_v47, %v1088_v38 }
  0xeb   : > { %v1321_v7 = vadd.f32 %v8446_v20, %v1301_v62  ;;  %v1322_v8 = vadd.f32 %v8446_v20, %v1302_v63  ;;  %v8502_v9 = vmul.f32 %v8420_v50, %v1100_v60  ;;  %v8505_v10 = vmul.f32 %v8414_v46, %v1100_v60 }
  0xec   : > { %v1188_v11 = vrot.slane %v1156_v5, 1  ;;  %v1271_v12 = vrot.slane %v1239_v6, 2  ;;  %v8508_v13 = vmul.f32 %v8417_v47, %v1100_v60  ;;  %v1127_v15 = vmul.f32 %v8420_v50, %v1096_v1 }
  0xed   : > { %vm1334_vm8 = vcmp.ge.f32.partialorder %v1321_v7, 0.0  ;;  %vm1335_vm9 = vcmp.ge.f32.partialorder %v1322_v8, 0.0  ;;  %v1347_v16 = vmul.f32 0.01, %v1321_v7  ;;  %v1348_v17 = vmul.f32 0.01, %v1322_v8 }
  0xee   : > { %v1189_v18 = vsel %vm1176_vm2, %v1186_v24, %v1188_v11  ;;  %v1191_v19 = vsel %vm1176_vm2, %v1188_v11, %v1190_v0  ;;  %v1272_v21 = vsel %vm1259_vm3, %v1269_v35, %v1271_v12  ;;  %v1274_v22 = vsel %vm1259_vm3, %v1271_v12, %v1273_v3 }
  0xef   : > { %v8515_v23 = vsel %vm1334_vm8, %v1321_v7, %v1347_v16  ;;  %v8517_v25 = vsel %vm1335_vm9, %v1322_v8, %v1348_v17  ;;  %v1220_v26 = vadd.f32 %v1189_v18, %v8437_v14  ;;  %v1221_v27 = vadd.f32 %v1191_v19, %v1125_v4 }
  0xf0   : > { %11205 = vst [vmem:[#allocation27_spill] sm:$0xff] %v8515_v23  ;;  %11206 = vst [vmem:[#allocation28_spill] sm:$0xff] %v8517_v25  ;;  %v1388_v30 = vrot.slane %v8515_v23, 7  ;;  %v1390_v31 = vrot.slane %v8517_v25, 7  ;;  %v1194_v24 = vrot.slane %v8505_v10, 1  ;;  %v1277_v32 = vrot.slane %v8508_v13, 2 }
  0xf1   : > { %5106 = vst.msk [vmem:[%s8471_s26 + $0x18] sm:$0xff] %vm1553_vm4, %v8515_v23  ;;  %5107 = vst.msk [vmem:[%s8471_s26 + $0x20] sm:$0xff] %vm1553_vm4, %v8517_v25  ;;  %v1303_v34 = vadd.f32 %v1272_v21, %v1220_v26  ;;  %v1304_v35 = vadd.f32 %v1274_v22, %v1221_v27  ;;  %v1158_v14 = vmul.f32 %v8414_v46, %v1096_v1  ;;  %vm11158_vm8 = vmmov 0  }
  0xf2   : > { %v1241_v36 = vmul.f32 %v8417_v47, %v1096_v1  ;;  %v1130_v37 = vmul.f32 %v8420_v50, %v1108_v28  ;;  %v1161_v38 = vmul.f32 %v8414_v46, %v1108_v28  ;;  %v8535_v39 = vmul.f32 %v8417_v47, %v1108_v28  ;;  %v1113_v1 = vpop.permute.xlu0 %1112  ;;  %7015 = vmatprep.mubr.msk.bf16.mxu0 %vm11158_vm8, %v11125_v44 }
  0xf3   : > { %v1129_v40 = vmul.f32 %v8420_v50, %v1104_v29  ;;  %v1323_v41 = vadd.f32 %v8446_v20, %v1303_v34  ;;  %v1324_v42 = vadd.f32 %v8446_v20, %v1304_v35  ;;  %v1192_v43 = vrot.slane %v1158_v14, 1  ;;  %7047 = vmatprep.mubr.msk.bf16.mxu1 %vm11158_vm8, %v11125_v44 }
  0xf4   : > { %v1275_v45 = vrot.slane %v1241_v36, 2  ;;  %v1198_v48 = vrot.slane %v1161_v38, 1  ;;  %v1281_v49 = vrot.slane %v8535_v39, 2  ;;  %v1160_v51 = vmul.f32 %v8414_v46, %v1104_v29 }
  0xf5   : > { %v1243_v53 = vmul.f32 %v8417_v47, %v1104_v29  ;;  %vm1336_vm10 = vcmp.ge.f32.partialorder %v1323_v41, 0.0  ;;  %vm1337_vm11 = vcmp.ge.f32.partialorder %v1324_v42, 0.0  ;;  %v1349_v54 = vmul.f32 0.01, %v1323_v41 }
  0xf6   : > { %v1350_v55 = vmul.f32 0.01, %v1324_v42  ;;  %v1193_v59 = vsel %vm1176_vm2, %v1190_v0, %v1192_v43  ;;  %v1195_v60 = vsel %vm1176_vm2, %v1192_v43, %v1194_v24  ;;  %v1276_v62 = vsel %vm1259_vm3, %v1273_v3, %v1275_v45  ;;  %v7828_v43 = vld [vmem:[%s8206_s21 + $0x10] sm:$0xff]  }
  0xf7   : > { %v1278_v63 = vsel %vm1259_vm3, %v1275_v45, %v1277_v32  ;;  %v8547_v4 = vsel %vm1336_vm10, %v1323_v41, %v1349_v54  ;;  %v1222_v6 = vadd.f32 %v1193_v59, %v8457_v33  ;;  %v1223_v7 = vadd.f32 %v1195_v60, %v1127_v15  ;;  %7014 = vmatpush3.bf16.msra.mxu0 %v7828_v43 }
  0xf8   : > { %11207 = vst [vmem:[#allocation29_spill] sm:$0xff] %v8547_v4  ;;  %v8549_v5 = vsel %vm1337_vm11, %v1324_v42, %v1350_v55  ;;  %v1392_v8 = vrot.slane %v8547_v4, 7  ;;  %5108 = vst.msk [vmem:[%s8471_s26 + $0x28] sm:$0xff] %vm1553_vm4, %v8547_v4  ;;  %v1196_v0 = vrot.slane %v1160_v51, 1  ;;  %v1279_v3 = vrot.slane %v1243_v53, 2  ;;  %4014 = vmatprep.subr.bf16.mxu0 %v11123_v2 }
  0xf9   : > { %11208 = vst [vmem:[#allocation30_spill] sm:$0xff] %v8549_v5  ;;  %v1394_v10 = vrot.slane %v8549_v5, 7  ;;  %5109 = vst.msk [vmem:[%s8471_s26 + $0x30] sm:$0xff] %vm1553_vm4, %v8549_v5  ;;  %v1305_v11 = vadd.f32 %v1276_v62, %v1222_v6  ;;  %v1306_v12 = vadd.f32 %v1278_v63, %v1223_v7  ;;  %v1131_v13 = vmul.f32 %v8420_v50, %v1113_v1 }
  0xfa   : > { %v1162_v16 = vmul.f32 %v8414_v46, %v1113_v1  ;;  %v1197_v33 = vsel %vm1176_vm2, %v1194_v24, %v1196_v0  ;;  %v1199_v15 = vsel %vm1176_vm2, %v1196_v0, %v1198_v48  ;;  %v1280_v17 = vsel %vm1259_vm3, %v1277_v32, %v1279_v3 }
  0xfb   : > { %v1282_v18 = vsel %vm1259_vm3, %v1279_v3, %v1281_v49  ;;  %v1325_v19 = vadd.f32 %v8446_v20, %v1305_v11  ;;  %v1326_v21 = vadd.f32 %v8446_v20, %v1306_v12  ;;  %v1224_v22 = vadd.f32 %v1197_v33, %v8502_v9 }
  0xfc   : > { %v1225_v26 = vadd.f32 %v1199_v15, %v1129_v40  ;;  %v1200_v27 = vrot.slane %v1162_v16, 1  ;;  %v1245_v50 = vmul.f32 %v8417_v47, %v1113_v1  ;;  %v1383_v46 = vrot.slane %v8482_v57, 7 }
  0xfd   : > { %v8576_v28 = vsel %vm1029_vm0, %v1384_v61, %v1386_v56  ;;  %vm1338_vm12 = vcmp.ge.f32.partialorder %v1325_v19, 0.0  ;;  %vm1339_vm13 = vcmp.ge.f32.partialorder %v1326_v21, 0.0  ;;  %v1351_v29 = vmul.f32 0.01, %v1325_v19 }
  0xfe   : > { %v1352_v24 = vmul.f32 0.01, %v1326_v21  ;;  %v1307_v9 = vadd.f32 %v1280_v17, %v1224_v22  ;;  %v1308_v32 = vadd.f32 %v1282_v18, %v1225_v26  ;;  %v1201_v47 = vsel %vm1176_vm2, %v1198_v48, %v1200_v27 }
  0xff   : > { %v1227_v34 = vadd.f32 %v1200_v27, %v1131_v13  ;;  %v8579_v35 = vsel %vm1338_vm12, %v1325_v19, %v1351_v29  ;;  %v1226_v36 = vadd.f32 %v1201_v47, %v1130_v37  ;;  %v1283_v38 = vrot.slane %v1245_v50, 2 }
 0x100   : > { %11209 = vst [vmem:[#allocation31_spill] sm:$0xff] %v8579_v35  ;;  %v8581_v14 = vsel %vm1339_vm13, %v1326_v21, %v1352_v24  ;;  %v1396_v39 = vrot.slane %v8579_v35, 7  ;;  %5110 = vst.msk [vmem:[%s8471_s26 + $0x38] sm:$0xff] %vm1553_vm4, %v8579_v35  ;;  %v1327_v41 = vadd.f32 %v8446_v20, %v1307_v9  ;;  %v1328_v42 = vadd.f32 %v8446_v20, %v1308_v32 }
 0x101   : > { %11210 = vst [vmem:[#allocation32_spill] sm:$0xff] %v8581_v14  ;;  %v1398_v40 = vrot.slane %v8581_v14, 7  ;;  %5111 = vst.msk [vmem:[%s8471_s26 + $0x40] sm:$0xff] %vm1553_vm4, %v8581_v14  ;;  %v1284_v45 = vsel %vm1259_vm3, %v1281_v49, %v1283_v38  ;;  %v1310_v48 = vadd.f32 %v1283_v38, %v1227_v34  ;;  %v8598_v37 = vsel %vm1029_vm0, %v1383_v46, %v1384_v61 }
 0x102   : > { %v8601_v51 = vsel %vm1029_vm0, 0.0, %v1383_v46  ;;  %vm1340_vm15 = vcmp.ge.f32.partialorder %v1327_v41, 0.0  ;;  %vm1341_vm5 = vcmp.ge.f32.partialorder %v1328_v42, 0.0  ;;  %v1353_v53 = vmul.f32 0.01, %v1327_v41 }
 0x103   : > { %v1354_v54 = vmul.f32 0.01, %v1328_v42  ;;  %v1309_v55 = vadd.f32 %v1284_v45, %v1226_v36  ;;  %v1330_v59 = vadd.f32 %v8446_v20, %v1310_v48  ;;  %v1489_v49 = vrot.slane %v8601_v51, 2 }
 0x104   : > { %v1490_v60 = vrot.slane %v8598_v37, 2  ;;  %v8607_v61 = vsel %vm1340_vm15, %v1327_v41, %v1353_v53  ;;  %v1492_v63 = vrot.slane %v8576_v28, 2  ;;  %v1425_v1 = vrot.slane %v8601_v51, 1 }
 0x105   : > { %11211 = vst [vmem:[#allocation33_spill] sm:$0xff] %v8607_v61  ;;  %v8609_v62 = vsel %vm1341_vm5, %v1328_v42, %v1354_v54  ;;  %v1400_v6 = vrot.slane %v8607_v61, 7  ;;  %5112 = vst.msk [vmem:[%s8471_s26 + $0x48] sm:$0xff] %vm1553_vm4, %v8607_v61  ;;  %v1329_v0 = vadd.f32 %v8446_v20, %v1309_v55  ;;  %vm1343_vm6 = vcmp.ge.f32.partialorder %v1330_v59, 0.0 }
 0x106   : > { %11212 = vst [vmem:[#allocation34_spill] sm:$0xff] %v8609_v62  ;;  %v1402_v7 = vrot.slane %v8609_v62, 7  ;;  %5113 = vst.msk [vmem:[%s8471_s26 + $0x50] sm:$0xff] %vm1553_vm4, %v8609_v62  ;;  %v1356_v3 = vmul.f32 0.01, %v1330_v59  ;;  %v1491_v11 = vsel %vm1259_vm3, %v1489_v49, %v1490_v60  ;;  %v1493_v12 = vsel %vm1259_vm3, %v1490_v60, %v1492_v63 }
 0x107   : > { %v1426_v13 = vrot.slane %v8598_v37, 1  ;;  %vm1342_vm7 = vcmp.ge.f32.partialorder %v1329_v0, 0.0  ;;  %v1355_v16 = vmul.f32 0.01, %v1329_v0  ;;  %v7251_v33 = vpack.i.bf16 %v1493_v12, %v1491_v11 }
 0x108   : > { %v1428_v15 = vrot.slane %v8576_v28, 1  ;;  %v8626_v17 = vsel %vm1343_vm6, %v1330_v59, %v1356_v3  ;;  %v8634_v20 = vsel %vm1029_vm0, %v1386_v56, %v1388_v30  ;;  %v8641_v19 = vsel %vm1029_vm0, %v1388_v30, %v1390_v31 }
 0x109   : > { %11213 = vst [vmem:[#allocation35_spill] sm:$0xff] %v8626_v17  ;;  %v1427_v18 = vsel %vm1176_vm2, %v1425_v1, %v1426_v13  ;;  %v8643_v21 = vsel %vm1342_vm7, %v1329_v0, %v1355_v16  ;;  %v1406_v22 = vrot.slane %v8626_v17, 7  ;;  %7252 = vrot.lane.b32.xlu0 %v7251_v33, %s11163_s24  ;;  %v1494_v27 = vrot.slane %v8634_v20, 2  ;;  %5115 = vst.msk [vmem:[%s8471_s26 + $0x60] sm:$0xf] %vm2946_vm14, %v8626_v17 }
 0x10a   : > { %11214 = vst [vmem:[#allocation36_spill] sm:$0xff] %v8643_v21  ;;  %v1429_v26 = vsel %vm1176_vm2, %v1426_v13, %v1428_v15  ;;  %v1404_v56 = vrot.slane %v8643_v21, 7  ;;  %5114 = vst.msk [vmem:[%s8471_s26 + $0x58] sm:$0xff] %vm1553_vm4, %v8643_v21  ;;  %v1496_v50 = vrot.slane %v8641_v19, 2  ;;  %v1430_v46 = vrot.slane %v8634_v20, 1  ;;  %s8170_s26 = smov 8  }
 0x10b   : > { %v7246_v30 = vpack.i.bf16 %v1429_v26, %v1427_v18  ;;  %v1495_v29 = vsel %vm1259_vm3, %v1492_v63, %v1494_v27  ;;  %v1432_v24 = vrot.slane %v8641_v19, 1  ;;  %v8665_v9 = vsel %vm1029_vm0, %v1390_v31, %v1392_v8 }
 0x10c   : > { %v8672_v32 = vsel %vm1029_vm0, %v1392_v8, %v1394_v10  ;;  %v1497_v47 = vsel %vm1259_vm3, %v1494_v27, %v1496_v50  ;;  %v1431_v34 = vsel %vm1176_vm2, %v1428_v15, %v1430_v46  ;;  %v1498_v36 = vrot.slane %v8665_v9, 2 }
 0x10d   : > { %7247 = vrot.lane.b32.xlu1 %v7246_v30, %s11161_s6  ;;  %v1500_v38 = vrot.slane %v8672_v32, 2  ;;  %v7261_v31 = vpack.i.bf16 %v1497_v47, %v1495_v29  ;;  %v1433_v41 = vsel %vm1176_vm2, %v1430_v46, %v1432_v24  ;;  %v1434_v42 = vrot.slane %v8665_v9, 1 }
 0x10e   : > { %v1436_v43 = vrot.slane %v8672_v32, 1  ;;  %v7256_v8 = vpack.i.bf16 %v1433_v41, %v1431_v34  ;;  %v1499_v45 = vsel %vm1259_vm3, %v1496_v50, %v1498_v36  ;;  %v8689_v53 = vsel %vm1029_vm0, %v1394_v10, %v1396_v39 }
 0x10f   : > { %v1501_v48 = vsel %vm1259_vm3, %v1498_v36, %v1500_v38  ;;  %7262 = vrot.lane.b32.xlu0 %v7261_v31, %s11163_s24  ;;  %v1435_v55 = vsel %vm1176_vm2, %v1432_v24, %v1434_v42  ;;  %v8699_v49 = vsel %vm1029_vm0, %v1396_v39, %v1398_v40  ;;  %v1502_v10 = vrot.slane %v8689_v53, 2 }
 0x110   : > { %v7271_v54 = vpack.i.bf16 %v1501_v48, %v1499_v45  ;;  %v1437_v59 = vsel %vm1176_vm2, %v1434_v42, %v1436_v43  ;;  %v1504_v63 = vrot.slane %v8699_v49, 2  ;;  %v1438_v1 = vrot.slane %v8689_v53, 1  ;;  %v8756_v48 = vld [vmem:[%s8244_s30 + $0x1] ss:$0 sm:$0xff] }
 0x111   : > { %7257 = vrot.lane.b32.xlu1 %v7256_v8, %s11161_s6  ;;  %v7266_v60 = vpack.i.bf16 %v1437_v59, %v1435_v55  ;;  %v1440_v0 = vrot.slane %v8699_v49, 1  ;;  %v8709_v3 = vsel %vm1029_vm0, %v1398_v40, %v1400_v6  ;;  %v8712_v11 = vsel %vm1029_vm0, %v1400_v6, %v1402_v7 }
 0x112   : > { %v8715_v39 = vsel %vm1029_vm0, %v1402_v7, %v1404_v56  ;;  %v1503_v12 = vsel %vm1259_vm3, %v1500_v38, %v1502_v10  ;;  %v1505_v13 = vsel %vm1259_vm3, %v1502_v10, %v1504_v63  ;;  %v1439_v16 = vsel %vm1176_vm2, %v1436_v43, %v1438_v1 }
 0x113   : > { %v1506_v33 = vrot.slane %v8709_v3, 2  ;;  %7272 = vrot.lane.b32.xlu0 %v7271_v54, %s11163_s24  ;;  %v7281_v15 = vpack.i.bf16 %v1505_v13, %v1503_v12  ;;  %v1441_v40 = vsel %vm1176_vm2, %v1438_v1, %v1440_v0  ;;  %v1508_v18 = vrot.slane %v8712_v11, 2  ;;  %v8759_v54 = vld [vmem:[%s8244_s30 + $0x2] ss:$0 sm:$0xff]  ;;  %v8775_v1 = vld [vmem:[%s8244_s30] ss:$0 sm:$0xff] }
 0x114   : > { %v1442_v6 = vrot.slane %v8709_v3, 1  ;;  %v7276_v7 = vpack.i.bf16 %v1441_v40, %v1439_v16  ;;  %v1444_v27 = vrot.slane %v8712_v11, 1  ;;  %v1407_v30 = vsel %vm1029_vm0, %v1404_v56, %v1406_v22 }
 0x115   : > { %7267 = vrot.lane.b32.xlu1 %v7266_v60, %s11161_s6  ;;  %v1507_v26 = vsel %vm1259_vm3, %v1504_v63, %v1506_v33  ;;  %v1509_v50 = vsel %vm1259_vm3, %v1506_v33, %v1508_v18  ;;  %v8732_v29 = vsel %vm1058_vm1, %v1407_v30, 0.0  ;;  %v1510_v24 = vrot.slane %v8715_v39, 2 }
 0x116   : > { %v1443_v46 = vsel %vm1176_vm2, %v1440_v0, %v1442_v6  ;;  %v1445_v47 = vsel %vm1176_vm2, %v1442_v6, %v1444_v27  ;;  %v1512_v34 = vrot.slane %v8732_v29, 2  ;;  %v1446_v36 = vrot.slane %v8715_v39, 1 }
 0x117   : > { %7282 = vrot.lane.b32.xlu0 %v7281_v15, %s11163_s24  ;;  %v7291_v38 = vpack.i.bf16 %v1509_v50, %v1507_v26  ;;  %v1448_v22 = vrot.slane %v8732_v29, 1  ;;  %v7286_v56 = vpack.i.bf16 %v1445_v47, %v1443_v46  ;;  %v1511_v31 = vsel %vm1259_vm3, %v1508_v18, %v1510_v24 }
 0x118   : > { %v1513_v41 = vsel %vm1259_vm3, %v1510_v24, %v1512_v34  ;;  %v1447_v42 = vsel %vm1176_vm2, %v1444_v27, %v1446_v36  ;;  %v8763_v55 = vmul.f32 %v8756_v48, %v8715_v39  ;;  %v8767_v59 = vmul.f32 %v8759_v54, %v8715_v39 }
 0x119   : > { %7277 = vrot.lane.b32.xlu1 %v7276_v7, %s11161_s6  ;;  %v1449_v43 = vsel %vm1176_vm2, %v1446_v36, %v1448_v22  ;;  %v7301_v8 = vpack.i.bf16 %v1513_v41, %v1511_v31  ;;  %v2763_v10 = vmul.f32 %v8756_v48, %v8732_v29  ;;  %v2845_v63 = vmul.f32 %v8759_v54, %v8732_v29 }
 0x11a   : > { %v7296_v45 = vpack.i.bf16 %v1449_v43, %v1447_v42  ;;  %v11128_v60 = vrot.slane %v8763_v55, 1  ;;  %v11127_v0 = vrot.slane %v8767_v59, 2  ;;  %v2732_v12 = vmul.f32 %v8775_v1, %v8732_v29 }
 0x11b   : > { %7292 = vrot.lane.b32.xlu0 %v7291_v38, %s11163_s24  ;;  %v2800_v13 = vrot.slane %v2763_v10, 1  ;;  %v2882_v16 = vrot.slane %v2845_v63, 2  ;;  %v2731_v33 = vmul.f32 %v8775_v1, %v8715_v39  ;;  %vm1567_vm9 = vcmask 261120  }
 0x11c   : > { %vm11160_vm10 = vcmask 392192  }
 0x11d   : > { %7287 = vrot.lane.b32.xlu1 %v7286_v56, %s11161_s6  ;;  %v2827_v15 = vadd.f32 %v2800_v13, %v2732_v12  ;;  %v2801_v40 = vsel %vm1176_vm2, %v11128_v60, %v2800_v13  ;;  %v2883_v18 = vsel %vm1259_vm3, %v11127_v0, %v2882_v16 }
 0x11e   : > { %v2826_v6 = vadd.f32 %v2801_v40, %v2731_v33 }
 0x11f   : > { %7302 = vrot.lane.b32.xlu0 %v7301_v8, %s11163_s24  ;;  %v2909_v7 = vadd.f32 %v2882_v16, %v2827_v15 }
 0x120   : > { %v8788_v26 = vadd.f32 %v2883_v18, %v2826_v6 }
 0x121   : > { %7297 = vrot.lane.b32.xlu1 %v7296_v45, %s11161_s6  ;;  %v8791_v27 = vsel %vm2946_vm14, %v2909_v7, 0.0  ;;  %vm2026_vm14 = vcmask 1043456  }
 0x122   : > { %11215 = vst [vmem:[#allocation37_spill] sm:$0xff] %v8788_v26  ;;  %11216 = vst [vmem:[#allocation38_spill] sm:$0xff] %v8791_v27 }
 0x123   : > { %1538 = vrot.lane.b32.xlu0 %v1512_v34, %s11163_s24 }
 0x125   : > { %1474 = vrot.lane.b32.xlu1 %v1448_v22, %s11161_s6 }
 0x17b   : > { %v7253_v30 = vpop.permute.xlu0 %7252 }
 0x17c   : > { %v7255_v46 = vunpack.i.h.bf16 %v7253_v30  ;;  %v7254_v24 = vunpack.i.l.bf16 %v7253_v30 }
 0x17f   : > { %v7248_v50 = vpop.permute.xlu1 %7247 }
 0x180   : > { %v7250_v47 = vunpack.i.h.bf16 %v7248_v50  ;;  %v7249_v34 = vunpack.i.l.bf16 %v7248_v50 }
 0x181   : > { %v7263_v22 = vpop.permute.xlu0 %7262 }
 0x182   : > { %v1555_v36 = vsel %vm1553_vm4, %v8598_v37, %v7250_v47  ;;  %v1554_v38 = vsel %vm1553_vm4, %v8601_v51, %v7249_v34  ;;  %v7265_v45 = vunpack.i.h.bf16 %v7263_v22  ;;  %v7264_v10 = vunpack.i.l.bf16 %v7263_v22 }
 0x183   : > { %v1569_v56 = vsel %vm1567_vm9, %v1555_v36, %v7255_v46  ;;  %v1568_v31 = vsel %vm1567_vm9, %v1554_v38, %v7254_v24  ;;  %v7258_v41 = vpop.permute.xlu1 %7257 }
 0x184   : > { %v7260_v42 = vunpack.i.h.bf16 %v7258_v41  ;;  %v7259_v43 = vunpack.i.l.bf16 %v7258_v41  ;;  %v8799_v8 = vpack.c.bf16 %v1569_v56, %v1568_v31 }
 0x185   : > { %v7273_v18 = vpop.permute.xlu0 %7272 }
 0x186   : > { %v1557_v63 = vsel %vm1553_vm4, %v8634_v20, %v7260_v42  ;;  %v1556_v12 = vsel %vm1553_vm4, %v8576_v28, %v7259_v43  ;;  %7016 = vmatmul.mubr.msk.bf16.vlgmr.msra.gmra.mrb[0].mxu0 %vm11160_vm10, %v8799_v8  ;;  %v7275_v7 = vunpack.i.h.bf16 %v7273_v18  ;;  %v7274_v30 = vunpack.i.l.bf16 %v7273_v18 }
 0x187   : > { %v7268_v13 = vpop.permute.xlu1 %7267  ;;  %7019 = vmatprep.mubr.msk.bf16.mxu0 %vm11158_vm8, %v11125_v44  ;;  %v1571_v16 = vsel %vm1567_vm9, %v1557_v63, %v7265_v45  ;;  %v1570_v33 = vsel %vm1567_vm9, %v1556_v12, %v7264_v10 }
 0x188   : > { %v7270_v15 = vunpack.i.h.bf16 %v7268_v13  ;;  %v7269_v40 = vunpack.i.l.bf16 %v7268_v13  ;;  %v8811_v6 = vpack.c.bf16 %v1571_v16, %v1570_v33 }
 0x189   : > { %v7283_v22 = vpop.permute.xlu0 %7282 }
 0x18a   : > { %v1559_v50 = vsel %vm1553_vm4, %v8665_v9, %v7270_v15  ;;  %v1558_v46 = vsel %vm1553_vm4, %v8641_v19, %v7269_v40  ;;  %v7285_v31 = vunpack.i.h.bf16 %v7283_v22  ;;  %v7284_v41 = vunpack.i.l.bf16 %v7283_v22 }
 0x18b   : > { %v7278_v24 = vpop.permute.xlu1 %7277  ;;  %v1573_v47 = vsel %vm1567_vm9, %v1559_v50, %v7275_v7  ;;  %v1572_v34 = vsel %vm1567_vm9, %v1558_v46, %v7274_v30 }
 0x18c   : > { %v7280_v36 = vunpack.i.h.bf16 %v7278_v24  ;;  %v7279_v38 = vunpack.i.l.bf16 %v7278_v24  ;;  %v8823_v56 = vpack.c.bf16 %v1573_v47, %v1572_v34 }
 0x18d   : > { %v7293_v16 = vpop.permute.xlu0 %7292 }
 0x18e   : > { %7020 = vmatmul.mubr.msk.bf16.gmra.mrb[4].mxu0 %vm11160_vm10, %v8811_v6  ;;  %v1561_v42 = vsel %vm1553_vm4, %v8689_v53, %v7280_v36  ;;  %v1560_v43 = vsel %vm1553_vm4, %v8672_v32, %v7279_v38  ;;  %v7295_v15 = vunpack.i.h.bf16 %v7293_v16  ;;  %v7294_v40 = vunpack.i.l.bf16 %v7293_v16  ;;  %v7829_v16 = vld [vmem:[%s8216_s29] sm:$0xff]  }
 0x18f   : > { %7023 = vmatprep.mubr.msk.bf16.mxu0 %vm11158_vm8, %v11125_v44  ;;  %v7288_v45 = vpop.permute.xlu1 %7287  ;;  %v1575_v10 = vsel %vm1567_vm9, %v1561_v42, %v7285_v31  ;;  %v1574_v63 = vsel %vm1567_vm9, %v1560_v43, %v7284_v41  ;;  %7044 = vmatpush3.bf16.msra.mxu1 %v7829_v16  ;;  %v7830_v16 = vld [vmem:[%s8216_s29 + $0x8] ss:$0 sps:$4 sm:$0xff]  }
 0x190   : > { %v7290_v12 = vunpack.i.h.bf16 %v7288_v45  ;;  %v7289_v13 = vunpack.i.l.bf16 %v7288_v45  ;;  %v8835_v33 = vpack.c.bf16 %v1575_v10, %v1574_v63  ;;  %7045 = vmatprep.subr.bf16.mxu1 %v11125_v44 }
 0x191   : > { %v7303_v34 = vpop.permute.xlu0 %7302 }
 0x192   : > { %v1563_v18 = vsel %vm1553_vm4, %v8709_v3, %v7290_v12  ;;  %v1562_v7 = vsel %vm1553_vm4, %v8699_v49, %v7289_v13  ;;  %v7305_v38 = vunpack.i.h.bf16 %v7303_v34  ;;  %v7304_v22 = vunpack.i.l.bf16 %v7303_v34 }
 0x193   : > { %v7298_v30 = vpop.permute.xlu1 %7297  ;;  %v1577_v50 = vsel %vm1567_vm9, %v1563_v18, %v7295_v15  ;;  %v1576_v46 = vsel %vm1567_vm9, %v1562_v7, %v7294_v40  ;;  %v8874_v15 = vld [vmem:[%s8211_s25] ss:$0 sm:$0xff] }
 0x194   : > { %v7300_v24 = vunpack.i.h.bf16 %v7298_v30  ;;  %v7299_v47 = vunpack.i.l.bf16 %v7298_v30  ;;  %v8847_v36 = vpack.c.bf16 %v1577_v50, %v1576_v46 }
 0x195   : > { %v1539_v63 = vpop.permute.xlu0 %1538 }
 0x196   : > { %7024 = vmatmul.mubr.msk.bf16.gmra.mrb[8].mxu0 %vm11160_vm10, %v8823_v56  ;;  %11217 = vst [vmem:[#allocation39_spill] sm:$0xff] %v8847_v36  ;;  %v1565_v31 = vsel %vm1553_vm4, %v8715_v39, %v7300_v24  ;;  %v1564_v41 = vsel %vm1553_vm4, %v8712_v11, %v7299_v47 }
 0x197   : > { %7027 = vmatprep.mubr.msk.bf16.mxu0 %vm11158_vm8, %v11125_v44  ;;  %v1579_v42 = vsel %vm1567_vm9, %v1565_v31, %v7305_v38  ;;  %v1578_v43 = vsel %vm1567_vm9, %v1564_v41, %v7304_v22  ;;  %v1475_v45 = vpop.permute.xlu1 %1474 }
 0x198   : > { %v8859_v10 = vpack.c.bf16 %v1579_v42, %v1578_v43  ;;  %v1566_v39 = vsel %vm1553_vm4, %v8732_v29, %v1475_v45 }
 0x199   : > { %v1580_v12 = vsel %vm1567_vm9, %v1566_v39, %v1539_v63 }
 0x19a   : > { %11218 = vst [vmem:[#allocation40_spill] sm:$0xff] %v8859_v10  ;;  %v8868_v13 = vpack.c.bf16 %v1580_v12, %v1580_v12 }
 0x19c   : > { %11219 = vst [vmem:[#allocation41_spill] sm:$0xff] %v8868_v13 }
 0x19e   : > { %7028 = vmatmul.mubr.msk.bf16.gmra.mrb[12].mxu0 %vm11160_vm10, %v8835_v33 }
 0x19f   : > { %7031 = vmatprep.mubr.msk.bf16.mxu0 %vm11158_vm8, %v11125_v44 }
 0x1a6   : > { %7032 = vmatmul.mubr.msk.bf16.gmra.mrb[16].mxu0 %vm11160_vm10, %v8847_v36 }
 0x1a7   : > { %7035 = vmatprep.mubr.msk.bf16.mxu0 %vm11158_vm8, %v11125_v44 }
 0x1ae   : > { %7036 = vmatmul.mubr.msk.bf16.gmra.mrb[20].mxu0 %vm11160_vm10, %v8859_v10 }
 0x1af   : > { %7039 = vmatprep.mubr.msk.bf16.mxu0 %vm11158_vm8, %v11125_v44 }
 0x1b6   : > { %7040 = vmatmul.mubr.msk.bf16.gmra.mrb[24].mxu0 %vm11160_vm10, %v8868_v13  ;;  %v9064_v13 = vmul.f32 %v8756_v48, %v8712_v11 }
 0x259   : > { %v1675_v29 = vpop.f32.mrb[0].mxu0 }
 0x25a   : > { %v1676_v40 = vadd.f32 %v8874_v15, %v1675_v29  ;;  %v7017_v18 = vpop.f32.mrb[1].mxu0 }
 0x25b   : > { %v1678_v7 = vpop.f32.mrb[2].mxu0 }
 0x25c   : > { %vm1729_vm11 = vcmp.ge.f32.partialorder %v1676_v40, 0.0  ;;  %v1742_v30 = vmul.f32 0.01, %v1676_v40  ;;  %v1679_v50 = vadd.f32 %v8874_v15, %v1678_v7  ;;  %v7018_v46 = vpop.f32.mrb[3].mxu0 }
 0x25e   : > { %v1755_v24 = vsel %vm1729_vm11, %v1676_v40, %v1742_v30  ;;  %vm1730_vm12 = vcmp.ge.f32.partialorder %v1679_v50, 0.0  ;;  %v1743_v47 = vmul.f32 0.01, %v1679_v50 }
 0x25f   : > { %v1781_v38 = vrot.slane %v1755_v24, 7 }
 0x260   : > { %v1756_v34 = vsel %vm1730_vm12, %v1679_v50, %v1743_v47  ;;  %v2028_v50 = vsel %vm2026_vm14, %v7830_v16, 0 }
 0x261   : > { %v1782_v22 = vrot.slane %v1756_v34, 7  ;;  %v1683_v31 = vpop.f32.mrb[4].mxu0  ;;  %v8886_v29 = vsel %vm1029_vm0, 0.0, %v1781_v38  ;;  %7046 = vmatpush3.bf16.msra.mxu1 %v2028_v50 }
 0x262   : > { %v1684_v41 = vadd.f32 %v8874_v15, %v1683_v31  ;;  %v7021_v42 = vpop.f32.mrb[5].mxu0  ;;  %v1887_v31 = vrot.slane %v8886_v29, 2  ;;  %7075 = vmatprep.subr.bf16.mxu1 %v11125_v44  ;;  %v1823_v16 = vrot.slane %v8886_v29, 1 }
 0x263   : > { %v8881_v43 = vsel %vm1029_vm0, %v1781_v38, %v1782_v22  ;;  %v1686_v45 = vpop.f32.mrb[6].mxu0 }
 0x264   : > { %vm1731_vm13 = vcmp.ge.f32.partialorder %v1684_v41, 0.0  ;;  %v1744_v39 = vmul.f32 0.01, %v1684_v41  ;;  %v1687_v63 = vadd.f32 %v8874_v15, %v1686_v45  ;;  %v7022_v12 = vpop.f32.mrb[7].mxu0  ;;  %v1888_v30 = vrot.slane %v8881_v43, 2 }
 0x265   : > { %v1824_v38 = vrot.slane %v8881_v43, 1 }
 0x266   : > { %v1757_v40 = vsel %vm1731_vm13, %v1684_v41, %v1744_v39  ;;  %vm1732_vm15 = vcmp.ge.f32.partialorder %v1687_v63, 0.0  ;;  %v1745_v18 = vmul.f32 0.01, %v1687_v63  ;;  %v1889_v12 = vsel %vm1259_vm3, %v1887_v31, %v1888_v30 }
 0x267   : > { %v1784_v7 = vrot.slane %v1757_v40, 7 }
 0x268   : > { %v1758_v46 = vsel %vm1732_vm15, %v1687_v63, %v1745_v18 }
 0x269   : > { %v8891_v24 = vsel %vm1029_vm0, %v1782_v22, %v1784_v7  ;;  %v1786_v47 = vrot.slane %v1758_v46, 7  ;;  %v1691_v34 = vpop.f32.mrb[8].mxu0 }
 0x26a   : > { %v1692_v41 = vadd.f32 %v8874_v15, %v1691_v34  ;;  %v7025_v42 = vpop.f32.mrb[9].mxu0  ;;  %v1890_v45 = vrot.slane %v8891_v24, 2  ;;  %v1826_v39 = vrot.slane %v8891_v24, 1 }
 0x26b   : > { %v8900_v63 = vsel %vm1029_vm0, %v1784_v7, %v1786_v47  ;;  %v1694_v22 = vpop.f32.mrb[10].mxu0  ;;  %v1825_v42 = vsel %vm1176_vm2, %v1823_v16, %v1824_v38 }
 0x26c   : > { %vm1733_vm5 = vcmp.ge.f32.partialorder %v1692_v41, 0.0  ;;  %v1746_v40 = vmul.f32 0.01, %v1692_v41  ;;  %v1695_v18 = vadd.f32 %v8874_v15, %v1694_v22  ;;  %v7026_v50 = vpop.f32.mrb[11].mxu0  ;;  %v1891_v46 = vsel %vm1259_vm3, %v1888_v30, %v1890_v45 }
 0x26d   : > { %v7311_v34 = vpack.i.bf16 %v1891_v46, %v1889_v12  ;;  %v1827_v2 = vsel %vm1176_vm2, %v1824_v38, %v1826_v39  ;;  %v1892_v31 = vrot.slane %v8900_v63, 2  ;;  %v1828_v38 = vrot.slane %v8900_v63, 1 }
 0x26e   : > { %v1759_v44 = vsel %vm1733_vm5, %v1692_v41, %v1746_v40  ;;  %vm1734_vm6 = vcmp.ge.f32.partialorder %v1695_v18, 0.0  ;;  %v1747_v7 = vmul.f32 0.01, %v1695_v18  ;;  %v7306_v0 = vpack.i.bf16 %v1827_v2, %v1825_v42 }
 0x26f   : > { %v1788_v60 = vrot.slane %v1759_v44, 7  ;;  %7312 = vrot.lane.b32.xlu0 %v7311_v34, %s11161_s6  ;;  %v1829_v42 = vsel %vm1176_vm2, %v1826_v39, %v1828_v38 }
 0x270   : > { %v1760_v61 = vsel %vm1734_vm6, %v1695_v18, %v1747_v7  ;;  %7307 = vrot.lane.b32.xlu1 %v7306_v0, %s8170_s26  ;;  %v1893_v0 = vsel %vm1259_vm3, %v1890_v45, %v1892_v31 }
 0x271   : > { %v8912_v30 = vsel %vm1029_vm0, %v1786_v47, %v1788_v60  ;;  %v1790_v22 = vrot.slane %v1760_v61, 7  ;;  %v1699_v12 = vpop.f32.mrb[12].mxu0 }
 0x272   : > { %v1700_v41 = vadd.f32 %v8874_v15, %v1699_v12  ;;  %v7029_v16 = vpop.f32.mrb[13].mxu0  ;;  %v1894_v2 = vrot.slane %v8912_v30, 2  ;;  %v1830_v44 = vrot.slane %v8912_v30, 1 }
 0x273   : > { %v8919_v40 = vsel %vm1029_vm0, %v1788_v60, %v1790_v22  ;;  %v1702_v18 = vpop.f32.mrb[14].mxu0 }
 0x274   : > { %vm1735_vm7 = vcmp.ge.f32.partialorder %v1700_v41, 0.0  ;;  %v1748_v47 = vmul.f32 0.01, %v1700_v41  ;;  %v1703_v61 = vadd.f32 %v8874_v15, %v1702_v18  ;;  %v7030_v50 = vpop.f32.mrb[15].mxu0  ;;  %v1895_v46 = vsel %vm1259_vm3, %v1892_v31, %v1894_v2 }
 0x275   : > { %v7321_v34 = vpack.i.bf16 %v1895_v46, %v1893_v0  ;;  %v1831_v7 = vsel %vm1176_vm2, %v1828_v38, %v1830_v44  ;;  %v1896_v45 = vrot.slane %v8919_v40, 2  ;;  %v1832_v39 = vrot.slane %v8919_v40, 1 }
 0x276   : > { %v1761_v12 = vsel %vm1735_vm7, %v1700_v41, %v1748_v47  ;;  %vm1736_vm11 = vcmp.ge.f32.partialorder %v1703_v61, 0.0  ;;  %v1749_v16 = vmul.f32 0.01, %v1703_v61  ;;  %v7316_v60 = vpack.i.bf16 %v1831_v7, %v1829_v42 }
 0x277   : > { %v1792_v62 = vrot.slane %v1761_v12, 7  ;;  %7322 = vrot.lane.b32.xlu0 %v7321_v34, %s11161_s6  ;;  %v1897_v34 = vsel %vm1259_vm3, %v1894_v2, %v1896_v45  ;;  %vm1951_vm7 = vcmask 64512  }
 0x278   : > { %v1762_v35 = vsel %vm1736_vm11, %v1703_v61, %v1749_v16  ;;  %7317 = vrot.lane.b32.xlu1 %v7316_v60, %s8170_s26  ;;  %v1833_v16 = vsel %vm1176_vm2, %v1830_v44, %v1832_v39  ;;  %vm2004_vm11 = vcmask 195584  }
 0x279   : > { %v8930_v18 = vsel %vm1029_vm0, %v1790_v22, %v1792_v62  ;;  %v1794_v31 = vrot.slane %v1762_v35, 7  ;;  %v1707_v0 = vpop.f32.mrb[16].mxu0 }
 0x27a   : > { %v1708_v38 = vadd.f32 %v8874_v15, %v1707_v0  ;;  %v7033_v41 = vpop.f32.mrb[17].mxu0  ;;  %v1898_v47 = vrot.slane %v8930_v18, 2  ;;  %v1834_v50 = vrot.slane %v8930_v18, 1 }
 0x27b   : > { %v8937_v46 = vsel %vm1029_vm0, %v1792_v62, %v1794_v31  ;;  %v1710_v61 = vpop.f32.mrb[18].mxu0 }
 0x27c   : > { %vm1737_vm12 = vcmp.ge.f32.partialorder %v1708_v38, 0.0  ;;  %v1750_v22 = vmul.f32 0.01, %v1708_v38  ;;  %v1711_v35 = vadd.f32 %v8874_v15, %v1710_v61  ;;  %v7034_v42 = vpop.f32.mrb[19].mxu0  ;;  %v1899_v7 = vsel %vm1259_vm3, %v1896_v45, %v1898_v47 }
 0x27d   : > { %v7331_v12 = vpack.i.bf16 %v1899_v7, %v1897_v34  ;;  %v1835_v60 = vsel %vm1176_vm2, %v1832_v39, %v1834_v50  ;;  %v1900_v2 = vrot.slane %v8937_v46, 2  ;;  %v1836_v44 = vrot.slane %v8937_v46, 1 }
 0x27e   : > { %v1763_v0 = vsel %vm1737_vm12, %v1708_v38, %v1750_v22  ;;  %vm1738_vm13 = vcmp.ge.f32.partialorder %v1711_v35, 0.0  ;;  %v1751_v41 = vmul.f32 0.01, %v1711_v35  ;;  %v7326_v62 = vpack.i.bf16 %v1835_v60, %v1833_v16 }
 0x27f   : > { %v1796_v14 = vrot.slane %v1763_v0, 7  ;;  %7332 = vrot.lane.b32.xlu0 %v7331_v12, %s11161_s6  ;;  %v1901_v12 = vsel %vm1259_vm3, %v1898_v47, %v1900_v2 }
 0x280   : > { %v1764_v4 = vsel %vm1738_vm13, %v1711_v35, %v1751_v41  ;;  %7327 = vrot.lane.b32.xlu1 %v7326_v62, %s8170_s26  ;;  %v1837_v41 = vsel %vm1176_vm2, %v1834_v50, %v1836_v44 }
 0x281   : > { %v8948_v61 = vsel %vm1029_vm0, %v1794_v31, %v1796_v14  ;;  %v1798_v45 = vrot.slane %v1764_v4, 7  ;;  %v1715_v34 = vpop.f32.mrb[20].mxu0 }
 0x282   : > { %v1716_v39 = vadd.f32 %v8874_v15, %v1715_v34  ;;  %v7037_v38 = vpop.f32.mrb[21].mxu0  ;;  %v1902_v22 = vrot.slane %v8948_v61, 2  ;;  %v1838_v42 = vrot.slane %v8948_v61, 1 }
 0x283   : > { %v8955_v7 = vsel %vm1029_vm0, %v1796_v14, %v1798_v45  ;;  %v1718_v35 = vpop.f32.mrb[22].mxu0 }
 0x284   : > { %vm1739_vm15 = vcmp.ge.f32.partialorder %v1716_v39, 0.0  ;;  %v1752_v31 = vmul.f32 0.01, %v1716_v39  ;;  %v1719_v4 = vadd.f32 %v8874_v15, %v1718_v35  ;;  %v7038_v16 = vpop.f32.mrb[23].mxu0  ;;  %v1903_v60 = vsel %vm1259_vm3, %v1900_v2, %v1902_v22 }
 0x285   : > { %v7341_v0 = vpack.i.bf16 %v1903_v60, %v1901_v12  ;;  %v1839_v62 = vsel %vm1176_vm2, %v1836_v44, %v1838_v42  ;;  %v1904_v47 = vrot.slane %v8955_v7, 2  ;;  %v1840_v23 = vrot.slane %v8955_v7, 1 }
 0x286   : > { %v1765_v34 = vsel %vm1739_vm15, %v1716_v39, %v1752_v31  ;;  %vm1740_vm5 = vcmp.ge.f32.partialorder %v1719_v4, 0.0  ;;  %v1753_v38 = vmul.f32 0.01, %v1719_v4  ;;  %v7336_v14 = vpack.i.bf16 %v1839_v62, %v1837_v41 }
 0x287   : > { %v1800_v5 = vrot.slane %v1765_v34, 7  ;;  %7342 = vrot.lane.b32.xlu0 %v7341_v0, %s11161_s6  ;;  %v1841_v41 = vsel %vm1176_vm2, %v1838_v42, %v1840_v23 }
 0x288   : > { %v1766_v35 = vsel %vm1740_vm5, %v1719_v4, %v1753_v38  ;;  %7337 = vrot.lane.b32.xlu1 %v7336_v14, %s8170_s26  ;;  %v1905_v4 = vsel %vm1259_vm3, %v1902_v22, %v1904_v47 }
 0x289   : > { %v8967_v2 = vsel %vm1029_vm0, %v1798_v45, %v1800_v5  ;;  %v1802_v50 = vrot.slane %v1766_v35, 7  ;;  %v1723_v12 = vpop.f32.mrb[24].mxu0 }
 0x28a   : > { %v1724_v44 = vadd.f32 %v8874_v15, %v1723_v12  ;;  %v7041_v39 = vpop.f32.mrb[25].mxu0  ;;  %v1906_v31 = vrot.slane %v8967_v2, 2  ;;  %v1842_v16 = vrot.slane %v8967_v2, 1 }
 0x28b   : > { %v8973_v60 = vsel %vm1029_vm0, %v1800_v5, %v1802_v50  ;;  %v1726_v0 = vpop.f32.mrb[26].mxu0 }
 0x28c   : > { %vm1741_vm6 = vcmp.ge.f32.partialorder %v1724_v44, 0.0  ;;  %v1754_v45 = vmul.f32 0.01, %v1724_v44  ;;  %v7042_v62 = vpop.f32.mrb[27].mxu0  ;;  %v1907_v34 = vsel %vm1259_vm3, %v1904_v47, %v1906_v31  ;;  %v1843_v15 = vsel %vm1176_vm2, %v1840_v23, %v1842_v16 }
 0x28d   : > { %v7351_v38 = vpack.i.bf16 %v1907_v34, %v1905_v4  ;;  %v7346_v14 = vpack.i.bf16 %v1843_v15, %v1841_v41  ;;  %v1908_v22 = vrot.slane %v8973_v60, 2  ;;  %v1844_v42 = vrot.slane %v8973_v60, 1 }
 0x28e   : > { %v1767_v35 = vsel %vm1741_vm6, %v1724_v44, %v1754_v45  ;;  %v2751_v62 = vmul.f32 %v8756_v48, %v8601_v51 }
 0x28f   : > { %v1804_v12 = vrot.slane %v1767_v35, 7  ;;  %7352 = vrot.lane.b32.xlu0 %v7351_v38, %s11161_s6  ;;  %7347 = vrot.lane.b32.xlu1 %v7346_v14, %s8170_s26  ;;  %v1909_v44 = vsel %vm1259_vm3, %v1906_v31, %v1908_v22  ;;  %v1845_v4 = vsel %vm1176_vm2, %v1842_v16, %v1844_v42  ;;  %v2752_v31 = vmul.f32 %v8756_v48, %v8598_v37 }
 0x290   : > { %v9003_v16 = vmul.f32 %v8756_v48, %v8634_v20  ;;  %v2777_v34 = vrot.slane %v2751_v62, 1  ;;  %v2756_v38 = vmul.f32 %v8756_v48, %v8665_v9  ;;  %v2833_v14 = vmul.f32 %v8759_v54, %v8601_v51 }
 0x291   : > { %v1805_v5 = vsel %vm1029_vm0, %v1802_v50, %v1804_v12  ;;  %v2778_v15 = vrot.slane %v2752_v31, 1  ;;  %v9011_v35 = vmul.f32 %v8759_v54, %v8598_v37  ;;  %v2753_v12 = vmul.f32 %v8756_v48, %v8576_v28 }
 0x292   : > { %v8985_v39 = vsel %vm1058_vm1, %v1805_v5, 0.0  ;;  %v2755_v5 = vmul.f32 %v8756_v48, %v8641_v19  ;;  %v2838_v31 = vmul.f32 %v8759_v54, %v8665_v9 }
 0x293   : > { %v1910_v47 = vrot.slane %v8985_v39, 2  ;;  %v1846_v23 = vrot.slane %v8985_v39, 1 }
 0x294   : > { %v2784_v62 = vrot.slane %v2755_v5, 1  ;;  %v9047_v5 = vmul.f32 %v8756_v48, %v8699_v49  ;;  %v2868_v21 = vrot.slane %v2838_v31, 2 }
 0x295   : > { %v1911_v0 = vsel %vm1259_vm3, %v1908_v22, %v1910_v47  ;;  %v1847_v41 = vsel %vm1176_vm2, %v1844_v42, %v1846_v23  ;;  %v2782_v22 = vrot.slane %v9003_v16, 1  ;;  %v9020_v42 = vmul.f32 %v8756_v48, %v8672_v32 }
 0x296   : > { %v7361_v50 = vpack.i.bf16 %v1911_v0, %v1909_v44  ;;  %v7356_v45 = vpack.i.bf16 %v1847_v41, %v1845_v4  ;;  %v2720_v44 = vmul.f32 %v8775_v1, %v8601_v51  ;;  %v2859_v0 = vrot.slane %v2833_v14, 2 }
 0x297   : > { %v2860_v4 = vrot.slane %v9011_v35, 2  ;;  %v2780_v41 = vrot.slane %v2753_v12, 1  ;;  %v9037_v51 = vmul.f32 %v8759_v54, %v8641_v19  ;;  %v2722_v14 = vmul.f32 %v8775_v1, %v8576_v28 }
 0x298   : > { %7362 = vrot.lane.b32.xlu0 %v7361_v50, %s11161_s6  ;;  %7357 = vrot.lane.b32.xlu1 %v7356_v45, %s8170_s26  ;;  %v2835_v50 = vmul.f32 %v8759_v54, %v8576_v28  ;;  %v9030_v45 = vmul.f32 %v8759_v54, %v8634_v20  ;;  %v2758_v12 = vmul.f32 %v8756_v48, %v8689_v53 }
 0x299   : > { %v2866_v58 = vrot.slane %v9037_v51, 2  ;;  %v2781_v31 = vsel %vm1176_vm2, %v2778_v15, %v2780_v41  ;;  %v2721_v51 = vmul.f32 %v8775_v1, %v8598_v37  ;;  %v2727_v37 = vmul.f32 %v8775_v1, %v8689_v53 }
 0x29a   : > { %v2862_v28 = vrot.slane %v2835_v50, 2  ;;  %v2864_v17 = vrot.slane %v9030_v45, 2  ;;  %v2790_v27 = vrot.slane %v2758_v12, 1  ;;  %v2725_v50 = vmul.f32 %v8775_v1, %v8665_v9 }
 0x29b   : > { %v2785_v10 = vsel %vm1176_vm2, %v2782_v22, %v2784_v62 }
 0x29c   : > { %1936 = vrot.lane.b32.xlu0 %v1910_v47, %s11161_s6  ;;  %1872 = vrot.lane.b32.xlu1 %v1846_v23, %s8170_s26  ;;  %v2779_v47 = vsel %vm1176_vm2, %v2777_v34, %v2778_v15  ;;  %v2786_v23 = vrot.slane %v2756_v38, 1  ;;  %v2783_v34 = vsel %vm1176_vm2, %v2780_v41, %v2782_v22  ;;  %v2788_v38 = vrot.slane %v9020_v42, 1  ;;  %s9419_s26 = scalar_lea.vmem %s11229_s4, %s8389_s11  ;;  %s9480_s6 = scalar_lea.vmem %s11230_s9, %s8389_s11 }
 0x29d   : > { %v2815_v16 = vadd.f32 %v2779_v47, %v2720_v44  ;;  %v2861_v47 = vsel %vm1259_vm3, %v2859_v0, %v2860_v4  ;;  %v2724_v44 = vmul.f32 %v8775_v1, %v8641_v19  ;;  %v9054_v42 = vmul.f32 %v8759_v54, %v8672_v32  ;;  %s11247_s4 = smov 80  }
 0x29e   : > { %v2787_v35 = vsel %vm1176_vm2, %v2784_v62, %v2786_v23  ;;  %v2817_v25 = vadd.f32 %v2783_v34, %v2722_v14  ;;  %v2789_v26 = vsel %vm1176_vm2, %v2786_v23, %v2788_v38  ;;  %v2792_v0 = vrot.slane %v9047_v5, 1 }
 0x29f   : > { %v2897_v52 = vadd.f32 %v2861_v47, %v2815_v16  ;;  %v2819_v57 = vadd.f32 %v2787_v35, %v2724_v44  ;;  %v2760_v19 = vmul.f32 %v8756_v48, %v8709_v3  ;;  %v2870_v45 = vrot.slane %v9054_v42, 2 }
 0x2a0   : > { %v2840_v23 = vmul.f32 %v8759_v54, %v8689_v53  ;;  %v2865_v16 = vsel %vm1259_vm3, %v2862_v28, %v2864_v17  ;;  %v2869_v34 = vsel %vm1259_vm3, %v2866_v58, %v2868_v21  ;;  %v2841_v48 = vmul.f32 %v8759_v54, %v8699_v49 }
 0x2a1   : > { %v2910_v14 = vsel %vm1553_vm4, %v2897_v52, 0.0  ;;  %v2899_v9 = vadd.f32 %v2865_v16, %v2817_v25  ;;  %v2901_v35 = vadd.f32 %v2869_v34, %v2819_v57  ;;  %v2820_v12 = vadd.f32 %v2789_v26, %v2725_v50 }
 0x2a2   : > { %v2816_v15 = vadd.f32 %v2781_v31, %v2721_v51  ;;  %v2793_v41 = vsel %vm1176_vm2, %v2790_v27, %v2792_v0  ;;  %v2794_v5 = vrot.slane %v2760_v19, 1  ;;  %v2796_v47 = vrot.slane %v9064_v13, 1 }
 0x2a3   : > { %v2871_v44 = vsel %vm1259_vm3, %v2868_v21, %v2870_v45  ;;  %v2872_v42 = vrot.slane %v2840_v23, 2  ;;  %v2874_v36 = vrot.slane %v2841_v48, 2  ;;  %v2723_v52 = vmul.f32 %v8775_v1, %v8634_v20 }
 0x2a4   : > { %v2842_v57 = vmul.f32 %v8759_v54, %v8709_v3  ;;  %v2843_v25 = vmul.f32 %v8759_v54, %v8712_v11  ;;  %v2916_v26 = vsel %vm1553_vm4, %v2899_v9, 0.0  ;;  %v2902_v13 = vadd.f32 %v2871_v44, %v2820_v12 }
 0x2a5   : > { %v2863_v21 = vsel %vm1259_vm3, %v2860_v4, %v2862_v28  ;;  %v2822_v19 = vadd.f32 %v2793_v41, %v2727_v37  ;;  %v2922_v53 = vsel %vm1553_vm4, %v2901_v35, 0.0  ;;  %v2818_v62 = vadd.f32 %v2785_v10, %v2723_v52 }
 0x2a6   : > { %v2898_v22 = vadd.f32 %v2863_v21, %v2816_v15  ;;  %v2797_v50 = vsel %vm1176_vm2, %v2794_v5, %v2796_v47  ;;  %v2729_v20 = vmul.f32 %v8775_v1, %v8709_v3  ;;  %v2791_v31 = vsel %vm1176_vm2, %v2788_v38, %v2790_v27 }
 0x2a7   : > { %v2875_v54 = vsel %vm1259_vm3, %v2872_v42, %v2874_v36  ;;  %v2876_v23 = vrot.slane %v2842_v57, 2  ;;  %v2878_v16 = vrot.slane %v2843_v25, 2  ;;  %v2726_v4 = vmul.f32 %v8775_v1, %v8672_v32 }
 0x2a8   : > { %v2925_v28 = vsel %vm1553_vm4, %v2902_v13, 0.0  ;;  %v2904_v34 = vadd.f32 %v2875_v54, %v2822_v19  ;;  %v2867_v10 = vsel %vm1259_vm3, %v2864_v17, %v2866_v58  ;;  %v2824_v51 = vadd.f32 %v2797_v50, %v2729_v20 }
 0x2a9   : > { %v2913_v48 = vsel %vm1553_vm4, %v2898_v22, 0.0  ;;  %v2821_v3 = vadd.f32 %v2791_v31, %v2726_v4  ;;  %v2795_v27 = vsel %vm1176_vm2, %v2792_v0, %v2794_v5  ;;  %v2879_v38 = vsel %vm1259_vm3, %v2876_v23, %v2878_v16 }
 0x2aa   : > { %v2728_v9 = vmul.f32 %v8775_v1, %v8699_v49  ;;  %v2931_v32 = vsel %vm1553_vm4, %v2904_v34, 0.0  ;;  %v2906_v35 = vadd.f32 %v2879_v38, %v2824_v51  ;;  %v2873_v12 = vsel %vm1259_vm3, %v2870_v45, %v2872_v42 }
 0x2ab   : > { %v2903_v17 = vadd.f32 %v2873_v12, %v2821_v3  ;;  %v11220_v41 = vrot.slane %v8763_v55, 1  ;;  %v2730_v5 = vmul.f32 %v8775_v1, %v8712_v11  ;;  %v2877_v44 = vsel %vm1259_vm3, %v2874_v36, %v2876_v23 }
 0x2ac   : > { %v2823_v15 = vadd.f32 %v2795_v27, %v2728_v9  ;;  %v2937_v49 = vsel %vm1553_vm4, %v2906_v35, 0.0  ;;  %v11221_v52 = vrot.slane %v8767_v59, 2 }
 0x2ad   : > { %v2799_v0 = vsel %vm1176_vm2, %v2796_v47, %v11220_v41  ;;  %v2928_v45 = vsel %vm1553_vm4, %v2903_v17, 0.0 }
 0x2ae   : > { %v2905_v37 = vadd.f32 %v2877_v44, %v2823_v15  ;;  %v2825_v42 = vadd.f32 %v2799_v0, %v2730_v5  ;;  %v2881_v57 = vsel %vm1259_vm3, %v2878_v16, %v11221_v52  ;;  %v11222_v16 = vmov 0.0  }
 0x2b0   : > { %v2934_v55 = vsel %vm1553_vm4, %v2905_v37, 0.0  ;;  %v2907_v47 = vadd.f32 %v2881_v57, %v2825_v42 }
 0x2b2   : > { %v2940_v11 = vsel %vm1553_vm4, %v2907_v47, 0.0 }
 0x2bb   : > { %2911 = vadd.xlane.f32.xlu0 %v2910_v14  ;;  %v2900_v14 = vadd.f32 %v2867_v10, %v2818_v62  ;;  %v7831_v62 = vld [vmem:[%s11198_s8] sm:$0xff]  }
 0x2bd   : > { %v2919_v58 = vsel %vm1553_vm4, %v2900_v14, 0.0 }
 0x2bf   : > { %2917 = vadd.xlane.f32.xlu0 %v2916_v26 }
 0x2c0   : > { %2923 = vadd.xlane.f32.xlu1 %v2922_v53 }
 0x2c3   : > { %2926 = vadd.xlane.f32.xlu0 %v2925_v28 }
 0x2c4   : > { %2914 = vadd.xlane.f32.xlu1 %v2913_v48  ;;  %v7833_v48 = vld [vmem:[%s11198_s8 + $0x10] sm:$0xff]  }
 0x2c7   : > { %2932 = vadd.xlane.f32.xlu0 %v2931_v32 }
 0x2c8   : > { %2920 = vadd.xlane.f32.xlu1 %v2919_v58 }
 0x2cb   : > { %2938 = vadd.xlane.f32.xlu0 %v2937_v49 }
 0x2cc   : > { %2929 = vadd.xlane.f32.xlu1 %v2928_v45 }
 0x2d0   : > { %2935 = vadd.xlane.f32.xlu1 %v2934_v55 }
 0x2d4   : > { %2941 = vadd.xlane.f32.xlu1 %v2940_v11 }
 0x2e1   : > { %v7313_v1 = vpop.permute.xlu0 %7312 }
 0x2e2   : > { %v7315_v36 = vunpack.i.h.bf16 %v7313_v1  ;;  %v7314_v25 = vunpack.i.l.bf16 %v7313_v1  ;;  %v7308_v26 = vpop.permute.xlu1 %7307 }
 0x2e3   : > { %v7310_v13 = vunpack.i.h.bf16 %v7308_v26  ;;  %v7309_v21 = vunpack.i.l.bf16 %v7308_v26 }
 0x2e5   : > { %v1953_v59 = vsel %vm1951_vm7, %v8881_v43, %v7310_v13  ;;  %v1952_v19 = vsel %vm1951_vm7, %v8886_v29, %v7309_v21  ;;  %v7832_v43 = vld [vmem:[%s11198_s8 + $0x8] sm:$0xff]   ;;  %s11250_s8 = smov 96  }
 0x2e6   : > { %v1965_v53 = vsel %vm1553_vm4, %v1952_v19, %v7314_v25  ;;  %v1966_v22 = vsel %vm1553_vm4, %v1953_v59, %v7315_v36 }
 0x2e7   : > { %v1978_v50 = vpack.c.bf16 %v1966_v22, %v1965_v53 }
 0x2e9   : > { %7048 = vmatmul.mubr.msk.bf16.vlgmr.msra.gmra.mrb[0].mxu1 %vm2004_vm11, %v1978_v50  ;;  %v7323_v20 = vpop.permute.xlu0 %7322 }
 0x2ea   : > { %7076 = vmatpush3.bf16.msra.mxu1 %v7831_v62  ;;  %v7325_v31 = vunpack.i.h.bf16 %v7323_v20  ;;  %v7324_v54 = vunpack.i.l.bf16 %v7323_v20  ;;  %v7318_v23 = vpop.permute.xlu1 %7317  ;;  %7051 = vmatprep.mubr.msk.bf16.mxu1 %vm11158_vm8, %v11222_v16 }
 0x2eb   : > { %v7320_v29 = vunpack.i.h.bf16 %v7318_v23  ;;  %v7319_v4 = vunpack.i.l.bf16 %v7318_v23  ;;  %7077 = vmatprep.subr.bf16.mxu1 %v11222_v16 }
 0x2ed   : > { %v1955_v28 = vsel %vm1951_vm7, %v8900_v63, %v7320_v29  ;;  %v1954_v34 = vsel %vm1951_vm7, %v8891_v24, %v7319_v4 }
 0x2ee   : > { %v1967_v10 = vsel %vm1553_vm4, %v1954_v34, %v7324_v54  ;;  %v1968_v51 = vsel %vm1553_vm4, %v1955_v28, %v7325_v31  ;;  %7078 = vmatpush3.bf16.msra.mxu1 %v7832_v43 }
 0x2ef   : > { %v1979_v14 = vpack.c.bf16 %v1968_v51, %v1967_v10  ;;  %7079 = vmatprep.subr.bf16.mxu1 %v11222_v16 }
 0x2f1   : > { %7052 = vmatmul.mubr.msk.bf16.gmra.mrb[4].mxu1 %vm2004_vm11, %v1979_v14  ;;  %v7333_v3 = vpop.permute.xlu0 %7332 }
 0x2f2   : > { %v7335_v27 = vunpack.i.h.bf16 %v7333_v3  ;;  %v7334_v38 = vunpack.i.l.bf16 %v7333_v3  ;;  %v7328_v9 = vpop.permute.xlu1 %7327  ;;  %7055 = vmatprep.mubr.msk.bf16.mxu1 %vm11158_vm8, %v11222_v16  ;;  %7080 = vmatpush3.bf16.msra.mxu1 %v7833_v48 }
 0x2f3   : > { %v7330_v24 = vunpack.i.h.bf16 %v7328_v9  ;;  %v7329_v63 = vunpack.i.l.bf16 %v7328_v9 }
 0x2f5   : > { %v1957_v32 = vsel %vm1951_vm7, %v8919_v40, %v7330_v24  ;;  %v1956_v35 = vsel %vm1951_vm7, %v8912_v30, %v7329_v63 }
 0x2f6   : > { %v1969_v12 = vsel %vm1553_vm4, %v1956_v35, %v7334_v38  ;;  %v1970_v58 = vsel %vm1553_vm4, %v1957_v32, %v7335_v27 }
 0x2f7   : > { %v1980_v17 = vpack.c.bf16 %v1970_v58, %v1969_v12 }
 0x2f9   : > { %7056 = vmatmul.mubr.msk.bf16.gmra.mrb[8].mxu1 %vm2004_vm11, %v1980_v17  ;;  %v7343_v15 = vpop.permute.xlu0 %7342 }
 0x2fa   : > { %v7345_v41 = vunpack.i.h.bf16 %v7343_v15  ;;  %v7344_v0 = vunpack.i.l.bf16 %v7343_v15  ;;  %v7338_v5 = vpop.permute.xlu1 %7337  ;;  %7059 = vmatprep.mubr.msk.bf16.mxu1 %vm11158_vm8, %v11222_v16 }
 0x2fb   : > { %v7340_v49 = vunpack.i.h.bf16 %v7338_v5  ;;  %v7339_v44 = vunpack.i.l.bf16 %v7338_v5 }
 0x2fd   : > { %v1959_v40 = vsel %vm1951_vm7, %v8937_v46, %v7340_v49  ;;  %v1958_v30 = vsel %vm1951_vm7, %v8930_v18, %v7339_v44 }
 0x2fe   : > { %v1971_v45 = vsel %vm1553_vm4, %v1958_v30, %v7344_v0  ;;  %v1972_v37 = vsel %vm1553_vm4, %v1959_v40, %v7345_v41  ;;  %v9216_v0 = vld [vmem:[%s11226_s3] ss:$0 sm:$0xff]  ;;  %s11167_s3 = smov 48  }
 0x2ff   : > { %v1981_v42 = vpack.c.bf16 %v1972_v37, %v1971_v45 }
 0x301   : > { %7060 = vmatmul.mubr.msk.bf16.gmra.mrb[12].mxu1 %vm2004_vm11, %v1981_v42  ;;  %v7353_v52 = vpop.permute.xlu0 %7352  ;;  %v7348_v57 = vpop.permute.xlu1 %7347 }
 0x302   : > { %v7355_v55 = vunpack.i.h.bf16 %v7353_v52  ;;  %v7354_v47 = vunpack.i.l.bf16 %v7353_v52  ;;  %v7350_v11 = vunpack.i.h.bf16 %v7348_v57  ;;  %v7349_v1 = vunpack.i.l.bf16 %v7348_v57  ;;  %7063 = vmatprep.mubr.msk.bf16.mxu1 %vm11158_vm8, %v11222_v16 }
 0x304   : > { %v1961_v46 = vsel %vm1951_vm7, %v8955_v7, %v7350_v11  ;;  %v1960_v18 = vsel %vm1951_vm7, %v8948_v61, %v7349_v1  ;;  %v9227_v1 = vld [vmem:[%s8231_s14] ss:$0 sm:$0xff] }
 0x305   : > { %v1973_v36 = vsel %vm1553_vm4, %v1960_v18, %v7354_v47  ;;  %v1974_v25 = vsel %vm1553_vm4, %v1961_v46, %v7355_v55 }
 0x306   : > { %v1982_v26 = vpack.c.bf16 %v1974_v25, %v1973_v36 }
 0x309   : > { %7064 = vmatmul.mubr.msk.bf16.gmra.mrb[16].mxu1 %vm2004_vm11, %v1982_v26 }
 0x30a   : > { %v7363_v13 = vpop.permute.xlu0 %7362  ;;  %v7358_v21 = vpop.permute.xlu1 %7357  ;;  %7067 = vmatprep.mubr.msk.bf16.mxu1 %vm11158_vm8, %v11222_v16 }
 0x30b   : > { %v7365_v59 = vunpack.i.h.bf16 %v7363_v13  ;;  %v7364_v19 = vunpack.i.l.bf16 %v7363_v13  ;;  %v7360_v53 = vunpack.i.h.bf16 %v7358_v21  ;;  %v7359_v22 = vunpack.i.l.bf16 %v7358_v21 }
 0x30d   : > { %v1963_v7 = vsel %vm1951_vm7, %v8973_v60, %v7360_v53  ;;  %v1962_v61 = vsel %vm1951_vm7, %v8967_v2, %v7359_v22 }
 0x30e   : > { %v1873_v62 = vpop.permute.xlu1 %1872  ;;  %v1975_v50 = vsel %vm1553_vm4, %v1962_v61, %v7364_v19  ;;  %v1976_v20 = vsel %vm1553_vm4, %v1963_v7, %v7365_v59  ;;  %v1937_v54 = vpop.permute.xlu0 %1936 }
 0x30f   : > { %v1983_v31 = vpack.c.bf16 %v1976_v20, %v1975_v50  ;;  %v1964_v23 = vsel %vm1951_vm7, %v8985_v39, %v1873_v62 }
 0x310   : > { %v1977_v60 = vsel %vm1553_vm4, %v1964_v23, %v1937_v54 }
 0x311   : > { %7068 = vmatmul.mubr.msk.bf16.gmra.mrb[20].mxu1 %vm2004_vm11, %v1983_v31  ;;  %v1984_v43 = vpack.c.bf16 %v1977_v60, %v1977_v60 }
 0x312   : > { %7071 = vmatprep.mubr.msk.bf16.mxu1 %vm11158_vm8, %v11222_v16 }
 0x319   : > { %7072 = vmatmul.mubr.msk.bf16.gmra.mrb[24].mxu1 %vm2004_vm11, %v1984_v43 }
 0x31a   : > { %7081 = vmatprep.mubr.msk.bf16.mxu1 %vm11158_vm8, %v11222_v16 }
 0x321   : > { %7082 = vmatmul.mubr.msk.bf16.vlgmr.msra.gmra.mrb[28].mxu1 %vm11160_vm10, %v8799_v8  ;;  %v11223_v8 = vld [vmem:[#allocation39_spill] sm:$0xff] }
 0x322   : > { %7085 = vmatprep.mubr.msk.bf16.mxu1 %vm11158_vm8, %v11222_v16 }
 0x329   : > { %7086 = vmatmul.mubr.msk.bf16.gmra.mrb[32].mxu1 %vm11160_vm10, %v8811_v6  ;;  %v11224_v6 = vld [vmem:[#allocation40_spill] sm:$0xff] }
 0x32a   : > { %7089 = vmatprep.mubr.msk.bf16.mxu1 %vm11158_vm8, %v11222_v16 }
 0x331   : > { %7090 = vmatmul.mubr.msk.bf16.gmra.mrb[36].mxu1 %vm11160_vm10, %v8823_v56  ;;  %v11225_v56 = vld [vmem:[#allocation41_spill] sm:$0xff] }
 0x332   : > { %7093 = vmatprep.mubr.msk.bf16.mxu1 %vm11158_vm8, %v11222_v16 }
 0x339   : > { %7094 = vmatmul.mubr.msk.bf16.gmra.mrb[40].mxu1 %vm11160_vm10, %v8835_v33 }
 0x33a   : > { %7097 = vmatprep.mubr.msk.bf16.mxu1 %vm11158_vm8, %v11222_v16 }
 0x341   : > { %7098 = vmatmul.mubr.msk.bf16.gmra.mrb[44].mxu1 %vm11160_vm10, %v11223_v8 }
 0x342   : > { %7101 = vmatprep.mubr.msk.bf16.mxu1 %vm11158_vm8, %v11222_v16 }
 0x349   : > { %7102 = vmatmul.mubr.msk.bf16.gmra.mrb[48].mxu1 %vm11160_vm10, %v11224_v6 }
 0x34a   : > { %7105 = vmatprep.mubr.msk.bf16.mxu1 %vm11158_vm8, %v11222_v16 }
 0x351   : > { %7106 = vmatmul.mubr.msk.bf16.gmra.mrb[52].mxu1 %vm11160_vm10, %v11225_v56 }
 0x3bc   : > { %v2064_v2 = vpop.f32.mrb[0].mxu1 }
 0x3bd   : > { %v7049_v33 = vpop.f32.mrb[1].mxu1  ;;  %v2065_v5 = vadd.f32 %v9216_v0, %v2064_v2 }
 0x3be   : > { %v2067_v39 = vpop.f32.mrb[2].mxu1 }
 0x3bf   : > { %v7050_v29 = vpop.f32.mrb[3].mxu1  ;;  %v2068_v49 = vadd.f32 %v9216_v0, %v2067_v39  ;;  %v2131_v37 = vmul.f32 0.01, %v2065_v5  ;;  %vm2118_vm12 = vcmp.ge.f32.partialorder %v2065_v5, 0.0 }
 0x3c1   : > { %v2132_v52 = vmul.f32 0.01, %v2068_v49  ;;  %vm2119_vm13 = vcmp.ge.f32.partialorder %v2068_v49, 0.0  ;;  %v2144_v46 = vsel %vm2118_vm12, %v2065_v5, %v2131_v37 }
 0x3c3   : > { %v2145_v18 = vsel %vm2119_vm13, %v2068_v49, %v2132_v52 }
 0x3c4   : > { %v2072_v4 = vpop.f32.mrb[4].mxu1 }
 0x3c5   : > { %v7053_v28 = vpop.f32.mrb[5].mxu1  ;;  %v2073_v44 = vadd.f32 %v9216_v0, %v2072_v4 }
 0x3c6   : > { %v2075_v34 = vpop.f32.mrb[6].mxu1 }
 0x3c7   : > { %v7054_v10 = vpop.f32.mrb[7].mxu1  ;;  %v2133_v57 = vmul.f32 0.01, %v2073_v44  ;;  %vm2120_vm15 = vcmp.ge.f32.partialorder %v2073_v44, 0.0  ;;  %v2076_v55 = vadd.f32 %v9216_v0, %v2075_v34 }
 0x3c9   : > { %v9229_v36 = vsel %vm2120_vm15, %v2073_v44, %v2133_v57  ;;  %vm2121_vm5 = vcmp.ge.f32.partialorder %v2076_v55, 0.0  ;;  %v2134_v21 = vmul.f32 0.01, %v2076_v55  ;;  %v9267_v44 = vld [vmem:[%s8236_s19] ss:$0 sm:$0xff] }
 0x3cb   : > { %v2147_v33 = vsel %vm2121_vm5, %v2076_v55, %v2134_v21 }
 0x3cc   : > { %v2080_v51 = vpop.f32.mrb[8].mxu1 }
 0x3cd   : > { %v7057_v48 = vpop.f32.mrb[9].mxu1  ;;  %v2081_v47 = vadd.f32 %v9216_v0, %v2080_v51 }
 0x3ce   : > { %v2083_v14 = vpop.f32.mrb[10].mxu1 }
 0x3cf   : > { %v7058_v3 = vpop.f32.mrb[11].mxu1  ;;  %v2084_v11 = vadd.f32 %v9216_v0, %v2083_v14  ;;  %vm2122_vm6 = vcmp.ge.f32.partialorder %v2081_v47, 0.0  ;;  %v2135_v22 = vmul.f32 0.01, %v2081_v47 }
 0x3d1   : > { %vm2123_vm7 = vcmp.ge.f32.partialorder %v2084_v11, 0.0  ;;  %v2136_v62 = vmul.f32 0.01, %v2084_v11  ;;  %v9240_v39 = vsel %vm2122_vm6, %v2081_v47, %v2135_v22 }
 0x3d3   : > { %v9243_v4 = vsel %vm2123_vm7, %v2084_v11, %v2136_v62 }
 0x3d4   : > { %v2088_v27 = vpop.f32.mrb[12].mxu1 }
 0x3d5   : > { %v7061_v38 = vpop.f32.mrb[13].mxu1  ;;  %v2089_v25 = vadd.f32 %v9216_v0, %v2088_v27 }
 0x3d6   : > { %v2091_v9 = vpop.f32.mrb[14].mxu1 }
 0x3d7   : > { %v7062_v24 = vpop.f32.mrb[15].mxu1  ;;  %v2092_v26 = vadd.f32 %v9216_v0, %v2091_v9  ;;  %vm2124_vm12 = vcmp.ge.f32.partialorder %v2089_v25, 0.0  ;;  %v2137_v54 = vmul.f32 0.01, %v2089_v25  ;;  %v9256_v9 = vld [vmem:[%s8236_s19 + $0x1] ss:$0 sm:$0xff] }
 0x3d8   : > { %v9259_v24 = vld [vmem:[%s8236_s19 + $0x2] ss:$0 sm:$0xff] }
 0x3d9   : > { %vm2125_vm13 = vcmp.ge.f32.partialorder %v2092_v26, 0.0  ;;  %v2138_v23 = vmul.f32 0.01, %v2092_v26  ;;  %v9247_v48 = vsel %vm2124_vm12, %v2089_v25, %v2137_v54 }
 0x3db   : > { %v9250_v14 = vsel %vm2125_vm13, %v2092_v26, %v2138_v23 }
 0x3dc   : > { %v2096_v63 = vpop.f32.mrb[16].mxu1 }
 0x3dd   : > { %v7065_v32 = vpop.f32.mrb[17].mxu1  ;;  %v2097_v59 = vadd.f32 %v9216_v0, %v2096_v63 }
 0x3de   : > { %v2099_v35 = vpop.f32.mrb[18].mxu1 }
 0x3df   : > { %v7066_v12 = vpop.f32.mrb[19].mxu1  ;;  %v2100_v7 = vadd.f32 %v9216_v0, %v2099_v35  ;;  %v2139_v60 = vmul.f32 0.01, %v2097_v59  ;;  %vm2126_vm8 = vcmp.ge.f32.partialorder %v2097_v59, 0.0 }
 0x3e1   : > { %v2140_v6 = vmul.f32 0.01, %v2100_v7  ;;  %vm2127_vm10 = vcmp.ge.f32.partialorder %v2100_v7, 0.0  ;;  %v9252_v3 = vsel %vm2126_vm8, %v2097_v59, %v2139_v60  ;;  %vm2576_vm8 = vcmask 31744  }
 0x3e3   : > { %v9261_v63 = vsel %vm2127_vm10, %v2100_v7, %v2140_v6 }
 0x3e4   : > { %v2104_v58 = vpop.f32.mrb[20].mxu1 }
 0x3e5   : > { %v7069_v17 = vpop.f32.mrb[21].mxu1  ;;  %v2105_v56 = vadd.f32 %v9216_v0, %v2104_v58 }
 0x3e6   : > { %v2107_v15 = vpop.f32.mrb[22].mxu1 }
 0x3e7   : > { %v7070_v41 = vpop.f32.mrb[23].mxu1  ;;  %v2108_v28 = vadd.f32 %v9216_v0, %v2107_v15  ;;  %v2141_v32 = vmul.f32 0.01, %v2105_v56  ;;  %vm2128_vm5 = vcmp.ge.f32.partialorder %v2105_v56, 0.0 }
 0x3e9   : > { %v2142_v5 = vmul.f32 0.01, %v2108_v28  ;;  %v9272_v57 = vsel %vm2128_vm5, %v2105_v56, %v2141_v32  ;;  %vm2129_vm7 = vcmp.ge.f32.partialorder %v2108_v28, 0.0 }
 0x3ec   : > { %v9221_v40 = vpop.f32.mrb[24].mxu1 }
 0x3ed   : > { %v7073_v30 = vpop.f32.mrb[25].mxu1  ;;  %v9281_v22 = vadd.f32 %v9216_v0, %v9221_v40 }
 0x3ee   : > { %v2115_v45 = vpop.f32.mrb[26].mxu1 }
 0x3ef   : > { %v7074_v42 = vpop.f32.mrb[27].mxu1 }
 0x3f4   : > { %v2222_v13 = vpop.f32.mrb[28].mxu1 }
 0x3f5   : > { %v2223_v19 = vadd.f32 %v9227_v1, %v2222_v13  ;;  %v7083_v53 = vpop.f32.mrb[29].mxu1 }
 0x3f6   : > { %v2225_v61 = vpop.f32.mrb[30].mxu1  ;;  %v9277_v53 = vsel %vm2129_vm7, %v2108_v28, %v2142_v5 }
 0x3f7   : > { %vm2276_vm11 = vcmp.ge.f32.partialorder %v2223_v19, 0.0  ;;  %v2289_v50 = vmul.f32 0.01, %v2223_v19  ;;  %v2226_v20 = vadd.f32 %v9227_v1, %v2225_v61  ;;  %v7084_v31 = vpop.f32.mrb[31].mxu1 }
 0x3f9   : > { %v2302_v43 = vsel %vm2276_vm11, %v2223_v19, %v2289_v50  ;;  %vm2277_vm15 = vcmp.ge.f32.partialorder %v2226_v20, 0.0  ;;  %v2290_v8 = vmul.f32 0.01, %v2226_v20 }
 0x3fa   : > { %v2315_v2 = vadd.f32 %v2302_v43, %v2144_v46 }
 0x3fb   : > { %v2303_v29 = vsel %vm2277_vm15, %v2226_v20, %v2290_v8 }
 0x3fc   : > { %v2341_v34 = vrot.slane %v2315_v2, 7  ;;  %v2316_v10 = vadd.f32 %v2303_v29, %v2145_v18  ;;  %v2230_v51 = vpop.f32.mrb[32].mxu1 }
 0x3fd   : > { %v2231_v27 = vadd.f32 %v9227_v1, %v2230_v51  ;;  %v7087_v38 = vpop.f32.mrb[33].mxu1 }
 0x3fe   : > { %v2379_v35 = vsel %vm1029_vm0, 0.0, %v2341_v34  ;;  %v2342_v12 = vrot.slane %v2316_v10, 7  ;;  %v2233_v58 = vpop.f32.mrb[34].mxu1 }
 0x3ff   : > { %vm2278_vm6 = vcmp.ge.f32.partialorder %v2231_v27, 0.0  ;;  %v2291_v17 = vmul.f32 0.01, %v2231_v27  ;;  %v2234_v15 = vadd.f32 %v9227_v1, %v2233_v58  ;;  %v7088_v41 = vpop.f32.mrb[35].mxu1  ;;  %v2417_v30 = vmul.f32 %v9256_v9, %v2379_v35 }
 0x400   : > { %v2343_v49 = vsel %vm1029_vm0, %v2341_v34, %v2342_v12  ;;  %v2499_v45 = vmul.f32 %v9259_v24, %v2379_v35  ;;  %v2386_v46 = vmul.f32 %v9267_v44, %v2379_v35 }
 0x401   : > { %v2304_v37 = vsel %vm2278_vm6, %v2231_v27, %v2291_v17  ;;  %vm2279_vm10 = vcmp.ge.f32.partialorder %v2234_v15, 0.0  ;;  %v2292_v42 = vmul.f32 0.01, %v2234_v15  ;;  %v2418_v52 = vmul.f32 %v9256_v9, %v2343_v49 }
 0x402   : > { %v2317_v55 = vadd.f32 %v2304_v37, %v9229_v36  ;;  %v2500_v47 = vmul.f32 %v9259_v24, %v2343_v49  ;;  %v2443_v18 = vrot.slane %v2417_v30, 1  ;;  %v2525_v59 = vrot.slane %v2499_v45, 2 }
 0x403   : > { %v2305_v11 = vsel %vm2279_vm10, %v2234_v15, %v2292_v42  ;;  %v2444_v25 = vrot.slane %v2418_v52, 1  ;;  %v2387_v8 = vmul.f32 %v9267_v44, %v2343_v49  ;;  %v9296_v27 = vmul.f32 0.01, %v9281_v22 }
 0x404   : > { %v2344_v26 = vrot.slane %v2317_v55, 7  ;;  %v2318_v13 = vadd.f32 %v2305_v11, %v2147_v33  ;;  %v2238_v21 = vpop.f32.mrb[36].mxu1  ;;  %v2526_v19 = vrot.slane %v2500_v47, 2  ;;  %vm2130_vm6 = vcmp.ge.f32.partialorder %v9281_v22, 0.0 }
 0x405   : > { %v2239_v36 = vadd.f32 %v9227_v1, %v2238_v21  ;;  %v7091_v7 = vpop.f32.mrb[37].mxu1  ;;  %v2445_v61 = vsel %vm1176_vm2, %v2443_v18, %v2444_v25 }
 0x406   : > { %v2346_v62 = vrot.slane %v2318_v13, 7  ;;  %v2241_v50 = vpop.f32.mrb[38].mxu1  ;;  %v2481_v20 = vadd.f32 %v2445_v61, %v2386_v46  ;;  %v2527_v31 = vsel %vm1259_vm3, %v2525_v59, %v2526_v19  ;;  %v2345_v54 = vsel %vm1029_vm0, %v2342_v12, %v2344_v26 }
 0x407   : > { %vm2280_vm11 = vcmp.ge.f32.partialorder %v2239_v36, 0.0  ;;  %v2293_v23 = vmul.f32 0.01, %v2239_v36  ;;  %v2242_v60 = vadd.f32 %v9227_v1, %v2241_v50  ;;  %v7092_v43 = vpop.f32.mrb[39].mxu1  ;;  %v2419_v0 = vmul.f32 %v9256_v9, %v2345_v54 }
 0x408   : > { %v2563_v40 = vadd.f32 %v2527_v31, %v2481_v20  ;;  %v2501_v6 = vmul.f32 %v9259_v24, %v2345_v54  ;;  %v2347_v56 = vsel %vm1029_vm0, %v2344_v26, %v2346_v62  ;;  %v2388_v49 = vmul.f32 %v9267_v44, %v2345_v54 }
 0x409   : > { %v2306_v2 = vsel %vm2280_vm11, %v2239_v36, %v2293_v23  ;;  %vm2281_vm12 = vcmp.ge.f32.partialorder %v2242_v60, 0.0  ;;  %v2294_v33 = vmul.f32 0.01, %v2242_v60  ;;  %v2446_v29 = vrot.slane %v2419_v0, 1 }
 0x40a   : > { %v2319_v28 = vadd.f32 %v2306_v2, %v9240_v39  ;;  %v2577_v34 = vsel %vm2576_vm8, %v2563_v40, 0.0  ;;  %v2528_v10 = vrot.slane %v2501_v6, 2  ;;  %v2420_v51 = vmul.f32 %v9256_v9, %v2347_v56 }
 0x40b   : > { %v2307_v38 = vsel %vm2281_vm12, %v2242_v60, %v2294_v33  ;;  %2578 = vadd.xlane.f32.xlu1 %v2577_v34  ;;  %v2447_v32 = vsel %vm1176_vm2, %v2444_v25, %v2446_v29  ;;  %v2502_v35 = vmul.f32 %v9259_v24, %v2347_v56  ;;  %v2389_v47 = vmul.f32 %v9267_v44, %v2347_v56 }
 0x40c   : > { %v2348_v12 = vrot.slane %v2319_v28, 7  ;;  %v2320_v58 = vadd.f32 %v2307_v38, %v9243_v4  ;;  %v2246_v17 = vpop.f32.mrb[40].mxu1  ;;  %v2482_v15 = vadd.f32 %v2447_v32, %v2387_v8  ;;  %v2529_v39 = vsel %vm1259_vm3, %v2526_v19, %v2528_v10 }
 0x40d   : > { %v2247_v41 = vadd.f32 %v9227_v1, %v2246_v17  ;;  %v7095_v5 = vpop.f32.mrb[41].mxu1  ;;  %v2448_v30 = vrot.slane %v2420_v51, 1  ;;  %v2530_v45 = vrot.slane %v2502_v35, 2 }
 0x40e   : > { %v2350_v37 = vrot.slane %v2320_v58, 7  ;;  %v2249_v42 = vpop.f32.mrb[42].mxu1  ;;  %v2564_v52 = vadd.f32 %v2529_v39, %v2482_v15  ;;  %v2349_v55 = vsel %vm1029_vm0, %v2346_v62, %v2348_v12 }
 0x40f   : > { %vm2282_vm13 = vcmp.ge.f32.partialorder %v2247_v41, 0.0  ;;  %v2295_v4 = vmul.f32 0.01, %v2247_v41  ;;  %v2250_v11 = vadd.f32 %v9227_v1, %v2249_v42  ;;  %v7096_v46 = vpop.f32.mrb[43].mxu1  ;;  %v2449_v18 = vsel %vm1176_vm2, %v2446_v29, %v2448_v30 }
 0x410   : > { %v2580_v25 = vsel %vm2576_vm8, %v2564_v52, 0.0  ;;  %v2483_v26 = vadd.f32 %v2449_v18, %v2388_v49  ;;  %v2531_v13 = vsel %vm1259_vm3, %v2528_v10, %v2530_v45  ;;  %v2421_v21 = vmul.f32 %v9256_v9, %v2349_v55 }
 0x411   : > { %v2308_v59 = vsel %vm2282_vm13, %v2247_v41, %v2295_v4  ;;  %vm2283_vm15 = vcmp.ge.f32.partialorder %v2250_v11, 0.0  ;;  %v2296_v19 = vmul.f32 0.01, %v2250_v11  ;;  %2581 = vadd.xlane.f32.xlu0 %v2580_v25  ;;  %v2503_v36 = vmul.f32 %v9259_v24, %v2349_v55 }
 0x412   : > { %v2321_v7 = vadd.f32 %v2308_v59, %v9247_v48  ;;  %v2565_v61 = vadd.f32 %v2531_v13, %v2483_v26  ;;  %v2450_v62 = vrot.slane %v2421_v21, 1  ;;  %v2351_v50 = vsel %vm1029_vm0, %v2348_v12, %v2350_v37 }
 0x413   : > { %v2309_v20 = vsel %vm2283_vm15, %v2250_v11, %v2296_v19  ;;  %v2532_v31 = vrot.slane %v2503_v36, 2  ;;  %v2390_v54 = vmul.f32 %v9267_v44, %v2349_v55  ;;  %v2422_v23 = vmul.f32 %v9256_v9, %v2351_v50 }
 0x414   : > { %v2352_v60 = vrot.slane %v2321_v7, 7  ;;  %v2322_v43 = vadd.f32 %v2309_v20, %v9250_v14  ;;  %v2583_v0 = vsel %vm2576_vm8, %v2565_v61, 0.0  ;;  %v2254_v40 = vpop.f32.mrb[44].mxu1  ;;  %v2451_v8 = vsel %vm1176_vm2, %v2448_v30, %v2450_v62 }
 0x415   : > { %2584 = vadd.xlane.f32.xlu1 %v2583_v0  ;;  %v2255_v48 = vadd.f32 %v9227_v1, %v2254_v40  ;;  %v7099_v6 = vpop.f32.mrb[45].mxu1  ;;  %v2484_v56 = vadd.f32 %v2451_v8, %v2389_v47  ;;  %v2533_v2 = vsel %vm1259_vm3, %v2530_v45, %v2532_v31  ;;  %v2452_v33 = vrot.slane %v2422_v23, 1 }
 0x416   : > { %v2354_v29 = vrot.slane %v2322_v43, 7  ;;  %v2257_v28 = vpop.f32.mrb[46].mxu1  ;;  %v2504_v34 = vmul.f32 %v9259_v24, %v2351_v50  ;;  %v2353_v10 = vsel %vm1029_vm0, %v2350_v37, %v2352_v60  ;;  %v2391_v14 = vmul.f32 %v9267_v44, %v2351_v50 }
 0x417   : > { %vm2284_vm5 = vcmp.ge.f32.partialorder %v2255_v48, 0.0  ;;  %v2297_v51 = vmul.f32 0.01, %v2255_v48  ;;  %v2258_v38 = vadd.f32 %v9227_v1, %v2257_v28  ;;  %v7100_v32 = vpop.f32.mrb[47].mxu1  ;;  %v2566_v35 = vadd.f32 %v2533_v2, %v2484_v56 }
 0x418   : > { %v2453_v12 = vsel %vm1176_vm2, %v2450_v62, %v2452_v33  ;;  %v2534_v58 = vrot.slane %v2504_v34, 2  ;;  %v2423_v17 = vmul.f32 %v9256_v9, %v2353_v10  ;;  %v2505_v15 = vmul.f32 %v9259_v24, %v2353_v10 }
 0x419   : > { %v2310_v39 = vsel %vm2284_vm5, %v2255_v48, %v2297_v51  ;;  %vm2285_vm10 = vcmp.ge.f32.partialorder %v2258_v38, 0.0  ;;  %v2298_v41 = vmul.f32 0.01, %v2258_v38  ;;  %v2586_v5 = vsel %vm2576_vm8, %v2566_v35, 0.0 }
 0x41a   : > { %v2323_v49 = vadd.f32 %v2310_v39, %v9252_v3  ;;  %2587 = vadd.xlane.f32.xlu0 %v2586_v5  ;;  %v2485_v30 = vadd.f32 %v2453_v12, %v2390_v54  ;;  %v2535_v45 = vsel %vm1259_vm3, %v2532_v31, %v2534_v58  ;;  %v2454_v37 = vrot.slane %v2423_v17, 1 }
 0x41b   : > { %v2311_v42 = vsel %vm2285_vm10, %v2258_v38, %v2298_v41  ;;  %v2536_v52 = vrot.slane %v2505_v15, 2  ;;  %v2355_v55 = vsel %vm1029_vm0, %v2352_v60, %v2354_v29  ;;  %v2392_v47 = vmul.f32 %v9267_v44, %v2353_v10 }
 0x41c   : > { %v2356_v4 = vrot.slane %v2323_v49, 7  ;;  %v2324_v11 = vadd.f32 %v2311_v42, %v9261_v63  ;;  %v2262_v46 = vpop.f32.mrb[48].mxu1  ;;  %v2567_v18 = vadd.f32 %v2535_v45, %v2485_v30  ;;  %v2455_v25 = vsel %vm1176_vm2, %v2452_v33, %v2454_v37 }
 0x41d   : > { %v2263_v3 = vadd.f32 %v9227_v1, %v2262_v46  ;;  %v7103_v26 = vpop.f32.mrb[49].mxu1  ;;  %v2486_v13 = vadd.f32 %v2455_v25, %v2391_v14  ;;  %v2537_v21 = vsel %vm1259_vm3, %v2534_v58, %v2536_v52  ;;  %v2424_v59 = vmul.f32 %v9256_v9, %v2355_v55 }
 0x41e   : > { %v2358_v19 = vrot.slane %v2324_v11, 7  ;;  %v2589_v36 = vsel %vm2576_vm8, %v2567_v18, 0.0  ;;  %v2265_v7 = vpop.f32.mrb[50].mxu1  ;;  %v2506_v61 = vmul.f32 %v9259_v24, %v2355_v55  ;;  %v2357_v63 = vsel %vm1029_vm0, %v2354_v29, %v2356_v4 }
 0x41f   : > { %vm2286_vm7 = vcmp.ge.f32.partialorder %v2263_v3, 0.0  ;;  %v2299_v62 = vmul.f32 0.01, %v2263_v3  ;;  %2590 = vadd.xlane.f32.xlu0 %v2589_v36  ;;  %v2266_v50 = vadd.f32 %v9227_v1, %v2265_v7  ;;  %v7104_v20 = vpop.f32.mrb[51].mxu1  ;;  %v2568_v31 = vadd.f32 %v2537_v21, %v2486_v13 }
 0x420   : > { %v2456_v54 = vrot.slane %v2424_v59, 1  ;;  %v2538_v23 = vrot.slane %v2506_v61, 2  ;;  %v2393_v60 = vmul.f32 %v9267_v44, %v2355_v55  ;;  %v2425_v43 = vmul.f32 %v9256_v9, %v2357_v63 }
 0x421   : > { %v2312_v0 = vsel %vm2286_vm7, %v2263_v3, %v2299_v62  ;;  %vm2287_vm11 = vcmp.ge.f32.partialorder %v2266_v50, 0.0  ;;  %v2300_v40 = vmul.f32 0.01, %v2266_v50  ;;  %v2592_v8 = vsel %vm2576_vm8, %v2568_v31, 0.0 }
 0x422   : > { %v2325_v48 = vadd.f32 %v2312_v0, %v9272_v57  ;;  %2593 = vadd.xlane.f32.xlu1 %v2592_v8  ;;  %v2457_v6 = vsel %vm1176_vm2, %v2454_v37, %v2456_v54  ;;  %v2539_v56 = vsel %vm1259_vm3, %v2536_v52, %v2538_v23  ;;  %v2458_v2 = vrot.slane %v2425_v43, 1 }
 0x423   : > { %v2313_v33 = vsel %vm2287_vm11, %v2266_v50, %v2300_v40  ;;  %v2487_v29 = vadd.f32 %v2457_v6, %v2392_v47  ;;  %v2507_v28 = vmul.f32 %v9259_v24, %v2357_v63  ;;  %v2359_v34 = vsel %vm1029_vm0, %v2356_v4, %v2358_v19 }
 0x424   : > { %v2156_v10 = vsel %vm2130_vm6, %v9281_v22, %v9296_v27  ;;  %v2360_v14 = vrot.slane %v2325_v48, 7  ;;  %v2326_v57 = vadd.f32 %v2313_v33, %v9277_v53  ;;  %v2270_v51 = vpop.f32.mrb[52].mxu1  ;;  %v2459_v38 = vsel %vm1176_vm2, %v2456_v54, %v2458_v2 }
 0x425   : > { %v2569_v32 = vadd.f32 %v2539_v56, %v2487_v29  ;;  %v2271_v35 = vadd.f32 %v9227_v1, %v2270_v51  ;;  %v7107_v12 = vpop.f32.mrb[53].mxu1  ;;  %v2488_v58 = vadd.f32 %v2459_v38, %v2393_v60  ;;  %v2540_v17 = vrot.slane %v2507_v28, 2 }
 0x426   : > { %v2362_v15 = vrot.slane %v2326_v57, 7  ;;  %v2273_v39 = vpop.f32.mrb[54].mxu1  ;;  %v2426_v41 = vmul.f32 %v9256_v9, %v2359_v34  ;;  %v2508_v5 = vmul.f32 %v9259_v24, %v2359_v34  ;;  %v2361_v22 = vsel %vm1029_vm0, %v2358_v19, %v2360_v14  ;;  %v11227_v12 = vld [vmem:[#allocation38_spill] sm:$0xff] }
 0x427   : > { %v2595_v27 = vsel %vm2576_vm8, %v2569_v32, 0.0  ;;  %vm2288_vm12 = vcmp.ge.f32.partialorder %v2271_v35, 0.0  ;;  %v2301_v53 = vmul.f32 0.01, %v2271_v35  ;;  %v7108_v49 = vpop.f32.mrb[55].mxu1  ;;  %v2541_v30 = vsel %vm1259_vm3, %v2538_v23, %v2540_v17  ;;  %v2912_v39 = vpop.xlane.xlu0 %2911 }
 0x428   : > { %2596 = vadd.xlane.f32.xlu0 %v2595_v27  ;;  %v2570_v1 = vadd.f32 %v2541_v30, %v2488_v58  ;;  %v2394_v45 = vmul.f32 %v9267_v44, %v2357_v63  ;;  %v2460_v37 = vrot.slane %v2426_v41, 1  ;;  %v2542_v42 = vrot.slane %v2508_v5, 2 }
 0x429   : > { %v2314_v52 = vsel %vm2288_vm12, %v2271_v35, %v2301_v53  ;;  %v2427_v55 = vmul.f32 %v9256_v9, %v2361_v22  ;;  %v2509_v47 = vmul.f32 %v9259_v24, %v2361_v22  ;;  %v2363_v4 = vsel %vm1029_vm0, %v2360_v14, %v2362_v15 }
 0x42a   : > { %v2327_v11 = vadd.f32 %v2314_v52, %v2156_v10  ;;  %v2598_v46 = vsel %vm2576_vm8, %v2570_v1, 0.0  ;;  %v2461_v18 = vsel %vm1176_vm2, %v2458_v2, %v2460_v37  ;;  %v2543_v25 = vsel %vm1259_vm3, %v2540_v17, %v2542_v42  ;;  %v2924_v17 = vpop.xlane.xlu1 %2923  ;;  %v9399_v1 = vld [vmem:[#allocation2] ss:$0 sm:$0xff] }
 0x42b   : > { %2599 = vadd.xlane.f32.xlu1 %v2598_v46  ;;  %v2489_v3 = vadd.f32 %v2461_v18, %v2394_v45  ;;  %v2462_v26 = vrot.slane %v2427_v55, 1  ;;  %v2544_v13 = vrot.slane %v2509_v47, 2  ;;  %v2395_v59 = vmul.f32 %v9267_v44, %v2359_v34  ;;  %v2918_v5 = vpop.xlane.xlu0 %2917 }
 0x42c   : > { %v2364_v21 = vrot.slane %v2327_v11, 7  ;;  %v2428_v19 = vmul.f32 %v9256_v9, %v2363_v4  ;;  %v2510_v36 = vmul.f32 %v9259_v24, %v2363_v4  ;;  %v2396_v23 = vmul.f32 %v9267_v44, %v2361_v22 }
 0x42d   : > { %v2571_v7 = vadd.f32 %v2543_v25, %v2489_v3  ;;  %v2463_v61 = vsel %vm1176_vm2, %v2460_v37, %v2462_v26  ;;  %v2545_v63 = vsel %vm1259_vm3, %v2542_v42, %v2544_v13  ;;  %v2397_v34 = vmul.f32 %v9267_v44, %v2363_v4  ;;  %v9401_v37 = vld [vmem:[#allocation3] ss:$0 sm:$0xff] }
 0x42e   : > { %v2490_v62 = vadd.f32 %v2463_v61, %v2395_v59  ;;  %v2464_v50 = vrot.slane %v2428_v19, 1  ;;  %v2546_v20 = vrot.slane %v2510_v36, 2  ;;  %v2365_v31 = vsel %vm1029_vm0, %v2362_v15, %v2364_v21  ;;  %v2915_v15 = vpop.xlane.xlu1 %2914 }
 0x42f   : > { %v2601_v54 = vsel %vm2576_vm8, %v2571_v7, 0.0  ;;  %v2380_v60 = vsel %vm1058_vm1, %v2365_v31, 0.0  ;;  %vm2613_vm13 = vcmask 27648   ;;  %v2927_v27 = vpop.xlane.xlu0 %2926  ;;  %v2957_v47 = vadd.f32 %v9401_v37, %v2912_v39 }
 0x430   : > { %2602 = vadd.xlane.f32.xlu0 %v2601_v54  ;;  %v2572_v43 = vadd.f32 %v2545_v63, %v2490_v62  ;;  %v2465_v0 = vsel %vm1176_vm2, %v2462_v26, %v2464_v50  ;;  %v2547_v40 = vsel %vm1259_vm3, %v2544_v13, %v2546_v20  ;;  %v2429_v48 = vmul.f32 %v9256_v9, %v2380_v60 }
 0x431   : > { %v2491_v8 = vadd.f32 %v2465_v0, %v2396_v23  ;;  %v2511_v6 = vmul.f32 %v9259_v24, %v2380_v60  ;;  %v2398_v33 = vmul.f32 %v9267_v44, %v2380_v60  ;;  %v11228_v44 = vld [vmem:[#allocation37_spill] sm:$0xff]  ;;  %v2970_v18 = vsub.f32 0.0, %v2957_v47 }
 0x432   : > { %v2604_v56 = vsel %vm2576_vm8, %v2572_v43, 0.0  ;;  %v2466_v29 = vrot.slane %v2429_v48, 1  ;;  %v2943_v58 = vsel %vm1553_vm4, %v11228_v44, 0.0  ;;  %v2921_v41 = vpop.xlane.xlu1 %2920  ;;  %v2959_v25 = vadd.f32 %v9401_v37, %v2918_v5 }
 0x433   : > { %v2573_v2 = vadd.f32 %v2547_v40, %v2491_v8  ;;  %v2548_v28 = vrot.slane %v2511_v6, 2  ;;  %v2933_v49 = vpop.xlane.xlu0 %2932  ;;  %v2983_v59 = vmul.f32 1.442695, %v2970_v18  ;;  %v2961_v19 = vadd.f32 %v9401_v37, %v2924_v17 }
 0x434   : > { %2605 = vadd.xlane.f32.xlu0 %v2604_v56  ;;  %v2493_v14 = vadd.f32 %v2466_v29, %v2398_v33  ;;  %v2467_v57 = vsel %vm1176_vm2, %v2464_v50, %v2466_v29  ;;  %v2972_v36 = vsub.f32 0.0, %v2959_v25  ;;  %v2962_v7 = vadd.f32 %v9401_v37, %v2927_v27 }
 0x435   : > { %v2607_v10 = vsel %vm2576_vm8, %v2573_v2, 0.0  ;;  %v2549_v51 = vsel %vm1259_vm3, %v2546_v20, %v2548_v28  ;;  %v2492_v9 = vadd.f32 %v2467_v57, %v2397_v34  ;;  %v2974_v50 = vsub.f32 0.0, %v2961_v19 }
 0x436   : > { %2608 = vadd.xlane.f32.xlu1 %v2607_v10  ;;  %v2575_v24 = vadd.f32 %v2548_v28, %v2493_v14  ;;  %v9393_v22 = vpop.xlane.xlu1 %2929  ;;  %v2987_v54 = vmul.f32 1.442695, %v2972_v36  ;;  %v2975_v23 = vsub.f32 0.0, %v2962_v7  ;;  %v2958_v60 = vadd.f32 %v9401_v37, %v2915_v15 }
 0x437   : > { %v2574_v38 = vadd.f32 %v2549_v51, %v2492_v9  ;;  %v2939_v52 = vpop.xlane.xlu0 %2938  ;;  %v2991_v40 = vmul.f32 1.442695, %v2974_v50  ;;  %v2964_v8 = vadd.f32 %v9401_v37, %v2933_v49  ;;  %v2960_v29 = vadd.f32 %v9401_v37, %v2921_v41 }
 0x438   : > { %v2614_v32 = vsel %vm2613_vm13, %v2575_v24, 0.0  ;;  %v2993_v56 = vmul.f32 1.442695, %v2975_v23  ;;  %v2971_v2 = vsub.f32 0.0, %v2958_v60  ;;  %v2966_v24 = vadd.f32 %v9401_v37, %v2939_v52 }
 0x439   : > { %v2610_v35 = vsel %vm2576_vm8, %v2574_v38, 0.0  ;;  %v2977_v14 = vsub.f32 0.0, %v2964_v8  ;;  %vm3087_vm8 = vcmask 7168   ;;  %v2963_v52 = vadd.f32 %v9401_v37, %v9393_v22 }
 0x43a   : > { %2615 = vadd.xlane.f32.xlu1 %v2614_v32  ;;  %2611 = vadd.xlane.f32.xlu0 %v2610_v35  ;;  %v9395_v53 = vpop.xlane.xlu1 %2935  ;;  %v2985_v9 = vmul.f32 1.442695, %v2971_v2  ;;  %v2973_v35 = vsub.f32 0.0, %v2960_v29  ;;  %v2979_v41 = vsub.f32 0.0, %v2966_v24  ;;  %vm3108_vm15 = vcmask 3072  }
 0x43b   : > { %v2965_v22 = vadd.f32 %v9401_v37, %v9395_v53  ;;  %vm3672_vm5 = vcmask 1041408   ;;  %vm3605_vm6 = vcmask 1042432   ;;  %vm11253_vm10 = vcmask 392192  }
 0x43c   : > { %v2989_v49 = vmul.f32 1.442695, %v2973_v35  ;;  %vm11254_vm7 = vmmov %vm11253_vm10  ;;  %vm3844_vm11 = vcmask 523264   ;;  %vm3858_vm12 = vcmask 654336   ;;  %vm3872_vm13 = vcmask 785408  }
 0x43e   : > { %2948 = vadd.xlane.f32.xlu1 %v11227_v12  ;;  %2944 = vadd.xlane.f32.xlu0 %v2943_v58  ;;  %v9397_v30 = vpop.xlane.xlu1 %2941  ;;  %v2997_v58 = vmul.f32 1.442695, %v2977_v14 }
 0x498   : > { %v2579_v45 = vpop.xlane.xlu1 %2578 }
 0x499   : > { %v2624_v42 = vadd.f32 %v9399_v1, %v2579_v45 }
 0x49b   : > { %v2637_v55 = vsub.f32 0.0, %v2624_v42 }
 0x49d   : > { %v2650_v4 = vmul.f32 1.442695, %v2637_v55 }
 0x49e   : > { %v2582_v11 = vpop.xlane.xlu0 %2581 }
 0x49f   : > { %7939 = vpow2.f32 %v2650_v4  ;;  %v2625_v46 = vadd.f32 %v9399_v1, %v2582_v11  ;;  %v3001_v11 = vmul.f32 1.442695, %v2979_v41 }
 0x4a1   : > { %v2638_v3 = vsub.f32 0.0, %v2625_v46 }
 0x4a2   : > { %v2585_v26 = vpop.xlane.xlu1 %2584 }
 0x4a3   : > { %v2652_v13 = vmul.f32 1.442695, %v2638_v3  ;;  %v2626_v21 = vadd.f32 %v9399_v1, %v2585_v26 }
 0x4a5   : > { %7941 = vpow2.f32 %v2652_v13  ;;  %v2639_v61 = vsub.f32 0.0, %v2626_v21  ;;  %v2976_v21 = vsub.f32 0.0, %v2963_v52 }
 0x4a6   : > { %7943 = vpow2.f32 %v2983_v59  ;;  %v2967_v59 = vadd.f32 %v9401_v37, %v9397_v30 }
 0x4a7   : > { %v2654_v63 = vmul.f32 1.442695, %v2639_v61  ;;  %v2588_v62 = vpop.xlane.xlu0 %2587 }
 0x4a8   : > { %v2627_v20 = vadd.f32 %v9399_v1, %v2588_v62  ;;  %v2978_v62 = vsub.f32 0.0, %v2965_v22 }
 0x4a9   : > { %v7940_v31 = vpop.eup %7939  ;;  %7945 = vpow2.f32 %v2654_v63 }
 0x4aa   : > { %v2676_v43 = vadd.f32 1.0, %v7940_v31  ;;  %v2640_v0 = vsub.f32 0.0, %v2627_v20  ;;  %v2995_v31 = vmul.f32 1.442695, %v2976_v21  ;;  %v2999_v8 = vmul.f32 1.442695, %v2978_v62 }
 0x4ac   : > { %7947 = vrcp.f32 %v2676_v43  ;;  %v2656_v48 = vmul.f32 1.442695, %v2640_v0  ;;  %v2591_v6 = vpop.xlane.xlu0 %2590 }
 0x4ad   : > { %7949 = vpow2.f32 %v2987_v54  ;;  %v2628_v33 = vadd.f32 %v9399_v1, %v2591_v6  ;;  %v2980_v54 = vsub.f32 0.0, %v2967_v59 }
 0x4ae   : > { %7951 = vpow2.f32 %v2656_v48 }
 0x4af   : > { %v7942_v28 = vpop.eup %7941  ;;  %v2641_v34 = vsub.f32 0.0, %v2628_v33  ;;  %v2594_v10 = vpop.xlane.xlu1 %2593  ;;  %7953 = vpow2.f32 %v2991_v40  ;;  %v3003_v33 = vmul.f32 1.442695, %v2980_v54 }
 0x4b0   : > { %v2677_v57 = vadd.f32 1.0, %v7942_v28  ;;  %v2629_v51 = vadd.f32 %v9399_v1, %v2594_v10  ;;  %7955 = vpow2.f32 %v2993_v56  ;;  %v7944_v32 = vpop.eup %7943 }
 0x4b1   : > { %v2658_v38 = vmul.f32 1.442695, %v2641_v34  ;;  %v3009_v39 = vadd.f32 1.0, %v7944_v32 }
 0x4b2   : > { %7957 = vrcp.f32 %v2677_v57  ;;  %v2642_v12 = vsub.f32 0.0, %v2629_v51 }
 0x4b3   : > { %v7946_v44 = vpop.eup %7945  ;;  %7959 = vpow2.f32 %v2658_v38 }
 0x4b4   : > { %v2678_v17 = vadd.f32 1.0, %v7946_v44  ;;  %v2660_v15 = vmul.f32 1.442695, %v2642_v12  ;;  %7961 = vpow2.f32 %v2985_v9 }
 0x4b5   : > { %v2597_v5 = vpop.xlane.xlu0 %2596 }
 0x4b6   : > { %v9421_v27 = vpop.eup %7947  ;;  %7963 = vrcp.f32 %v2678_v17  ;;  %v2630_v45 = vadd.f32 %v9399_v1, %v2597_v5 }
 0x4b7   : > { %v7950_v42 = vpop.eup %7949  ;;  %5116 = vst.msk [vmem:[%s9419_s26] sm:$0xff] %vm3087_vm8, %v9421_v27  ;;  %7965 = vpow2.f32 %v2660_v15 }
 0x4b8   : > { %v7952_v55 = vpop.eup %7951  ;;  %7967 = vpow2.f32 %v2997_v58  ;;  %v2643_v47 = vsub.f32 0.0, %v2630_v45  ;;  %v2600_v4 = vpop.xlane.xlu1 %2599  ;;  %v3011_v3 = vadd.f32 1.0, %v7950_v42 }
 0x4b9   : > { %7969 = vrcp.f32 %v3009_v39  ;;  %v2679_v46 = vadd.f32 1.0, %v7952_v55  ;;  %v2631_v18 = vadd.f32 %v9399_v1, %v2600_v4  ;;  %v7954_v25 = vpop.eup %7953 }
 0x4ba   : > { %7971 = vpow2.f32 %v2989_v49  ;;  %v2662_v26 = vmul.f32 1.442695, %v2643_v47  ;;  %v7956_v13 = vpop.eup %7955  ;;  %v3013_v61 = vadd.f32 1.0, %v7954_v25 }
 0x4bb   : > { %7973 = vrcp.f32 %v2679_v46  ;;  %v2644_v19 = vsub.f32 0.0, %v2631_v18  ;;  %v3014_v38 = vadd.f32 1.0, %v7956_v13 }
 0x4bc   : > { %v9434_v36 = vpop.eup %7957  ;;  %7975 = vpow2.f32 %v2662_v26 }
 0x4bd   : > { %v7960_v7 = vpop.eup %7959  ;;  %7977 = vpow2.f32 %v3001_v11  ;;  %5117 = vst.msk [vmem:[%s9419_s26 + $0x8] sm:$0xff] %vm3087_vm8, %v9434_v36  ;;  %v2664_v63 = vmul.f32 1.442695, %v2644_v19  ;;  %v2603_v53 = vpop.xlane.xlu0 %2602 }
 0x4be   : > { %7979 = vrcp.f32 %v3011_v3  ;;  %v2680_v50 = vadd.f32 1.0, %v7960_v7  ;;  %v2632_v20 = vadd.f32 %v9399_v1, %v2603_v53  ;;  %v7962_v30 = vpop.eup %7961 }
 0x4bf   : > { %7981 = vpow2.f32 %v2664_v63  ;;  %v3010_v39 = vadd.f32 1.0, %v7962_v30 }
 0x4c0   : > { %v9440_v23 = vpop.eup %7963  ;;  %7983 = vrcp.f32 %v2680_v50  ;;  %v2645_v60 = vsub.f32 0.0, %v2632_v20 }
 0x4c1   : > { %v7966_v43 = vpop.eup %7965  ;;  %7985 = vrcp.f32 %v3013_v61  ;;  %5118 = vst.msk [vmem:[%s9419_s26 + $0x10] sm:$0xff] %vm3087_vm8, %v9440_v23  ;;  %v2606_v0 = vpop.xlane.xlu0 %2605 }
 0x4c2   : > { %v7968_v40 = vpop.eup %7967  ;;  %v2681_v48 = vadd.f32 1.0, %v7966_v43  ;;  %v2666_v6 = vmul.f32 1.442695, %v2645_v60  ;;  %v2633_v56 = vadd.f32 %v9399_v1, %v2606_v0  ;;  %7987 = vpow2.f32 %v2995_v31 }
 0x4c3   : > { %v9446_v2 = vpop.eup %7969  ;;  %v2609_v29 = vpop.xlane.xlu1 %2608  ;;  %v3016_v47 = vadd.f32 1.0, %v7968_v40 }
 0x4c4   : > { %v7972_v28 = vpop.eup %7971  ;;  %7989 = vrcp.f32 %v2681_v48  ;;  %v2646_v34 = vsub.f32 0.0, %v2633_v56  ;;  %v2634_v10 = vadd.f32 %v9399_v1, %v2609_v29 }
 0x4c5   : > { %v9449_v14 = vpop.eup %7973  ;;  %7991 = vpow2.f32 %v2666_v6  ;;  %v3012_v18 = vadd.f32 1.0, %v7972_v28 }
 0x4c6   : > { %v7976_v57 = vpop.eup %7975  ;;  %7993 = vpow2.f32 %v2999_v8  ;;  %5119 = vst.msk [vmem:[%s9419_s26 + $0x18] sm:$0xff] %vm3087_vm8, %v9449_v14  ;;  %v2668_v51 = vmul.f32 1.442695, %v2646_v34  ;;  %v2647_v9 = vsub.f32 0.0, %v2634_v10 }
 0x4c7   : > { %v7978_v24 = vpop.eup %7977  ;;  %7995 = vpow2.f32 %v3003_v33  ;;  %v2682_v32 = vadd.f32 1.0, %v7976_v57  ;;  %v2616_v35 = vpop.xlane.xlu1 %2615 }
 0x4c8   : > { %v9454_v12 = vpop.eup %7979  ;;  %7997 = vpow2.f32 %v2668_v51  ;;  %v2670_v44 = vmul.f32 1.442695, %v2647_v9  ;;  %v2636_v58 = vadd.f32 %v9399_v1, %v2616_v35  ;;  %v2612_v17 = vpop.xlane.xlu0 %2611 }
 0x4c9   : > { %v7982_v15 = vpop.eup %7981  ;;  %7999 = vrcp.f32 %v2682_v32  ;;  %v2635_v41 = vadd.f32 %v9399_v1, %v2612_v17 }
 0x4ca   : > { %v9458_v5 = vpop.eup %7983  ;;  %v2683_v49 = vadd.f32 1.0, %v7982_v15  ;;  %8001 = vpow2.f32 %v2670_v44  ;;  %v2649_v45 = vsub.f32 0.0, %v2636_v58  ;;  %v3048_v44 = vadd.f32 %v9446_v2, %v9421_v27  ;;  %v3065_v58 = vld [vmem:[%s9480_s6 + $0x20] sm:$0xff] }
 0x4cb   : > { %v9460_v42 = vpop.eup %7985  ;;  %8003 = vrcp.f32 %v3014_v38  ;;  %5120 = vst.msk [vmem:[%s9419_s26 + $0x20] sm:$0xff] %vm3087_vm8, %v9458_v5  ;;  %v2648_v52 = vsub.f32 0.0, %v2635_v41  ;;  %v2949_v55 = vpop.xlane.xlu1 %2948  ;;  %v3061_v15 = vld [vmem:[%s9480_s6] sm:$0xff] }
 0x4cc   : > { %8005 = vrcp.f32 %v2683_v49  ;;  %v2674_v4 = vmul.f32 1.442695, %v2649_v45  ;;  %v2969_v11 = vadd.f32 %v9401_v37, %v2949_v55  ;;  %v2945_v1 = vpop.xlane.xlu0 %2944  ;;  %v7988_v46 = vpop.eup %7987  ;;  %v3052_v32 = vadd.f32 %v9460_v42, %v9458_v5  ;;  %v3066_v45 = vld [vmem:[%s9480_s6 + $0x28] sm:$0xff]  ;;  %v3069_v2 = vld [vmem:[%s9480_s6 + $0x40] sm:$0xff] }
 0x4cd   : > { %8007 = vrcp.f32 %v3010_v39  ;;  %v2672_v25 = vmul.f32 1.442695, %v2648_v52  ;;  %v2968_v3 = vadd.f32 %v9401_v37, %v2945_v1  ;;  %v3018_v37 = vadd.f32 1.0, %v7978_v24  ;;  %v3062_v52 = vld [vmem:[%s9480_s6 + $0x8] sm:$0xff]  ;;  %v3068_v1 = vld [vmem:[%s9480_s6 + $0x38] sm:$0xff] }
 0x4ce   : > { %v9467_v22 = vpop.eup %7989  ;;  %8009 = vpow2.f32 %v2674_v4  ;;  %v2982_v26 = vsub.f32 0.0, %v2969_v11  ;;  %v3015_v54 = vadd.f32 1.0, %v7988_v46  ;;  %v9500_v4 = vadd.f32 %v3065_v58, %v3052_v32  ;;  %v3067_v11 = vld [vmem:[%s9480_s6 + $0x30] sm:$0xff] }
 0x4cf   : > { %v7992_v13 = vpop.eup %7991  ;;  %5121 = vst.msk [vmem:[%s9419_s26 + $0x28] sm:$0xff] %vm3087_vm8, %v9467_v22  ;;  %8011 = vpow2.f32 %v2672_v25  ;;  %v2981_v21 = vsub.f32 0.0, %v2968_v3  ;;  %v3074_v25 = vadd.f32 %v3061_v15, %v3048_v44  ;;  %v3063_v3 = vld [vmem:[%s9480_s6 + $0x10] sm:$0xff] }
 0x4d0   : > { %v7994_v59 = vpop.eup %7993  ;;  %8013 = vrcp.f32 %v3016_v47  ;;  %v2684_v19 = vadd.f32 1.0, %v7992_v13  ;;  %v3007_v7 = vmul.f32 1.442695, %v2982_v26  ;;  %v3050_v47 = vadd.f32 %v9454_v12, %v9440_v23  ;;  %v3070_v26 = vld [vmem:[%s9480_s6 + $0x48] sm:$0xff]  ;;  %v3071_v12 = vld [vmem:[%s9480_s6 + $0x50] sm:$0xff] }
 0x4d1   : > { %v7996_v61 = vpop.eup %7995  ;;  %8015 = vrcp.f32 %v3012_v18  ;;  %v3005_v63 = vmul.f32 1.442695, %v2981_v21  ;;  %v3017_v30 = vadd.f32 1.0, %v7994_v59 }
 0x4d2   : > { %v7998_v53 = vpop.eup %7997  ;;  %8017 = vrcp.f32 %v2684_v19  ;;  %v3019_v0 = vadd.f32 1.0, %v7996_v61 }
 0x4d3   : > { %v8000_v62 = vpop.eup %7999  ;;  %v2685_v50 = vadd.f32 1.0, %v7998_v53  ;;  %8019 = vpow2.f32 %v3007_v7  ;;  %v3076_v7 = vadd.f32 %v3063_v3, %v3050_v47 }
 0x4d4   : > { %v8002_v20 = vpop.eup %8001  ;;  %5122 = vst.msk [vmem:[%s9419_s26 + $0x30] sm:$0xff] %vm3087_vm8, %v8000_v62  ;;  %8021 = vpow2.f32 %v3005_v63  ;;  %v3092_v63 = vsel %vm3087_vm8, %v9500_v4, -inf }
 0x4d5   : > { %v8004_v31 = vpop.eup %8003  ;;  %8023 = vrcp.f32 %v2685_v50  ;;  %v2686_v60 = vadd.f32 1.0, %v8002_v20  ;;  %v3073_v20 = vld [vmem:[%s9480_s6 + $0x60] sm:$0xf] }
 0x4d6   : > { %v8006_v43 = vpop.eup %8005  ;;  %8025 = vrcp.f32 %v3018_v37  ;;  %v3053_v41 = vadd.f32 %v8004_v31, %v9467_v22  ;;  %v3064_v22 = vld [vmem:[%s9480_s6 + $0x18] sm:$0xff] }
 0x4d7   : > { %v8008_v40 = vpop.eup %8007  ;;  %5123 = vst.msk [vmem:[%s9419_s26 + $0x38] sm:$0xff] %vm3087_vm8, %v8006_v43  ;;  %8027 = vrcp.f32 %v2686_v60 }
 0x4d8   : > { %v8010_v8 = vpop.eup %8009  ;;  %8029 = vrcp.f32 %v3017_v30  ;;  %v3049_v39 = vadd.f32 %v8008_v40, %v9434_v36  ;;  %v9509_v21 = vadd.f32 %v3066_v45, %v3053_v41 }
 0x4d9   : > { %v8012_v48 = vpop.eup %8011  ;;  %8031 = vrcp.f32 %v3015_v54  ;;  %v2688_v6 = vadd.f32 1.0, %v8010_v8 }
 0x4da   : > { %v8014_v56 = vpop.eup %8013  ;;  %8033 = vrcp.f32 %v3019_v0  ;;  %v2687_v33 = vadd.f32 1.0, %v8012_v48  ;;  %v3094_v31 = vsel %vm3087_vm8, %v9509_v21, -inf }
 0x4db   : > { %v8016_v29 = vpop.eup %8015  ;;  %8035 = vrcp.f32 %v2688_v6  ;;  %v3055_v27 = vadd.f32 %v8014_v56, %v8006_v43  ;;  %v3072_v43 = vld [vmem:[%s9480_s6 + $0x58] sm:$0xff]  ;;  %v3090_v56 = vsel %vm3087_vm8, %v3076_v7, -inf  ;;  %s11231_s6 = sld [smem:[#allocation11_spill]] }
 0x4dc   : > { %v8018_v28 = vpop.eup %8017  ;;  %8037 = vrcp.f32 %v2687_v33  ;;  %v3051_v36 = vadd.f32 %v8016_v29, %v9449_v14  ;;  %v3075_v14 = vadd.f32 %v3062_v52, %v3049_v39 }
 0x4dd   : > { %v8020_v34 = vpop.eup %8019  ;;  %5124 = vst.msk [vmem:[%s9419_s26 + $0x40] sm:$0xff] %vm3087_vm8, %v8018_v28  ;;  %v9518_v19 = vadd.f32 %v3068_v1, %v3055_v27 }
 0x4de   : > { %v8022_v10 = vpop.eup %8021  ;;  %v3021_v57 = vadd.f32 1.0, %v8020_v34  ;;  %v3077_v61 = vadd.f32 %v3064_v22, %v3051_v36  ;;  %v3089_v0 = vsel %vm3087_vm8, %v3075_v14, -inf }
 0x4df   : > { %v8024_v51 = vpop.eup %8023  ;;  %v3020_v9 = vadd.f32 1.0, %v8022_v10  ;;  %v3098_v48 = vsel %vm3087_vm8, %v9518_v19, -inf }
 0x4e0   : > { %v8026_v24 = vpop.eup %8025  ;;  %5125 = vst.msk [vmem:[%s9419_s26 + $0x48] sm:$0xff] %vm3087_vm8, %v8024_v51  ;;  %8039 = vrcp.f32 %v3021_v57  ;;  %v3091_v33 = vsel %vm3087_vm8, %v3077_v61, -inf }
 0x4e1   : > { %v8028_v38 = vpop.eup %8027  ;;  %8041 = vrcp.f32 %v3020_v9  ;;  %v3057_v46 = vadd.f32 %v8026_v24, %v8024_v51  ;;  %v3095_v51 = vmax.f32 %v3089_v0, %v3094_v31  ;;  %v3099_v24 = vmax.f32 %v3091_v33, %v3098_v48 }
 0x4e2   : > { %v8030_v35 = vpop.eup %8029  ;;  %5126 = vst.msk [vmem:[%s9419_s26 + $0x50] sm:$0xff] %vm3087_vm8, %v8028_v38 }
 0x4e3   : > { %v8032_v17 = vpop.eup %8031  ;;  %v3056_v49 = vadd.f32 %v8030_v35, %v8018_v28  ;;  %v9522_v53 = vadd.f32 %v3070_v26, %v3057_v46 }
 0x4e4   : > { %v8034_v5 = vpop.eup %8033  ;;  %v3054_v42 = vadd.f32 %v8032_v17, %v8000_v62  ;;  %v3088_v62 = vsel %vm3087_vm8, %v3074_v25, -inf }
 0x4e5   : > { %v8036_v55 = vpop.eup %8035  ;;  %v3058_v13 = vadd.f32 %v8034_v5, %v8028_v38  ;;  %v9511_v23 = vadd.f32 %v3069_v2, %v3056_v49  ;;  %v3093_v40 = vmax.f32 %v3088_v62, %v3092_v63  ;;  %v3102_v29 = vsel %vm3087_vm8, %v9522_v53, -inf }
 0x4e6   : > { %v8038_v18 = vpop.eup %8037  ;;  %5128 = vst.msk [vmem:[%s9419_s26 + $0x60] sm:$0xf] %vm3108_vm15, %v8036_v55  ;;  %v9516_v59 = vadd.f32 %v3067_v11, %v3054_v42  ;;  %v3103_v44 = vmax.f32 %v3095_v51, %v3102_v29 }
 0x4e7   : > { %5127 = vst.msk [vmem:[%s9419_s26 + $0x58] sm:$0xff] %vm3087_vm8, %v8038_v18  ;;  %v9525_v50 = vadd.f32 %v3071_v12, %v3058_v13  ;;  %v3100_v54 = vsel %vm3087_vm8, %v9511_v23, -inf  ;;  %s11240_s26 = smov 16  }
 0x4e8   : > { %v3096_v8 = vsel %vm3087_vm8, %v9516_v59, -inf  ;;  %v3101_v34 = vmax.f32 %v3093_v40, %v3100_v54 }
 0x4e9   : > { %v3104_v10 = vsel %vm3087_vm8, %v9525_v50, -inf  ;;  %v3097_v9 = vmax.f32 %v3090_v56, %v3096_v8 }
 0x4ea   : > { %v8040_v37 = vpop.eup %8039 }
 0x4eb   : > { %v8042_v30 = vpop.eup %8041  ;;  %v3060_v60 = vadd.f32 %v8040_v37, %v8036_v55  ;;  %v3105_v58 = vmax.f32 %v3097_v9, %v3104_v10 }
 0x4ec   : > { %v3059_v6 = vadd.f32 %v8042_v30, %v8038_v18 }
 0x4ed   : > { %v9542_v28 = vadd.f32 %v3073_v20, %v3060_v60 }
 0x4ee   : > { %v3085_v57 = vadd.f32 %v3072_v43, %v3059_v6 }
 0x4ef   : > { %v3109_v38 = vsel %vm3108_vm15, %v9542_v28, -inf }
 0x4f0   : > { %v3110_v32 = vmax.f32 %v3101_v34, %v3109_v38  ;;  %v3106_v35 = vsel %vm3087_vm8, %v3085_v57, -inf }
 0x4f1   : > { %v3107_v17 = vmax.f32 %v3099_v24, %v3106_v35 }
 0x4f2   : > { %v3111_v15 = vmax.f32 %v3110_v32, %v3103_v44 }
 0x4f3   : > { %v3112_v39 = vmax.f32 %v3105_v58, %v3107_v17 }
 0x4f5   : > { %v3113_v41 = vmax.f32 %v3111_v15, %v3112_v39 }
 0x4f7   : > { %v3114_v49 = vrot.slane %v3113_v41, 4 }
 0x4f9   : > { %v3115_v5 = vmax.f32 %v3113_v41, %v3114_v49 }
 0x4fb   : > { %v3116_v45 = vrot.slane %v3115_v5, 2 }
 0x4fd   : > { %v3117_v42 = vmax.f32 %v3115_v5, %v3116_v45 }
 0x4ff   : > { %v3118_v27 = vrot.slane %v3117_v42, 1 }
 0x501   : > { %v3119_v2 = vmax.f32 %v3117_v42, %v3118_v27 }
 0x503   : > { %v3120_v52 = vsub.f32 %v3074_v25, %v3119_v2  ;;  %v3121_v55 = vsub.f32 %v3075_v14, %v3119_v2  ;;  %v3122_v47 = vsub.f32 %v3076_v7, %v3119_v2  ;;  %v3123_v36 = vsub.f32 %v3077_v61, %v3119_v2 }
 0x504   : > { %v3124_v11 = vsub.f32 %v9500_v4, %v3119_v2  ;;  %v3125_v3 = vsub.f32 %v9509_v21, %v3119_v2  ;;  %v3126_v26 = vsub.f32 %v9516_v59, %v3119_v2  ;;  %v3127_v12 = vsub.f32 %v9518_v19, %v3119_v2 }
 0x505   : > { %v3133_v1 = vmul.f32 1.442695, %v3120_v52  ;;  %v3135_v46 = vmul.f32 1.442695, %v3121_v55  ;;  %v3137_v18 = vmul.f32 1.442695, %v3122_v47  ;;  %v3128_v14 = vsub.f32 %v9511_v23, %v3119_v2 }
 0x506   : > { %v3139_v22 = vmul.f32 1.442695, %v3123_v36  ;;  %v3141_v13 = vmul.f32 1.442695, %v3124_v11  ;;  %v3143_v25 = vmul.f32 1.442695, %v3125_v3  ;;  %v3129_v7 = vsub.f32 %v9522_v53, %v3119_v2 }
 0x507   : > { %8043 = vpow2.f32 %v3133_v1  ;;  %v3145_v4 = vmul.f32 1.442695, %v3126_v26  ;;  %v3147_v61 = vmul.f32 1.442695, %v3127_v12  ;;  %v3130_v21 = vsub.f32 %v9525_v50, %v3119_v2 }
 0x508   : > { %8045 = vpow2.f32 %v3135_v46  ;;  %v3149_v63 = vmul.f32 1.442695, %v3128_v14  ;;  %v3131_v62 = vsub.f32 %v3085_v57, %v3119_v2  ;;  %v3151_v20 = vmul.f32 1.442695, %v3129_v7 }
 0x509   : > { %8047 = vpow2.f32 %v3137_v18  ;;  %v3132_v54 = vsub.f32 %v9542_v28, %v3119_v2  ;;  %v3153_v53 = vmul.f32 1.442695, %v3130_v21 }
 0x50a   : > { %8049 = vpow2.f32 %v3139_v22  ;;  %v3155_v0 = vmul.f32 1.442695, %v3131_v62 }
 0x50b   : > { %8051 = vpow2.f32 %v3141_v13  ;;  %v3157_v6 = vmul.f32 1.442695, %v3132_v54  ;;  %v11234_v54 = vmov 0  }
 0x50c   : > { %8053 = vpow2.f32 %v3143_v25 }
 0x50d   : > { %8055 = vpow2.f32 %v3145_v4 }
 0x50e   : > { %8057 = vpow2.f32 %v3147_v61 }
 0x50f   : > { %8059 = vpow2.f32 %v3149_v63 }
 0x510   : > { %8061 = vpow2.f32 %v3151_v20 }
 0x511   : > { %v8044_v59 = vpop.eup %8043  ;;  %8063 = vpow2.f32 %v3153_v53  ;;  %v7835_v53 = vld [vmem:[%s11231_s6 + $0x8] sm:$0xff]  }
 0x512   : > { %v8046_v37 = vpop.eup %8045  ;;  %v3159_v19 = vsel %vm3087_vm8, %v8044_v59, 0.0  ;;  %8065 = vpow2.f32 %v3155_v0 }
 0x513   : > { %v8048_v30 = vpop.eup %8047  ;;  %v3160_v23 = vsel %vm3087_vm8, %v8046_v37, 0.0  ;;  %8067 = vpow2.f32 %v3157_v6 }
 0x514   : > { %v8050_v31 = vpop.eup %8049  ;;  %v3161_v60 = vadd.f32 %v3160_v23, %v3159_v19  ;;  %v3162_v50 = vsel %vm3087_vm8, %v8048_v30, 0.0  ;;  %v11232_v19 = vld [vmem:[#allocation26_spill] sm:$0xff]  ;;  %v11233_v23 = vld [vmem:[#allocation25_spill] sm:$0xff] }
 0x515   : > { %v8052_v43 = vpop.eup %8051  ;;  %v3164_v8 = vsel %vm3087_vm8, %v8050_v31, 0.0 }
 0x516   : > { %v3163_v40 = vadd.f32 %v3162_v50, %v3161_v60  ;;  %v8054_v48 = vpop.eup %8053  ;;  %v3166_v33 = vsel %vm3087_vm8, %v8052_v43, 0.0 }
 0x517   : > { %v8056_v29 = vpop.eup %8055  ;;  %v3168_v34 = vsel %vm3087_vm8, %v8054_v48, 0.0 }
 0x518   : > { %v3165_v56 = vadd.f32 %v3164_v8, %v3163_v40  ;;  %v8058_v10 = vpop.eup %8057  ;;  %v3170_v51 = vsel %vm3087_vm8, %v8056_v29, 0.0  ;;  %v7836_v40 = vld [vmem:[%s11231_s6 + $0x10] sm:$0xff]  }
 0x519   : > { %v8060_v9 = vpop.eup %8059  ;;  %v3172_v38 = vsel %vm3087_vm8, %v8058_v10, 0.0  ;;  %v11235_v8 = vld [vmem:[#allocation24_spill] sm:$0xff] }
 0x51a   : > { %v3167_v28 = vadd.f32 %v3166_v33, %v3165_v56  ;;  %v8062_v32 = vpop.eup %8061  ;;  %v3174_v44 = vsel %vm3087_vm8, %v8060_v9, 0.0 }
 0x51b   : > { %v8064_v58 = vpop.eup %8063  ;;  %v3176_v15 = vsel %vm3087_vm8, %v8062_v32, 0.0 }
 0x51c   : > { %v3169_v57 = vadd.f32 %v3168_v34, %v3167_v28  ;;  %v8066_v39 = vpop.eup %8065  ;;  %v3178_v49 = vsel %vm3087_vm8, %v8064_v58, 0.0  ;;  %v7837_v34 = vld [vmem:[%s11231_s6 + $0x18] sm:$0xff]  }
 0x51d   : > { %v8068_v5 = vpop.eup %8067  ;;  %v3180_v42 = vsel %vm3087_vm8, %v8066_v39, 0.0  ;;  %vm3886_vm8 = vcmask 916480  }
 0x51e   : > { %v3171_v24 = vadd.f32 %v3170_v51, %v3169_v57  ;;  %v3182_v2 = vsel %vm3108_vm15, %v8068_v5, 0.0  ;;  %vm11255_vm15 = vmmov %vm11254_vm7 }
 0x520   : > { %v3173_v35 = vadd.f32 %v3172_v38, %v3171_v24 }
 0x522   : > { %v3175_v17 = vadd.f32 %v3174_v44, %v3173_v35 }
 0x524   : > { %v3177_v41 = vadd.f32 %v3176_v15, %v3175_v17  ;;  %v11236_v17 = vld [vmem:[#allocation36_spill] sm:$0xff] }
 0x526   : > { %v3179_v45 = vadd.f32 %v3178_v49, %v3177_v41 }
 0x528   : > { %v3181_v27 = vadd.f32 %v3180_v42, %v3179_v45  ;;  %v11237_v45 = vld [vmem:[#allocation35_spill] sm:$0xff] }
 0x52a   : > { %v3183_v52 = vadd.f32 %v3182_v2, %v3181_v27  ;;  %v11238_v27 = vld [vmem:[#allocation28_spill] sm:$0xff] }
 0x52c   : > { %v3184_v55 = vrot.slane %v3183_v52, 4 }
 0x52e   : > { %v3185_v47 = vadd.f32 %v3184_v55, %v3183_v52  ;;  %v7839_v55 = vld [vmem:[%s11231_s6 + $0x28] sm:$0xff]  }
 0x530   : > { %v3186_v36 = vrot.slane %v3185_v47, 2 }
 0x532   : > { %v3187_v11 = vadd.f32 %v3186_v36, %v3185_v47  ;;  %v11239_v47 = vld [vmem:[#allocation27_spill] sm:$0xff] }
 0x534   : > { %v3188_v1 = vrot.slane %v3187_v11, 1 }
 0x536   : > { %v3189_v46 = vadd.f32 %v3188_v1, %v3187_v11 }
 0x538   : > { %8069 = vrcp.f32 %v3189_v46 }
 0x542   : > { %v8070_v18 = vpop.eup %8069 }
 0x543   : > { %v3192_v3 = vmul.f32 %v8070_v18, %v8046_v37  ;;  %v3191_v22 = vmul.f32 %v8070_v18, %v8044_v59  ;;  %v3193_v26 = vmul.f32 %v8070_v18, %v8048_v30  ;;  %v3194_v13 = vmul.f32 %v8070_v18, %v8050_v31  ;;  %v7834_v37 = vld [vmem:[%s11231_s6] sm:$0xff]  }
 0x544   : > { %v3195_v12 = vmul.f32 %v8070_v18, %v8052_v43  ;;  %v3196_v25 = vmul.f32 %v8070_v18, %v8054_v48  ;;  %v3197_v14 = vmul.f32 %v8070_v18, %v8056_v29  ;;  %v3198_v4 = vmul.f32 %v8070_v18, %v8058_v10  ;;  %4015 = vmatpush1.bf16.msra.mxu0 %v7834_v37 }
 0x545   : > { %3211 = vperm.xlu1 %7245, %v3192_v3   ;;  %3206 = vperm.xlu0 %7244, %v3191_v22   ;;  %v3199_v7 = vmul.f32 %v8070_v18, %v8060_v9  ;;  %v3200_v61 = vmul.f32 %v8070_v18, %v8062_v32  ;;  %v3201_v21 = vmul.f32 %v8070_v18, %v8064_v58 }
 0x546   : > { %v3202_v63 = vmul.f32 %v8070_v18, %v8066_v39  ;;  %v3203_v59 = vmul.f32 %v8070_v18, %v8068_v5  ;;  %4016 = vmatprep.subr.bf16.mxu0 %v11234_v54  ;;  %v7838_v39 = vld [vmem:[%s11231_s6 + $0x20] sm:$0xff]  }
 0x548   : > { %4017 = vmatpush1.bf16.msra.mxu0 %v7835_v53 }
 0x549   : > { %3216 = vperm.xlu1 %7245, %v3193_v26   ;;  %3221 = vperm.xlu0 %7244, %v3194_v13  }
 0x54a   : > { %4018 = vmatprep.subr.bf16.mxu0 %v11234_v54 }
 0x54c   : > { %4019 = vmatpush1.bf16.msra.mxu0 %v7836_v40 }
 0x54d   : > { %3226 = vperm.xlu1 %7245, %v3195_v12   ;;  %3231 = vperm.xlu0 %7244, %v3196_v25  }
 0x54e   : > { %4020 = vmatprep.subr.bf16.mxu0 %v11234_v54 }
 0x550   : > { %4021 = vmatpush1.bf16.msra.mxu0 %v7837_v34 }
 0x551   : > { %3236 = vperm.xlu1 %7245, %v3197_v14   ;;  %3241 = vperm.xlu0 %7244, %v3198_v4   ;;  %v7840_v14 = vld [vmem:[%s11231_s6 + $0x30] sm:$0xff]  }
 0x552   : > { %4022 = vmatprep.subr.bf16.mxu0 %v11234_v54 }
 0x554   : > { %4023 = vmatpush1.bf16.msra.mxu0 %v7838_v39 }
 0x555   : > { %3246 = vperm.xlu1 %7245, %v3199_v7   ;;  %3251 = vperm.xlu0 %7244, %v3200_v61  }
 0x556   : > { %4024 = vmatprep.subr.bf16.mxu0 %v11234_v54 }
 0x558   : > { %4025 = vmatpush1.bf16.msra.mxu0 %v7839_v55 }
 0x559   : > { %3256 = vperm.xlu1 %7245, %v3201_v21   ;;  %3261 = vperm.xlu0 %7244, %v3202_v63  }
 0x55a   : > { %4026 = vmatprep.subr.bf16.mxu0 %v11234_v54 }
 0x55c   : > { %4027 = vmatpush1.bf16.msra.mxu0 %v7840_v14 }
 0x55d   : > { %3266 = vperm.xlu1 %7245, %v3203_v59   ;;  %4028 = vmatprep.subr.bf16.mxu0 %v11234_v54 }
 0x5c4   : > { %v3212_v62 = vpop.permute.xlu1 %3211  ;;  %v3207_v20 = vpop.permute.xlu0 %3206 }
 0x5c5   : > { %v3270_v30 = vmul.f32 %v3212_v62, %v11232_v19  ;;  %v3269_v31 = vmul.f32 %v3207_v20, %v11233_v23 }
 0x5c7   : > { %v3283_v60 = vadd.f32 %v3270_v30, %v11232_v19  ;;  %v3282_v50 = vadd.f32 %v3269_v31, %v11233_v23 }
 0x5c8   : > { %v3217_v43 = vpop.permute.xlu1 %3216  ;;  %v3222_v0 = vpop.permute.xlu0 %3221 }
 0x5c9   : > { %v3271_v48 = vmul.f32 %v3217_v43, %v11235_v8  ;;  %v3309_v6 = vrot.slane %v3283_v60, 4  ;;  %v3308_v56 = vrot.slane %v3282_v50, 4  ;;  %v3272_v36 = vmul.f32 %v3222_v0, %v11239_v47  ;;  %v7841_v60 = vld [vmem:[%s11231_s6 + $0x38] sm:$0xff]  }
 0x5ca   : > { %4029 = vmatpush1.bf16.msra.mxu0 %v7841_v60 }
 0x5cb   : > { %v9581_v33 = vadd.f32 %v3271_v48, %v11235_v8  ;;  %v9589_v57 = vsel %vm2026_vm14, %v3308_v56, %v3309_v6  ;;  %v9614_v49 = vsel %vm2026_vm14, 0.0, %v3308_v56  ;;  %v3285_v4 = vadd.f32 %v3272_v36, %v11239_v47  ;;  %4030 = vmatprep.subr.bf16.mxu0 %v11234_v54 }
 0x5cc   : > { %v3227_v29 = vpop.permute.xlu1 %3226  ;;  %v9583_v28 = vpop.permute.xlu0 %3231  ;;  %v3412_v11 = vrot.slane %v9614_v49, 2  ;;  %v3413_v26 = vrot.slane %v9589_v57, 2  ;;  %v3348_v13 = vrot.slane %v9614_v49, 1  ;;  %v3349_v12 = vrot.slane %v9589_v57, 1 }
 0x5cd   : > { %v3311_v10 = vrot.slane %v9581_v33, 4  ;;  %v3273_v2 = vmul.f32 %v3227_v29, %v11238_v27  ;;  %v3540_v30 = vrot.slane %v9614_v49, 4  ;;  %v3541_v23 = vrot.slane %v9589_v57, 4  ;;  %v11241_v33 = vld [vmem:[#allocation30_spill] sm:$0xff] }
 0x5ce   : > { %v3414_v20 = vsel %vm1259_vm3, %v3412_v11, %v3413_v26  ;;  %v3350_v19 = vsel %vm1176_vm2, %v3348_v13, %v3349_v12  ;;  %v3476_v31 = vrot.slane %v9614_v49, 3  ;;  %v3477_v53 = vrot.slane %v9589_v57, 3  ;;  %v11242_v13 = vld [vmem:[#allocation29_spill] sm:$0xff] }
 0x5cf   : > { %v9594_v51 = vsel %vm2026_vm14, %v3309_v6, %v3311_v10  ;;  %v9629_v22 = vadd.f32 %v3273_v2, %v11238_v27  ;;  %v3313_v50 = vrot.slane %v3285_v4, 4  ;;  %v3673_v29 = vrot.slane %v9614_v49, 6 }
 0x5d0   : > { %v9596_v9 = vpop.permute.xlu1 %3236  ;;  %v9598_v24 = vpop.permute.xlu0 %3241  ;;  %v3901_v38 = vpack.c.bf16 %v9594_v51, %v9589_v57  ;;  %v3415_v18 = vrot.slane %v9594_v51, 2  ;;  %v3351_v3 = vrot.slane %v9594_v51, 1  ;;  %v3543_v59 = vrot.slane %v9594_v51, 4 }
 0x5d1   : > { %v3479_v37 = vrot.slane %v9594_v51, 3  ;;  %v3315_v62 = vrot.slane %v9629_v22, 4  ;;  %v3676_v48 = vrot.slane %v9594_v51, 6  ;;  %v3609_v6 = vrot.slane %v9594_v51, 5 }
 0x5d2   : > { %6711 = vmatprep.mubr.msk.bf16.mxu0 %vm1553_vm4, %v3901_v38  ;;  %v3416_v21 = vsel %vm1259_vm3, %v3413_v26, %v3415_v18  ;;  %v3352_v63 = vsel %vm1176_vm2, %v3349_v12, %v3351_v3  ;;  %v3544_v40 = vsel %vm2026_vm14, %v3541_v23, %v3543_v59  ;;  %v3674_v34 = vrot.slane %v9589_v57, 6 }
 0x5d3   : > { %v7371_v43 = vpack.i.bf16 %v3416_v21, %v3414_v20  ;;  %v7366_v0 = vpack.i.bf16 %v3352_v63, %v3350_v19  ;;  %v3480_v8 = vsel %vm1058_vm1, %v3477_v53, %v3479_v37  ;;  %v9678_v56 = vsel %vm2026_vm14, %v3313_v50, %v3315_v62 }
 0x5d4   : > { %v9604_v32 = vpop.permute.xlu1 %3246  ;;  %v9606_v35 = vpop.permute.xlu0 %3251  ;;  %v3542_v38 = vsel %vm2026_vm14, %v3540_v30, %v3541_v23  ;;  %v9692_v39 = vsel %vm2026_vm14, %v3311_v10, %v3313_v50  ;;  %v3677_v27 = vsel %vm3672_vm5, %v3674_v34, %v3676_v48  ;;  %v3742_v55 = vrot.slane %v9594_v51, 7 }
 0x5d5   : > { %v3275_v10 = vmul.f32 %v9596_v9, %v11241_v33  ;;  %v3675_v47 = vsel %vm3672_vm5, %v3673_v29, %v3674_v34  ;;  %v3353_v11 = vrot.slane %v9692_v39, 1  ;;  %v3740_v26 = vrot.slane %v9589_v57, 7 }
 0x5d6   : > { %v3274_v9 = vmul.f32 %v9583_v28, %v11242_v13  ;;  %v7391_v12 = vpack.i.bf16 %v3677_v27, %v3675_v47  ;;  %v3483_v63 = vrot.slane %v9678_v56, 3  ;;  %v3419_v20 = vrot.slane %v9678_v56, 2 }
 0x5d7   : > { %v3743_v21 = vsel %vm1029_vm0, %v3740_v26, %v3742_v55  ;;  %v9724_v19 = vadd.f32 %v3275_v10, %v11241_v33  ;;  %v3354_v28 = vsel %vm1176_vm2, %v3351_v3, %v3353_v11  ;;  %v3481_v23 = vrot.slane %v9692_v39, 3 }
 0x5d8   : > { %v9608_v44 = vpop.permute.xlu1 %3256  ;;  %v3262_v58 = vpop.permute.xlu0 %3261  ;;  %v3613_v3 = vrot.slane %v9678_v56, 5  ;;  %v3680_v27 = vrot.slane %v9678_v56, 6 }
 0x5d9   : > { %v3280_v15 = vmul.f32 %v3262_v58, %v11236_v17  ;;  %v3478_v58 = vsel %vm1058_vm1, %v3476_v31, %v3477_v53  ;;  %v3417_v31 = vrot.slane %v9692_v39, 2  ;;  %v3287_v53 = vadd.f32 %v3274_v9, %v11242_v13 }
 0x5da   : > { %v3482_v29 = vsel %vm1058_vm1, %v3479_v37, %v3481_v23  ;;  %v3746_v37 = vrot.slane %v9678_v56, 7 }
 0x5db   : > { %v9617_v5 = vadd.f32 %v3280_v15, %v11236_v17  ;;  %v3606_v17 = vrot.slane %v9614_v49, 5  ;;  %v3607_v15 = vrot.slane %v9589_v57, 5  ;;  %v3418_v34 = vsel %vm1259_vm3, %v3415_v18, %v3417_v31 }
 0x5dc   : > { %v3267_v41 = vpop.permute.xlu1 %3266 }
 0x5dd   : > { %v3281_v42 = vmul.f32 %v3267_v41, %v11237_v45  ;;  %v3329_v1 = vrot.slane %v9617_v5, 4  ;;  %v7381_v41 = vpack.i.bf16 %v3544_v40, %v3542_v38  ;;  %v3610_v2 = vsel %vm3605_vm6, %v3607_v15, %v3609_v6 }
 0x5de   : > { %v3608_v36 = vsel %vm3605_vm6, %v3606_v17, %v3607_v15  ;;  %v3547_v40 = vrot.slane %v9678_v56, 4  ;;  %v3611_v38 = vrot.slane %v9692_v39, 5  ;;  %v3317_v17 = vrot.slane %v3287_v53, 4 }
 0x5df   : > { %v3294_v52 = vadd.f32 %v3281_v42, %v11237_v45  ;;  %v7376_v45 = vpack.i.bf16 %v3480_v8, %v3478_v58  ;;  %v7842_v42 = vld [vmem:[%s11231_s6 + $0x40] sm:$0xff]   ;;  %v7386_v14 = vpack.i.bf16 %v3610_v2, %v3608_v36  ;;  %v3319_v8 = vrot.slane %v9724_v19, 4  ;;  %v11243_v2 = vld [vmem:[#allocation32_spill] sm:$0xff]  ;;  %s11249_s6 = smov 112  }
 0x5e0   : > { %4031 = vmatpush1.bf16.msra.mxu0 %v7842_v42  ;;  %v3545_v58 = vrot.slane %v9692_v39, 4  ;;  %v3277_v33 = vmul.f32 %v9604_v32, %v11243_v2  ;;  %v3612_v10 = vsel %vm3605_vm6, %v3609_v6, %v3611_v38  ;;  %v3744_v36 = vrot.slane %v9692_v39, 7 }
 0x5e1   : > { %v3331_v46 = vrot.slane %v3294_v52, 4  ;;  %v3355_v52 = vrot.slane %v9678_v56, 1  ;;  %7109 = vmatprep.subr.bf16.mxu0 %v11222_v16  ;;  %v9765_v18 = vsel %vm2026_vm14, %v3317_v17, %v3319_v8  ;;  %v9782_v32 = vsel %vm2026_vm14, %v3315_v62, %v3317_v17 }
 0x5e2   : > { %v3548_v42 = vsel %vm2026_vm14, %v3545_v58, %v3547_v40  ;;  %v3546_v47 = vsel %vm2026_vm14, %v3543_v59, %v3545_v58  ;;  %v3747_v6 = vsel %vm1029_vm0, %v3744_v36, %v3746_v37  ;;  %v3359_v22 = vrot.slane %v9765_v18, 1 }
 0x5e3   : > { %v9638_v25 = vsel %vm2026_vm14, %v3329_v1, %v3331_v46  ;;  %v3739_v46 = vrot.slane %v9614_v49, 7  ;;  %v3356_v4 = vsel %vm1176_vm2, %v3353_v11, %v3355_v52  ;;  %v3678_v11 = vrot.slane %v9692_v39, 6 }
 0x5e4   : > { %v3435_v7 = vrot.slane %v9638_v25, 2  ;;  %v3371_v61 = vrot.slane %v9638_v25, 1  ;;  %v7401_v60 = vpack.i.bf16 %v3356_v4, %v3354_v28  ;;  %v7416_v9 = vpack.i.bf16 %v3548_v42, %v3546_v47 }
 0x5e5   : > { %v3741_v30 = vsel %vm1029_vm0, %v3739_v46, %v3740_v26  ;;  %v11246_v46 = vld [vmem:[#allocation31_spill] sm:$0xff]  ;;  %v3681_v59 = vsel %vm3672_vm5, %v3678_v11, %v3680_v27  ;;  %v9795_v62 = vadd.f32 %v3277_v33, %v11243_v2  ;;  %v3421_v4 = vrot.slane %v9782_v32, 2 }
 0x5e6   : > { %3461 = vrot.lane.b32.xlu1 %v3435_v7, %s11163_s24  ;;  %3397 = vrot.lane.b32.xlu0 %v3371_v61, %s11240_s26  ;;  %v7396_v50 = vpack.i.bf16 %v3743_v21, %v3741_v30  ;;  %v3276_v26 = vmul.f32 %v9598_v24, %v11246_v46  ;;  %v3745_v24 = vsel %vm1029_vm0, %v3742_v55, %v3744_v36  ;;  %v3357_v21 = vrot.slane %v9782_v32, 1 }
 0x5e7   : > { %v7431_v30 = vpack.i.bf16 %v3747_v6, %v3745_v24  ;;  %v3551_v55 = vrot.slane %v9765_v18, 4  ;;  %v3682_v2 = vrot.slane %v9782_v32, 6  ;;  %v3615_v33 = vrot.slane %v9782_v32, 5 }
 0x5e8   : > { %v3289_v28 = vadd.f32 %v3276_v26, %v11246_v46  ;;  %v3360_v53 = vsel %vm1176_vm2, %v3357_v21, %v3359_v22  ;;  %v11251_v26 = vld [vmem:[#allocation34_spill] sm:$0xff]  ;;  %v3748_v6 = vrot.slane %v9782_v32, 7 }
 0x5e9   : > { %v3683_v19 = vsel %vm3672_vm5, %v3680_v27, %v3682_v2 }
 0x5ea   : > { %7372 = vrot.lane.b32.xlu1 %v7371_v43, %s11163_s24  ;;  %7367 = vrot.lane.b32.xlu0 %v7366_v0, %s11240_s26  ;;  %s11165_s24 = smov 64   ;;  %v3484_v43 = vsel %vm1058_vm1, %v3481_v23, %v3483_v63  ;;  %v3420_v0 = vsel %vm1259_vm3, %v3417_v31, %v3419_v20 }
 0x5eb   : > { %v7411_v15 = vpack.i.bf16 %v3484_v43, %v3482_v29  ;;  %v3358_v43 = vsel %vm1176_vm2, %v3355_v52, %v3357_v21  ;;  %v3485_v29 = vrot.slane %v9782_v32, 3 }
 0x5ec   : > { %v7436_v58 = vpack.i.bf16 %v3360_v53, %v3358_v43 }
 0x5ed   : > { %v3486_v42 = vsel %vm1058_vm1, %v3483_v63, %v3485_v29  ;;  %v3750_v63 = vrot.slane %v9765_v18, 7 }
 0x5ee   : > { %7382 = vrot.lane.b32.xlu1 %v7381_v41, %s11165_s24  ;;  %7377 = vrot.lane.b32.xlu0 %v7376_v45, %s11167_s3  ;;  %s11169_s24 = smov 96   ;;  %s11173_s3 = smov 80   ;;  %v7406_v41 = vpack.i.bf16 %v3420_v0, %v3418_v34  ;;  %v3614_v45 = vsel %vm3605_vm6, %v3611_v38, %v3613_v3  ;;  %v3549_v0 = vrot.slane %v9782_v32, 4  ;;  %v3321_v34 = vrot.slane %v3289_v28, 4 }
 0x5ef   : > { %v7421_v13 = vpack.i.bf16 %v3614_v45, %v3612_v10  ;;  %v3751_v21 = vsel %vm1029_vm0, %v3748_v6, %v3750_v63 }
 0x5f0   : > { %v3552_v17 = vsel %vm2026_vm14, %v3549_v0, %v3551_v55  ;;  %v3550_v45 = vsel %vm2026_vm14, %v3547_v40, %v3549_v0  ;;  %v9849_v10 = vsel %vm2026_vm14, %v3319_v8, %v3321_v34  ;;  %v3616_v8 = vsel %vm3605_vm6, %v3613_v3, %v3615_v33 }
 0x5f1   : > { %v7451_v47 = vpack.i.bf16 %v3552_v17, %v3550_v45  ;;  %v3619_v17 = vrot.slane %v9849_v10, 5 }
 0x5f2   : > { %7392 = vrot.lane.b32.xlu1 %v7391_v12, %s11169_s24  ;;  %7387 = vrot.lane.b32.xlu0 %v7386_v14, %s11173_s3  ;;  %s11171_s24 = smov 112   ;;  %s11245_s3 = smov 32   ;;  %v3423_v12 = vrot.slane %v9765_v18, 2  ;;  %v3679_v14 = vsel %vm3672_vm5, %v3676_v48, %v3678_v11  ;;  %v3323_v48 = vrot.slane %v9795_v62, 4 }
 0x5f3   : > { %v7426_v23 = vpack.i.bf16 %v3681_v59, %v3679_v14  ;;  %v11252_v59 = vld [vmem:[#allocation33_spill] sm:$0xff] }
 0x5f4   : > { %v3424_v31 = vsel %vm1259_vm3, %v3421_v4, %v3423_v12  ;;  %v9834_v52 = vsel %vm2026_vm14, %v3321_v34, %v3323_v48  ;;  %v3278_v24 = vmul.f32 %v9606_v35, %v11252_v59 }
 0x5f5   : > { %v3363_v46 = vrot.slane %v9834_v52, 1  ;;  %v3491_v27 = vrot.slane %v9834_v52, 3  ;;  %v3427_v28 = vrot.slane %v9834_v52, 2  ;;  %v3555_v34 = vrot.slane %v9834_v52, 4 }
 0x5f6   : > { %7402 = vrot.lane.b32.xlu1 %v7401_v60, %s11240_s26  ;;  %7397 = vrot.lane.b32.xlu0 %v7396_v50, %s11171_s24  ;;  %s11244_s24 = smov 48   ;;  %v3487_v60 = vrot.slane %v9765_v18, 3  ;;  %v3422_v50 = vsel %vm1259_vm3, %v3419_v20, %v3421_v4  ;;  %v3617_v20 = vrot.slane %v9765_v18, 5  ;;  %v3291_v53 = vadd.f32 %v3278_v24, %v11252_v59 }
 0x5f7   : > { %v7441_v38 = vpack.i.bf16 %v3424_v31, %v3422_v50  ;;  %v3425_v31 = vrot.slane %v9849_v10, 2 }
 0x5f8   : > { %v3618_v40 = vsel %vm3605_vm6, %v3615_v33, %v3617_v20  ;;  %v3325_v45 = vrot.slane %v3291_v53, 4 }
 0x5f9   : > { %v7456_v14 = vpack.i.bf16 %v3618_v40, %v3616_v8 }
 0x5fa   : > { %7412 = vrot.lane.b32.xlu1 %v7411_v15, %s11244_s24  ;;  %7407 = vrot.lane.b32.xlu0 %v7406_v41, %s11245_s3  ;;  %v3488_v15 = vsel %vm1058_vm1, %v3485_v29, %v3487_v60  ;;  %v3684_v41 = vrot.slane %v9765_v18, 6  ;;  %v3428_v29 = vsel %vm1259_vm3, %v3425_v31, %v3427_v28 }
 0x5fb   : > { %v7446_v36 = vpack.i.bf16 %v3488_v15, %v3486_v42  ;;  %v3553_v15 = vrot.slane %v9849_v10, 4 }
 0x5fc   : > { %v3685_v11 = vsel %vm3672_vm5, %v3682_v2, %v3684_v41 }
 0x5fd   : > { %v3554_v40 = vsel %vm2026_vm14, %v3551_v55, %v3553_v15 }
 0x5fe   : > { %7422 = vrot.lane.b32.xlu1 %v7421_v13, %s11247_s4  ;;  %7417 = vrot.lane.b32.xlu0 %v7416_v9, %s11248_s5  ;;  %v3279_v13 = vmul.f32 %v9608_v44, %v11251_v26  ;;  %v3361_v9 = vrot.slane %v9849_v10, 1  ;;  %v7461_v44 = vpack.i.bf16 %v3685_v11, %v3683_v19  ;;  %v9924_v19 = vsel %vm2026_vm14, %v3323_v48, %v3325_v45 }
 0x5ff   : > { %v3429_v24 = vrot.slane %v9924_v19, 2 }
 0x600   : > { %v3364_v4 = vsel %vm1176_vm2, %v3361_v9, %v3363_v46  ;;  %v9878_v3 = vadd.f32 %v3279_v13, %v11251_v26  ;;  %v3362_v35 = vsel %vm1176_vm2, %v3359_v22, %v3361_v9  ;;  %v3621_v22 = vrot.slane %v9834_v52, 5 }
 0x601   : > { %v7471_v50 = vpack.i.bf16 %v3364_v4, %v3362_v35  ;;  %v3752_v26 = vrot.slane %v9849_v10, 7  ;;  %v3686_v13 = vrot.slane %v9849_v10, 6 }
 0x602   : > { %7432 = vrot.lane.b32.xlu1 %v7431_v30, %s11249_s6  ;;  %7427 = vrot.lane.b32.xlu0 %v7426_v23, %s11250_s8  ;;  %v3749_v30 = vsel %vm1029_vm0, %v3746_v37, %v3748_v6  ;;  %v3489_v23 = vrot.slane %v9849_v10, 3  ;;  %v3327_v37 = vrot.slane %v9878_v3, 4  ;;  %v3622_v33 = vsel %vm3605_vm6, %v3619_v17, %v3621_v22 }
 0x603   : > { %v7466_v43 = vpack.i.bf16 %v3751_v21, %v3749_v30  ;;  %v3753_v62 = vsel %vm1029_vm0, %v3750_v63, %v3752_v26  ;;  %v3687_v48 = vsel %vm3672_vm5, %v3684_v41, %v3686_v13  ;;  %v3430_v41 = vsel %vm1259_vm3, %v3427_v28, %v3429_v24 }
 0x604   : > { %v3492_v0 = vsel %vm1058_vm1, %v3489_v23, %v3491_v27  ;;  %v9911_v11 = vsel %vm2026_vm14, %v3325_v45, %v3327_v37 }
 0x605   : > { %v3431_v59 = vrot.slane %v9911_v11, 2  ;;  %v3367_v55 = vrot.slane %v9911_v11, 1  ;;  %v3559_v35 = vrot.slane %v9911_v11, 4  ;;  %v3495_v63 = vrot.slane %v9911_v11, 3 }
 0x606   : > { %7442 = vrot.lane.b32.xlu1 %v7441_v38, %s11245_s3  ;;  %7437 = vrot.lane.b32.xlu0 %v7436_v58, %s11240_s26  ;;  %v3490_v38 = vsel %vm1058_vm1, %v3487_v60, %v3489_v23  ;;  %v3426_v58 = vsel %vm1259_vm3, %v3423_v12, %v3425_v31  ;;  %v3688_v60 = vrot.slane %v9834_v52, 6  ;;  %v3620_v12 = vsel %vm3605_vm6, %v3617_v20, %v3619_v17 }
 0x607   : > { %v7481_v42 = vpack.i.bf16 %v3492_v0, %v3490_v38  ;;  %v7476_v2 = vpack.i.bf16 %v3428_v29, %v3426_v58  ;;  %v7491_v8 = vpack.i.bf16 %v3622_v33, %v3620_v12  ;;  %v3432_v21 = vsel %vm1259_vm3, %v3429_v24, %v3431_v59 }
 0x608   : > { %v3689_v20 = vsel %vm3672_vm5, %v3686_v13, %v3688_v60  ;;  %v3557_v23 = vrot.slane %v9924_v19, 4  ;;  %v3493_v31 = vrot.slane %v9924_v19, 3  ;;  %v7511_v53 = vpack.i.bf16 %v3432_v21, %v3430_v41 }
 0x609   : > { %v7496_v4 = vpack.i.bf16 %v3689_v20, %v3687_v48  ;;  %v3692_v29 = vrot.slane %v9911_v11, 6  ;;  %v3625_v28 = vrot.slane %v9911_v11, 5  ;;  %v3690_v58 = vrot.slane %v9924_v19, 6 }
 0x60a   : > { %7452 = vrot.lane.b32.xlu1 %v7451_v47, %s11248_s5  ;;  %7447 = vrot.lane.b32.xlu0 %v7446_v36, %s11244_s24  ;;  %v3556_v47 = vsel %vm2026_vm14, %v3553_v15, %v3555_v34  ;;  %v3754_v36 = vrot.slane %v9834_v52, 7  ;;  %v3496_v0 = vsel %vm1058_vm1, %v3493_v31, %v3495_v63  ;;  %v3494_v38 = vsel %vm1058_vm1, %v3491_v27, %v3493_v31 }
 0x60b   : > { %v7486_v9 = vpack.i.bf16 %v3556_v47, %v3554_v40  ;;  %v3623_v17 = vrot.slane %v9924_v19, 5  ;;  %v9971_v15 = vsel %vm2026_vm14, %v3327_v37, %v3329_v1  ;;  %v3691_v27 = vsel %vm3672_vm5, %v3688_v60, %v3690_v58 }
 0x60c   : > { %v3755_v6 = vsel %vm1029_vm0, %v3752_v26, %v3754_v36  ;;  %v3756_v1 = vrot.slane %v9924_v19, 7  ;;  %v3369_v37 = vrot.slane %v9971_v15, 1  ;;  %v3499_v13 = vrot.slane %v9638_v25, 3 }
 0x60d   : > { %v3626_v33 = vsel %vm3605_vm6, %v3623_v17, %v3625_v28  ;;  %v3624_v5 = vsel %vm3605_vm6, %v3621_v22, %v3623_v17  ;;  %v3563_v48 = vrot.slane %v9638_v25, 4  ;;  %v3629_v24 = vrot.slane %v9638_v25, 5 }
 0x60e   : > { %7462 = vrot.lane.b32.xlu1 %v7461_v44, %s11250_s8  ;;  %7457 = vrot.lane.b32.xlu0 %v7456_v14, %s11247_s4  ;;  %v3365_v44 = vrot.slane %v9924_v19, 1  ;;  %v7501_v14 = vpack.i.bf16 %v3755_v6, %v3753_v62  ;;  %v7526_v12 = vpack.i.bf16 %v3626_v33, %v3624_v5  ;;  %v3372_v26 = vsel %vm1176_vm2, %v3369_v37, %v3371_v61 }
 0x60f   : > { %v3757_v22 = vsel %vm1029_vm0, %v3754_v36, %v3756_v1  ;;  %v3370_v60 = vsel %vm1176_vm2, %v3367_v55, %v3369_v37  ;;  %v3696_v41 = vrot.slane %v9638_v25, 6  ;;  %v3760_v31 = vrot.slane %v9971_v15, 7 }
 0x610   : > { %v3368_v3 = vsel %vm1176_vm2, %v3365_v44, %v3367_v55  ;;  %v3366_v30 = vsel %vm1176_vm2, %v3363_v46, %v3365_v44  ;;  %v3558_v46 = vsel %vm2026_vm14, %v3555_v34, %v3557_v23  ;;  %v3758_v34 = vrot.slane %v9911_v11, 7 }
 0x611   : > { %v7541_v20 = vpack.i.bf16 %v3372_v26, %v3370_v60  ;;  %v3561_v44 = vrot.slane %v9971_v15, 4  ;;  %v10035_v17 = vrot.slane %v11222_v16, 6 }
 0x612   : > { %7472 = vrot.lane.b32.xlu1 %v7471_v50, %s11240_s26  ;;  %7467 = vrot.lane.b32.xlu0 %v7466_v43, %s11249_s6  ;;  %v7506_v50 = vpack.i.bf16 %v3368_v3, %v3366_v30  ;;  %v3560_v43 = vsel %vm2026_vm14, %v3557_v23, %v3559_v35  ;;  %v3759_v40 = vsel %vm1029_vm0, %v3756_v1, %v3758_v34  ;;  %v3762_v30 = vrot.slane %v9638_v25, 7 }
 0x613   : > { %v7521_v45 = vpack.i.bf16 %v3560_v43, %v3558_v46  ;;  %v7536_v6 = vpack.i.bf16 %v3759_v40, %v3757_v22  ;;  %v3564_v21 = vsel %vm2026_vm14, %v3561_v44, %v3563_v48  ;;  %v3694_v23 = vrot.slane %v9971_v15, 6 }
 0x615   : > { %v3697_v43 = vsel %vm3672_vm5, %v3694_v23, %v3696_v41  ;;  %v3695_v46 = vsel %vm3672_vm5, %v3692_v29, %v3694_v23 }
 0x616   : > { %7482 = vrot.lane.b32.xlu1 %v7481_v42, %s11244_s24  ;;  %7477 = vrot.lane.b32.xlu0 %v7476_v2, %s11245_s3  ;;  %v7516_v42 = vpack.i.bf16 %v3496_v0, %v3494_v38  ;;  %v3693_v2 = vsel %vm3672_vm5, %v3690_v58, %v3692_v29  ;;  %v3763_v0 = vsel %vm1029_vm0, %v3760_v31, %v3762_v30  ;;  %v10032_v58 = vrot.slane %v11222_v16, 5 }
 0x617   : > { %v7531_v47 = vpack.i.bf16 %v3693_v2, %v3691_v27  ;;  %v7566_v38 = vpack.i.bf16 %v3697_v43, %v3695_v46 }
 0x618   : > { %v3632_v29 = vsel %vm3605_vm6, %v3629_v24, %v10032_v58 }
 0x61a   : > { %7492 = vrot.lane.b32.xlu1 %v7491_v8, %s11247_s4  ;;  %7487 = vrot.lane.b32.xlu0 %v7486_v9, %s11248_s5  ;;  %v3433_v8 = vrot.slane %v9971_v15, 2  ;;  %v3497_v9 = vrot.slane %v9971_v15, 3 }
 0x61c   : > { %v3436_v61 = vsel %vm1259_vm3, %v3433_v8, %v3435_v7  ;;  %v3500_v62 = vsel %vm1058_vm1, %v3497_v9, %v3499_v13  ;;  %v3434_v36 = vsel %vm1259_vm3, %v3431_v59, %v3433_v8  ;;  %v3498_v55 = vsel %vm1058_vm1, %v3495_v63, %v3497_v9 }
 0x61d   : > { %v3627_v7 = vrot.slane %v9971_v15, 5  ;;  %v3562_v59 = vsel %vm2026_vm14, %v3559_v35, %v3561_v44  ;;  %v3761_v35 = vsel %vm1029_vm0, %v3758_v34, %v3760_v31 }
 0x61e   : > { %7502 = vrot.lane.b32.xlu1 %v7501_v14, %s11249_s6  ;;  %7497 = vrot.lane.b32.xlu0 %v7496_v4, %s11250_s8  ;;  %v7546_v14 = vpack.i.bf16 %v3436_v61, %v3434_v36  ;;  %v7551_v4 = vpack.i.bf16 %v3500_v62, %v3498_v55 }
 0x61f   : > { %v3630_v3 = vsel %vm3605_vm6, %v3627_v7, %v3629_v24  ;;  %v3628_v63 = vsel %vm3605_vm6, %v3625_v28, %v3627_v7  ;;  %v7571_v28 = vpack.i.bf16 %v3763_v0, %v3761_v35 }
 0x622   : > { %7512 = vrot.lane.b32.xlu1 %v7511_v53, %s11245_s3  ;;  %7507 = vrot.lane.b32.xlu0 %v7506_v50, %s11240_s26  ;;  %v7556_v53 = vpack.i.bf16 %v3564_v21, %v3562_v59  ;;  %v7561_v50 = vpack.i.bf16 %v3630_v3, %v3628_v63 }
 0x626   : > { %7522 = vrot.lane.b32.xlu1 %v7521_v45, %s11248_s5  ;;  %7517 = vrot.lane.b32.xlu0 %v7516_v42, %s11244_s24  ;;  %v3699_v45 = vsel %vm3672_vm5, %v3696_v41, %v10035_v17  ;;  %v10044_v42 = vrot.slane %v11222_v16, 7 }
 0x628   : > { %v3765_v2 = vsel %vm1029_vm0, %v3762_v30, %v10044_v42 }
 0x62a   : > { %7532 = vrot.lane.b32.xlu1 %v7531_v47, %s11250_s8  ;;  %7527 = vrot.lane.b32.xlu0 %v7526_v12, %s11247_s4 }
 0x62e   : > { %7537 = vrot.lane.b32.xlu0 %v7536_v6, %s11249_s6  ;;  %7542 = vrot.lane.b32.xlu1 %v7541_v20, %s11240_s26  ;;  %s11267_s26 = sld [smem:[#allocation14_spill]] }
 0x632   : > { %7547 = vrot.lane.b32.xlu0 %v7546_v14, %s11245_s3  ;;  %7552 = vrot.lane.b32.xlu1 %v7551_v4, %s11244_s24 }
 0x636   : > { %7557 = vrot.lane.b32.xlu0 %v7556_v53, %s11248_s5  ;;  %7562 = vrot.lane.b32.xlu1 %v7561_v50, %s11247_s4 }
 0x63a   : > { %7567 = vrot.lane.b32.xlu0 %v7566_v38, %s11250_s8  ;;  %7572 = vrot.lane.b32.xlu1 %v7571_v28, %s11249_s6 }
 0x63e   : > { %3525 = vrot.lane.b32.xlu0 %v3499_v13, %s11244_s24  ;;  %3589 = vrot.lane.b32.xlu1 %v3563_v48, %s11248_s5  ;;  %s11265_s24 = sld [smem:[#allocation12_spill]] }
 0x642   : > { %3657 = vrot.lane.b32.xlu0 %v3632_v29, %s11247_s4  ;;  %3724 = vrot.lane.b32.xlu1 %v3699_v45, %s11250_s8  ;;  %v3903_v29 = vpack.c.bf16 %v9678_v56, %v9692_v39  ;;  %s11263_s4 = sld [smem:[#allocation13_spill]] }
 0x646   : > { %3790 = vrot.lane.b32.xlu0 %v3765_v2, %s11249_s6  ;;  %s11266_s6 = sld [smem:[#allocation15_spill]] }
 0x658   : > { %v10051_v33 = vpop.permute.xlu1 %3461  ;;  %v10053_v34 = vpop.permute.xlu0 %3397 }
 0x65c   : > { %v7373_v27 = vpop.permute.xlu1 %7372  ;;  %v7368_v5 = vpop.permute.xlu0 %7367 }
 0x65d   : > { %v7370_v1 = vunpack.i.h.bf16 %v7368_v5  ;;  %v7369_v37 = vunpack.i.l.bf16 %v7368_v5  ;;  %v7375_v47 = vunpack.i.h.bf16 %v7373_v27  ;;  %v7374_v12 = vunpack.i.l.bf16 %v7373_v27 }
 0x65f   : > { %v3806_v40 = vsel %vm1553_vm4, %v9589_v57, %v7370_v1  ;;  %v3805_v26 = vsel %vm1553_vm4, %v9614_v49, %v7369_v37 }
 0x660   : > { %v7383_v13 = vpop.permute.xlu1 %7382  ;;  %v7378_v22 = vpop.permute.xlu0 %7377  ;;  %v3818_v20 = vsel %vm1567_vm9, %v3805_v26, %v7374_v12  ;;  %v3819_v61 = vsel %vm1567_vm9, %v3806_v40, %v7375_v47 }
 0x661   : > { %v7380_v60 = vunpack.i.h.bf16 %v7378_v22  ;;  %v7379_v8 = vunpack.i.l.bf16 %v7378_v22  ;;  %v7385_v9 = vunpack.i.h.bf16 %v7383_v13  ;;  %v7384_v6 = vunpack.i.l.bf16 %v7383_v13 }
 0x663   : > { %v3831_v62 = vsel %vm11253_vm10, %v3818_v20, %v7379_v8  ;;  %v3832_v48 = vsel %vm11254_vm7, %v3819_v61, %v7380_v60  ;;  %vm11256_vm10 = vmmov %vm11254_vm7 }
 0x664   : > { %v7393_v24 = vpop.permute.xlu1 %7392  ;;  %v7388_v57 = vpop.permute.xlu0 %7387  ;;  %v3845_v7 = vsel %vm3844_vm11, %v3831_v62, %v7384_v6  ;;  %v3846_v14 = vsel %vm3844_vm11, %v3832_v48, %v7385_v9 }
 0x665   : > { %v7390_v36 = vunpack.i.h.bf16 %v7388_v57  ;;  %v7389_v49 = vunpack.i.l.bf16 %v7388_v57  ;;  %v7395_v55 = vunpack.i.h.bf16 %v7393_v24  ;;  %v7394_v44 = vunpack.i.l.bf16 %v7393_v24 }
 0x667   : > { %v3859_v4 = vsel %vm3858_vm12, %v3845_v7, %v7389_v49  ;;  %v3860_v21 = vsel %vm3858_vm12, %v3846_v14, %v7390_v36 }
 0x668   : > { %v7403_v3 = vpop.permute.xlu1 %7402  ;;  %v7398_v41 = vpop.permute.xlu0 %7397  ;;  %v3873_v31 = vsel %vm3872_vm13, %v3859_v4, %v7394_v44  ;;  %v3874_v53 = vsel %vm3872_vm13, %v3860_v21, %v7395_v55 }
 0x669   : > { %v7400_v30 = vunpack.i.h.bf16 %v7398_v41  ;;  %v7399_v59 = vunpack.i.l.bf16 %v7398_v41  ;;  %v7405_v63 = vunpack.i.h.bf16 %v7403_v3  ;;  %v7404_v23 = vunpack.i.l.bf16 %v7403_v3 }
 0x66b   : > { %v3887_v50 = vsel %vm3886_vm8, %v3873_v31, %v7399_v59  ;;  %v3888_v43 = vsel %vm3886_vm8, %v3874_v53, %v7400_v30  ;;  %v3808_v45 = vsel %vm1553_vm4, %v9692_v39, %v7405_v63  ;;  %v3807_v2 = vsel %vm1553_vm4, %v9594_v51, %v7404_v23 }
 0x66c   : > { %v3900_v0 = vpack.c.bf16 %v3888_v43, %v3887_v50  ;;  %v7413_v46 = vpop.permute.xlu1 %7412  ;;  %v7408_v35 = vpop.permute.xlu0 %7407  ;;  %v3905_v23 = vpack.c.bf16 %v9765_v18, %v9782_v32 }
 0x66d   : > { %v7410_v38 = vunpack.i.h.bf16 %v7408_v35  ;;  %v7409_v28 = vunpack.i.l.bf16 %v7408_v35  ;;  %v7415_v27 = vunpack.i.h.bf16 %v7413_v46  ;;  %v7414_v5 = vunpack.i.l.bf16 %v7413_v46 }
 0x66e   : > { %4047 = vmatmul.mubr.bf16.vlgmr.msra.gmra.mrb[28].mxu0 %v3900_v0 }
 0x66f   : > { %v3821_v1 = vsel %vm1567_vm9, %v3808_v45, %v7410_v38  ;;  %v3820_v37 = vsel %vm1567_vm9, %v3807_v2, %v7409_v28  ;;  %6712 = vmatprep.mubr.msk.bf16.mxu0 %vm1553_vm4, %v3903_v29 }
 0x670   : > { %v7423_v47 = vpop.permute.xlu1 %7422  ;;  %v7418_v12 = vpop.permute.xlu0 %7417  ;;  %v3833_v39 = vsel %vm11255_vm15, %v3820_v37, %v7414_v5  ;;  %v3834_v60 = vsel %vm11256_vm10, %v3821_v1, %v7415_v27  ;;  %vm11257_vm15 = vmmov %vm11254_vm7 }
 0x671   : > { %v7420_v40 = vunpack.i.h.bf16 %v7418_v12  ;;  %v7419_v26 = vunpack.i.l.bf16 %v7418_v12  ;;  %v7425_v13 = vunpack.i.h.bf16 %v7423_v47  ;;  %v7424_v22 = vunpack.i.l.bf16 %v7423_v47  ;;  %vm11258_vm10 = vmmov %vm11254_vm7 }
 0x673   : > { %v3847_v51 = vsel %vm3844_vm11, %v3833_v39, %v7419_v26  ;;  %v3848_v8 = vsel %vm3844_vm11, %v3834_v60, %v7420_v40 }
 0x674   : > { %v7433_v9 = vpop.permute.xlu1 %7432  ;;  %v7428_v6 = vpop.permute.xlu0 %7427  ;;  %v3861_v24 = vsel %vm3858_vm12, %v3847_v51, %v7424_v22  ;;  %v3862_v57 = vsel %vm3858_vm12, %v3848_v8, %v7425_v13 }
 0x675   : > { %v7435_v20 = vunpack.i.h.bf16 %v7433_v9  ;;  %v7434_v61 = vunpack.i.l.bf16 %v7433_v9  ;;  %v7430_v62 = vunpack.i.h.bf16 %v7428_v6  ;;  %v7429_v48 = vunpack.i.l.bf16 %v7428_v6 }
 0x677   : > { %v3875_v36 = vsel %vm3872_vm13, %v3861_v24, %v7429_v48  ;;  %v3876_v49 = vsel %vm3872_vm13, %v3862_v57, %v7430_v62  ;;  %v3907_v57 = vpack.c.bf16 %v9834_v52, %v9849_v10 }
 0x678   : > { %v7443_v55 = vpop.permute.xlu1 %7442  ;;  %v7438_v44 = vpop.permute.xlu0 %7437  ;;  %v3889_v7 = vsel %vm3886_vm8, %v3875_v36, %v7434_v61  ;;  %v3890_v14 = vsel %vm3886_vm8, %v3876_v49, %v7435_v20 }
 0x679   : > { %v7440_v4 = vunpack.i.h.bf16 %v7438_v44  ;;  %v7439_v21 = vunpack.i.l.bf16 %v7438_v44  ;;  %v7445_v3 = vunpack.i.h.bf16 %v7443_v55  ;;  %v7444_v41 = vunpack.i.l.bf16 %v7443_v55 }
 0x67a   : > { %v3902_v30 = vpack.c.bf16 %v3890_v14, %v3889_v7 }
 0x67b   : > { %v3810_v59 = vsel %vm1553_vm4, %v9782_v32, %v7440_v4  ;;  %v3809_v63 = vsel %vm1553_vm4, %v9678_v56, %v7439_v21 }
 0x67c   : > { %4055 = vmatmul.mubr.bf16.gmra.mrb[32].mxu0 %v3902_v30  ;;  %v7453_v31 = vpop.permute.xlu1 %7452  ;;  %v7448_v53 = vpop.permute.xlu0 %7447  ;;  %v3822_v35 = vsel %vm1567_vm9, %v3809_v63, %v7444_v41  ;;  %v3823_v38 = vsel %vm1567_vm9, %v3810_v59, %v7445_v3 }
 0x67d   : > { %v7450_v50 = vunpack.i.h.bf16 %v7448_v53  ;;  %v7449_v43 = vunpack.i.l.bf16 %v7448_v53  ;;  %6713 = vmatprep.mubr.msk.bf16.mxu0 %vm1553_vm4, %v3905_v23  ;;  %v7455_v0 = vunpack.i.h.bf16 %v7453_v31  ;;  %v7454_v46 = vunpack.i.l.bf16 %v7453_v31 }
 0x67f   : > { %v3835_v28 = vsel %vm11254_vm7, %v3822_v35, %v7449_v43  ;;  %v3836_v56 = vsel %vm11257_vm15, %v3823_v38, %v7450_v50  ;;  %vm11259_vm15 = vmmov %vm11254_vm7 }
 0x680   : > { %v7463_v29 = vpop.permute.xlu1 %7462  ;;  %v7458_v45 = vpop.permute.xlu0 %7457  ;;  %v3849_v1 = vsel %vm3844_vm11, %v3835_v28, %v7454_v46  ;;  %v3850_v37 = vsel %vm3844_vm11, %v3836_v56, %v7455_v0 }
 0x681   : > { %v7460_v32 = vunpack.i.h.bf16 %v7458_v45  ;;  %v7459_v2 = vunpack.i.l.bf16 %v7458_v45  ;;  %v7465_v27 = vunpack.i.h.bf16 %v7463_v29  ;;  %v7464_v5 = vunpack.i.l.bf16 %v7463_v29 }
 0x683   : > { %v3863_v47 = vsel %vm3858_vm12, %v3849_v1, %v7459_v2  ;;  %v3864_v12 = vsel %vm3858_vm12, %v3850_v37, %v7460_v32 }
 0x684   : > { %v7473_v40 = vpop.permute.xlu1 %7472  ;;  %v7468_v26 = vpop.permute.xlu0 %7467  ;;  %v3877_v51 = vsel %vm3872_vm13, %v3863_v47, %v7464_v5  ;;  %v3878_v8 = vsel %vm3872_vm13, %v3864_v12, %v7465_v27 }
 0x685   : > { %v7470_v13 = vunpack.i.h.bf16 %v7468_v26  ;;  %v7469_v22 = vunpack.i.l.bf16 %v7468_v26  ;;  %v7475_v39 = vunpack.i.h.bf16 %v7473_v40  ;;  %v7474_v60 = vunpack.i.l.bf16 %v7473_v40 }
 0x686   : > { %v3909_v26 = vpack.c.bf16 %v9911_v11, %v9924_v19 }
 0x687   : > { %v3891_v9 = vsel %vm3886_vm8, %v3877_v51, %v7469_v22  ;;  %v3892_v6 = vsel %vm3886_vm8, %v3878_v8, %v7470_v13  ;;  %v3812_v36 = vsel %vm1553_vm4, %v9849_v10, %v7475_v39  ;;  %v3811_v49 = vsel %vm1553_vm4, %v9765_v18, %v7474_v60 }
 0x688   : > { %v7483_v20 = vpop.permute.xlu1 %7482  ;;  %v7478_v61 = vpop.permute.xlu0 %7477  ;;  %v3904_v62 = vpack.c.bf16 %v3892_v6, %v3891_v9 }
 0x689   : > { %v7480_v48 = vunpack.i.h.bf16 %v7478_v61  ;;  %v7479_v24 = vunpack.i.l.bf16 %v7478_v61  ;;  %v7485_v55 = vunpack.i.h.bf16 %v7483_v20  ;;  %v7484_v44 = vunpack.i.l.bf16 %v7483_v20 }
 0x68a   : > { %4063 = vmatmul.mubr.bf16.gmra.mrb[36].mxu0 %v3904_v62 }
 0x68b   : > { %v3825_v7 = vsel %vm1567_vm9, %v3812_v36, %v7480_v48  ;;  %v3824_v14 = vsel %vm1567_vm9, %v3811_v49, %v7479_v24  ;;  %6714 = vmatprep.mubr.msk.bf16.mxu0 %vm1553_vm4, %v3907_v57 }
 0x68c   : > { %v7493_v4 = vpop.permute.xlu1 %7492  ;;  %v7488_v21 = vpop.permute.xlu0 %7487  ;;  %v3837_v10 = vsel %vm11258_vm10, %v3824_v14, %v7484_v44  ;;  %v3838_v63 = vsel %vm11254_vm7, %v3825_v7, %v7485_v55  ;;  %vm11260_vm10 = vmmov %vm11254_vm7 }
 0x68d   : > { %v7490_v3 = vunpack.i.h.bf16 %v7488_v21  ;;  %v7489_v41 = vunpack.i.l.bf16 %v7488_v21  ;;  %v7495_v30 = vunpack.i.h.bf16 %v7493_v4  ;;  %v7494_v59 = vunpack.i.l.bf16 %v7493_v4 }
 0x68f   : > { %v3851_v18 = vsel %vm3844_vm11, %v3837_v10, %v7489_v41  ;;  %v3852_v23 = vsel %vm3844_vm11, %v3838_v63, %v7490_v3 }
 0x690   : > { %v7503_v31 = vpop.permute.xlu1 %7502  ;;  %v7498_v53 = vpop.permute.xlu0 %7497  ;;  %v3865_v35 = vsel %vm3858_vm12, %v3851_v18, %v7494_v59  ;;  %v3866_v38 = vsel %vm3858_vm12, %v3852_v23, %v7495_v30 }
 0x691   : > { %v7505_v50 = vunpack.i.h.bf16 %v7503_v31  ;;  %v7504_v43 = vunpack.i.l.bf16 %v7503_v31  ;;  %v7500_v0 = vunpack.i.h.bf16 %v7498_v53  ;;  %v7499_v46 = vunpack.i.l.bf16 %v7498_v53 }
 0x693   : > { %v3879_v28 = vsel %vm3872_vm13, %v3865_v35, %v7499_v46  ;;  %v3880_v56 = vsel %vm3872_vm13, %v3866_v38, %v7500_v0 }
 0x694   : > { %v7513_v29 = vpop.permute.xlu1 %7512  ;;  %v7508_v45 = vpop.permute.xlu0 %7507  ;;  %v3893_v32 = vsel %vm3886_vm8, %v3879_v28, %v7504_v43  ;;  %v3894_v2 = vsel %vm3886_vm8, %v3880_v56, %v7505_v50  ;;  %v3911_v43 = vpack.c.bf16 %v9638_v25, %v9971_v15 }
 0x695   : > { %v7510_v27 = vunpack.i.h.bf16 %v7508_v45  ;;  %v7509_v5 = vunpack.i.l.bf16 %v7508_v45  ;;  %v7515_v1 = vunpack.i.h.bf16 %v7513_v29  ;;  %v7514_v37 = vunpack.i.l.bf16 %v7513_v29 }
 0x696   : > { %v3906_v47 = vpack.c.bf16 %v3894_v2, %v3893_v32 }
 0x697   : > { %v3814_v12 = vsel %vm1553_vm4, %v9924_v19, %v7510_v27  ;;  %v3813_v40 = vsel %vm1553_vm4, %v9834_v52, %v7509_v5 }
 0x698   : > { %4071 = vmatmul.mubr.bf16.gmra.mrb[40].mxu0 %v3906_v47  ;;  %v7523_v13 = vpop.permute.xlu1 %7522  ;;  %v7518_v22 = vpop.permute.xlu0 %7517  ;;  %v3826_v9 = vsel %vm1567_vm9, %v3813_v40, %v7514_v37  ;;  %v3827_v6 = vsel %vm1567_vm9, %v3814_v12, %v7515_v1  ;;  %v3817_v47 = vsel %vm1553_vm4, %v9638_v25, %v10053_v34 }
 0x699   : > { %v7520_v39 = vunpack.i.h.bf16 %v7518_v22  ;;  %v7519_v60 = vunpack.i.l.bf16 %v7518_v22  ;;  %6715 = vmatprep.mubr.msk.bf16.mxu0 %vm1553_vm4, %v3909_v26  ;;  %v7525_v51 = vunpack.i.h.bf16 %v7523_v13  ;;  %v7524_v8 = vunpack.i.l.bf16 %v7523_v13 }
 0x69b   : > { %v3839_v20 = vsel %vm11259_vm15, %v3826_v9, %v7519_v60  ;;  %v3840_v52 = vsel %vm11260_vm10, %v3827_v6, %v7520_v39  ;;  %vm11261_vm15 = vmmov %vm11254_vm7  ;;  %v3830_v6 = vsel %vm1567_vm9, %v3817_v47, %v10051_v33  ;;  %vm11264_vm10 = vmmov 0  }
 0x69c   : > { %v7533_v61 = vpop.permute.xlu1 %7532  ;;  %v7528_v62 = vpop.permute.xlu0 %7527  ;;  %v3853_v36 = vsel %vm3844_vm11, %v3839_v20, %v7524_v8  ;;  %v3854_v49 = vsel %vm3844_vm11, %v3840_v52, %v7525_v51 }
 0x69d   : > { %v7530_v19 = vunpack.i.h.bf16 %v7528_v62  ;;  %v7529_v48 = vunpack.i.l.bf16 %v7528_v62  ;;  %v7535_v24 = vunpack.i.h.bf16 %v7533_v61  ;;  %v7534_v57 = vunpack.i.l.bf16 %v7533_v61 }
 0x69f   : > { %v3867_v55 = vsel %vm3858_vm12, %v3853_v36, %v7529_v48  ;;  %v3868_v44 = vsel %vm3858_vm12, %v3854_v49, %v7530_v19 }
 0x6a0   : > { %v7538_v7 = vpop.permute.xlu0 %7537  ;;  %v7543_v14 = vpop.permute.xlu1 %7542  ;;  %v3881_v30 = vsel %vm3872_vm13, %v3867_v55, %v7534_v57  ;;  %v3882_v59 = vsel %vm3872_vm13, %v3868_v44, %v7535_v24  ;;  %v8176_v24 = vmov 0.0|0.0  }
 0x6a1   : > { %v7540_v4 = vunpack.i.h.bf16 %v7538_v7  ;;  %v7539_v21 = vunpack.i.l.bf16 %v7538_v7  ;;  %v7545_v3 = vunpack.i.h.bf16 %v7543_v14  ;;  %v7544_v41 = vunpack.i.l.bf16 %v7543_v14  ;;  %v7843_v7 = vld [vmem:[%s11263_s4 + $0x80] sm:$0xff]   ;;  %v7844_v14 = vld [vmem:[%s11263_s4 + $0x88] sm:$0xff]  }
 0x6a2   : > { %7110 = vmatpush3.bf16.msra.mxu0 %v7843_v7 }
 0x6a3   : > { %v3895_v10 = vsel %vm3886_vm8, %v3881_v30, %v7539_v21  ;;  %v3896_v63 = vsel %vm3886_vm8, %v3882_v59, %v7540_v4  ;;  %v3816_v0 = vsel %vm1553_vm4, %v9971_v15, %v7545_v3  ;;  %v3815_v46 = vsel %vm1553_vm4, %v9911_v11, %v7544_v41  ;;  %7111 = vmatprep.subr.bf16.mxu0 %v11222_v16  ;;  %v7845_v4 = vld [vmem:[%s11263_s4 + $0x40] sm:$0xff]   ;;  %v7847_v3 = vld [vmem:[%s11263_s4 + $0x48] sm:$0xff]   ;;  %v7849_v30 = vld [vmem:[%s11263_s4 + $0x50] sm:$0xff]  }
 0x6a4   : > { %v7548_v18 = vpop.permute.xlu0 %7547  ;;  %v7553_v23 = vpop.permute.xlu1 %7552  ;;  %v3908_v31 = vpack.c.bf16 %v3896_v63, %v3895_v10  ;;  %v7846_v21 = vld [vmem:[%s11263_s4] sm:$0xff]   ;;  %6883 = vmatprep.subr.bf16.mxu1 %v7845_v4  ;;  %v7848_v41 = vld [vmem:[%s11263_s4 + $0x8] sm:$0xff]   ;;  %v7850_v59 = vld [vmem:[%s11263_s4 + $0x10] sm:$0xff]  }
 0x6a5   : > { %v7550_v53 = vunpack.i.h.bf16 %v7548_v18  ;;  %v7549_v50 = vunpack.i.l.bf16 %v7548_v18  ;;  %v7555_v35 = vunpack.i.h.bf16 %v7553_v23  ;;  %v7554_v38 = vunpack.i.l.bf16 %v7553_v23  ;;  %6884 = vmatpush3.bf16.msra.mxu1 %v7846_v21  ;;  %v7851_v10 = vld [vmem:[%s11263_s4 + $0x58] sm:$0xff]   ;;  %v7853_v18 = vld [vmem:[%s11263_s4 + $0x60] sm:$0xff]  }
 0x6a6   : > { %4079 = vmatmul.mubr.bf16.gmra.mrb[44].mxu0 %v3908_v31  ;;  %6885 = vmatprep.subr.bf16.mxu1 %v7847_v3  ;;  %v7852_v63 = vld [vmem:[%s11263_s4 + $0x18] sm:$0xff]   ;;  %v10192_v23 = vld [vmem:[%s11265_s24] ss:$0 sm:$0xff]  ;;  %s10731_s24 = scalar_lea.vmem %s8319_s22, %s8389_s11  ;;  %s11270_s11 = sld [smem:[#allocation19_spill]] }
 0x6a7   : > { %v3828_v28 = vsel %vm1567_vm9, %v3815_v46, %v7549_v50  ;;  %v3829_v56 = vsel %vm1567_vm9, %v3816_v0, %v7550_v53  ;;  %6716 = vmatprep.mubr.msk.bf16.mxu0 %vm1553_vm4, %v3911_v43  ;;  %vm11262_vm4 = vmmov %vm11254_vm7  ;;  %7112 = vmatpush3.bf16.msra.mxu0 %v7844_v14  ;;  %v7854_v31 = vld [vmem:[%s11263_s4 + $0x20] sm:$0xff]  }
 0x6a8   : > { %v7558_v29 = vpop.permute.xlu0 %7557  ;;  %v7563_v45 = vpop.permute.xlu1 %7562  ;;  %v3841_v27 = vsel %vm11254_vm7, %v3828_v28, %v7554_v38  ;;  %v3842_v15 = vsel %vm11261_vm15, %v3829_v56, %v7555_v35 }
 0x6a9   : > { %v7560_v32 = vunpack.i.h.bf16 %v7558_v29  ;;  %v7559_v2 = vunpack.i.l.bf16 %v7558_v29  ;;  %v7565_v5 = vunpack.i.h.bf16 %v7563_v45  ;;  %v7564_v1 = vunpack.i.l.bf16 %v7563_v45  ;;  %6886 = vmatpush3.bf16.msra.mxu1 %v7848_v41 }
 0x6aa   : > { %6887 = vmatprep.subr.bf16.mxu1 %v7849_v30  ;;  %v7859_v30 = vld [vmem:[%s11263_s4 + $0x78] sm:$0xff]  }
 0x6ab   : > { %v3855_v11 = vsel %vm3844_vm11, %v3841_v27, %v7559_v2  ;;  %v3856_v37 = vsel %vm3844_vm11, %v3842_v15, %v7560_v32 }
 0x6ac   : > { %v7568_v12 = vpop.permute.xlu0 %7567  ;;  %v7573_v40 = vpop.permute.xlu1 %7572  ;;  %v3869_v60 = vsel %vm3858_vm12, %v3855_v11, %v7564_v1  ;;  %v3870_v51 = vsel %vm3858_vm12, %v3856_v37, %v7565_v5 }
 0x6ad   : > { %v7570_v26 = vunpack.i.h.bf16 %v7568_v12  ;;  %v7569_v13 = vunpack.i.l.bf16 %v7568_v12  ;;  %v7575_v22 = vunpack.i.h.bf16 %v7573_v40  ;;  %v7574_v39 = vunpack.i.l.bf16 %v7573_v40  ;;  %6888 = vmatpush3.bf16.msra.mxu1 %v7850_v59  ;;  %v7855_v12 = vld [vmem:[%s11263_s4 + $0x68] sm:$0xff]   ;;  %v7860_v59 = vld [vmem:[%s11263_s4 + $0x38] sm:$0xff]  }
 0x6ae   : > { %6889 = vmatprep.subr.bf16.mxu1 %v7851_v10  ;;  %v7856_v40 = vld [vmem:[%s11263_s4 + $0x28] sm:$0xff]  }
 0x6af   : > { %v3883_v8 = vsel %vm3872_vm13, %v3869_v60, %v7569_v13  ;;  %v3884_v9 = vsel %vm3872_vm13, %v3870_v51, %v7570_v26 }
 0x6b0   : > { %v3526_v20 = vpop.permute.xlu0 %3525  ;;  %v3590_v52 = vpop.permute.xlu1 %3589  ;;  %v3897_v25 = vsel %vm3886_vm8, %v3883_v8, %v7574_v39  ;;  %v3898_v34 = vsel %vm3886_vm8, %v3884_v9, %v7575_v22  ;;  %v7857_v9 = vld [vmem:[%s11263_s4 + $0x70] sm:$0xff]  }
 0x6b1   : > { %v3843_v61 = vsel %vm11262_vm4, %v3830_v6, %v3526_v20  ;;  %v3910_v62 = vpack.c.bf16 %v3898_v34, %v3897_v25  ;;  %6890 = vmatpush3.bf16.msra.mxu1 %v7852_v63  ;;  %v7858_v6 = vld [vmem:[%s11263_s4 + $0x30] sm:$0xff]  }
 0x6b2   : > { %v3857_v19 = vsel %vm3844_vm11, %v3843_v61, %v3590_v52  ;;  %6891 = vmatprep.subr.bf16.mxu1 %v7853_v18 }
 0x6b3   : > { %4087 = vmatmul.mubr.bf16.gmra.mrb[48].mxu0 %v3910_v62 }
 0x6b4   : > { %v3658_v48 = vpop.permute.xlu0 %3657  ;;  %4094 = vmatprep.mubr.bf16.mxu0 %v8176_v24  ;;  %v3725_v57 = vpop.permute.xlu1 %3724 }
 0x6b5   : > { %v3871_v33 = vsel %vm3858_vm12, %v3857_v19, %v3658_v48  ;;  %6892 = vmatpush3.bf16.msra.mxu1 %v7854_v31 }
 0x6b6   : > { %v3885_v36 = vsel %vm3872_vm13, %v3871_v33, %v3725_v57  ;;  %6893 = vmatprep.subr.bf16.mxu1 %v7855_v12 }
 0x6b8   : > { %v3791_v49 = vpop.permute.xlu0 %3790 }
 0x6b9   : > { %v3899_v55 = vsel %vm3886_vm8, %v3885_v36, %v3791_v49  ;;  %6894 = vmatpush3.bf16.msra.mxu1 %v7856_v40 }
 0x6ba   : > { %v3912_v44 = vpack.c.bf16 %v3899_v55, %v3899_v55  ;;  %6895 = vmatprep.subr.bf16.mxu1 %v7857_v9 }
 0x6bc   : > { %4095 = vmatmul.mubr.bf16.gmra.mrb[52].mxu0 %v3912_v44 }
 0x6bd   : > { %7113 = vmatprep.mubr.msk.bf16.mxu0 %vm11264_vm10, %v11222_v16  ;;  %6896 = vmatpush3.bf16.msra.mxu1 %v7858_v6 }
 0x6be   : > { %6897 = vmatprep.subr.bf16.mxu1 %v7859_v30 }
 0x6c1   : > { %6898 = vmatpush3.bf16.msra.mxu1 %v7860_v59 }
 0x6c2   : > { %5423 = vmatprep.subr.bf16.mxu1 %v11234_v54 }
 0x741   : > { %v4048_v53 = vpop.f32.mrb[28].mxu0 }
 0x742   : > { %v4049_v50 = vadd.f32 %v10192_v23, %v4048_v53  ;;  %v4050_v43 = vpop.f32.mrb[29].mxu0 }
 0x743   : > { %v4051_v0 = vpop.f32.mrb[30].mxu0 }
 0x744   : > { %vm4102_vm12 = vcmp.ge.f32.partialorder %v4049_v50, 0.0  ;;  %v4115_v46 = vmul.f32 0.01, %v4049_v50  ;;  %v4052_v35 = vadd.f32 %v10192_v23, %v4051_v0  ;;  %v4053_v38 = vpop.f32.mrb[31].mxu0 }
 0x746   : > { %v4128_v28 = vsel %vm4102_vm12, %v4049_v50, %v4115_v46  ;;  %vm4103_vm8 = vcmp.ge.f32.partialorder %v4052_v35, 0.0  ;;  %v4116_v56 = vmul.f32 0.01, %v4052_v35 }
 0x747   : > { %v4154_v45 = vrot.slane %v4128_v28, 4 }
 0x748   : > { %v4129_v29 = vsel %vm4103_vm8, %v4052_v35, %v4116_v56 }
 0x749   : > { %v4155_v32 = vrot.slane %v4129_v29, 4  ;;  %v10205_v26 = vsel %vm2026_vm14, 0.0, %v4154_v45 }
 0x74a   : > { %v4424_v25 = vrot.slane %v10205_v26, 5  ;;  %v4194_v34 = vrot.slane %v10205_v26, 1  ;;  %v4489_v3 = vrot.slane %v10205_v26, 6  ;;  %v4258_v63 = vrot.slane %v10205_v26, 2 }
 0x74b   : > { %v10198_v2 = vsel %vm2026_vm14, %v4154_v45, %v4155_v32  ;;  %v4554_v50 = vrot.slane %v10205_v26, 7 }
 0x74c   : > { %v4425_v51 = vrot.slane %v10198_v2, 5  ;;  %v4195_v8 = vrot.slane %v10198_v2, 1  ;;  %v4490_v57 = vrot.slane %v10198_v2, 6  ;;  %v4259_v36 = vrot.slane %v10198_v2, 2 }
 0x74d   : > { %v4555_v43 = vrot.slane %v10198_v2, 7  ;;  %v4323_v28 = vrot.slane %v10198_v2, 3 }
 0x74e   : > { %v4426_v55 = vsel %vm3605_vm6, %v4424_v25, %v4425_v51  ;;  %v4196_v7 = vsel %vm1176_vm2, %v4194_v34, %v4195_v8  ;;  %v4491_v35 = vsel %vm3672_vm5, %v4489_v3, %v4490_v57  ;;  %v4260_v38 = vsel %vm1259_vm3, %v4258_v63, %v4259_v36 }
 0x74f   : > { %v4056_v27 = vpop.f32.mrb[32].mxu0 }
 0x750   : > { %v4057_v15 = vadd.f32 %v10192_v23, %v4056_v27  ;;  %v4058_v5 = vpop.f32.mrb[33].mxu0  ;;  %v4322_v27 = vrot.slane %v10205_v26, 3 }
 0x751   : > { %v4059_v1 = vpop.f32.mrb[34].mxu0 }
 0x752   : > { %vm4104_vm7 = vcmp.ge.f32.partialorder %v4057_v15, 0.0  ;;  %v4117_v11 = vmul.f32 0.01, %v4057_v15  ;;  %v4060_v37 = vadd.f32 %v10192_v23, %v4059_v1  ;;  %v4061_v47 = vpop.f32.mrb[35].mxu0  ;;  %v4324_v40 = vsel %vm1058_vm1, %v4322_v27, %v4323_v28 }
 0x754   : > { %v4130_v13 = vsel %vm4104_vm7, %v4057_v15, %v4117_v11  ;;  %vm4105_vm15 = vcmp.ge.f32.partialorder %v4060_v37, 0.0  ;;  %v4118_v22 = vmul.f32 0.01, %v4060_v37 }
 0x755   : > { %v4157_v39 = vrot.slane %v4130_v13, 4 }
 0x756   : > { %v10207_v60 = vsel %vm4105_vm15, %v4060_v37, %v4118_v22  ;;  %v4556_v37 = vsel %vm1029_vm0, %v4554_v50, %v4555_v43 }
 0x757   : > { %v10214_v20 = vsel %vm2026_vm14, %v4155_v32, %v4157_v39  ;;  %v4159_v52 = vrot.slane %v10207_v60, 4 }
 0x758   : > { %v4699_v61 = vpack.c.bf16 %v10214_v20, %v10198_v2  ;;  %v4427_v62 = vrot.slane %v10214_v20, 5  ;;  %v4197_v19 = vrot.slane %v10214_v20, 1  ;;  %v4492_v48 = vrot.slane %v10214_v20, 6 }
 0x759   : > { %v10227_v33 = vsel %vm2026_vm14, %v4157_v39, %v4159_v52  ;;  %v4261_v49 = vrot.slane %v10214_v20, 2  ;;  %v4557_v41 = vrot.slane %v10214_v20, 7  ;;  %v4325_v31 = vrot.slane %v10214_v20, 3 }
 0x75a   : > { %7114 = vmatmul.mubr.msk.bf16.vlgmr.msra.gmra.mrb[56].mxu0 %vm1567_vm9, %v4699_v61  ;;  %v4428_v44 = vsel %vm3605_vm6, %v4425_v51, %v4427_v62  ;;  %v4198_v14 = vsel %vm1176_vm2, %v4195_v8, %v4197_v19  ;;  %v4493_v10 = vsel %vm3672_vm5, %v4490_v57, %v4492_v48  ;;  %v4429_v51 = vrot.slane %v10227_v33, 5 }
 0x75b   : > { %v7576_v4 = vpack.i.bf16 %v4428_v44, %v4426_v55  ;;  %v7581_v21 = vpack.i.bf16 %v4198_v14, %v4196_v7  ;;  %7117 = vmatprep.mubr.msk.bf16.mxu0 %vm11264_vm10, %v11222_v16  ;;  %v4262_v18 = vsel %vm1259_vm3, %v4259_v36, %v4261_v49  ;;  %v7586_v29 = vpack.i.bf16 %v4493_v10, %v4491_v35 }
 0x75c   : > { %v7591_v45 = vpack.i.bf16 %v4262_v18, %v4260_v38  ;;  %v4558_v32 = vsel %vm1029_vm0, %v4555_v43, %v4557_v41  ;;  %v4326_v11 = vsel %vm1058_vm1, %v4323_v28, %v4325_v31  ;;  %v4199_v9 = vrot.slane %v10227_v33, 1 }
 0x75d   : > { %7577 = vrot.lane.b32.xlu1 %v7576_v4, %s11245_s3  ;;  %7582 = vrot.lane.b32.xlu0 %v7581_v21, %s11245_s3  ;;  %v4064_v53 = vpop.f32.mrb[36].mxu0  ;;  %v7596_v22 = vpack.i.bf16 %v4558_v32, %v4556_v37  ;;  %v7601_v39 = vpack.i.bf16 %v4326_v11, %v4324_v40  ;;  %v4430_v60 = vsel %vm3605_vm6, %v4427_v62, %v4429_v51  ;;  %v4263_v21 = vrot.slane %v10227_v33, 2 }
 0x75e   : > { %v4065_v0 = vadd.f32 %v10192_v23, %v4064_v53  ;;  %v4066_v46 = vpop.f32.mrb[37].mxu0  ;;  %v4200_v14 = vsel %vm1176_vm2, %v4197_v19, %v4199_v9  ;;  %v4559_v18 = vrot.slane %v10227_v33, 7 }
 0x75f   : > { %v4067_v56 = vpop.f32.mrb[38].mxu0  ;;  %v4327_v46 = vrot.slane %v10227_v33, 3 }
 0x760   : > { %vm4106_vm4 = vcmp.ge.f32.partialorder %v4065_v0, 0.0  ;;  %v4119_v15 = vmul.f32 0.01, %v4065_v0  ;;  %v4068_v5 = vadd.f32 %v10192_v23, %v4067_v56  ;;  %v4069_v1 = vpop.f32.mrb[39].mxu0 }
 0x761   : > { %7587 = vrot.lane.b32.xlu1 %v7586_v29, %s11248_s5  ;;  %7592 = vrot.lane.b32.xlu0 %v7591_v45, %s11248_s5 }
 0x762   : > { %v4132_v47 = vsel %vm4106_vm4, %v4065_v0, %v4119_v15  ;;  %vm4107_vm12 = vcmp.ge.f32.partialorder %v4068_v5, 0.0  ;;  %v4120_v12 = vmul.f32 0.01, %v4068_v5  ;;  %v4264_v0 = vsel %vm1259_vm3, %v4261_v49, %v4263_v21 }
 0x763   : > { %v4161_v13 = vrot.slane %v4132_v47, 4  ;;  %v4560_v49 = vsel %vm1029_vm0, %v4557_v41, %v4559_v18 }
 0x764   : > { %v4133_v8 = vsel %vm4107_vm12, %v4068_v5, %v4120_v12  ;;  %v4328_v5 = vsel %vm1058_vm1, %v4325_v31, %v4327_v46 }
 0x765   : > { %v10281_v6 = vsel %vm2026_vm14, %v4159_v52, %v4161_v13  ;;  %v4163_v25 = vrot.slane %v4133_v8, 4  ;;  %7597 = vrot.lane.b32.xlu1 %v7596_v22, %s11250_s8  ;;  %7602 = vrot.lane.b32.xlu0 %v7601_v39, %s11250_s8  ;;  %v4494_v52 = vrot.slane %v10227_v33, 6 }
 0x766   : > { %v4702_v34 = vpack.c.bf16 %v10281_v6, %v10227_v33  ;;  %v4431_v61 = vrot.slane %v10281_v6, 5  ;;  %v4201_v57 = vrot.slane %v10281_v6, 1  ;;  %v4496_v36 = vrot.slane %v10281_v6, 6 }
 0x767   : > { %v10291_v55 = vsel %vm2026_vm14, %v4161_v13, %v4163_v25  ;;  %v4265_v44 = vrot.slane %v10281_v6, 2  ;;  %v4561_v30 = vrot.slane %v10281_v6, 7  ;;  %v4329_v10 = vrot.slane %v10281_v6, 3 }
 0x768   : > { %7118 = vmatmul.mubr.msk.bf16.gmra.mrb[60].mxu0 %vm1567_vm9, %v4702_v34  ;;  %v4432_v7 = vsel %vm3605_vm6, %v4429_v51, %v4431_v61  ;;  %v4202_v4 = vsel %vm1176_vm2, %v4199_v9, %v4201_v57  ;;  %v4497_v59 = vsel %vm3672_vm5, %v4494_v52, %v4496_v36  ;;  %v4495_v43 = vsel %vm3672_vm5, %v4492_v48, %v4494_v52 }
 0x769   : > { %v7606_v3 = vpack.i.bf16 %v4432_v7, %v4430_v60  ;;  %v7611_v62 = vpack.i.bf16 %v4202_v4, %v4200_v14  ;;  %7121 = vmatprep.mubr.msk.bf16.mxu0 %vm11264_vm10, %v11222_v16  ;;  %v4266_v19 = vsel %vm1259_vm3, %v4263_v21, %v4265_v44  ;;  %v7616_v38 = vpack.i.bf16 %v4497_v59, %v4495_v43 }
 0x76a   : > { %v7621_v28 = vpack.i.bf16 %v4266_v19, %v4264_v0  ;;  %v4562_v56 = vsel %vm1029_vm0, %v4559_v18, %v4561_v30  ;;  %v4330_v48 = vsel %vm1058_vm1, %v4327_v46, %v4329_v10  ;;  %v4433_v47 = vrot.slane %v10291_v55, 5 }
 0x76b   : > { %v4072_v63 = vpop.f32.mrb[40].mxu0  ;;  %7607 = vrot.lane.b32.xlu1 %v7606_v3, %s11245_s3  ;;  %7612 = vrot.lane.b32.xlu0 %v7611_v62, %s11245_s3  ;;  %v7626_v11 = vpack.i.bf16 %v4562_v56, %v4560_v49  ;;  %v7631_v37 = vpack.i.bf16 %v4330_v48, %v4328_v5  ;;  %v4203_v40 = vrot.slane %v10291_v55, 1  ;;  %v4267_v14 = vrot.slane %v10291_v55, 2 }
 0x76c   : > { %v4073_v53 = vadd.f32 %v10192_v23, %v4072_v63  ;;  %v4074_v50 = vpop.f32.mrb[41].mxu0  ;;  %v4434_v9 = vsel %vm3605_vm6, %v4431_v61, %v4433_v47  ;;  %v4563_v19 = vrot.slane %v10291_v55, 7  ;;  %v4331_v43 = vrot.slane %v10291_v55, 3 }
 0x76d   : > { %v4075_v35 = vpop.f32.mrb[42].mxu0  ;;  %v4204_v52 = vsel %vm1176_vm2, %v4201_v57, %v4203_v40  ;;  %v4268_v50 = vsel %vm1259_vm3, %v4265_v44, %v4267_v14 }
 0x76e   : > { %vm4108_vm8 = vcmp.ge.f32.partialorder %v4073_v53, 0.0  ;;  %v4121_v29 = vmul.f32 0.01, %v4073_v53  ;;  %v4076_v45 = vadd.f32 %v10192_v23, %v4075_v35  ;;  %v4077_v32 = vpop.f32.mrb[43].mxu0  ;;  %v4564_v44 = vsel %vm1029_vm0, %v4561_v30, %v4563_v19 }
 0x76f   : > { %7617 = vrot.lane.b32.xlu1 %v7616_v38, %s11248_s5  ;;  %7622 = vrot.lane.b32.xlu0 %v7621_v28, %s11248_s5  ;;  %v4332_v48 = vsel %vm1058_vm1, %v4329_v10, %v4331_v43 }
 0x770   : > { %v4134_v27 = vsel %vm4108_vm8, %v4073_v53, %v4121_v29  ;;  %vm4109_vm7 = vcmp.ge.f32.partialorder %v4076_v45, 0.0  ;;  %v4122_v15 = vmul.f32 0.01, %v4076_v45 }
 0x771   : > { %v4165_v1 = vrot.slane %v4134_v27, 4 }
 0x772   : > { %v4135_v12 = vsel %vm4109_vm7, %v4076_v45, %v4122_v15 }
 0x773   : > { %v10346_v13 = vsel %vm2026_vm14, %v4163_v25, %v4165_v1  ;;  %v4167_v22 = vrot.slane %v4135_v12, 4  ;;  %7627 = vrot.lane.b32.xlu1 %v7626_v11, %s11250_s8  ;;  %7632 = vrot.lane.b32.xlu0 %v7631_v37, %s11250_s8  ;;  %v4498_v25 = vrot.slane %v10291_v55, 6 }
 0x774   : > { %v4705_v41 = vpack.c.bf16 %v10346_v13, %v10291_v55  ;;  %v4435_v31 = vrot.slane %v10346_v13, 5  ;;  %v4205_v39 = vrot.slane %v10346_v13, 1  ;;  %v4500_v51 = vrot.slane %v10346_v13, 6 }
 0x775   : > { %v10356_v8 = vsel %vm2026_vm14, %v4165_v1, %v4167_v22  ;;  %v4269_v34 = vrot.slane %v10346_v13, 2  ;;  %v4565_v21 = vrot.slane %v10346_v13, 7  ;;  %v4333_v62 = vrot.slane %v10346_v13, 3 }
 0x776   : > { %7122 = vmatmul.mubr.msk.bf16.gmra.mrb[64].mxu0 %vm1567_vm9, %v4705_v41  ;;  %v4436_v60 = vsel %vm3605_vm6, %v4433_v47, %v4435_v31  ;;  %v4206_v7 = vsel %vm1176_vm2, %v4203_v40, %v4205_v39  ;;  %v4501_v3 = vsel %vm3672_vm5, %v4498_v25, %v4500_v51  ;;  %v4499_v53 = vsel %vm3672_vm5, %v4496_v36, %v4498_v25 }
 0x777   : > { %v7636_v4 = vpack.i.bf16 %v4436_v60, %v4434_v9  ;;  %v7641_v61 = vpack.i.bf16 %v4206_v7, %v4204_v52  ;;  %7125 = vmatprep.mubr.msk.bf16.mxu0 %vm11264_vm10, %v11222_v16  ;;  %v4270_v57 = vsel %vm1259_vm3, %v4267_v14, %v4269_v34  ;;  %v7646_v46 = vpack.i.bf16 %v4501_v3, %v4499_v53 }
 0x778   : > { %v7651_v35 = vpack.i.bf16 %v4270_v57, %v4268_v50  ;;  %v4566_v38 = vsel %vm1029_vm0, %v4563_v19, %v4565_v21  ;;  %v4334_v36 = vsel %vm1058_vm1, %v4331_v43, %v4333_v62  ;;  %v4437_v5 = vrot.slane %v10356_v8, 5 }
 0x779   : > { %7637 = vrot.lane.b32.xlu1 %v7636_v4, %s11245_s3  ;;  %7642 = vrot.lane.b32.xlu0 %v7641_v61, %s11245_s3  ;;  %v4080_v59 = vpop.f32.mrb[44].mxu0  ;;  %v7656_v27 = vpack.i.bf16 %v4566_v38, %v4564_v44  ;;  %v7661_v15 = vpack.i.bf16 %v4334_v36, %v4332_v48  ;;  %v4207_v11 = vrot.slane %v10356_v8, 1  ;;  %v4502_v9 = vrot.slane %v10356_v8, 6 }
 0x77a   : > { %v4081_v63 = vadd.f32 %v10192_v23, %v4080_v59  ;;  %v4082_v18 = vpop.f32.mrb[45].mxu0  ;;  %v4271_v14 = vrot.slane %v10356_v8, 2 }
 0x77b   : > { %v4083_v0 = vpop.f32.mrb[46].mxu0  ;;  %v4208_v52 = vsel %vm1176_vm2, %v4205_v39, %v4207_v11  ;;  %v4503_v18 = vsel %vm3672_vm5, %v4500_v51, %v4502_v9 }
 0x77c   : > { %vm4110_vm15 = vcmp.ge.f32.partialorder %v4081_v63, 0.0  ;;  %v4123_v28 = vmul.f32 0.01, %v4081_v63  ;;  %v4084_v56 = vadd.f32 %v10192_v23, %v4083_v0  ;;  %v4085_v29 = vpop.f32.mrb[47].mxu0  ;;  %v4272_v43 = vsel %vm1259_vm3, %v4269_v34, %v4271_v14 }
 0x77d   : > { %7647 = vrot.lane.b32.xlu1 %v7646_v46, %s11248_s5  ;;  %7652 = vrot.lane.b32.xlu0 %v7651_v35, %s11248_s5  ;;  %v4567_v0 = vrot.slane %v10356_v8, 7  ;;  %v4335_v46 = vrot.slane %v10356_v8, 3 }
 0x77e   : > { %v4136_v45 = vsel %vm4110_vm15, %v4081_v63, %v4123_v28  ;;  %vm4111_vm4 = vcmp.ge.f32.partialorder %v4084_v56, 0.0  ;;  %v4124_v32 = vmul.f32 0.01, %v4084_v56 }
 0x77f   : > { %v4169_v49 = vrot.slane %v4136_v45, 4  ;;  %v4336_v48 = vsel %vm1058_vm1, %v4333_v62, %v4335_v46 }
 0x780   : > { %v4137_v1 = vsel %vm4111_vm4, %v4084_v56, %v4124_v32  ;;  %v4568_v32 = vsel %vm1029_vm0, %v4565_v21, %v4567_v0 }
 0x781   : > { %v10409_v37 = vsel %vm2026_vm14, %v4167_v22, %v4169_v49  ;;  %v4171_v47 = vrot.slane %v4137_v1, 4  ;;  %7657 = vrot.lane.b32.xlu1 %v7656_v27, %s11250_s8  ;;  %7662 = vrot.lane.b32.xlu0 %v7661_v15, %s11250_s8  ;;  %v4438_v22 = vsel %vm3605_vm6, %v4435_v31, %v4437_v5 }
 0x782   : > { %v4708_v30 = vpack.c.bf16 %v10409_v37, %v10356_v8  ;;  %v4439_v10 = vrot.slane %v10409_v37, 5  ;;  %v4209_v12 = vrot.slane %v10409_v37, 1  ;;  %v4504_v40 = vrot.slane %v10409_v37, 6 }
 0x783   : > { %v10419_v41 = vsel %vm2026_vm14, %v4169_v49, %v4171_v47  ;;  %v4273_v25 = vrot.slane %v10409_v37, 2  ;;  %v4569_v57 = vrot.slane %v10409_v37, 7  ;;  %v4337_v59 = vrot.slane %v10409_v37, 3 }
 0x784   : > { %7126 = vmatmul.mubr.msk.bf16.gmra.mrb[68].mxu0 %vm1567_vm9, %v4708_v30  ;;  %v4440_v60 = vsel %vm3605_vm6, %v4437_v5, %v4439_v10  ;;  %v4210_v7 = vsel %vm1176_vm2, %v4207_v11, %v4209_v12  ;;  %v4505_v61 = vsel %vm3672_vm5, %v4502_v9, %v4504_v40  ;;  %v4441_v34 = vrot.slane %v10419_v41, 5 }
 0x785   : > { %v7666_v4 = vpack.i.bf16 %v4440_v60, %v4438_v22  ;;  %v7671_v31 = vpack.i.bf16 %v4210_v7, %v4208_v52  ;;  %7129 = vmatprep.mubr.msk.bf16.mxu0 %vm11264_vm10, %v11222_v16  ;;  %v4274_v39 = vsel %vm1259_vm3, %v4271_v14, %v4273_v25  ;;  %v7676_v50 = vpack.i.bf16 %v4505_v61, %v4503_v18 }
 0x786   : > { %v4088_v3 = vpop.f32.mrb[48].mxu0  ;;  %v7681_v56 = vpack.i.bf16 %v4274_v39, %v4272_v43  ;;  %v4570_v51 = vsel %vm1029_vm0, %v4567_v0, %v4569_v57  ;;  %v4338_v29 = vsel %vm1058_vm1, %v4335_v46, %v4337_v59  ;;  %v4211_v5 = vrot.slane %v10419_v41, 1 }
 0x787   : > { %v4089_v19 = vadd.f32 %v10192_v23, %v4088_v3  ;;  %v4090_v63 = vpop.f32.mrb[49].mxu0  ;;  %7667 = vrot.lane.b32.xlu1 %v7666_v4, %s11245_s3  ;;  %7672 = vrot.lane.b32.xlu0 %v7671_v31, %s11245_s3  ;;  %v7686_v27 = vpack.i.bf16 %v4570_v51, %v4568_v32  ;;  %v7691_v15 = vpack.i.bf16 %v4338_v29, %v4336_v48  ;;  %v4506_v7 = vrot.slane %v10419_v41, 6 }
 0x788   : > { %v4091_v53 = vpop.f32.mrb[50].mxu0  ;;  %v4442_v30 = vsel %vm3605_vm6, %v4439_v10, %v4441_v34  ;;  %v4212_v61 = vsel %vm1176_vm2, %v4209_v12, %v4211_v5  ;;  %v4275_v39 = vrot.slane %v10419_v41, 2  ;;  %v4571_v46 = vrot.slane %v10419_v41, 7 }
 0x789   : > { %vm4112_vm12 = vcmp.ge.f32.partialorder %v4089_v19, 0.0  ;;  %v4125_v35 = vmul.f32 0.01, %v4089_v19  ;;  %v4092_v38 = vadd.f32 %v10192_v23, %v4091_v53  ;;  %v4093_v28 = vpop.f32.mrb[51].mxu0 }
 0x78a   : > { %v4276_v28 = vsel %vm1259_vm3, %v4273_v25, %v4275_v39  ;;  %v4572_v32 = vsel %vm1029_vm0, %v4569_v57, %v4571_v46 }
 0x78b   : > { %v4138_v36 = vsel %vm4112_vm12, %v4089_v19, %v4125_v35  ;;  %vm4113_vm8 = vcmp.ge.f32.partialorder %v4092_v38, 0.0  ;;  %v4126_v44 = vmul.f32 0.01, %v4092_v38  ;;  %7677 = vrot.lane.b32.xlu1 %v7676_v50, %s11248_s5  ;;  %7682 = vrot.lane.b32.xlu0 %v7681_v56, %s11248_s5  ;;  %v4339_v56 = vrot.slane %v10419_v41, 3 }
 0x78c   : > { %v4173_v45 = vrot.slane %v4138_v36, 4 }
 0x78d   : > { %v4139_v49 = vsel %vm4113_vm8, %v4092_v38, %v4126_v44  ;;  %v4507_v38 = vsel %vm3672_vm5, %v4504_v40, %v4506_v7  ;;  %v4340_v48 = vsel %vm1058_vm1, %v4337_v59, %v4339_v56 }
 0x78e   : > { %v10472_v1 = vsel %vm2026_vm14, %v4171_v47, %v4173_v45  ;;  %v4175_v11 = vrot.slane %v4139_v49, 4 }
 0x78f   : > { %v4096_v22 = vpop.f32.mrb[52].mxu0  ;;  %7687 = vrot.lane.b32.xlu1 %v7686_v27, %s11250_s8  ;;  %7692 = vrot.lane.b32.xlu0 %v7691_v15, %s11250_s8  ;;  %v4711_v21 = vpack.c.bf16 %v10472_v1, %v10419_v41  ;;  %v4443_v62 = vrot.slane %v10472_v1, 5  ;;  %v4213_v9 = vrot.slane %v10472_v1, 1  ;;  %v4508_v60 = vrot.slane %v10472_v1, 6 }
 0x790   : > { %v10483_v47 = vsel %vm2026_vm14, %v4173_v45, %v4175_v11  ;;  %v4097_v52 = vadd.f32 %v10192_v23, %v4096_v22  ;;  %v4098_v10 = vpop.f32.mrb[53].mxu0  ;;  %v4277_v14 = vrot.slane %v10472_v1, 2  ;;  %v4573_v50 = vrot.slane %v10472_v1, 7 }
 0x791   : > { %v4099_v4 = vpop.f32.mrb[54].mxu0  ;;  %7130 = vmatmul.mubr.msk.bf16.gmra.mrb[72].mxu0 %vm1567_vm9, %v4711_v21  ;;  %v4444_v31 = vsel %vm3605_vm6, %v4441_v34, %v4443_v62  ;;  %v4214_v3 = vsel %vm1176_vm2, %v4211_v5, %v4213_v9  ;;  %v4509_v53 = vsel %vm3672_vm5, %v4506_v7, %v4508_v60  ;;  %v4341_v43 = vrot.slane %v10472_v1, 3 }
 0x792   : > { %vm4114_vm7 = vcmp.ge.f32.partialorder %v4097_v52, 0.0  ;;  %v4127_v23 = vmul.f32 0.01, %v4097_v52  ;;  %v4100_v19 = vpop.f32.mrb[55].mxu0  ;;  %v7696_v63 = vpack.i.bf16 %v4444_v31, %v4442_v30  ;;  %v7701_v18 = vpack.i.bf16 %v4214_v3, %v4212_v61  ;;  %7133 = vmatprep.mubr.msk.bf16.mxu0 %vm11264_vm10, %v11222_v16 }
 0x793   : > { %v4278_v12 = vsel %vm1259_vm3, %v4275_v39, %v4277_v14  ;;  %v7706_v51 = vpack.i.bf16 %v4509_v53, %v4507_v38  ;;  %v4574_v36 = vsel %vm1029_vm0, %v4571_v46, %v4573_v50  ;;  %v4342_v44 = vsel %vm1058_vm1, %v4339_v56, %v4341_v43 }
 0x794   : > { %v4140_v0 = vsel %vm4114_vm7, %v4097_v52, %v4127_v23  ;;  %7697 = vrot.lane.b32.xlu1 %v7696_v63, %s11245_s3  ;;  %7702 = vrot.lane.b32.xlu0 %v7701_v18, %s11245_s3  ;;  %v7711_v29 = vpack.i.bf16 %v4278_v12, %v4276_v28  ;;  %v4445_v49 = vrot.slane %v10483_v47, 5  ;;  %v4215_v27 = vrot.slane %v10483_v47, 1 }
 0x795   : > { %v4177_v35 = vrot.slane %v4140_v0, 4  ;;  %v7716_v15 = vpack.i.bf16 %v4574_v36, %v4572_v32  ;;  %v7721_v5 = vpack.i.bf16 %v4342_v44, %v4340_v48  ;;  %v4510_v52 = vrot.slane %v10483_v47, 6 }
 0x796   : > { %v4446_v59 = vsel %vm3605_vm6, %v4443_v62, %v4445_v49  ;;  %v4216_v21 = vsel %vm1176_vm2, %v4213_v9, %v4215_v27  ;;  %v4279_v10 = vrot.slane %v10483_v47, 2  ;;  %v4575_v23 = vrot.slane %v10483_v47, 7 }
 0x797   : > { %v10516_v34 = vsel %vm2026_vm14, %v4175_v11, %v4177_v35  ;;  %v4511_v62 = vsel %vm3672_vm5, %v4508_v60, %v4510_v52  ;;  %v4343_v19 = vrot.slane %v10483_v47, 3  ;;  %v4387_v36 = vrot.slane %v10198_v2, 4 }
 0x798   : > { %7707 = vrot.lane.b32.xlu1 %v7706_v51, %s11248_s5  ;;  %7712 = vrot.lane.b32.xlu0 %v7711_v29, %s11248_s5  ;;  %v4714_v40 = vpack.c.bf16 %v10516_v34, %v10483_v47  ;;  %v4447_v25 = vrot.slane %v10516_v34, 5  ;;  %v4217_v45 = vrot.slane %v10516_v34, 1  ;;  %v4512_v22 = vrot.slane %v10516_v34, 6 }
 0x799   : > { %v4281_v57 = vrot.slane %v10516_v34, 2  ;;  %v4577_v3 = vrot.slane %v10516_v34, 7  ;;  %v4345_v39 = vrot.slane %v10516_v34, 3  ;;  %v4280_v9 = vsel %vm1259_vm3, %v4277_v14, %v4279_v10 }
 0x79a   : > { %7134 = vmatmul.mubr.msk.bf16.gmra.mrb[76].mxu0 %vm1567_vm9, %v4714_v40  ;;  %v4448_v11 = vsel %vm3605_vm6, %v4445_v49, %v4447_v25  ;;  %v4218_v30 = vsel %vm1176_vm2, %v4215_v27, %v4217_v45  ;;  %v4513_v31 = vsel %vm3672_vm5, %v4510_v52, %v4512_v22  ;;  %v4576_v60 = vsel %vm1029_vm0, %v4573_v50, %v4575_v23 }
 0x79b   : > { %7137 = vmatprep.mubr.msk.bf16.mxu0 %vm11264_vm10, %v11222_v16  ;;  %v7726_v7 = vpack.i.bf16 %v4448_v11, %v4446_v59  ;;  %v7731_v4 = vpack.i.bf16 %v4218_v30, %v4216_v21  ;;  %v4282_v61 = vsel %vm1259_vm3, %v4279_v10, %v4281_v57  ;;  %v7736_v63 = vpack.i.bf16 %v4513_v31, %v4511_v62 }
 0x79c   : > { %7717 = vrot.lane.b32.xlu1 %v7716_v15, %s11250_s8  ;;  %7722 = vrot.lane.b32.xlu0 %v7721_v5, %s11250_s8  ;;  %v7741_v18 = vpack.i.bf16 %v4282_v61, %v4280_v9  ;;  %v4578_v53 = vsel %vm1029_vm0, %v4575_v23, %v4577_v3  ;;  %v4346_v12 = vsel %vm1058_vm1, %v4343_v19, %v4345_v39  ;;  %v4389_v29 = vrot.slane %v10214_v20, 4 }
 0x79d   : > { %v4344_v14 = vsel %vm1058_vm1, %v4341_v43, %v4343_v19  ;;  %v7746_v0 = vpack.i.bf16 %v4578_v53, %v4576_v60  ;;  %v4449_v35 = vsel %vm3605_vm6, %v4447_v25, %v10032_v58  ;;  %v4579_v56 = vsel %vm1029_vm0, %v4577_v3, %v10044_v42 }
 0x79e   : > { %v7751_v46 = vpack.i.bf16 %v4346_v12, %v4344_v14  ;;  %v7756_v38 = vpack.i.bf16 %v4217_v45, %v4449_v35  ;;  %v7766_v50 = vpack.i.bf16 %v4345_v39, %v4579_v56  ;;  %v4386_v42 = vrot.slane %v10205_v26, 4 }
 0x79f   : > { %v4390_v30 = vsel %vm2026_vm14, %v4387_v36, %v4389_v29  ;;  %v4391_v60 = vrot.slane %v10227_v33, 4  ;;  %v4393_v14 = vrot.slane %v10281_v6, 4 }
 0x7a0   : > { %7727 = vrot.lane.b32.xlu1 %v7726_v7, %s11245_s3  ;;  %7732 = vrot.lane.b32.xlu0 %v7731_v4, %s11245_s3  ;;  %v4388_v11 = vsel %vm2026_vm14, %v4386_v42, %v4387_v36 }
 0x7a1   : > { %v4392_v36 = vsel %vm2026_vm14, %v4389_v29, %v4391_v60 }
 0x7a2   : > { %7138 = vmatmul.mubr.bf16.gmra.mrb[80].mxu0 %v8176_v24  ;;  %v4514_v24 = vsel %vm3672_vm5, %v4512_v22, %v10035_v17 }
 0x7a3   : > { %v7761_v28 = vpack.i.bf16 %v4281_v57, %v4514_v24 }
 0x7a4   : > { %7737 = vrot.lane.b32.xlu1 %v7736_v63, %s11248_s5  ;;  %7742 = vrot.lane.b32.xlu0 %v7741_v18, %s11248_s5 }
 0x7a8   : > { %7747 = vrot.lane.b32.xlu1 %v7746_v0, %s11250_s8  ;;  %7752 = vrot.lane.b32.xlu0 %v7751_v46, %s11250_s8 }
 0x7ac   : > { %7757 = vrot.lane.b32.xlu1 %v7756_v38, %s11245_s3  ;;  %7762 = vrot.lane.b32.xlu0 %v7761_v28, %s11248_s5 }
 0x7b0   : > { %7767 = vrot.lane.b32.xlu1 %v7766_v50, %s11250_s8 }
 0x7cf   : > { %v7578_v43 = vpop.permute.xlu1 %7577  ;;  %v7583_v51 = vpop.permute.xlu0 %7582 }
 0x7d0   : > { %v7580_v44 = vunpack.i.h.bf16 %v7578_v43  ;;  %v7579_v40 = vunpack.i.l.bf16 %v7578_v43  ;;  %v7585_v25 = vunpack.i.h.bf16 %v7583_v51  ;;  %v7584_v45 = vunpack.i.l.bf16 %v7583_v51 }
 0x7d2   : > { %v4658_v22 = vsel %vm1567_vm9, %v4388_v11, %v7579_v40  ;;  %v4659_v57 = vsel %vm1567_vm9, %v4390_v30, %v7580_v44  ;;  %v4620_v59 = vsel %vm1567_vm9, %v10198_v2, %v7585_v25  ;;  %v4619_v21 = vsel %vm1567_vm9, %v10205_v26, %v7584_v45 }
 0x7d3   : > { %v7588_v32 = vpop.permute.xlu1 %7587  ;;  %v7593_v48 = vpop.permute.xlu0 %7592  ;;  %v4394_v44 = vsel %vm2026_vm14, %v4391_v60, %v4393_v14 }
 0x7d4   : > { %v7590_v49 = vunpack.i.h.bf16 %v7588_v32  ;;  %v7589_v27 = vunpack.i.l.bf16 %v7588_v32  ;;  %v7595_v15 = vunpack.i.h.bf16 %v7593_v48  ;;  %v7594_v5 = vunpack.i.l.bf16 %v7593_v48 }
 0x7d6   : > { %v4671_v3 = vsel %vm3844_vm11, %v4658_v22, %v7589_v27  ;;  %v4672_v39 = vsel %vm3844_vm11, %v4659_v57, %v7590_v49  ;;  %v4632_v62 = vsel %vm3844_vm11, %v4619_v21, %v7594_v5  ;;  %v4633_v9 = vsel %vm3844_vm11, %v4620_v59, %v7595_v15 }
 0x7d7   : > { %v7598_v52 = vpop.permute.xlu1 %7597  ;;  %v7603_v10 = vpop.permute.xlu0 %7602 }
 0x7d8   : > { %v7600_v7 = vunpack.i.h.bf16 %v7598_v52  ;;  %v7599_v4 = vunpack.i.l.bf16 %v7598_v52  ;;  %v7605_v31 = vunpack.i.h.bf16 %v7603_v10  ;;  %v7604_v61 = vunpack.i.l.bf16 %v7603_v10 }
 0x7da   : > { %v4645_v23 = vsel %vm3872_vm13, %v4632_v62, %v7604_v61  ;;  %v4646_v2 = vsel %vm3872_vm13, %v4633_v9, %v7605_v31  ;;  %v4684_v26 = vsel %vm3872_vm13, %v4671_v3, %v7599_v4  ;;  %v4685_v19 = vsel %vm3872_vm13, %v4672_v39, %v7600_v7 }
 0x7db   : > { %v4697_v63 = vpack.c.bf16 %v4646_v2, %v4645_v23  ;;  %v4698_v18 = vpack.c.bf16 %v4685_v19, %v4684_v26  ;;  %v4395_v4 = vrot.slane %v10291_v55, 4  ;;  %v4397_v31 = vrot.slane %v10346_v13, 4 }
 0x7dd   : > { %4920 = vmatprep.mubr.bf16.mxu1 %v4698_v18  ;;  %v7608_v53 = vpop.permute.xlu1 %7607  ;;  %v7613_v12 = vpop.permute.xlu0 %7612  ;;  %v4396_v18 = vsel %vm2026_vm14, %v4393_v14, %v4395_v4 }
 0x7de   : > { %4921 = vmatmul.mubr.bf16.vlgmr.msra.gmra.mrb[56].mxu1 %v4697_v63  ;;  %v7610_v0 = vunpack.i.h.bf16 %v7608_v53  ;;  %v7609_v46 = vunpack.i.l.bf16 %v7608_v53  ;;  %v7615_v35 = vunpack.i.h.bf16 %v7613_v12  ;;  %v7614_v24 = vunpack.i.l.bf16 %v7613_v12 }
 0x7df   : > { %v4398_v53 = vsel %vm2026_vm14, %v4395_v4, %v4397_v31 }
 0x7e0   : > { %v4661_v40 = vsel %vm1567_vm9, %v4394_v44, %v7610_v0  ;;  %v4660_v25 = vsel %vm1567_vm9, %v4392_v36, %v7609_v46  ;;  %v4622_v45 = vsel %vm1567_vm9, %v10227_v33, %v7615_v35  ;;  %v4621_v32 = vsel %vm1567_vm9, %v10214_v20, %v7614_v24 }
 0x7e1   : > { %v7618_v38 = vpop.permute.xlu1 %7617  ;;  %v7623_v28 = vpop.permute.xlu0 %7622 }
 0x7e2   : > { %v7620_v56 = vunpack.i.h.bf16 %v7618_v38  ;;  %v7619_v50 = vunpack.i.l.bf16 %v7618_v38  ;;  %v7625_v43 = vunpack.i.h.bf16 %v7623_v28  ;;  %v7624_v51 = vunpack.i.l.bf16 %v7623_v28 }
 0x7e4   : > { %v4673_v29 = vsel %vm3844_vm11, %v4660_v25, %v7619_v50  ;;  %v4674_v11 = vsel %vm3844_vm11, %v4661_v40, %v7620_v56  ;;  %v4634_v30 = vsel %vm3844_vm11, %v4621_v32, %v7624_v51  ;;  %v4635_v22 = vsel %vm3844_vm11, %v4622_v45, %v7625_v43 }
 0x7e5   : > { %v7628_v48 = vpop.permute.xlu1 %7627  ;;  %v7633_v42 = vpop.permute.xlu0 %7632 }
 0x7e6   : > { %v7630_v49 = vunpack.i.h.bf16 %v7628_v48  ;;  %v7629_v27 = vunpack.i.l.bf16 %v7628_v48  ;;  %v7635_v15 = vunpack.i.h.bf16 %v7633_v42  ;;  %v7634_v5 = vunpack.i.l.bf16 %v7633_v42 }
 0x7e7   : > { %v4399_v42 = vrot.slane %v10356_v8, 4 }
 0x7e8   : > { %v4686_v57 = vsel %vm3872_vm13, %v4673_v29, %v7629_v27  ;;  %v4687_v33 = vsel %vm3872_vm13, %v4674_v11, %v7630_v49  ;;  %v4647_v20 = vsel %vm3872_vm13, %v4634_v30, %v7634_v5  ;;  %v4648_v59 = vsel %vm3872_vm13, %v4635_v22, %v7635_v15 }
 0x7e9   : > { %v4701_v21 = vpack.c.bf16 %v4687_v33, %v4686_v57  ;;  %v4700_v52 = vpack.c.bf16 %v4648_v59, %v4647_v20  ;;  %v4401_v49 = vrot.slane %v10409_v37, 4  ;;  %v4400_v59 = vsel %vm2026_vm14, %v4397_v31, %v4399_v42 }
 0x7eb   : > { %v7638_v10 = vpop.permute.xlu1 %7637  ;;  %v7643_v7 = vpop.permute.xlu0 %7642  ;;  %4928 = vmatprep.mubr.bf16.mxu1 %v4701_v21  ;;  %v4402_v21 = vsel %vm2026_vm14, %v4399_v42, %v4401_v49 }
 0x7ec   : > { %4929 = vmatmul.mubr.bf16.gmra.mrb[60].mxu1 %v4700_v52  ;;  %v7640_v61 = vunpack.i.h.bf16 %v7638_v10  ;;  %v7639_v3 = vunpack.i.l.bf16 %v7638_v10  ;;  %v7645_v39 = vunpack.i.h.bf16 %v7643_v7  ;;  %v7644_v62 = vunpack.i.l.bf16 %v7643_v7 }
 0x7ee   : > { %v4663_v12 = vsel %vm1567_vm9, %v4398_v53, %v7640_v61  ;;  %v4662_v60 = vsel %vm1567_vm9, %v4396_v18, %v7639_v3  ;;  %v4624_v0 = vsel %vm1567_vm9, %v10291_v55, %v7645_v39  ;;  %v4623_v46 = vsel %vm1567_vm9, %v10281_v6, %v7644_v62 }
 0x7ef   : > { %v7648_v9 = vpop.permute.xlu1 %7647  ;;  %v7653_v23 = vpop.permute.xlu0 %7652 }
 0x7f0   : > { %v7650_v2 = vunpack.i.h.bf16 %v7648_v9  ;;  %v7649_v26 = vunpack.i.l.bf16 %v7648_v9  ;;  %v7655_v19 = vunpack.i.h.bf16 %v7653_v23  ;;  %v7654_v63 = vunpack.i.l.bf16 %v7653_v23 }
 0x7f2   : > { %v4675_v14 = vsel %vm3844_vm11, %v4662_v60, %v7649_v26  ;;  %v4676_v43 = vsel %vm3844_vm11, %v4663_v12, %v7650_v2  ;;  %v4636_v51 = vsel %vm3844_vm11, %v4623_v46, %v7654_v63  ;;  %v4637_v36 = vsel %vm3844_vm11, %v4624_v0, %v7655_v19 }
 0x7f3   : > { %v7658_v35 = vpop.permute.xlu1 %7657  ;;  %v7663_v24 = vpop.permute.xlu0 %7662  ;;  %v4403_v46 = vrot.slane %v10419_v41, 4 }
 0x7f4   : > { %v7660_v38 = vunpack.i.h.bf16 %v7658_v35  ;;  %v7659_v28 = vunpack.i.l.bf16 %v7658_v35  ;;  %v7665_v56 = vunpack.i.h.bf16 %v7663_v24  ;;  %v7664_v50 = vunpack.i.l.bf16 %v7663_v24 }
 0x7f5   : > { %v4405_v35 = vrot.slane %v10472_v1, 4 }
 0x7f6   : > { %v4688_v44 = vsel %vm3872_vm13, %v4675_v14, %v7659_v28  ;;  %v4689_v55 = vsel %vm3872_vm13, %v4676_v43, %v7660_v38  ;;  %v4649_v6 = vsel %vm3872_vm13, %v4636_v51, %v7664_v50  ;;  %v4650_v40 = vsel %vm3872_vm13, %v4637_v36, %v7665_v56 }
 0x7f7   : > { %v4704_v25 = vpack.c.bf16 %v4689_v55, %v4688_v44  ;;  %v4703_v45 = vpack.c.bf16 %v4650_v40, %v4649_v6  ;;  %v4404_v55 = vsel %vm2026_vm14, %v4401_v49, %v4403_v46  ;;  %v4406_v6 = vsel %vm2026_vm14, %v4403_v46, %v4405_v35 }
 0x7f9   : > { %4936 = vmatprep.mubr.bf16.mxu1 %v4704_v25  ;;  %v7668_v32 = vpop.permute.xlu1 %7667  ;;  %v7673_v48 = vpop.permute.xlu0 %7672 }
 0x7fa   : > { %4937 = vmatmul.mubr.bf16.gmra.mrb[64].mxu1 %v4703_v45  ;;  %v7670_v27 = vunpack.i.h.bf16 %v7668_v32  ;;  %v7669_v15 = vunpack.i.l.bf16 %v7668_v32  ;;  %v7675_v5 = vunpack.i.h.bf16 %v7673_v48  ;;  %v7674_v29 = vunpack.i.l.bf16 %v7673_v48 }
 0x7fc   : > { %v4665_v52 = vsel %vm1567_vm9, %v4402_v21, %v7670_v27  ;;  %v4664_v10 = vsel %vm1567_vm9, %v4400_v59, %v7669_v15  ;;  %v4626_v7 = vsel %vm1567_vm9, %v10356_v8, %v7675_v5  ;;  %v4625_v4 = vsel %vm1567_vm9, %v10346_v13, %v7674_v29 }
 0x7fd   : > { %v7678_v11 = vpop.permute.xlu1 %7677  ;;  %v7683_v30 = vpop.permute.xlu0 %7682 }
 0x7fe   : > { %v7680_v22 = vunpack.i.h.bf16 %v7678_v11  ;;  %v7679_v57 = vunpack.i.l.bf16 %v7678_v11  ;;  %v7685_v33 = vunpack.i.h.bf16 %v7683_v30  ;;  %v7684_v20 = vunpack.i.l.bf16 %v7683_v30 }
 0x800   : > { %v4677_v31 = vsel %vm3844_vm11, %v4664_v10, %v7679_v57  ;;  %v4678_v2 = vsel %vm3844_vm11, %v4665_v52, %v7680_v22  ;;  %v4638_v26 = vsel %vm3844_vm11, %v4625_v4, %v7684_v20  ;;  %v4639_v19 = vsel %vm3844_vm11, %v4626_v7, %v7685_v33 }
 0x801   : > { %v7688_v61 = vpop.permute.xlu1 %7687  ;;  %v7693_v3 = vpop.permute.xlu0 %7692  ;;  %v4407_v10 = vrot.slane %v10483_v47, 4  ;;  %v4409_v7 = vrot.slane %v10516_v34, 4 }
 0x802   : > { %v7690_v39 = vunpack.i.h.bf16 %v7688_v61  ;;  %v7689_v62 = vunpack.i.l.bf16 %v7688_v61  ;;  %v7695_v9 = vunpack.i.h.bf16 %v7693_v3  ;;  %v7694_v23 = vunpack.i.l.bf16 %v7693_v3 }
 0x804   : > { %v4690_v63 = vsel %vm3872_vm13, %v4677_v31, %v7689_v62  ;;  %v4691_v8 = vsel %vm3872_vm13, %v4678_v2, %v7690_v39  ;;  %v4651_v13 = vsel %vm3872_vm13, %v4638_v26, %v7694_v23  ;;  %v4652_v18 = vsel %vm3872_vm13, %v4639_v19, %v7695_v9 }
 0x805   : > { %v4707_v53 = vpack.c.bf16 %v4691_v8, %v4690_v63  ;;  %v4706_v12 = vpack.c.bf16 %v4652_v18, %v4651_v13  ;;  %v4408_v19 = vsel %vm2026_vm14, %v4405_v35, %v4407_v10  ;;  %v4410_v63 = vsel %vm2026_vm14, %v4407_v10, %v4409_v7 }
 0x806   : > { %v7698_v60 = vpop.permute.xlu1 %7697  ;;  %v7703_v0 = vpop.permute.xlu0 %7702 }
 0x807   : > { %4944 = vmatprep.mubr.bf16.mxu1 %v4707_v53  ;;  %v7700_v24 = vunpack.i.h.bf16 %v7698_v60  ;;  %v7699_v38 = vunpack.i.l.bf16 %v7698_v60  ;;  %v7705_v28 = vunpack.i.h.bf16 %v7703_v0  ;;  %v7704_v56 = vunpack.i.l.bf16 %v7703_v0 }
 0x808   : > { %4945 = vmatmul.mubr.bf16.gmra.mrb[68].mxu1 %v4706_v12 }
 0x809   : > { %v4667_v40 = vsel %vm1567_vm9, %v4406_v6, %v7700_v24  ;;  %v4666_v25 = vsel %vm1567_vm9, %v4404_v55, %v7699_v38  ;;  %v4628_v45 = vsel %vm1567_vm9, %v10419_v41, %v7705_v28  ;;  %v4627_v32 = vsel %vm1567_vm9, %v10409_v37, %v7704_v56 }
 0x80a   : > { %v7708_v50 = vpop.permute.xlu1 %7707  ;;  %v7713_v14 = vpop.permute.xlu0 %7712 }
 0x80b   : > { %v7710_v43 = vunpack.i.h.bf16 %v7708_v50  ;;  %v7709_v51 = vunpack.i.l.bf16 %v7708_v50  ;;  %v7715_v36 = vunpack.i.h.bf16 %v7713_v14  ;;  %v7714_v44 = vunpack.i.l.bf16 %v7713_v14 }
 0x80d   : > { %v4679_v49 = vsel %vm3844_vm11, %v4666_v25, %v7709_v51  ;;  %v4680_v11 = vsel %vm3844_vm11, %v4667_v40, %v7710_v43  ;;  %v4640_v30 = vsel %vm3844_vm11, %v4627_v32, %v7714_v44  ;;  %v4641_v22 = vsel %vm3844_vm11, %v4628_v45, %v7715_v36 }
 0x80e   : > { %v7718_v48 = vpop.permute.xlu1 %7717  ;;  %v7723_v42 = vpop.permute.xlu0 %7722 }
 0x80f   : > { %v7720_v27 = vunpack.i.h.bf16 %v7718_v48  ;;  %v7719_v15 = vunpack.i.l.bf16 %v7718_v48  ;;  %v7725_v5 = vunpack.i.h.bf16 %v7723_v42  ;;  %v7724_v29 = vunpack.i.l.bf16 %v7723_v42 }
 0x811   : > { %v4692_v57 = vsel %vm3872_vm13, %v4679_v49, %v7719_v15  ;;  %v4693_v41 = vsel %vm3872_vm13, %v4680_v11, %v7720_v27  ;;  %v4653_v37 = vsel %vm3872_vm13, %v4640_v30, %v7724_v29  ;;  %v4654_v33 = vsel %vm3872_vm13, %v4641_v22, %v7725_v5 }
 0x812   : > { %v7728_v20 = vpop.permute.xlu1 %7727  ;;  %v7733_v59 = vpop.permute.xlu0 %7732  ;;  %v4710_v21 = vpack.c.bf16 %v4693_v41, %v4692_v57  ;;  %v4709_v52 = vpack.c.bf16 %v4654_v33, %v4653_v37 }
 0x813   : > { %v7730_v4 = vunpack.i.h.bf16 %v7728_v20  ;;  %v7729_v61 = vunpack.i.l.bf16 %v7728_v20  ;;  %v7735_v3 = vunpack.i.h.bf16 %v7733_v59  ;;  %v7734_v39 = vunpack.i.l.bf16 %v7733_v59 }
 0x814   : > { %4952 = vmatprep.mubr.bf16.mxu1 %v4710_v21 }
 0x815   : > { %4953 = vmatmul.mubr.bf16.gmra.mrb[72].mxu1 %v4709_v52  ;;  %v4669_v8 = vsel %vm1567_vm9, %v4410_v63, %v7730_v4  ;;  %v4668_v13 = vsel %vm1567_vm9, %v4408_v19, %v7729_v61  ;;  %v4630_v18 = vsel %vm1567_vm9, %v10483_v47, %v7735_v3  ;;  %v4629_v53 = vsel %vm1567_vm9, %v10472_v1, %v7734_v39 }
 0x816   : > { %v7738_v62 = vpop.permute.xlu1 %7737  ;;  %v7743_v9 = vpop.permute.xlu0 %7742 }
 0x817   : > { %v7740_v23 = vunpack.i.h.bf16 %v7738_v62  ;;  %v7739_v31 = vunpack.i.l.bf16 %v7738_v62  ;;  %v7745_v2 = vunpack.i.h.bf16 %v7743_v9  ;;  %v7744_v26 = vunpack.i.l.bf16 %v7743_v9 }
 0x819   : > { %v4681_v35 = vsel %vm3844_vm11, %v4668_v13, %v7739_v31  ;;  %v4682_v28 = vsel %vm3844_vm11, %v4669_v8, %v7740_v23  ;;  %v4642_v56 = vsel %vm3844_vm11, %v4629_v53, %v7744_v26  ;;  %v4643_v50 = vsel %vm3844_vm11, %v4630_v18, %v7745_v2 }
 0x81a   : > { %v7748_v12 = vpop.permute.xlu1 %7747  ;;  %v7753_v60 = vpop.permute.xlu0 %7752 }
 0x81b   : > { %v7750_v0 = vunpack.i.h.bf16 %v7748_v12  ;;  %v7749_v46 = vunpack.i.l.bf16 %v7748_v12  ;;  %v7755_v24 = vunpack.i.h.bf16 %v7753_v60  ;;  %v7754_v38 = vunpack.i.l.bf16 %v7753_v60  ;;  %v7861_v60 = vld [vmem:[%s11266_s6] sm:$0xff]  }
 0x81c   : > { %5424 = vmatpush1.bf16.msra.mxu1 %v7861_v60 }
 0x81d   : > { %v4694_v14 = vsel %vm3872_vm13, %v4681_v35, %v7749_v46  ;;  %v4695_v47 = vsel %vm3872_vm13, %v4682_v28, %v7750_v0  ;;  %v4655_v1 = vsel %vm3872_vm13, %v4642_v56, %v7754_v38  ;;  %v4656_v43 = vsel %vm3872_vm13, %v4643_v50, %v7755_v24  ;;  %v7862_v0 = vld [vmem:[%s11266_s6 + $0x8] sm:$0xff]   ;;  %5425 = vmatprep.subr.bf16.mxu1 %v11234_v54  ;;  %v10721_v24 = vld [vmem:[%s11267_s26] ss:$0 sm:$0xff]  ;;  %v7863_v35 = vld [vmem:[%s11266_s6 + $0x10] sm:$0xff]   ;;  %s11271_s26 = sld [smem:[#allocation18_spill]] }
 0x81e   : > { %v7758_v51 = vpop.permute.xlu1 %7757  ;;  %v7763_v36 = vpop.permute.xlu0 %7762  ;;  %v4713_v44 = vpack.c.bf16 %v4695_v47, %v4694_v14  ;;  %v4712_v55 = vpack.c.bf16 %v4656_v43, %v4655_v1  ;;  %v7864_v1 = vld [vmem:[%s11266_s6 + $0x18] sm:$0xff]  }
 0x81f   : > { %v7760_v6 = vunpack.i.h.bf16 %v7758_v51  ;;  %v7759_v40 = vunpack.i.l.bf16 %v7758_v51  ;;  %v7765_v25 = vunpack.i.h.bf16 %v7763_v36  ;;  %v7764_v45 = vunpack.i.l.bf16 %v7763_v36 }
 0x820   : > { %4960 = vmatprep.mubr.bf16.mxu1 %v4713_v44  ;;  %5426 = vmatpush1.bf16.msra.mxu1 %v7862_v0 }
 0x821   : > { %v4631_v32 = vsel %vm1567_vm9, %v10516_v34, %v7760_v6  ;;  %v4670_v48 = vsel %vm1567_vm9, %v4409_v7, %v7759_v40  ;;  %4961 = vmatmul.mubr.bf16.gmra.mrb[76].mxu1 %v4712_v55  ;;  %5427 = vmatprep.subr.bf16.mxu1 %v11234_v54  ;;  %v7865_v55 = vld [vmem:[%s11266_s6 + $0x20] sm:$0xff]  }
 0x822   : > { %v7768_v42 = vpop.permute.xlu1 %7767  ;;  %v4644_v5 = vsel %vm3844_vm11, %v4631_v32, %v7765_v25  ;;  %v4683_v29 = vsel %vm3844_vm11, %v4670_v48, %v7764_v45  ;;  %v7866_v45 = vld [vmem:[%s11266_s6 + $0x28] sm:$0xff]  }
 0x823   : > { %v7770_v27 = vunpack.i.h.bf16 %v7768_v42  ;;  %v7769_v15 = vunpack.i.l.bf16 %v7768_v42 }
 0x824   : > { %5428 = vmatpush1.bf16.msra.mxu1 %v7863_v35 }
 0x825   : > { %v4696_v49 = vsel %vm3872_vm13, %v4683_v29, %v7769_v15  ;;  %v4657_v11 = vsel %vm3872_vm13, %v4644_v5, %v7770_v27  ;;  %5429 = vmatprep.subr.bf16.mxu1 %v11234_v54  ;;  %v7867_v5 = vld [vmem:[%s11266_s6 + $0x30] sm:$0xff]  }
 0x826   : > { %v4716_v30 = vpack.c.bf16 %v4696_v49, %v4696_v49  ;;  %v4715_v22 = vpack.c.bf16 %v4657_v11, %v4657_v11 }
 0x828   : > { %4968 = vmatprep.mubr.bf16.mxu1 %v4716_v30  ;;  %5430 = vmatpush1.bf16.msra.mxu1 %v7864_v1 }
 0x829   : > { %4969 = vmatmul.mubr.bf16.gmra.mrb[80].mxu1 %v4715_v22  ;;  %5431 = vmatprep.subr.bf16.mxu1 %v11234_v54  ;;  %v7868_v22 = vld [vmem:[%s11266_s6 + $0x38] sm:$0xff]  }
 0x82c   : > { %5432 = vmatpush1.bf16.msra.mxu1 %v7865_v55 }
 0x82d   : > { %v5010_v57 = vpop.f32.mrb[56].mxu0  ;;  %5433 = vmatprep.subr.bf16.mxu1 %v11234_v54 }
 0x82e   : > { %v7115_v34 = vpop.f32.mrb[57].mxu0 }
 0x82f   : > { %v5013_v41 = vpop.f32.mrb[58].mxu0 }
 0x830   : > { %v7116_v37 = vpop.f32.mrb[59].mxu0  ;;  %5434 = vmatpush1.bf16.msra.mxu1 %v7866_v45 }
 0x831   : > { %5435 = vmatprep.subr.bf16.mxu1 %v11234_v54 }
 0x834   : > { %5436 = vmatpush1.bf16.msra.mxu1 %v7867_v5 }
 0x835   : > { %5437 = vmatprep.subr.bf16.mxu1 %v11234_v54 }
 0x838   : > { %5438 = vmatpush1.bf16.msra.mxu1 %v7868_v22 }
 0x839   : > { %5439 = vmatprep.subr.bf16.mxu1 %v11234_v54 }
 0x83b   : > { %v10695_v33 = vpop.f32.mrb[60].mxu0 }
 0x83c   : > { %v7119_v20 = vpop.f32.mrb[61].mxu0 }
 0x83d   : > { %v10697_v59 = vpop.f32.mrb[62].mxu0 }
 0x83e   : > { %v7120_v21 = vpop.f32.mrb[63].mxu0 }
 0x849   : > { %v10699_v52 = vpop.f32.mrb[64].mxu0 }
 0x84a   : > { %v7123_v10 = vpop.f32.mrb[65].mxu0 }
 0x84b   : > { %v10701_v7 = vpop.f32.mrb[66].mxu0 }
 0x84c   : > { %v7124_v4 = vpop.f32.mrb[67].mxu0 }
 0x84d   : > { %v7870_v4 = vld [vmem:[%s11266_s6 + $0x48] sm:$0xff]  }
 0x857   : > { %v10703_v61 = vpop.f32.mrb[68].mxu0 }
 0x858   : > { %v7127_v3 = vpop.f32.mrb[69].mxu0 }
 0x859   : > { %v10705_v39 = vpop.f32.mrb[70].mxu0 }
 0x85a   : > { %v7128_v62 = vpop.f32.mrb[71].mxu0 }
 0x864   : > { %v10707_v9 = vpop.f32.mrb[72].mxu0 }
 0x865   : > { %v7131_v23 = vpop.f32.mrb[73].mxu0 }
 0x866   : > { %v10709_v31 = vpop.f32.mrb[74].mxu0 }
 0x867   : > { %v7132_v2 = vpop.f32.mrb[75].mxu0 }
 0x86d   : > { %v10711_v26 = vpop.f32.mrb[76].mxu0 }
 0x86e   : > { %v7135_v19 = vpop.f32.mrb[77].mxu0 }
 0x86f   : > { %v10713_v63 = vpop.f32.mrb[78].mxu0  ;;  %v7871_v19 = vld [vmem:[%s11266_s6 + $0x50] sm:$0xff]  }
 0x870   : > { %v7136_v8 = vpop.f32.mrb[79].mxu0 }
 0x875   : > { %v10715_v13 = vpop.f32.mrb[80].mxu0 }
 0x876   : > { %v7139_v18 = vpop.f32.mrb[81].mxu0 }
 0x877   : > { %v5061_v53 = vpop.f32.mrb[82].mxu0 }
 0x878   : > { %v7140_v12 = vpop.f32.mrb[83].mxu0 }
 0x8b1   : > { %v6899_v46 = vpop.f32.mrb[56].mxu1 }
 0x8b2   : > { %v6900_v38 = vpop.f32.mrb[57].mxu1 }
 0x8b3   : > { %v6901_v28 = vadd.f32 %v6900_v38, %v6899_v46  ;;  %v6902_v56 = vpop.f32.mrb[58].mxu1 }
 0x8b4   : > { %v6903_v50 = vpop.f32.mrb[59].mxu1 }
 0x8b5   : > { %v4923_v14 = vadd.f32 %v6901_v28, %v10721_v24  ;;  %v6904_v47 = vadd.f32 %v6903_v50, %v6902_v56 }
 0x8b7   : > { %v5011_v43 = vadd.f32 %v5010_v57, %v4923_v14  ;;  %v4926_v51 = vadd.f32 %v6904_v47, %v10721_v24 }
 0x8b9   : > { %vm5064_vm15 = vcmp.ge.f32.partialorder %v5011_v43, 0.0  ;;  %v5077_v36 = vmul.f32 0.01, %v5011_v43  ;;  %v5014_v44 = vadd.f32 %v5013_v41, %v4926_v51 }
 0x8bb   : > { %v5090_v6 = vsel %vm5064_vm15, %v5011_v43, %v5077_v36  ;;  %vm5065_vm4 = vcmp.ge.f32.partialorder %v5014_v44, 0.0  ;;  %v5078_v40 = vmul.f32 0.01, %v5014_v44 }
 0x8bc   : > { %5129 = vst.msk [vmem:[%s10731_s24] sm:$0xff] %vm1567_vm9, %v5090_v6 }
 0x8bd   : > { %v5091_v25 = vsel %vm5065_vm4, %v5014_v44, %v5078_v40 }
 0x8be   : > { %5130 = vst.msk [vmem:[%s10731_s24 + $0x8] sm:$0xff] %vm1567_vm9, %v5091_v25 }
 0x8bf   : > { %v6905_v32 = vpop.f32.mrb[60].mxu1 }
 0x8c0   : > { %v6906_v48 = vpop.f32.mrb[61].mxu1 }
 0x8c1   : > { %v6907_v42 = vadd.f32 %v6906_v48, %v6905_v32  ;;  %v6908_v27 = vpop.f32.mrb[62].mxu1 }
 0x8c2   : > { %v6909_v15 = vpop.f32.mrb[63].mxu1 }
 0x8c3   : > { %v4931_v29 = vadd.f32 %v6907_v42, %v10721_v24  ;;  %v6910_v49 = vadd.f32 %v6909_v15, %v6908_v27 }
 0x8c5   : > { %v5019_v11 = vadd.f32 %v10695_v33, %v4931_v29  ;;  %v4934_v30 = vadd.f32 %v6910_v49, %v10721_v24  ;;  %v7869_v33 = vld [vmem:[%s11266_s6 + $0x40] sm:$0xff]  }
 0x8c6   : > { %5440 = vmatpush1.bf16.msra.mxu1 %v7869_v33 }
 0x8c7   : > { %vm5066_vm12 = vcmp.ge.f32.partialorder %v5019_v11, 0.0  ;;  %v5079_v57 = vmul.f32 0.01, %v5019_v11  ;;  %v5022_v34 = vadd.f32 %v10697_v59, %v4934_v30  ;;  %5441 = vmatprep.subr.bf16.mxu1 %v11234_v54 }
 0x8c9   : > { %v5092_v41 = vsel %vm5066_vm12, %v5019_v11, %v5079_v57  ;;  %vm5067_vm8 = vcmp.ge.f32.partialorder %v5022_v34, 0.0  ;;  %v5080_v37 = vmul.f32 0.01, %v5022_v34 }
 0x8ca   : > { %5131 = vst.msk [vmem:[%s10731_s24 + $0x10] sm:$0xff] %vm1567_vm9, %v5092_v41  ;;  %5442 = vmatpush1.bf16.msra.mxu1 %v7870_v4 }
 0x8cb   : > { %v5093_v20 = vsel %vm5067_vm8, %v5022_v34, %v5080_v37  ;;  %5443 = vmatprep.subr.bf16.mxu1 %v11234_v54 }
 0x8cc   : > { %5132 = vst.msk [vmem:[%s10731_s24 + $0x18] sm:$0xff] %vm1567_vm9, %v5093_v20 }
 0x8cd   : > { %v6911_v21 = vpop.f32.mrb[64].mxu1 }
 0x8ce   : > { %v6912_v10 = vpop.f32.mrb[65].mxu1  ;;  %5444 = vmatpush1.bf16.msra.mxu1 %v7871_v19 }
 0x8cf   : > { %v6913_v59 = vadd.f32 %v6912_v10, %v6911_v21  ;;  %v6914_v3 = vpop.f32.mrb[66].mxu1  ;;  %5445 = vmatprep.subr.bf16.mxu1 %v11234_v54 }
 0x8d0   : > { %v6915_v62 = vpop.f32.mrb[67].mxu1 }
 0x8d1   : > { %v4939_v23 = vadd.f32 %v6913_v59, %v10721_v24  ;;  %v6916_v2 = vadd.f32 %v6915_v62, %v6914_v3 }
 0x8d3   : > { %v5027_v8 = vadd.f32 %v10699_v52, %v4939_v23  ;;  %v4942_v18 = vadd.f32 %v6916_v2, %v10721_v24 }
 0x8d5   : > { %vm5068_vm7 = vcmp.ge.f32.partialorder %v5027_v8, 0.0  ;;  %v5081_v53 = vmul.f32 0.01, %v5027_v8  ;;  %v5030_v12 = vadd.f32 %v10701_v7, %v4942_v18 }
 0x8d7   : > { %v5094_v60 = vsel %vm5068_vm7, %v5027_v8, %v5081_v53  ;;  %vm5069_vm15 = vcmp.ge.f32.partialorder %v5030_v12, 0.0  ;;  %v5082_v0 = vmul.f32 0.01, %v5030_v12 }
 0x8d8   : > { %5133 = vst.msk [vmem:[%s10731_s24 + $0x20] sm:$0xff] %vm1567_vm9, %v5094_v60 }
 0x8d9   : > { %v5095_v46 = vsel %vm5069_vm15, %v5030_v12, %v5082_v0 }
 0x8da   : > { %5134 = vst.msk [vmem:[%s10731_s24 + $0x28] sm:$0xff] %vm1567_vm9, %v5095_v46 }
 0x8db   : > { %v6917_v52 = vpop.f32.mrb[68].mxu1 }
 0x8dc   : > { %v6918_v38 = vpop.f32.mrb[69].mxu1 }
 0x8dd   : > { %v6919_v35 = vadd.f32 %v6918_v38, %v6917_v52  ;;  %v6920_v28 = vpop.f32.mrb[70].mxu1 }
 0x8de   : > { %v6921_v56 = vpop.f32.mrb[71].mxu1 }
 0x8df   : > { %v4947_v7 = vadd.f32 %v6919_v35, %v10721_v24  ;;  %v6922_v50 = vadd.f32 %v6921_v56, %v6920_v28  ;;  %v6744_v8 = vld [vmem:[%s10731_s24 + $0x1] ss:$5 sm:$0xff] }
 0x8e0   : > { %v6750_v28 = vld [vmem:[%s10731_s24 + $0x3] ss:$5 sm:$0xff] }
 0x8e1   : > { %v5035_v14 = vadd.f32 %v10703_v61, %v4947_v7  ;;  %v4950_v47 = vadd.f32 %v6922_v50, %v10721_v24  ;;  %v6753_v7 = vld [vmem:[%s10731_s24 + $0x4] ss:$5 sm:$0xff] }
 0x8e3   : > { %vm5070_vm4 = vcmp.ge.f32.partialorder %v5035_v14, 0.0  ;;  %v5083_v1 = vmul.f32 0.01, %v5035_v14  ;;  %v5038_v43 = vadd.f32 %v10705_v39, %v4950_v47 }
 0x8e5   : > { %v5096_v51 = vsel %vm5070_vm4, %v5035_v14, %v5083_v1  ;;  %vm5071_vm12 = vcmp.ge.f32.partialorder %v5038_v43, 0.0  ;;  %v5084_v36 = vmul.f32 0.01, %v5038_v43 }
 0x8e6   : > { %5135 = vst.msk [vmem:[%s10731_s24 + $0x30] sm:$0xff] %vm1567_vm9, %v5096_v51 }
 0x8e7   : > { %v5097_v44 = vsel %vm5071_vm12, %v5038_v43, %v5084_v36 }
 0x8e8   : > { %5136 = vst.msk [vmem:[%s10731_s24 + $0x38] sm:$0xff] %vm1567_vm9, %v5097_v44  ;;  %v6923_v55 = vpop.f32.mrb[72].mxu1 }
 0x8e9   : > { %v6924_v6 = vpop.f32.mrb[73].mxu1 }
 0x8ea   : > { %v6925_v40 = vadd.f32 %v6924_v6, %v6923_v55  ;;  %v6926_v61 = vpop.f32.mrb[74].mxu1 }
 0x8eb   : > { %v6927_v25 = vpop.f32.mrb[75].mxu1 }
 0x8ec   : > { %v4955_v45 = vadd.f32 %v6925_v40, %v10721_v24  ;;  %v6928_v32 = vadd.f32 %v6927_v25, %v6926_v61 }
 0x8ee   : > { %v5043_v39 = vadd.f32 %v10707_v9, %v4955_v45  ;;  %v4958_v48 = vadd.f32 %v6928_v32, %v10721_v24  ;;  %v7872_v32 = vld [vmem:[%s11266_s6 + $0x58] sm:$0xff]  }
 0x8ef   : > { %5446 = vmatpush1.bf16.msra.mxu1 %v7872_v32 }
 0x8f0   : > { %vm5072_vm8 = vcmp.ge.f32.partialorder %v5043_v39, 0.0  ;;  %v5085_v42 = vmul.f32 0.01, %v5043_v39  ;;  %v5046_v27 = vadd.f32 %v10709_v31, %v4958_v48  ;;  %5447 = vmatprep.subr.bf16.mxu1 %v11234_v54 }
 0x8f2   : > { %v5098_v15 = vsel %vm5072_vm8, %v5043_v39, %v5085_v42  ;;  %vm5073_vm7 = vcmp.ge.f32.partialorder %v5046_v27, 0.0  ;;  %v5086_v5 = vmul.f32 0.01, %v5046_v27  ;;  %vm5141_vm8 = vcmask 257024  }
 0x8f3   : > { %5137 = vst.msk [vmem:[%s10731_s24 + $0x40] sm:$0xff] %vm1567_vm9, %v5098_v15 }
 0x8f4   : > { %v5099_v29 = vsel %vm5073_vm7, %v5046_v27, %v5086_v5  ;;  %v6929_v49 = vpop.f32.mrb[76].mxu1 }
 0x8f5   : > { %5138 = vst.msk [vmem:[%s10731_s24 + $0x48] sm:$0xff] %vm1567_vm9, %v5099_v29  ;;  %v6930_v11 = vpop.f32.mrb[77].mxu1 }
 0x8f6   : > { %v6931_v30 = vadd.f32 %v6930_v11, %v6929_v49  ;;  %v6932_v22 = vpop.f32.mrb[78].mxu1 }
 0x8f7   : > { %v6933_v9 = vpop.f32.mrb[79].mxu1 }
 0x8f8   : > { %v4963_v57 = vadd.f32 %v6931_v30, %v10721_v24  ;;  %v6934_v34 = vadd.f32 %v6933_v9, %v6932_v22  ;;  %v7873_v30 = vld [vmem:[%s11266_s6 + $0x60] sm:$0xff]  }
 0x8f9   : > { %5448 = vmatpush1.bf16.msra.mxu1 %v7873_v30 }
 0x8fa   : > { %v5051_v31 = vadd.f32 %v10711_v26, %v4963_v57  ;;  %v4966_v41 = vadd.f32 %v6934_v34, %v10721_v24  ;;  %5449 = vmatprep.subr.bf16.mxu1 %v11234_v54 }
 0x8fc   : > { %vm5074_vm15 = vcmp.ge.f32.partialorder %v5051_v31, 0.0  ;;  %v5087_v37 = vmul.f32 0.01, %v5051_v31  ;;  %v5054_v33 = vadd.f32 %v10713_v63, %v4966_v41  ;;  %v6935_v20 = vpop.f32.mrb[80].mxu1  ;;  %v6742_v62 = vld [vmem:[%s10731_s24 + $0x28] ss:$5 sm:$0xff] }
 0x8fd   : > { %v6936_v21 = vpop.f32.mrb[81].mxu1  ;;  %v6745_v23 = vld [vmem:[%s10731_s24 + $0x29] ss:$5 sm:$0xff]  ;;  %v5143_v63 = vld [vmem:[%s10731_s24] ss:$5 sm:$0xff] }
 0x8fe   : > { %v5100_v10 = vsel %vm5074_vm15, %v5051_v31, %v5087_v37  ;;  %vm5075_vm4 = vcmp.ge.f32.partialorder %v5054_v33, 0.0  ;;  %v5088_v4 = vmul.f32 0.01, %v5054_v33  ;;  %v6937_v59 = vadd.f32 %v6936_v21, %v6935_v20  ;;  %v6938_v3 = vpop.f32.mrb[82].mxu1  ;;  %v6748_v0 = vld [vmem:[%s10731_s24 + $0x2a] ss:$5 sm:$0xff] }
 0x8ff   : > { %5139 = vst.msk [vmem:[%s10731_s24 + $0x50] sm:$0xff] %vm1567_vm9, %v5100_v10  ;;  %v6939_v26 = vpop.f32.mrb[83].mxu1  ;;  %v5155_v53 = vmax.f32 %v6742_v62, %v6745_v23  ;;  %v5154_v12 = vmax.f32 %v5143_v63, %v6744_v8  ;;  %v6751_v35 = vld [vmem:[%s10731_s24 + $0x2b] ss:$5 sm:$0xff]  ;;  %v6754_v50 = vld [vmem:[%s10731_s24 + $0x2c] ss:$5 sm:$0xff] }
 0x900   : > { %v5101_v2 = vsel %vm5075_vm4, %v5054_v33, %v5088_v4  ;;  %v4971_v19 = vadd.f32 %v6937_v59, %v10721_v24  ;;  %v6747_v24 = vld [vmem:[%s10731_s24 + $0x2] ss:$5 sm:$0xff] }
 0x901   : > { %5140 = vst.msk [vmem:[%s10731_s24 + $0x58] sm:$0xff] %vm1567_vm9, %v5101_v2  ;;  %v5164_v52 = vmax.f32 %v5155_v53, %v6748_v0  ;;  %v5163_v38 = vmax.f32 %v5154_v12, %v6747_v24  ;;  %v7874_v3 = vld [vmem:[%s11266_s6 + $0x68] sm:$0xff]  }
 0x902   : > { %v5059_v18 = vadd.f32 %v10715_v13, %v4971_v19  ;;  %5450 = vmatpush1.bf16.msra.mxu1 %v7874_v3 }
 0x903   : > { %v5173_v13 = vmax.f32 %v5164_v52, %v6751_v35  ;;  %v5172_v56 = vmax.f32 %v5163_v38, %v6750_v28  ;;  %5865 = vmatprep.subr.bf16.mxu1 %v11234_v54 }
 0x904   : > { %vm5076_vm12 = vcmp.ge.f32.partialorder %v5059_v18, 0.0  ;;  %v5089_v60 = vmul.f32 0.01, %v5059_v18 }
 0x905   : > { %v5182_v1 = vmax.f32 %v5173_v13, %v6754_v50  ;;  %v5181_v51 = vmax.f32 %v5172_v56, %v6753_v7 }
 0x906   : > { %v5102_v46 = vsel %vm5076_vm12, %v5059_v18, %v5089_v60 }
 0x907   : > { %5142 = vst.msk [vmem:[%s10731_s24 + $0x60] sm:$0xf] %vm5141_vm8, %v5102_v46  ;;  %v5188_v6 = vrot.slane %v5182_v1, 5  ;;  %v5187_v61 = vrot.slane %v5181_v51, 5 }
 0x908   : > { %v6743_v14 = vld [vmem:[%s10731_s24 + $0x50] ss:$5 sm:$0xf] }
 0x909   : > { %v10812_v39 = vsel %vm3605_vm6, %v5187_v61, %v5188_v6  ;;  %v10815_v42 = vsel %vm3605_vm6, 0.0, %v5187_v61 }
 0x90a   : > { %v5250_v15 = vrot.slane %v10812_v39, 5  ;;  %v5200_v5 = vrot.slane %v10812_v39, 1  ;;  %v5249_v49 = vrot.slane %v10815_v42, 5  ;;  %v5199_v11 = vrot.slane %v10815_v42, 1 }
 0x90b   : > { %v5265_v31 = vrot.slane %v10812_v39, 6  ;;  %v5214_v41 = vrot.slane %v10812_v39, 2  ;;  %v5264_v59 = vrot.slane %v10815_v42, 6  ;;  %v5213_v62 = vrot.slane %v10815_v42, 2 }
 0x90c   : > { %v5251_v37 = vsel %vm3605_vm6, %v5249_v49, %v5250_v15  ;;  %v5201_v20 = vsel %vm1176_vm2, %v5199_v11, %v5200_v5  ;;  %v5228_v8 = vrot.slane %v10812_v39, 3  ;;  %v5227_v60 = vrot.slane %v10815_v42, 3 }
 0x90d   : > { %v5266_v19 = vsel %vm3672_vm5, %v5264_v59, %v5265_v31  ;;  %v5215_v63 = vsel %vm1259_vm3, %v5213_v62, %v5214_v41  ;;  %v5242_v56 = vrot.slane %v10812_v39, 4  ;;  %v5241_v50 = vrot.slane %v10815_v42, 4 }
 0x90e   : > { %v6746_v47 = vld [vmem:[%s10731_s24 + $0x51] ss:$5 sm:$0xf]  ;;  %v6749_v36 = vld [vmem:[%s10731_s24 + $0x52] ss:$5 sm:$0xf]  ;;  %v5229_v46 = vsel %vm1058_vm1, %v5227_v60, %v5228_v8 }
 0x90f   : > { %v5156_v43 = vmax.f32 %v6743_v14, %v6746_v47  ;;  %v6752_v55 = vld [vmem:[%s10731_s24 + $0x53] ss:$5 sm:$0xf]  ;;  %v6755_v25 = vld [vmem:[%s10731_s24 + $0x54] ss:$5 sm:$0xf]  ;;  %v5243_v1 = vsel %vm2026_vm14, %v5241_v50, %v5242_v56 }
 0x910   : > { %s7162_s24 = smul.u32 24, %s8386_s7  ;;  %s11272_s7 = sld [smem:[#allocation21_spill]] }
 0x911   : > { %v5165_v44 = vmax.f32 %v5156_v43, %v6749_v36 }
 0x913   : > { %v5174_v40 = vmax.f32 %v5165_v44, %v6752_v55 }
 0x915   : > { %v5183_v45 = vmax.f32 %v5174_v40, %v6755_v25 }
 0x917   : > { %v5190_v48 = vrot.slane %v5183_v45, 5 }
 0x919   : > { %v5191_v27 = vsel %vm3605_vm6, %v5188_v6, %v5190_v48 }
 0x91a   : > { %v10822_v29 = vsel %vm1176_vm2, %v5191_v27, 0.0 }
 0x91b   : > { %v5252_v22 = vrot.slane %v10822_v29, 5  ;;  %v5202_v9 = vrot.slane %v10822_v29, 1  ;;  %v5267_v57 = vrot.slane %v10822_v29, 6  ;;  %v5216_v34 = vrot.slane %v10822_v29, 2 }
 0x91c   : > { %v5230_v2 = vrot.slane %v10822_v29, 3  ;;  %v5244_v28 = vrot.slane %v10822_v29, 4 }
 0x91d   : > { %v5253_v33 = vsel %vm3605_vm6, %v5250_v15, %v5252_v22  ;;  %v5203_v21 = vsel %vm1176_vm2, %v5200_v5, %v5202_v9  ;;  %v5268_v26 = vsel %vm3672_vm5, %v5265_v31, %v5267_v57  ;;  %v5217_v23 = vsel %vm1259_vm3, %v5214_v41, %v5216_v34 }
 0x91e   : > { %v7776_v10 = vpack.i.bf16 %v5253_v33, %v5251_v37  ;;  %v7771_v4 = vpack.i.bf16 %v5203_v21, %v5201_v20  ;;  %v7786_v18 = vpack.i.bf16 %v5268_v26, %v5266_v19  ;;  %v7781_v53 = vpack.i.bf16 %v5217_v23, %v5215_v63 }
 0x91f   : > { %v5254_v12 = vsel %vm3605_vm6, %v5252_v22, %v10032_v58  ;;  %v5231_v0 = vsel %vm1058_vm1, %v5228_v8, %v5230_v2  ;;  %v5269_v38 = vsel %vm3672_vm5, %v5267_v57, %v10035_v17  ;;  %v5245_v43 = vsel %vm2026_vm14, %v5242_v56, %v5244_v28 }
 0x920   : > { %7777 = vrot.lane.b32.xlu1 %v7776_v10, %s11245_s3  ;;  %7772 = vrot.lane.b32.xlu0 %v7771_v4, %s11245_s3  ;;  %v7796_v24 = vpack.i.bf16 %v5254_v12, %v5202_v9  ;;  %v7791_v52 = vpack.i.bf16 %v5231_v0, %v5229_v46  ;;  %v7801_v35 = vpack.i.bf16 %v5269_v38, %v5216_v34 }
 0x924   : > { %7787 = vrot.lane.b32.xlu1 %v7786_v18, %s11248_s5  ;;  %7782 = vrot.lane.b32.xlu0 %v7781_v53, %s11248_s5 }
 0x928   : > { %7797 = vrot.lane.b32.xlu1 %v7796_v24, %s11245_s3  ;;  %7792 = vrot.lane.b32.xlu0 %v7791_v52, %s11250_s8  ;;  %s11268_s3 = sld [smem:[#allocation17_spill]] }
 0x92c   : > { %5236 = vrot.lane.b32.xlu1 %v5230_v2, %s11250_s8  ;;  %7802 = vrot.lane.b32.xlu0 %v7801_v35, %s11248_s5  ;;  %s11269_s8 = sld [smem:[#allocation16_spill]] }
 0x92e   : > { %v7875_v19 = vld [vmem:[%s11268_s3 + $0x40] sm:$0xff]   ;;  %v7877_v63 = vld [vmem:[%s11268_s3 + $0x48] sm:$0xff]   ;;  %v7880_v12 = vld [vmem:[%s11268_s3 + $0x50] sm:$0xff]  }
 0x92f   : > { %v7879_v8 = vld [vmem:[%s11268_s3 + $0x80] sm:$0xff]   ;;  %6950 = vmatprep.subr.bf16.mxu0 %v7875_v19  ;;  %v7878_v18 = vld [vmem:[%s11268_s3 + $0x8] sm:$0xff]   ;;  %v7881_v60 = vld [vmem:[%s11268_s3 + $0x10] sm:$0xff]  }
 0x930   : > { %v7882_v53 = vld [vmem:[%s11268_s3 + $0x88] sm:$0xff]   ;;  %v7884_v0 = vld [vmem:[%s11268_s3 + $0x90] sm:$0xff]   ;;  %v7883_v46 = vld [vmem:[%s11268_s3 + $0x58] sm:$0xff]  }
 0x931   : > { %v7885_v24 = vld [vmem:[%s11268_s3 + $0x18] sm:$0xff]   ;;  %v7887_v38 = vld [vmem:[%s11268_s3 + $0x60] sm:$0xff]   ;;  %v7890_v56 = vld [vmem:[%s11268_s3 + $0xa8] sm:$0xff]  }
 0x932   : > { %v7886_v52 = vld [vmem:[%s11268_s3 + $0x98] sm:$0xff]   ;;  %v7888_v35 = vld [vmem:[%s11268_s3 + $0x20] sm:$0xff]   ;;  %v7895_v50 = vld [vmem:[%s11268_s3 + $0x70] sm:$0xff]  }
 0x992   : > { %v7778_v13 = vpop.permute.xlu1 %7777  ;;  %v7773_v7 = vpop.permute.xlu0 %7772 }
 0x993   : > { %v7780_v14 = vunpack.i.h.bf16 %v7778_v13  ;;  %v7779_v47 = vunpack.i.l.bf16 %v7778_v13  ;;  %v7775_v44 = vunpack.i.h.bf16 %v7773_v7  ;;  %v7774_v55 = vunpack.i.l.bf16 %v7773_v7  ;;  %v7891_v13 = vld [vmem:[%s11268_s3 + $0x68] sm:$0xff]  }
 0x994   : > { %v7892_v7 = vld [vmem:[%s11268_s3 + $0x28] sm:$0xff]  }
 0x995   : > { %v5288_v61 = vsel %vm1567_vm9, %v5243_v1, %v7779_v47  ;;  %v5289_v25 = vsel %vm1567_vm9, %v5245_v43, %v7780_v14  ;;  %v5280_v11 = vsel %vm1567_vm9, %v10812_v39, %v7775_v44  ;;  %v5279_v30 = vsel %vm1567_vm9, %v10815_v42, %v7774_v55  ;;  %v7893_v14 = vld [vmem:[%s11268_s3 + $0xb0] sm:$0xff]   ;;  %v7898_v1 = vld [vmem:[%s11268_s3 + $0x78] sm:$0xff]   ;;  %v7899_v44 = vld [vmem:[%s11268_s3 + $0xc8] sm:$0xff]  }
 0x996   : > { %v7788_v51 = vpop.permute.xlu1 %7787  ;;  %v7783_v36 = vpop.permute.xlu0 %7782  ;;  %v7896_v47 = vld [vmem:[%s11268_s3 + $0x30] sm:$0xff]   ;;  %v7894_v43 = vld [vmem:[%s11268_s3 + $0xb8] sm:$0xff]   ;;  %v6756_v55 = vld [vmem:[%s11269_s8] ss:$0 sm:$0xff]  ;;  %s11017_s8 = scalar_lea.vmem %s8324_s28, %s7162_s24  ;;  %s969_s24 = sand.u32 1, %s8125_s15  }
 0x997   : > { %v7790_v6 = vunpack.i.h.bf16 %v7788_v51  ;;  %v7789_v40 = vunpack.i.l.bf16 %v7788_v51  ;;  %v7785_v45 = vunpack.i.h.bf16 %v7783_v36  ;;  %v7784_v32 = vunpack.i.l.bf16 %v7783_v36  ;;  %v7900_v51 = vld [vmem:[%s11268_s3 + $0x38] sm:$0xff]   ;;  %v7897_v36 = vld [vmem:[%s11268_s3 + $0xc0] sm:$0xff]  }
 0x999   : > { %v5291_v48 = vsel %vm3844_vm11, %v5288_v61, %v7789_v40  ;;  %v5292_v27 = vsel %vm3844_vm11, %v5289_v25, %v7790_v6  ;;  %v5282_v57 = vsel %vm3844_vm11, %v5279_v30, %v7784_v32  ;;  %v5283_v34 = vsel %vm3844_vm11, %v5280_v11, %v7785_v45 }
 0x99a   : > { %v5295_v15 = vpack.c.bf16 %v5292_v27, %v5291_v48  ;;  %v7798_v5 = vpop.permute.xlu1 %7797  ;;  %v7793_v49 = vpop.permute.xlu0 %7792 }
 0x99b   : > { %v7795_v22 = vunpack.i.h.bf16 %v7793_v49  ;;  %v7794_v9 = vunpack.i.l.bf16 %v7793_v49  ;;  %v7800_v31 = vunpack.i.h.bf16 %v7798_v5  ;;  %v7799_v41 = vunpack.i.l.bf16 %v7798_v5 }
 0x99c   : > { %6771 = vmatprep.mubr.msk.bf16.mxu1 %vm3872_vm13, %v5295_v15 }
 0x99d   : > { %v5285_v37 = vsel %vm3872_vm13, %v5282_v57, %v7794_v9  ;;  %v5286_v33 = vsel %vm3872_vm13, %v5283_v34, %v7795_v22  ;;  %v5290_v10 = vsel %vm1567_vm9, %v5244_v28, %v7800_v31  ;;  %v5281_v4 = vsel %vm1567_vm9, %v10822_v29, %v7799_v41  ;;  %v7876_v29 = vld [vmem:[%s11268_s3] sm:$0xff]  }
 0x99e   : > { %v5294_v20 = vpack.c.bf16 %v5286_v33, %v5285_v37  ;;  %v7803_v39 = vpop.permute.xlu0 %7802  ;;  %v5237_v26 = vpop.permute.xlu1 %5236  ;;  %6951 = vmatpush3.bf16.msra.mxu0 %v7876_v29  ;;  %v7889_v28 = vld [vmem:[%s11268_s3 + $0xa0] sm:$0xff]  }
 0x99f   : > { %v7805_v42 = vunpack.i.h.bf16 %v7803_v39  ;;  %v7804_v21 = vunpack.i.l.bf16 %v7803_v39  ;;  %6952 = vmatprep.subr.bf16.mxu0 %v7877_v63  ;;  %v7901_v39 = vld [vmem:[%s11268_s3 + $0xd0] sm:$0xff]  }
 0x9a0   : > { %5456 = vmatmul.mubr.bf16.vlgmr.msra.gmra.mrb[84].mxu1 %v5294_v20 }
 0x9a1   : > { %v5293_v59 = vsel %vm3844_vm11, %v5290_v10, %v7805_v42  ;;  %v5284_v3 = vsel %vm3844_vm11, %v5281_v4, %v7804_v21  ;;  %5866 = vmatpush1.bf16.msra.mxu1 %v7879_v8 }
 0x9a2   : > { %v5297_v62 = vpack.c.bf16 %v5293_v59, %v5293_v59  ;;  %v5287_v23 = vsel %vm3872_vm13, %v5284_v3, %v5237_v26  ;;  %5867 = vmatprep.subr.bf16.mxu1 %v11234_v54  ;;  %6953 = vmatpush3.bf16.msra.mxu0 %v7878_v18 }
 0x9a3   : > { %v5296_v2 = vpack.c.bf16 %v5287_v23, %v5287_v23  ;;  %6954 = vmatprep.subr.bf16.mxu0 %v7880_v12  ;;  %v7902_v23 = vld [vmem:[%s11268_s3 + $0xd8] sm:$0xff]  }
 0x9a4   : > { %6772 = vmatprep.mubr.msk.bf16.mxu1 %vm3872_vm13, %v5297_v62 }
 0x9a5   : > { %5868 = vmatpush1.bf16.msra.mxu1 %v7882_v53 }
 0x9a6   : > { %5869 = vmatprep.subr.bf16.mxu1 %v11234_v54  ;;  %6955 = vmatpush3.bf16.msra.mxu0 %v7881_v60 }
 0x9a7   : > { %6956 = vmatprep.subr.bf16.mxu0 %v7883_v46 }
 0x9a8   : > { %5464 = vmatmul.mubr.bf16.gmra.mrb[88].mxu1 %v5296_v2 }
 0x9a9   : > { %5870 = vmatpush1.bf16.msra.mxu1 %v7884_v0 }
 0x9aa   : > { %5871 = vmatprep.subr.bf16.mxu1 %v11234_v54  ;;  %6957 = vmatpush3.bf16.msra.mxu0 %v7885_v24 }
 0x9ab   : > { %6958 = vmatprep.subr.bf16.mxu0 %v7887_v38 }
 0x9ad   : > { %5872 = vmatpush1.bf16.msra.mxu1 %v7886_v52 }
 0x9ae   : > { %5873 = vmatprep.subr.bf16.mxu1 %v11234_v54  ;;  %6959 = vmatpush3.bf16.msra.mxu0 %v7888_v35 }
 0x9af   : > { %6960 = vmatprep.subr.bf16.mxu0 %v7891_v13 }
 0x9b1   : > { %5874 = vmatpush1.bf16.msra.mxu1 %v7889_v28 }
 0x9b2   : > { %5875 = vmatprep.subr.bf16.mxu1 %v11234_v54  ;;  %6961 = vmatpush3.bf16.msra.mxu0 %v7892_v7 }
 0x9b3   : > { %6962 = vmatprep.subr.bf16.mxu0 %v7895_v50 }
 0x9b5   : > { %5876 = vmatpush1.bf16.msra.mxu1 %v7890_v56 }
 0x9b6   : > { %5877 = vmatprep.subr.bf16.mxu1 %v11234_v54  ;;  %6963 = vmatpush3.bf16.msra.mxu0 %v7896_v47 }
 0x9b7   : > { %6964 = vmatprep.subr.bf16.mxu0 %v7898_v1 }
 0x9b9   : > { %5878 = vmatpush1.bf16.msra.mxu1 %v7893_v14 }
 0x9ba   : > { %5879 = vmatprep.subr.bf16.mxu1 %v11234_v54  ;;  %6965 = vmatpush3.bf16.msra.mxu0 %v7900_v51 }
 0x9bb   : > { %6060 = vmatprep.subr.bf16.mxu0 %v11234_v54 }
 0x9bd   : > { %5880 = vmatpush1.bf16.msra.mxu1 %v7894_v43 }
 0x9be   : > { %5881 = vmatprep.subr.bf16.mxu1 %v11234_v54 }
 0x9c1   : > { %5882 = vmatpush1.bf16.msra.mxu1 %v7897_v36 }
 0x9c2   : > { %5883 = vmatprep.subr.bf16.mxu1 %v11234_v54 }
 0x9c5   : > { %5884 = vmatpush1.bf16.msra.mxu1 %v7899_v44 }
 0x9c6   : > { %5885 = vmatprep.subr.bf16.mxu1 %v11234_v54 }
 0x9c9   : > { %5886 = vmatpush1.bf16.msra.mxu1 %v7901_v39 }
 0x9ca   : > { %5887 = vmatprep.subr.bf16.mxu1 %v11234_v54 }
 0x9cd   : > { %5888 = vmatpush1.bf16.msra.mxu1 %v7902_v23  ;;  %v7903_v23 = vld [vmem:[%s11270_s11] sm:$0xff]  }
 0xa73   : > { %v5457_v6 = vpop.f32.mrb[84].mxu1 }
 0xa74   : > { %v5458_v40 = vadd.f32 %v6756_v55, %v5457_v6  ;;  %v5459_v61 = vpop.f32.mrb[85].mxu1 }
 0xa75   : > { %v5460_v25 = vpop.f32.mrb[86].mxu1 }
 0xa76   : > { %vm5471_vm9 = vcmp.ge.f32.partialorder %v5458_v40, 0.0  ;;  %v5474_v45 = vmul.f32 0.01, %v5458_v40  ;;  %v5461_v32 = vadd.f32 %v6756_v55, %v5460_v25  ;;  %v5462_v48 = vpop.f32.mrb[87].mxu1 }
 0xa78   : > { %v5477_v27 = vsel %vm5471_vm9, %v5458_v40, %v5474_v45  ;;  %vm5472_vm13 = vcmp.ge.f32.partialorder %v5461_v32, 0.0  ;;  %v5475_v15 = vmul.f32 0.01, %v5461_v32 }
 0xa79   : > { %v5483_v49 = vrot.slane %v5477_v27, 5 }
 0xa7a   : > { %v5478_v5 = vsel %vm5472_vm13, %v5461_v32, %v5475_v15 }
 0xa7b   : > { %v5484_v11 = vrot.slane %v5478_v5, 5  ;;  %v5465_v30 = vpop.f32.mrb[88].mxu1  ;;  %v10930_v33 = vsel %vm3605_vm6, 0.0, %v5483_v49 }
 0xa7c   : > { %v5466_v22 = vadd.f32 %v6756_v55, %v5465_v30  ;;  %v5467_v9 = vpop.f32.mrb[89].mxu1  ;;  %v5554_v3 = vrot.slane %v10930_v33, 6  ;;  %v5517_v26 = vrot.slane %v10930_v33, 3  ;;  %v5495_v62 = vrot.slane %v10930_v33, 1 }
 0xa7d   : > { %v10927_v57 = vsel %vm3605_vm6, %v5483_v49, %v5484_v11  ;;  %v5468_v34 = vpop.f32.mrb[90].mxu1  ;;  %v5539_v35 = vrot.slane %v10930_v33, 5  ;;  %v5509_v1 = vrot.slane %v10930_v33, 2  ;;  %v5531_v45 = vrot.slane %v10930_v33, 4 }
 0xa7e   : > { %vm5473_vm7 = vcmp.ge.f32.partialorder %v5466_v22, 0.0  ;;  %v5476_v31 = vmul.f32 0.01, %v5466_v22  ;;  %v5469_v41 = vpop.f32.mrb[91].mxu1  ;;  %v5555_v42 = vrot.slane %v10927_v57, 6  ;;  %v5518_v21 = vrot.slane %v10927_v57, 3 }
 0xa7f   : > { %v5496_v4 = vrot.slane %v10927_v57, 1  ;;  %v5540_v53 = vrot.slane %v10927_v57, 5  ;;  %v5510_v14 = vrot.slane %v10927_v57, 2  ;;  %v5532_v55 = vrot.slane %v10927_v57, 4 }
 0xa80   : > { %v5479_v37 = vsel %vm5473_vm7, %v5466_v22, %v5476_v31  ;;  %v5556_v8 = vsel %vm3672_vm5, %v5554_v3, %v5555_v42  ;;  %v5519_v18 = vsel %vm1058_vm1, %v5517_v26, %v5518_v21 }
 0xa81   : > { %v5486_v20 = vrot.slane %v5479_v37, 5  ;;  %v5497_v0 = vsel %vm1176_vm2, %v5495_v62, %v5496_v4  ;;  %v5541_v13 = vsel %vm3605_vm6, %v5539_v35, %v5540_v53  ;;  %v5511_v6 = vsel %vm1259_vm3, %v5509_v1, %v5510_v14 }
 0xa82   : > { %v5533_v30 = vsel %vm2026_vm14, %v5531_v45, %v5532_v55 }
 0xa83   : > { %v5487_v10 = vsel %vm3605_vm6, %v5484_v11, %v5486_v20 }
 0xa84   : > { %v10938_v59 = vsel %vm1176_vm2, %v5487_v10, 0.0 }
 0xa85   : > { %v5557_v2 = vrot.slane %v10938_v59, 6  ;;  %v5520_v19 = vrot.slane %v10938_v59, 3  ;;  %v5498_v29 = vrot.slane %v10938_v59, 1  ;;  %v5542_v63 = vrot.slane %v10938_v59, 5 }
 0xa86   : > { %v5512_v47 = vrot.slane %v10938_v59, 2 }
 0xa87   : > { %v5558_v12 = vsel %vm3672_vm5, %v5555_v42, %v5557_v2  ;;  %v5521_v60 = vsel %vm1058_vm1, %v5518_v21, %v5520_v19  ;;  %v5499_v46 = vsel %vm1176_vm2, %v5496_v4, %v5498_v29  ;;  %v5543_v28 = vsel %vm3605_vm6, %v5540_v53, %v5542_v63  ;;  %v7911_v53 = vld [vmem:[%s11270_s11 + $0x40] sm:$0xff]  }
 0xa88   : > { %v5575_v24 = vpack.c.bf16 %v5558_v12, %v5556_v8  ;;  %v7806_v52 = vpack.i.bf16 %v5521_v60, %v5519_v18  ;;  %v7811_v38 = vpack.i.bf16 %v5499_v46, %v5497_v0  ;;  %v7816_v56 = vpack.i.bf16 %v5543_v28, %v5541_v13  ;;  %v7909_v8 = vld [vmem:[%s11270_s11 + $0x30] sm:$0xff]   ;;  %v7910_v18 = vld [vmem:[%s11270_s11 + $0x38] sm:$0xff]   ;;  %v7912_v12 = vld [vmem:[%s11270_s11 + $0x48] sm:$0xff]  }
 0xa89   : > { %v7821_v7 = vpack.i.bf16 %v5498_v29, %v5520_v19  ;;  %v5544_v50 = vsel %vm3605_vm6, %v5542_v63, %v10032_v58  ;;  %v5534_v58 = vrot.slane %v10938_v59, 4  ;;  %v5513_v25 = vsel %vm1259_vm3, %v5510_v14, %v5512_v47  ;;  %v7906_v19 = vld [vmem:[%s11270_s11 + $0x18] sm:$0xff]   ;;  %v7907_v29 = vld [vmem:[%s11270_s11 + $0x20] sm:$0xff]   ;;  %v7908_v63 = vld [vmem:[%s11270_s11 + $0x28] sm:$0xff]  }
 0xa8a   : > { %6802 = vmatprep.mubr.msk.bf16.mxu1 %vm3844_vm11, %v5575_v24  ;;  %7807 = vrot.lane.b32.xlu0 %v7806_v52, %s11248_s5  ;;  %v5559_v20 = vsel %vm3672_vm5, %v5557_v2, %v10035_v17  ;;  %v7904_v2 = vld [vmem:[%s11270_s11 + $0x8] sm:$0xff]   ;;  %v7913_v60 = vld [vmem:[%s11270_s11 + $0x50] sm:$0xff]   ;;  %v6773_v24 = vld [vmem:[%s11271_s26] ss:$0 sm:$0xff]  ;;  %vm5924_vm5 = vcmask 519168   ;;  %s11274_s26 = sld [smem:[#allocation22_spill]] }
 0xa8b   : > { %7812 = vrot.lane.b32.xlu1 %v7811_v38, %s11248_s5  ;;  %v5535_v31 = vsel %vm2026_vm14, %v5532_v55, %v5534_v58  ;;  %v5579_v10 = vpack.c.bf16 %v5559_v20, %v5559_v20  ;;  %v7915_v20 = vld [vmem:[%s11272_s7 + $0x40] sm:$0xff]  }
 0xa8c   : > { %6978 = vmatprep.subr.bf16.mxu1 %v7915_v20 }
 0xa8e   : > { %7817 = vrot.lane.b32.xlu0 %v7816_v56, %s11248_s5 }
 0xa8f   : > { %7822 = vrot.lane.b32.xlu1 %v7821_v7, %s11248_s5 }
 0xa92   : > { %5549 = vrot.lane.b32.xlu0 %v5544_v50, %s11248_s5 }
 0xafc   : > { %v7808_v43 = vpop.permute.xlu0 %7807 }
 0xafd   : > { %v7810_v51 = vunpack.i.h.bf16 %v7808_v43  ;;  %v7809_v36 = vunpack.i.l.bf16 %v7808_v43  ;;  %v7813_v44 = vpop.permute.xlu1 %7812 }
 0xafe   : > { %v7815_v40 = vunpack.i.h.bf16 %v7813_v44  ;;  %v7814_v61 = vunpack.i.l.bf16 %v7813_v44 }
 0xaff   : > { %v5566_v32 = vsel %vm3844_vm11, %v5511_v6, %v7809_v36  ;;  %v5567_v48 = vsel %vm3844_vm11, %v5513_v25, %v7810_v51 }
 0xb00   : > { %v5564_v27 = vsel %vm3844_vm11, %v10927_v57, %v7815_v40  ;;  %v5563_v15 = vsel %vm3844_vm11, %v10930_v33, %v7814_v61  ;;  %v7818_v5 = vpop.permute.xlu0 %7817  ;;  %v5573_v49 = vpack.c.bf16 %v5567_v48, %v5566_v32 }
 0xb01   : > { %v5572_v11 = vpack.c.bf16 %v5564_v27, %v5563_v15  ;;  %v7820_v22 = vunpack.i.h.bf16 %v7818_v5  ;;  %v7819_v9 = vunpack.i.l.bf16 %v7818_v5  ;;  %v7823_v34 = vpop.permute.xlu1 %7822 }
 0xb02   : > { %v7825_v41 = vunpack.i.h.bf16 %v7823_v34  ;;  %v7824_v37 = vunpack.i.l.bf16 %v7823_v34  ;;  %5849 = vmatprep.mubr.bf16.mxu0 %v5573_v49 }
 0xb03   : > { %v5570_v57 = vsel %vm3844_vm11, %v5535_v31, %v7820_v22  ;;  %v5569_v33 = vsel %vm3844_vm11, %v5533_v30, %v7819_v9  ;;  %5850 = vmatmul.mubr.bf16.vlgmr.msra.gmra.mrb[84].mxu0 %v5572_v11  ;;  %v7914_v31 = vld [vmem:[%s11270_s11 + $0x58] sm:$0xff]  }
 0xb04   : > { %v5574_v39 = vpack.c.bf16 %v5570_v57, %v5569_v33  ;;  %v5568_v42 = vsel %vm3844_vm11, %v5512_v47, %v7824_v37  ;;  %v5550_v4 = vpop.permute.xlu0 %5549  ;;  %v5565_v3 = vsel %vm3844_vm11, %v10938_v59, %v7825_v41  ;;  %6061 = vmatpush1.bf16.msra.mxu0 %v7903_v23  ;;  %v7905_v59 = vld [vmem:[%s11270_s11 + $0x10] sm:$0xff]   ;;  %v7917_v33 = vld [vmem:[%s11272_s7] sm:$0xff]  }
 0xb05   : > { %v5577_v21 = vpack.c.bf16 %v5568_v42, %v5568_v42  ;;  %v5571_v17 = vsel %vm3844_vm11, %v5534_v58, %v5550_v4  ;;  %v5576_v26 = vpack.c.bf16 %v5565_v3, %v5565_v3  ;;  %6062 = vmatprep.subr.bf16.mxu0 %v11234_v54  ;;  %v7918_v42 = vld [vmem:[%s11272_s7 + $0x48] sm:$0xff]   ;;  %v7921_v3 = vld [vmem:[%s11272_s7 + $0x50] sm:$0xff]  }
 0xb06   : > { %5898 = vmatmul.mubr.bf16.vlgmr.msra.gmra.mrb[92].mxu1 %v5574_v39  ;;  %v5578_v62 = vpack.c.bf16 %v5571_v17, %v5571_v17  ;;  %v7923_v23 = vld [vmem:[%s11272_s7 + $0x10] sm:$0xff]  }
 0xb07   : > { %5857 = vmatprep.mubr.bf16.mxu0 %v5577_v21  ;;  %6803 = vmatprep.mubr.msk.bf16.mxu1 %vm3844_vm11, %v5579_v10  ;;  %v7920_v10 = vld [vmem:[%s11272_s7 + $0x8] sm:$0xff]  }
 0xb08   : > { %6063 = vmatpush1.bf16.msra.mxu0 %v7904_v2  ;;  %6979 = vmatpush3.bf16.msra.mxu1 %v7917_v33 }
 0xb09   : > { %6064 = vmatprep.subr.bf16.mxu0 %v11234_v54  ;;  %6980 = vmatprep.subr.bf16.mxu1 %v7918_v42 }
 0xb0b   : > { %5858 = vmatmul.mubr.bf16.gmra.mrb[88].mxu0 %v5576_v26 }
 0xb0c   : > { %6065 = vmatpush1.bf16.msra.mxu0 %v7905_v59  ;;  %6981 = vmatpush3.bf16.msra.mxu1 %v7920_v10  ;;  %v7924_v59 = vld [vmem:[%s11272_s7 + $0x58] sm:$0xff]  }
 0xb0d   : > { %6066 = vmatprep.subr.bf16.mxu0 %v11234_v54  ;;  %6982 = vmatprep.subr.bf16.mxu1 %v7921_v3 }
 0xb0e   : > { %5906 = vmatmul.mubr.bf16.gmra.mrb[96].mxu1 %v5578_v62 }
 0xb10   : > { %6067 = vmatpush1.bf16.msra.mxu0 %v7906_v19  ;;  %6983 = vmatpush3.bf16.msra.mxu1 %v7923_v23  ;;  %v7926_v19 = vld [vmem:[%s11272_s7 + $0x18] sm:$0xff]  }
 0xb11   : > { %6068 = vmatprep.subr.bf16.mxu0 %v11234_v54  ;;  %6984 = vmatprep.subr.bf16.mxu1 %v7924_v59 }
 0xb14   : > { %6069 = vmatpush1.bf16.msra.mxu0 %v7907_v29  ;;  %v7927_v29 = vld [vmem:[%s11272_s7 + $0x60] sm:$0xff]   ;;  %6985 = vmatpush3.bf16.msra.mxu1 %v7926_v19 }
 0xb15   : > { %6070 = vmatprep.subr.bf16.mxu0 %v11234_v54  ;;  %6986 = vmatprep.subr.bf16.mxu1 %v7927_v29 }
 0xb18   : > { %6071 = vmatpush1.bf16.msra.mxu0 %v7908_v63 }
 0xb19   : > { %6072 = vmatprep.subr.bf16.mxu0 %v11234_v54 }
 0xb1c   : > { %6073 = vmatpush1.bf16.msra.mxu0 %v7909_v8 }
 0xb1d   : > { %6074 = vmatprep.subr.bf16.mxu0 %v11234_v54 }
 0xb20   : > { %6075 = vmatpush1.bf16.msra.mxu0 %v7910_v18  ;;  %v7916_v18 = vld [vmem:[%s11272_s7 + $0x80] sm:$0xff]  }
 0xb21   : > { %6076 = vmatprep.subr.bf16.mxu0 %v11234_v54 }
 0xb24   : > { %6077 = vmatpush1.bf16.msra.mxu0 %v7911_v53 }
 0xb25   : > { %6078 = vmatprep.subr.bf16.mxu0 %v11234_v54 }
 0xb28   : > { %6079 = vmatpush1.bf16.msra.mxu0 %v7912_v12  ;;  %v7919_v12 = vld [vmem:[%s11272_s7 + $0x88] sm:$0xff]  }
 0xb29   : > { %6080 = vmatprep.subr.bf16.mxu0 %v11234_v54 }
 0xb2c   : > { %6081 = vmatpush1.bf16.msra.mxu0 %v7913_v60  ;;  %v7922_v60 = vld [vmem:[%s11272_s7 + $0x90] sm:$0xff]  }
 0xb2d   : > { %6082 = vmatprep.subr.bf16.mxu0 %v11234_v54 }
 0xb30   : > { %6083 = vmatpush1.bf16.msra.mxu0 %v7914_v31 }
 0xb31   : > { %7141 = vmatprep.subr.bf16.mxu0 %v11222_v16 }
 0xbd6   : > { %v6966_v0 = vpop.f32.mrb[84].mxu0 }
 0xbd7   : > { %v6967_v46 = vpop.f32.mrb[85].mxu0 }
 0xbd8   : > { %v6968_v52 = vadd.f32 %v6967_v46, %v6966_v0  ;;  %v6969_v38 = vpop.f32.mrb[86].mxu0  ;;  %v7925_v0 = vld [vmem:[%s11272_s7 + $0x98] sm:$0xff]   ;;  %v7928_v46 = vld [vmem:[%s11272_s7 + $0xa0] sm:$0xff]  }
 0xbd9   : > { %v6970_v35 = vpop.f32.mrb[87].mxu0  ;;  %v5899_v28 = vpop.f32.mrb[92].mxu1 }
 0xbda   : > { %v6971_v13 = vadd.f32 %v6970_v35, %v6969_v38  ;;  %v5852_v56 = vadd.f32 %v6968_v52, %v6773_v24  ;;  %v5901_v7 = vpop.f32.mrb[93].mxu1  ;;  %v7930_v52 = vld [vmem:[%s11272_s7 + $0x68] sm:$0xff]  }
 0xbdb   : > { %v5902_v50 = vpop.f32.mrb[94].mxu1  ;;  %v7931_v38 = vld [vmem:[%s11272_s7 + $0xa8] sm:$0xff]   ;;  %v7937_v7 = vld [vmem:[%s11272_s7 + $0xb8] sm:$0xff]  }
 0xbdc   : > { %v5900_v14 = vadd.f32 %v5899_v28, %v5852_v56  ;;  %v5855_v47 = vadd.f32 %v6971_v13, %v6773_v24  ;;  %v5904_v1 = vpop.f32.mrb[95].mxu1  ;;  %v7932_v35 = vld [vmem:[%s11272_s7 + $0x28] sm:$0xff]   ;;  %v7934_v28 = vld [vmem:[%s11272_s7 + $0xb0] sm:$0xff]  }
 0xbdd   : > { %v7933_v13 = vld [vmem:[%s11272_s7 + $0x70] sm:$0xff]  }
 0xbde   : > { %vm5913_vm2 = vcmp.ge.f32.partialorder %v5900_v14, 0.0  ;;  %v5916_v54 = vmul.f32 0.01, %v5900_v14  ;;  %v5903_v43 = vadd.f32 %v5902_v50, %v5855_v47  ;;  %v6972_v51 = vpop.f32.mrb[88].mxu0  ;;  %v7935_v56 = vld [vmem:[%s11272_s7 + $0x30] sm:$0xff]   ;;  %v7936_v50 = vld [vmem:[%s11272_s7 + $0x78] sm:$0xff]  }
 0xbdf   : > { %v6973_v36 = vpop.f32.mrb[89].mxu0 }
 0xbe0   : > { %v5919_v44 = vsel %vm5913_vm2, %v5900_v14, %v5916_v54  ;;  %vm5914_vm3 = vcmp.ge.f32.partialorder %v5903_v43, 0.0  ;;  %v5917_v55 = vmul.f32 0.01, %v5903_v43  ;;  %v6974_v6 = vadd.f32 %v6973_v36, %v6972_v51  ;;  %v6975_v40 = vpop.f32.mrb[90].mxu0  ;;  %v7938_v14 = vld [vmem:[%s11272_s7 + $0x38] sm:$0xff]  }
 0xbe1   : > { %5922 = vst.msk [vmem:[%s11017_s8] sm:$0xff] %vm3844_vm11, %v5919_v44  ;;  %v6976_v61 = vpop.f32.mrb[91].mxu0  ;;  %v5907_v58 = vpop.f32.mrb[96].mxu1 }
 0xbe2   : > { %v5920_v25 = vsel %vm5914_vm3, %v5903_v43, %v5917_v55  ;;  %v5860_v45 = vadd.f32 %v6974_v6, %v6773_v24  ;;  %v5909_v32 = vpop.f32.mrb[97].mxu1  ;;  %v7929_v24 = vld [vmem:[%s11272_s7 + $0x20] sm:$0xff]  }
 0xbe3   : > { %5923 = vst.msk [vmem:[%s11017_s8 + $0x8] sm:$0xff] %vm3844_vm11, %v5920_v25  ;;  %v5910_v48 = vpop.f32.mrb[98].mxu1  ;;  %6987 = vmatpush3.bf16.msra.mxu1 %v7929_v24 }
 0xbe4   : > { %v5908_v27 = vadd.f32 %v5907_v58, %v5860_v45  ;;  %v5911_v15 = vpop.f32.mrb[99].mxu1  ;;  %6988 = vmatprep.subr.bf16.mxu1 %v7930_v52 }
 0xbe6   : > { %vm5915_vm14 = vcmp.ge.f32.partialorder %v5908_v27, 0.0  ;;  %v5918_v5 = vmul.f32 0.01, %v5908_v27 }
 0xbe7   : > { %6989 = vmatpush3.bf16.msra.mxu1 %v7932_v35 }
 0xbe8   : > { %v5921_v49 = vsel %vm5915_vm14, %v5908_v27, %v5918_v5  ;;  %6990 = vmatprep.subr.bf16.mxu1 %v7933_v13  ;;  %v6822_v5 = vld [vmem:[%s11274_s26] ss:$0 sm:$0xff]  ;;  %s6420_s26 = scalar_lea.sflag [#allocation5], %s969_s24 }
 0xbe9   : > { %5925 = vst.msk [vmem:[%s11017_s8 + $0x10] sm:$0xf] %vm5924_vm5, %v5921_v49 }
 0xbea   : > { %v5926_v11 = vld [vmem:[%s11017_s8] ss:$5 sm:$0xf] }
 0xbeb   : > { %6991 = vmatpush3.bf16.msra.mxu1 %v7935_v56 }
 0xbec   : > { %6992 = vmatprep.subr.bf16.mxu1 %v7936_v50 }
 0xbef   : > { %6993 = vmatpush3.bf16.msra.mxu1 %v7938_v14 }
 0xbf0   : > { %v6804_v30 = vld [vmem:[%s11017_s8 + $0x1] ss:$5 sm:$0xf]  ;;  %v6805_v9 = vld [vmem:[%s11017_s8 + $0x2] ss:$5 sm:$0xf] }
 0xbf1   : > { %v5929_v22 = vmax.f32 %v5926_v11, %v6804_v30  ;;  %v6806_v41 = vld [vmem:[%s11017_s8 + $0x3] ss:$5 sm:$0xf]  ;;  %v6807_v57 = vld [vmem:[%s11017_s8 + $0x4] ss:$5 sm:$0xf] }
 0xbf2   : > { %s6650_s8 = sshll.u32 %s969_s24, 2 }
 0xbf3   : > { %v5932_v34 = vmax.f32 %v5929_v22, %v6805_v9  ;;  %s971_s3 = scalar_lea.vmem [#allocation4], %s6650_s8 }
 0xbf4   : > { %s6445_s4 = sshll.u32 %s971_s3, 4  ;;  %s11080_s4 = int_to_ptr.vmem [resolvable:$true] %s6445_s4 }
 0xbf5   : > { %v5935_v37 = vmax.f32 %v5932_v34, %v6806_v41  ;;  %s8071_s7 = scalar_lea.vmem %s11080_s4, 64 }
 0xbf6   : > { %p8072_p11 = scmp.ne.s32.totalorder %s11080_s4, %s8071_s7 }
 0xbf7   : > { %v5938_v39 = vmax.f32 %v5935_v37, %v6807_v57 }
 0xbf8   : > { %p8073_p12 = pnand %p8072_p11, %p8372_p5 }
 0xbf9   : > { %v5940_v21 = vrot.slane %v5938_v39, 7 }
 0xbfa   : > { %p8074_p13 = pneg %p8073_p12 }
 0xbfb   : > { %v5942_v4 = vsel %vm1029_vm0, 0.0, %v5940_v21 }
 0xbfc   : > { %v5943_v17 = vsel %vm1058_vm1, %v5942_v4, 0.0 }
 0xbfd   : > { %v5945_v26 = vrot.slane %v5943_v17, 1  ;;  %v5949_v62 = vrot.slane %v5943_v17, 2 }
 0xbff   : > { %5946 = vrot.lane.b32.xlu1 %v5945_v26, %s11248_s5  ;;  %v5953_v2 = vpack.c.bf16 %v5949_v62, %v5949_v62  ;;  %s11273_s5 = sld [smem:[#allocation20_spill]] }
 0xc01   : > { %6821 = vmatprep.mubr.msk.bf16.mxu0 %vm3844_vm11, %v5953_v2 }
 0xc05   : > { %v6808_v47 = vld [vmem:[%s11273_s5] ss:$0 sm:$0xff]  ;;  %s6851_s5 = sshll.u32 %s8355_s0, 6  ;;  %s8177_s0 = smov [#allocation4]  }
 0xc06   : > { %s11078_s6 = scalar_lea.hbm %s8329_s20, %s6851_s5  ;;  %s8075_s8 = sshll.u32 %s8177_s0, 4  ;;  %s8076_s8 = int_to_ptr.vmem [resolvable:$false] %s8075_s8 }
 0xc07   : > { %s8077_s9 = scalar_lea.vmem %s8076_s8, 128  ;;  %p8078_p0 = scmp.lt.s32.totalorder %s11080_s4, %s8076_s8 }
 0xc08   : > { %p8079_p1 = scmp.lt.s32.totalorder %s8077_s9, %s8071_s7 }
 0xc0a   : > { %p8080_p2 = por %p8079_p1, %p8078_p0 }
 0xc0c   : > { %p8081_p3 = pnand %p8080_p2, %p8074_p13 }
 0xc71   : > { %v5947_v63 = vpop.permute.xlu1 %5946 }
 0xc72   : > { %v5951_v8 = vsel %vm3844_vm11, %v5943_v17, %v5947_v63  ;;  %vm6847_vm11 = vmpackc.low %vm1058_vm1, %vm1058_vm1 }
 0xc73   : > { %v5952_v53 = vpack.c.bf16 %v5951_v8, %v5951_v8 }
 0xc75   : > { %6093 = vmatmul.mubr.bf16.vlgmr.msra.gmra.mrb[92].mxu0 %v5952_v53 }
 0xc76   : > { %7142 = vmatpush3.bf16.msra.mxu0 %v7916_v18  ;;  %7157 = vmatprep.mubr.msk.bf16.mxu0 %vm11264_vm10, %v11222_v16 }
 0xc77   : > { %7143 = vmatprep.subr.bf16.mxu0 %v11222_v16 }
 0xc7a   : > { %7144 = vmatpush3.bf16.msra.mxu0 %v7919_v12 }
 0xc7b   : > { %7145 = vmatprep.subr.bf16.mxu0 %v11222_v16 }
 0xc7e   : > { %7146 = vmatpush3.bf16.msra.mxu0 %v7922_v60 }
 0xc7f   : > { %7147 = vmatprep.subr.bf16.mxu0 %v11222_v16 }
 0xc82   : > { %7148 = vmatpush3.bf16.msra.mxu0 %v7925_v0 }
 0xc83   : > { %7149 = vmatprep.subr.bf16.mxu0 %v11222_v16 }
 0xc86   : > { %7150 = vmatpush3.bf16.msra.mxu0 %v7928_v46 }
 0xc87   : > { %7151 = vmatprep.subr.bf16.mxu0 %v11222_v16 }
 0xc8a   : > { %7152 = vmatpush3.bf16.msra.mxu0 %v7931_v38 }
 0xc8b   : > { %7153 = vmatprep.subr.bf16.mxu0 %v11222_v16 }
 0xc8e   : > { %7154 = vmatpush3.bf16.msra.mxu0 %v7934_v28 }
 0xc8f   : > { %7155 = vmatprep.subr.bf16.mxu0 %v11222_v16 }
 0xc92   : > { %7156 = vmatpush3.bf16.msra.mxu0 %v7937_v7 }
 0xd48   : > { %v6094_v1 = vpop.f32.mrb[92].mxu0 }
 0xd49   : > { %v6095_v54 = vadd.f32 %v6808_v47, %v6094_v1  ;;  %v6096_v43 = vpop.f32.mrb[93].mxu0 }
 0xd4a   : > { %v6097_v51 = vpop.f32.mrb[94].mxu0 }
 0xd4b   : > { %vm6100_vm6 = vcmp.ge.f32.partialorder %v6095_v54, 0.0  ;;  %v6101_v36 = vmul.f32 0.01, %v6095_v54  ;;  %v6098_v44 = vpop.f32.mrb[95].mxu0 }
 0xd4d   : > { %v6102_v55 = vsel %vm6100_vm6, %v6095_v54, %v6101_v36 }
 0xd4e   : > { %v6104_v6 = vrot.slane %v6102_v55, 7 }
 0xd50   : > { %v6106_v40 = vsel %vm1029_vm0, 0.0, %v6104_v6 }
 0xd51   : > { %v6107_v16 = vsel %vm1058_vm1, %v6106_v40, 0.0  ;;  %v6848_v32 = vpack.c.bf16 %v6106_v40, %v6106_v40 }
 0xd52   : > { %v6109_v61 = vrot.slane %v6107_v16, 1  ;;  %v6111_v58 = vrot.slane %v6107_v16, 2 }
 0xd54   : > { %v6114_v25 = vpack.c.bf16 %v6109_v61, %v6109_v61  ;;  %v6115_v45 = vpack.c.bf16 %v6111_v58, %v6111_v58 }
 0xd56   : > { %6347 = vmatprep.mubr.bf16.mxu1 %v6114_v25  ;;  %7158 = vmatmul.mubr.bf16.vlgmr.msra.gmra.mrb[96].mxu0 %v6115_v45 }
 0xd57   : > { %6849 = vmatmul.mubr.msk.bf16.vlgmr.msra.gmra.mrb[100].mxu1 %vm6847_vm11, %v6848_v32 }
 0xe29   : > { %v6389_v48 = vpop.f32.mrb[96].mxu0 }
 0xe2a   : > { %v6994_v27 = vpop.f32.mrb[100].mxu1  ;;  %v7159_v15 = vpop.f32.mrb[97].mxu0 }
 0xe2b   : > { %v6995_v49 = vpop.f32.mrb[101].mxu1  ;;  %v6392_v11 = vpop.f32.mrb[98].mxu0 }
 0xe2c   : > { %v6996_v30 = vadd.f32 %v6995_v49, %v6994_v27  ;;  %v6997_v22 = vpop.f32.mrb[102].mxu1  ;;  %v7160_v9 = vpop.f32.mrb[99].mxu0 }
 0xe2d   : > { %v6998_v34 = vpop.f32.mrb[103].mxu1 }
 0xe2e   : > { %v6350_v31 = vadd.f32 %v6996_v30, %v6822_v5 }
 0xe30   : > { %v6390_v41 = vadd.f32 %v6389_v48, %v6350_v31 }
 0xe32   : > { %vm6395_vm0 = vcmp.ge.f32.partialorder %v6390_v41, 0.0  ;;  %v6396_v37 = vmul.f32 0.01, %v6390_v41 }
 0xe34   : > { %v6397_v20 = vsel %vm6395_vm0, %v6390_v41, %v6396_v37 }
 0xe35   : > { %6398 = vst [vmem:[%s971_s3] sm:$0xf] %v6397_v20 }
 0xe36   : > { %8084 = shalt.err (!%p8081_p3)
}
 0xe37   : > { %s8085_s3 = scalar_lea.hbm %s11078_s6, 64  ;;  %s8089_s24 = scalar_lea.hbm %s8329_s20, 128 }
 0xe38   : > { %p8086_p4 = scmp.ne.s32.totalorder %s11078_s6, %s8085_s3  ;;  %p8090_p9 = scmp.lt.u32.totalorder %s11078_s6, %s8329_s20 }
 0xe39   : > { %p8091_p10 = scmp.lt.u32.totalorder %s8089_s24, %s8085_s3  ;;  %p8093_p12 = scmp.lt.u32.totalorder %s8085_s3, %s11078_s6 }
 0xe3a   : > { %p8087_p7 = pnand %p8086_p4, %p8372_p5 }
 0xe3b   : > { %p8092_p11 = por %p8091_p10, %p8090_p9 }
 0xe3c   : > { %p8088_p8 = pneg %p8087_p7 }
 0xe3d   : > { %p8094_p0 = por %p8093_p12, %p8092_p11 }
 0xe3f   : > { %p8095_p13 = pnand %p8094_p0, %p8088_p8 }
 0xe41   : > { %8098 = shalt.err (!%p8095_p13)
}
 0xe42   : > { %7163 = dma.vmem_to_hbm [thread:$0]  (%p8372_p5), %s11080_s4, 64, %s11078_s6, %s6420_s26  }
 0xe43 PF: > { %p7169_p1 = scmp.ge.s32.totalorder %s8133_s27, 2  ;;  %s6489_s9 = sand.u32 1, %s8121_s12  }
 0xe44   : > { %s6490_s7 = scalar_lea.sflag [#allocation5], %s6489_s9 }
 0xe45   : > { %p7166_p2 = pnand %p7169_p1, %p8376_p6 }
 0xe47   : > { %8116 = dma.done.wait (!%p7166_p2), %s6490_s7, 64  }
 0xe48   : > { %8118 = vsyncadd (!%p7166_p2), %s6490_s7, 4294967232  ;;  %p76_p3 = scmp.ge.s32.totalorder %s8359_s23, 4   ;;  %s11275_s12 = smov %s8125_s15 }
 0xe49   : > { %s11276_s15 = smov %s8129_s18  ;;  %s11277_s18 = smov %s8370_s1 }
 0xe4a   : > { %s11278_s27 = smov %s8359_s23  ;;  %78 = sbr.rel (!%p76_p3) target bundleno = 56 (0x38), region = 258 }
 0xe51   :  { %6495 = vsyncpa [#allocation5], 1 }
 0xe52   :  { %6497 = vsyncpa [#allocation5 + $0x1], 1 }

</bundles_post_ra>
